<compile_context>
chip_gen: v6e
topology: v6e:2x2x1
jax: 0.10.0
libtpu: 0.0.40
codegen_flags: <defaults>
</compile_context>

<pallas_src>
import jax
import jax.numpy as jnp
from jax.experimental import pallas as pl
from jax.experimental.pallas import tpu as pltpu

# --------------------------- static configuration ---------------------------
BS = 2
NUM_CAMERAS = 3
IMG_FEAT_DIM = 3
IMG_SIZE = 16
IMG_PATCH_SIZE = 8
NUM_PAT = IMG_SIZE // IMG_PATCH_SIZE          # 2 patches per side
IM_CHANNELS = 16
PROPRIO_DIM = 4
INPUT_DIM_BEFORE_SEQ = IM_CHANNELS * 2        # add_proprio=True -> 32
ATTN_DIM = 32
ATTN_HEADS = 2
ATTN_DIM_HEAD = 16
ATTN_SCALE = ATTN_DIM_HEAD ** -0.5
DEPTH = 2
FF_MULT = 4
LRELU_SLOPE = 0.02
GN_GROUPS = 4
GN_EPS = 1e-5
LN_EPS = 1e-5
UP_RATIO = IMG_PATCH_SIZE                     # ConvexUpSample up_ratio = 8
UP_KERNEL = 3
UP_R2 = UP_RATIO * UP_RATIO                   # 64
UP_K2 = UP_KERNEL * UP_KERNEL                 # 9
UP_HID = 2 * INPUT_DIM_BEFORE_SEQ             # 64 hidden channels in up head
MASK_SCALE = 0.1
T_IMG = NUM_PAT * NUM_PAT                     # 4 tokens per camera image
T_ALL = NUM_CAMERAS * T_IMG                   # 12 tokens per batch element

_LAYER_PARAM_NAMES = ("ln1_g", "ln1_b", "wqkv", "wo", "bo",
                      "ln2_g", "ln2_b", "w1", "b1", "w2", "b2", "mask")
PARAM_NAMES = (
    "patch_w", "patch_b", "patch_gn_g", "patch_gn_b", "A_grp", "B_img",
    "prop_w", "prop_b", "prop_gn_g", "prop_gn_b", "R_tok",
    "fcb_w_top", "fcb_w_bot", "fcb_bias_pos",
) + tuple(f"L{l}_{n}" for l in range(DEPTH) for n in _LAYER_PARAM_NAMES) + (
    "fc_aft_w", "fc_aft_b", "P_fold",
    "up_w_c1", "up_b_c1", "up_w_oc2", "up_b_oc2", "up_w_oc3", "up_b_oc3",
    "up_w_m2", "up_b_m2", "U_unf",
)

_SQRT1_2 = 0.7071067811865476


# ------------------------------ in-kernel math ------------------------------

def _erf(x):
    """Abramowitz & Stegun 7.1.26 rational erf approx (|err| < 1.5e-7); EUP-only."""
    a1, a2, a3, a4, a5 = 0.254829592, -0.284496736, 1.421413741, -1.453152027, 1.061405429
    p = 0.3275911
    ax = jnp.abs(x)
    t = 1.0 / (1.0 + p * ax)
    poly = t * (a1 + t * (a2 + t * (a3 + t * (a4 + t * a5))))
    y = 1.0 - poly * jnp.exp(-ax * ax)
    return jnp.where(x >= 0.0, y, -y)


def _gelu(x):
    """Exact (erf) GELU, matching torch nn.GELU default."""
    return 0.5 * x * (1.0 + _erf(x * _SQRT1_2))


# =========================== the single fused kernel ===========================

def _mvt_forward_kernel(*refs):
    n_in = 2 + len(PARAM_NAMES)
    patches_ref, proprio_ref = refs[0], refs[1]
    prm = dict(zip(PARAM_NAMES, refs[2:n_in]))
    x128_out, trans_out = refs[n_in], refs[n_in + 1]

    f32 = jnp.float32
    D = INPUT_DIM_BEFORE_SEQ

    def mm(a, b):
        return jnp.dot(a, b, preferred_element_type=f32)

    def lrelu(x):
        return jnp.where(x >= 0.0, x, LRELU_SLOPE * x)

    def layernorm(x, g, b):
        mu = jnp.mean(x, axis=-1, keepdims=True)
        xc = x - mu
        var = jnp.mean(xc * xc, axis=-1, keepdims=True)
        return xc * jax.lax.rsqrt(var + LN_EPS) * g + b

    A = prm["A_grp"][...]          # (16,16) average within channel group (GroupNorm(4,16))

    # ---- patchify Conv2DBlock: conv(k=s=8) + GroupNorm(4,16) + LeakyReLU ----
    t16 = mm(patches_ref[...], prm["patch_w"][...]) + prm["patch_b"][...]     # (24,16)
    B = prm["B_img"][...]                                                     # (24,24) per-image spatial avg
    mu = mm(mm(B, t16), A)                                                    # full (group x spatial) mean
    ex2 = mm(mm(B, t16 * t16), A)
    t16 = (t16 - mu) * jax.lax.rsqrt(ex2 - mu * mu + GN_EPS)
    t16 = lrelu(t16 * prm["patch_gn_g"][...] + prm["patch_gn_b"][...])

    # ---- proprio DenseBlock: Linear + GroupNorm(4,16) + LeakyReLU ----
    p16 = mm(proprio_ref[...], prm["prop_w"][...]) + prm["prop_b"][...]       # (2,16)
    mu_p = mm(p16, A)
    ex2_p = mm(p16 * p16, A)
    p16 = (p16 - mu_p) * jax.lax.rsqrt(ex2_p - mu_p * mu_p + GN_EPS)
    p16 = lrelu(p16 * prm["prop_gn_g"][...] + prm["prop_gn_b"][...])
    p24 = mm(prm["R_tok"][...], p16)                                          # broadcast per token (24,16)

    # ---- [img | proprio] concat + pos-encoding + fc_bef_attn (algebraically folded) ----
    x = (mm(t16, prm["fcb_w_top"][...]) + mm(p24, prm["fcb_w_bot"][...])
         + prm["fcb_bias_pos"][...])                                          # (24,32)

    # ---- transformer layers: block-diagonal masked attention + GELU FF ----
    inner = ATTN_HEADS * ATTN_DIM_HEAD
    for l in range(DEPTH):
        mask = prm[f"L{l}_mask"][...]                                         # (24,24) additive
        xn = layernorm(x, prm[f"L{l}_ln1_g"][...], prm[f"L{l}_ln1_b"][...])
        qkv = mm(xn, prm[f"L{l}_wqkv"][...])                                  # (24,96)
        wo = prm[f"L{l}_wo"][...]
        o_proj = prm[f"L{l}_bo"][...]
        for hd in range(ATTN_HEADS):
            c0 = hd * ATTN_DIM_HEAD
            q = qkv[:, c0:c0 + ATTN_DIM_HEAD] * ATTN_SCALE
            k = qkv[:, inner + c0:inner + c0 + ATTN_DIM_HEAD]
            v = qkv[:, 2 * inner + c0:2 * inner + c0 + ATTN_DIM_HEAD]
            s = jax.lax.dot_general(q, k, (((1,), (1,)), ((), ())),
                                    preferred_element_type=f32) + mask        # (24,24)
            s = s - jnp.max(s, axis=-1, keepdims=True)
            e = jnp.exp(s)
            pattn = e / jnp.sum(e, axis=-1, keepdims=True)
            o_h = mm(pattn, v)                                                # (24,16)
            o_proj = o_proj + mm(o_h, wo[c0:c0 + ATTN_DIM_HEAD, :])
        x = x + o_proj
        xn2 = layernorm(x, prm[f"L{l}_ln2_g"][...], prm[f"L{l}_ln2_b"][...])
        h1 = _gelu(mm(xn2, prm[f"L{l}_w1"][...]) + prm[f"L{l}_b1"][...])      # (24,128)
        x = x + mm(h1, prm[f"L{l}_w2"][...]) + prm[f"L{l}_b2"][...]

    # ---- fc_aft_attn ----
    tokens = mm(x, prm["fc_aft_w"][...]) + prm["fc_aft_b"][...]               # (24,32)

    # ---- fold tokens to per-image position-major featmap + first up-convs ----
    # x128[n, q*32 + d] = tokens[n*4 + q, d]; conv1(out)+conv1(mask) share one matmul.
    w_c1 = prm["up_w_c1"][...]                                                # (128,512)
    h1 = prm["up_b_c1"][...]                                                  # (1,512) -> broadcast
    for q in range(T_IMG):
        part = mm(prm["P_fold"][q], tokens)                                   # (6,32)
        x128_out[:, q * D:(q + 1) * D] = part
        h1 = h1 + mm(part, w_c1[q * D:(q + 1) * D, :])
    h1 = jnp.maximum(h1, 0.0)                                                 # (6,512)
    oc_h = h1[:, :T_IMG * UP_HID]                                             # (6,256) net_out hidden
    m_h = h1[:, T_IMG * UP_HID:]                                              # (6,256) net_mask hidden

    oc2 = jnp.maximum(mm(oc_h, prm["up_w_oc2"][...]) + prm["up_b_oc2"][...], 0.0)  # (6,256)
    out_low = mm(oc2, prm["up_w_oc3"][...]) + prm["up_b_oc3"][...]            # (6,4)  low-res logits
    unf = mm(out_low, prm["U_unf"][...])                                      # (6,36) F.unfold equivalent

    wm2 = prm["up_w_m2"][...]                                                 # (64,576)
    bm2 = prm["up_b_m2"][...]
    for p in range(T_IMG):
        mh_p = m_h[:, p * UP_HID:(p + 1) * UP_HID]                            # (6,64)
        logit = (mm(mh_p, wm2) + bm2) * MASK_SCALE                            # (6,576) = 9 taps x 64
        taps = [logit[:, k * UP_R2:(k + 1) * UP_R2] for k in range(UP_K2)]
        tmax = taps[0]
        for k in range(1, UP_K2):
            tmax = jnp.maximum(tmax, taps[k])
        den = jnp.zeros_like(tmax)
        num = jnp.zeros_like(tmax)
        for k in range(UP_K2):
            e = jnp.exp(taps[k] - tmax)
            den = den + e
            num = num + e * unf[:, p * UP_K2 + k:p * UP_K2 + k + 1]
        trans_out[:, p * UP_R2:(p + 1) * UP_R2] = num / den                   # (6,64)


# ============================== parameter prep ==============================

def _conv3x3_to_posmat(w):
    """(O,I,3,3) torch conv weight -> (T_IMG*I, T_IMG*O) matmul weight for the
    NUM_PAT x NUM_PAT input with zero padding 1, stride 1.
    rows = q*I + ci (input position, in-channel); cols = p*O + co (output position, out-channel)."""
    O, I = w.shape[0], w.shape[1]
    row_blocks = []
    for qy in range(NUM_PAT):
        for qx in range(NUM_PAT):
            col_blocks = []
            for py in range(NUM_PAT):
                for px in range(NUM_PAT):
                    dy, dx = qy - py + 1, qx - px + 1
                    if 0 <= dy < UP_KERNEL and 0 <= dx < UP_KERNEL:
                        blk = jnp.transpose(w[:, :, dy, dx])                  # (I,O)
                    else:
                        blk = jnp.zeros((I, O), jnp.float32)
                    col_blocks.append(blk)
            row_blocks.append(jnp.concatenate(col_blocks, axis=1))
    return jnp.concatenate(row_blocks, axis=0)


def prepare_params(params, bs):
    """Hoist every layout conversion / constant-matrix build out of the forward."""
    D = INPUT_DIM_BEFORE_SEQ
    P = IMG_PATCH_SIZE
    n_img = bs * NUM_CAMERAS
    n_tok = bs * T_ALL
    f32 = jnp.float32
    f = {}

    # patchify Conv2DBlock
    f["patch_w"] = jnp.transpose(params["patch_w"], (2, 3, 1, 0)).reshape(
        P * P * IMG_FEAT_DIM, IM_CHANNELS)
    f["patch_b"] = params["patch_b"].reshape(1, IM_CHANNELS)
    f["patch_gn_g"] = params["patch_gn_g"].reshape(1, IM_CHANNELS)
    f["patch_gn_b"] = params["patch_gn_b"].reshape(1, IM_CHANNELS)
    cg = IM_CHANNELS // GN_GROUPS
    grp = jnp.arange(IM_CHANNELS) // cg
    f["A_grp"] = (grp[:, None] == grp[None, :]).astype(f32) / cg
    row_img = jnp.arange(n_tok) // T_IMG
    f["B_img"] = (row_img[:, None] == row_img[None, :]).astype(f32) / T_IMG

    # proprio DenseBlock
    f["prop_w"] = params["prop_w"]
    f["prop_b"] = params["prop_b"].reshape(1, IM_CHANNELS)
    f["prop_gn_g"] = params["prop_gn_g"].reshape(1, IM_CHANNELS)
    f["prop_gn_b"] = params["prop_gn_b"].reshape(1, IM_CHANNELS)
    tok_b = jnp.arange(n_tok) // T_ALL
    f["R_tok"] = (tok_b[:, None] == jnp.arange(bs)[None, :]).astype(f32)

    # positional encoding folded into fc_bef_attn
    pos = jnp.tile(params["pos_encoding"], (bs, 1, 1)).reshape(n_tok, D)
    f["fcb_w_top"] = params["fc_bef_w"][:IM_CHANNELS, :]
    f["fcb_w_bot"] = params["fc_bef_w"][IM_CHANNELS:, :]
    f["fcb_bias_pos"] = pos @ params["fc_bef_w"] + params["fc_bef_b"].reshape(1, ATTN_DIM)

    # per-layer params + block-diagonal attention masks (per-camera / per-batch)
    cam_id = jnp.arange(n_tok) // T_IMG
    bat_id = jnp.arange(n_tok) // T_ALL
    mask_cam = jnp.where(cam_id[:, None] == cam_id[None, :], 0.0, -1e9).astype(f32)
    mask_bat = jnp.where(bat_id[:, None] == bat_id[None, :], 0.0, -1e9).astype(f32)
    for l, lp in enumerate(params["layers"]):
        f[f"L{l}_ln1_g"] = lp["ln1_g"].reshape(1, ATTN_DIM)
        f[f"L{l}_ln1_b"] = lp["ln1_b"].reshape(1, ATTN_DIM)
        f[f"L{l}_wqkv"] = lp["wqkv"]
        f[f"L{l}_wo"] = lp["wo"]
        f[f"L{l}_bo"] = lp["bo"].reshape(1, ATTN_DIM)
        f[f"L{l}_ln2_g"] = lp["ln2_g"].reshape(1, ATTN_DIM)
        f[f"L{l}_ln2_b"] = lp["ln2_b"].reshape(1, ATTN_DIM)
        f[f"L{l}_w1"] = lp["w1"]
        f[f"L{l}_b1"] = lp["b1"].reshape(1, ATTN_DIM * FF_MULT)
        f[f"L{l}_w2"] = lp["w2"]
        f[f"L{l}_b2"] = lp["b2"].reshape(1, ATTN_DIM)
        f[f"L{l}_mask"] = mask_cam if l < DEPTH // 2 else mask_bat

    # fc_aft_attn
    f["fc_aft_w"] = params["fc_aft_w"]
    f["fc_aft_b"] = params["fc_aft_b"].reshape(1, D)

    # token -> (image, position-major) fold selector (T_IMG, n_img, n_tok)
    q_i = jnp.arange(T_IMG)
    n_i = jnp.arange(n_img)
    r_i = jnp.arange(n_tok)
    f["P_fold"] = (r_i[None, None, :] ==
                   (n_i[None, :, None] * T_IMG + q_i[:, None, None])).astype(f32)

    # ConvexUpSample head: 3x3 convs -> position-pair matmuls; out1 & m1 concatenated along N
    up = params["up0"]
    w_out1 = _conv3x3_to_posmat(up["out1_w"])                                 # (128,256)
    w_m1 = _conv3x3_to_posmat(up["m1_w"])                                     # (128,256)
    f["up_w_c1"] = jnp.concatenate([w_out1, w_m1], axis=1)                    # (128,512)
    f["up_b_c1"] = jnp.concatenate(
        [jnp.tile(up["out1_b"], T_IMG), jnp.tile(up["m1_b"], T_IMG)]).reshape(1, -1)
    f["up_w_oc2"] = _conv3x3_to_posmat(up["out2_w"])                          # (256,256)
    f["up_b_oc2"] = jnp.tile(up["out2_b"], T_IMG).reshape(1, -1)
    f["up_w_oc3"] = _conv3x3_to_posmat(up["out3_w"])                          # (256,4)
    f["up_b_oc3"] = jnp.tile(up["out3_b"], T_IMG).reshape(1, -1)
    mask_dim = UP_K2 * UP_R2
    f["up_w_m2"] = jnp.transpose(up["m2_w"].reshape(mask_dim, UP_HID))        # (64,576)
    f["up_b_m2"] = up["m2_b"].reshape(1, mask_dim)

    # F.unfold(out_low, 3, padding=1) selector: (q, p*9 + tap)
    U = jnp.zeros((T_IMG, T_IMG * UP_K2), f32)
    for py in range(NUM_PAT):
        for px in range(NUM_PAT):
            p = py * NUM_PAT + px
            for dy in range(UP_KERNEL):
                for dx in range(UP_KERNEL):
                    k = dy * UP_KERNEL + dx
                    qy, qx = py + dy - 1, px + dx - 1
                    if 0 <= qy < NUM_PAT and 0 <= qx < NUM_PAT:
                        q = qy * NUM_PAT + qx
                        U = U.at[q, p * UP_K2 + k].set(1.0)
    f["U_unf"] = U

    return tuple(f[name] for name in PARAM_NAMES)


# =============================== forward (jitted) ===============================

def _extract_patches(img):
    """(bs, nc, C, H, W) -> (bs*nc*hp*wp, P*P*C), rows ordered (b, cam, ph, pw)."""
    bs, nc, cin, h, w = img.shape
    P = IMG_PATCH_SIZE
    hp = h // P
    x = img.reshape(bs * nc, cin, h, w).transpose(0, 2, 3, 1)                 # NHWC
    x = x.reshape(bs * nc, hp, P, hp, P, cin).transpose(0, 1, 3, 2, 4, 5)
    return x.reshape(bs * nc * hp * hp, P * P * cin)


def mvt_forward(flat_params, img, proprio):
    bs, nc, cin, h, w = img.shape
    D = INPUT_DIM_BEFORE_SEQ
    n_img = bs * nc
    patches = _extract_patches(img)

    n_in = 2 + len(PARAM_NAMES)
    vmem_spec = pl.BlockSpec(memory_space=pltpu.MemorySpace.VMEM)
    x128, trans = pl.pallas_call(
        _mvt_forward_kernel,
        in_specs=[vmem_spec] * n_in,
        out_specs=(vmem_spec, vmem_spec),
        out_shape=(
            jax.ShapeDtypeStruct((n_img, T_IMG * D), jnp.float32),
            jax.ShapeDtypeStruct((n_img, T_IMG * UP_R2), jnp.float32),
        ),
    )(patches, proprio, *flat_params)

    # visual_featmap: (bs*nc, D, hp, hp)
    featmap = x128.reshape(n_img, T_IMG, D).transpose(0, 2, 1).reshape(
        n_img, D, NUM_PAT, NUM_PAT)
    # screen logits: (bs, nc, 16, 16)
    comb = trans.reshape(n_img, NUM_PAT, NUM_PAT, UP_RATIO, UP_RATIO)
    screen = comb.transpose(0, 1, 3, 2, 4).reshape(bs, nc, h, w)

    # TODO(synk): feature branch (CubePointCloudRenderer waypoint projection,
    # grid_sample_from_heatmap, rotation heads) skipped: renderer has no Pallas
    # equivalent; module instantiated with skip_feature_branch=True.
    return {"visual_featmap": featmap, "screen_logits": screen}


mvt_forward_jit = jax.jit(mvt_forward)


# ============================= parameter creation =============================

def init_params(key):
    keys = iter(jax.random.split(key, 64))

    def nrm(shape, scale=0.02):
        return (scale * jax.random.normal(next(keys), shape)).astype(jnp.float32)

    D = INPUT_DIM_BEFORE_SEQ
    inner = ATTN_HEADS * ATTN_DIM_HEAD
    mask_dim = UP_K2 * UP_R2
    params = {
        "pos_encoding": jax.random.normal(
            next(keys), (1, NUM_CAMERAS * NUM_PAT * NUM_PAT, D)).astype(jnp.float32),
        # patchify Conv2DBlock: Conv2d(3,16,k=8,s=8) + GroupNorm(4,16) + LeakyReLU
        "patch_w": nrm((IM_CHANNELS, IMG_FEAT_DIM, IMG_PATCH_SIZE, IMG_PATCH_SIZE)),
        "patch_b": nrm((IM_CHANNELS,)),
        "patch_gn_g": jnp.ones((IM_CHANNELS,), jnp.float32),
        "patch_gn_b": jnp.zeros((IM_CHANNELS,), jnp.float32),
        # proprio DenseBlock: Linear(4,16) + GroupNorm(4,16) + LeakyReLU
        "prop_w": nrm((PROPRIO_DIM, IM_CHANNELS)),
        "prop_b": nrm((IM_CHANNELS,)),
        "prop_gn_g": jnp.ones((IM_CHANNELS,), jnp.float32),
        "prop_gn_b": jnp.zeros((IM_CHANNELS,), jnp.float32),
        # fc_bef_attn / fc_aft_attn (plain Linear)
        "fc_bef_w": nrm((D, ATTN_DIM)), "fc_bef_b": nrm((ATTN_DIM,)),
        "fc_aft_w": nrm((ATTN_DIM, D)), "fc_aft_b": nrm((D,)),
    }
    layers = []
    for _ in range(DEPTH):
        layers.append(dict(
            ln1_g=jnp.ones((ATTN_DIM,), jnp.float32),
            ln1_b=jnp.zeros((ATTN_DIM,), jnp.float32),
            wqkv=nrm((ATTN_DIM, 3 * inner)),                  # to_qkv (no bias)
            wo=nrm((inner, ATTN_DIM)), bo=nrm((ATTN_DIM,)),   # to_out
            ln2_g=jnp.ones((ATTN_DIM,), jnp.float32),
            ln2_b=jnp.zeros((ATTN_DIM,), jnp.float32),
            w1=nrm((ATTN_DIM, ATTN_DIM * FF_MULT)), b1=nrm((ATTN_DIM * FF_MULT,)),
            w2=nrm((ATTN_DIM * FF_MULT, ATTN_DIM)), b2=nrm((ATTN_DIM,)),
        ))
    params["layers"] = layers
    params["up0"] = dict(
        out1_w=nrm((2 * D, D, 3, 3)), out1_b=nrm((2 * D,)),
        out2_w=nrm((2 * D, 2 * D, 3, 3)), out2_b=nrm((2 * D,)),
        out3_w=nrm((1, 2 * D, 3, 3)), out3_b=nrm((1,)),
        m1_w=nrm((2 * D, D, 3, 3)), m1_b=nrm((2 * D,)),
        m2_w=nrm((mask_dim, 2 * D, 1, 1)), m2_b=nrm((mask_dim,)),
    )
    return params


# =================================== main ====================================

if __name__ == "__main__":
    root = jax.random.PRNGKey(0)
    pkey, ikey, qkey = jax.random.split(root, 3)
    params = init_params(pkey)
    flat_params = prepare_params(params, BS)      # one-time layout conversion

    img = jax.random.normal(
        ikey, (BS, NUM_CAMERAS, IMG_FEAT_DIM, IMG_SIZE, IMG_SIZE), jnp.float32)
    proprio = jax.random.normal(qkey, (BS, PROPRIO_DIM), jnp.float32)

    out = mvt_forward_jit(flat_params, img, proprio)
    out = jax.block_until_ready(out)

    assert out["visual_featmap"].shape == (BS * NUM_CAMERAS, INPUT_DIM_BEFORE_SEQ,
                                           NUM_PAT, NUM_PAT)
    assert out["screen_logits"].shape == (BS, NUM_CAMERAS, IMG_SIZE, IMG_SIZE)
    assert bool(jnp.all(jnp.isfinite(out["visual_featmap"])))
    assert bool(jnp.all(jnp.isfinite(out["screen_logits"])))
    print("KERNEL_OK")
</pallas_src>

<mosaic_0001>
module attributes {stable_mosaic.version = 11 : i64} {
  func.func @_mvt_forward_kernel(%arg0: memref<24x192xf32, #tpu.memory_space<vmem>>, %arg1: memref<2x4xf32, #tpu.memory_space<vmem>>, %arg2: memref<192x16xf32, #tpu.memory_space<vmem>>, %arg3: memref<1x16xf32, #tpu.memory_space<vmem>>, %arg4: memref<1x16xf32, #tpu.memory_space<vmem>>, %arg5: memref<1x16xf32, #tpu.memory_space<vmem>>, %arg6: memref<16x16xf32, #tpu.memory_space<vmem>>, %arg7: memref<24x24xf32, #tpu.memory_space<vmem>>, %arg8: memref<4x16xf32, #tpu.memory_space<vmem>>, %arg9: memref<1x16xf32, #tpu.memory_space<vmem>>, %arg10: memref<1x16xf32, #tpu.memory_space<vmem>>, %arg11: memref<1x16xf32, #tpu.memory_space<vmem>>, %arg12: memref<24x2xf32, #tpu.memory_space<vmem>>, %arg13: memref<16x32xf32, #tpu.memory_space<vmem>>, %arg14: memref<16x32xf32, #tpu.memory_space<vmem>>, %arg15: memref<24x32xf32, #tpu.memory_space<vmem>>, %arg16: memref<1x32xf32, #tpu.memory_space<vmem>>, %arg17: memref<1x32xf32, #tpu.memory_space<vmem>>, %arg18: memref<32x96xf32, #tpu.memory_space<vmem>>, %arg19: memref<32x32xf32, #tpu.memory_space<vmem>>, %arg20: memref<1x32xf32, #tpu.memory_space<vmem>>, %arg21: memref<1x32xf32, #tpu.memory_space<vmem>>, %arg22: memref<1x32xf32, #tpu.memory_space<vmem>>, %arg23: memref<32x128xf32, #tpu.memory_space<vmem>>, %arg24: memref<1x128xf32, #tpu.memory_space<vmem>>, %arg25: memref<128x32xf32, #tpu.memory_space<vmem>>, %arg26: memref<1x32xf32, #tpu.memory_space<vmem>>, %arg27: memref<24x24xf32, #tpu.memory_space<vmem>>, %arg28: memref<1x32xf32, #tpu.memory_space<vmem>>, %arg29: memref<1x32xf32, #tpu.memory_space<vmem>>, %arg30: memref<32x96xf32, #tpu.memory_space<vmem>>, %arg31: memref<32x32xf32, #tpu.memory_space<vmem>>, %arg32: memref<1x32xf32, #tpu.memory_space<vmem>>, %arg33: memref<1x32xf32, #tpu.memory_space<vmem>>, %arg34: memref<1x32xf32, #tpu.memory_space<vmem>>, %arg35: memref<32x128xf32, #tpu.memory_space<vmem>>, %arg36: memref<1x128xf32, #tpu.memory_space<vmem>>, %arg37: memref<128x32xf32, #tpu.memory_space<vmem>>, %arg38: memref<1x32xf32, #tpu.memory_space<vmem>>, %arg39: memref<24x24xf32, #tpu.memory_space<vmem>>, %arg40: memref<32x32xf32, #tpu.memory_space<vmem>>, %arg41: memref<1x32xf32, #tpu.memory_space<vmem>>, %arg42: memref<4x6x24xf32, #tpu.memory_space<vmem>>, %arg43: memref<128x512xf32, #tpu.memory_space<vmem>>, %arg44: memref<1x512xf32, #tpu.memory_space<vmem>>, %arg45: memref<256x256xf32, #tpu.memory_space<vmem>>, %arg46: memref<1x256xf32, #tpu.memory_space<vmem>>, %arg47: memref<256x4xf32, #tpu.memory_space<vmem>>, %arg48: memref<1x4xf32, #tpu.memory_space<vmem>>, %arg49: memref<64x576xf32, #tpu.memory_space<vmem>>, %arg50: memref<1x576xf32, #tpu.memory_space<vmem>>, %arg51: memref<4x36xf32, #tpu.memory_space<vmem>>, %arg52: memref<6x128xf32, #tpu.memory_space<vmem>>, %arg53: memref<6x256xf32, #tpu.memory_space<vmem>>) attributes {dimension_semantics = [], scalar_prefetch = 0 : i64, scratch_operands = 0 : i64, tpu.core_type = #tpu.core_type<tc>} {
    %c0 = arith.constant 0 : index
    %c0_0 = arith.constant 0 : index
    %0 = vector.load %arg6[%c0, %c0_0] : memref<16x16xf32, #tpu.memory_space<vmem>>, vector<16x16xf32>
    %c0_1 = arith.constant 0 : index
    %c0_2 = arith.constant 0 : index
    %1 = vector.load %arg0[%c0_1, %c0_2] : memref<24x192xf32, #tpu.memory_space<vmem>>, vector<24x192xf32>
    %c0_3 = arith.constant 0 : index
    %c0_4 = arith.constant 0 : index
    %2 = vector.load %arg2[%c0_3, %c0_4] : memref<192x16xf32, #tpu.memory_space<vmem>>, vector<192x16xf32>
    %cst = arith.constant dense<0.000000e+00> : vector<24x16xf32>
    %3 = tpu.matmul %1, %2, %cst {dimension_numbers = #tpu.dot_dimension_numbers<[1], [0], [0], [1], [0, 0, 1, 1], [], []>} : vector<24x192xf32>, vector<192x16xf32>, vector<24x16xf32> -> vector<24x16xf32>
    %c0_5 = arith.constant 0 : index
    %c0_6 = arith.constant 0 : index
    %4 = vector.load %arg3[%c0_5, %c0_6] : memref<1x16xf32, #tpu.memory_space<vmem>>, vector<1x16xf32>
    %5 = vector.broadcast %4 : vector<1x16xf32> to vector<24x16xf32>
    %6 = arith.addf %3, %5 : vector<24x16xf32>
    %c0_7 = arith.constant 0 : index
    %c0_8 = arith.constant 0 : index
    %7 = vector.load %arg7[%c0_7, %c0_8] : memref<24x24xf32, #tpu.memory_space<vmem>>, vector<24x24xf32>
    %cst_9 = arith.constant dense<0.000000e+00> : vector<24x16xf32>
    %8 = tpu.matmul %7, %6, %cst_9 {dimension_numbers = #tpu.dot_dimension_numbers<[1], [0], [0], [1], [0, 0, 1, 1], [], []>} : vector<24x24xf32>, vector<24x16xf32>, vector<24x16xf32> -> vector<24x16xf32>
    %cst_10 = arith.constant dense<0.000000e+00> : vector<24x16xf32>
    %9 = tpu.matmul %8, %0, %cst_10 {dimension_numbers = #tpu.dot_dimension_numbers<[1], [0], [0], [1], [0, 0, 1, 1], [], []>} : vector<24x16xf32>, vector<16x16xf32>, vector<24x16xf32> -> vector<24x16xf32>
    %10 = arith.mulf %6, %6 : vector<24x16xf32>
    %cst_11 = arith.constant dense<0.000000e+00> : vector<24x16xf32>
    %11 = tpu.matmul %7, %10, %cst_11 {dimension_numbers = #tpu.dot_dimension_numbers<[1], [0], [0], [1], [0, 0, 1, 1], [], []>} : vector<24x24xf32>, vector<24x16xf32>, vector<24x16xf32> -> vector<24x16xf32>
    %cst_12 = arith.constant dense<0.000000e+00> : vector<24x16xf32>
    %12 = tpu.matmul %11, %0, %cst_12 {dimension_numbers = #tpu.dot_dimension_numbers<[1], [0], [0], [1], [0, 0, 1, 1], [], []>} : vector<24x16xf32>, vector<16x16xf32>, vector<24x16xf32> -> vector<24x16xf32>
    %13 = arith.subf %6, %9 : vector<24x16xf32>
    %14 = arith.mulf %9, %9 : vector<24x16xf32>
    %15 = arith.subf %12, %14 : vector<24x16xf32>
    %cst_13 = arith.constant 9.99999974E-6 : f32
    %16 = vector.broadcast %cst_13 : f32 to vector<24x16xf32>
    %17 = arith.addf %15, %16 : vector<24x16xf32>
    %18 = math.rsqrt %17 : vector<24x16xf32>
    %19 = arith.mulf %13, %18 : vector<24x16xf32>
    %c0_14 = arith.constant 0 : index
    %c0_15 = arith.constant 0 : index
    %20 = vector.load %arg4[%c0_14, %c0_15] : memref<1x16xf32, #tpu.memory_space<vmem>>, vector<1x16xf32>
    %21 = vector.broadcast %20 : vector<1x16xf32> to vector<24x16xf32>
    %22 = arith.mulf %19, %21 : vector<24x16xf32>
    %c0_16 = arith.constant 0 : index
    %c0_17 = arith.constant 0 : index
    %23 = vector.load %arg5[%c0_16, %c0_17] : memref<1x16xf32, #tpu.memory_space<vmem>>, vector<1x16xf32>
    %24 = vector.broadcast %23 : vector<1x16xf32> to vector<24x16xf32>
    %25 = arith.addf %22, %24 : vector<24x16xf32>
    %cst_18 = arith.constant 0.000000e+00 : f32
    %26 = vector.broadcast %cst_18 : f32 to vector<24x16xf32>
    %27 = arith.cmpf oge, %25, %26 : vector<24x16xf32>
    %cst_19 = arith.constant 2.000000e-02 : f32
    %28 = vector.broadcast %cst_19 : f32 to vector<24x16xf32>
    %29 = arith.mulf %28, %25 : vector<24x16xf32>
    %30 = arith.select %27, %25, %29 : vector<24x16xi1>, vector<24x16xf32>
    %c0_20 = arith.constant 0 : index
    %c0_21 = arith.constant 0 : index
    %31 = vector.load %arg1[%c0_20, %c0_21] : memref<2x4xf32, #tpu.memory_space<vmem>>, vector<2x4xf32>
    %c0_22 = arith.constant 0 : index
    %c0_23 = arith.constant 0 : index
    %32 = vector.load %arg8[%c0_22, %c0_23] : memref<4x16xf32, #tpu.memory_space<vmem>>, vector<4x16xf32>
    %cst_24 = arith.constant dense<0.000000e+00> : vector<2x16xf32>
    %33 = tpu.matmul %31, %32, %cst_24 {dimension_numbers = #tpu.dot_dimension_numbers<[1], [0], [0], [1], [0, 0, 1, 1], [], []>} : vector<2x4xf32>, vector<4x16xf32>, vector<2x16xf32> -> vector<2x16xf32>
    %c0_25 = arith.constant 0 : index
    %c0_26 = arith.constant 0 : index
    %34 = vector.load %arg9[%c0_25, %c0_26] : memref<1x16xf32, #tpu.memory_space<vmem>>, vector<1x16xf32>
    %35 = vector.broadcast %34 : vector<1x16xf32> to vector<2x16xf32>
    %36 = arith.addf %33, %35 : vector<2x16xf32>
    %cst_27 = arith.constant dense<0.000000e+00> : vector<2x16xf32>
    %37 = tpu.matmul %36, %0, %cst_27 {dimension_numbers = #tpu.dot_dimension_numbers<[1], [0], [0], [1], [0, 0, 1, 1], [], []>} : vector<2x16xf32>, vector<16x16xf32>, vector<2x16xf32> -> vector<2x16xf32>
    %38 = arith.mulf %36, %36 : vector<2x16xf32>
    %cst_28 = arith.constant dense<0.000000e+00> : vector<2x16xf32>
    %39 = tpu.matmul %38, %0, %cst_28 {dimension_numbers = #tpu.dot_dimension_numbers<[1], [0], [0], [1], [0, 0, 1, 1], [], []>} : vector<2x16xf32>, vector<16x16xf32>, vector<2x16xf32> -> vector<2x16xf32>
    %40 = arith.subf %36, %37 : vector<2x16xf32>
    %41 = arith.mulf %37, %37 : vector<2x16xf32>
    %42 = arith.subf %39, %41 : vector<2x16xf32>
    %cst_29 = arith.constant 9.99999974E-6 : f32
    %43 = vector.broadcast %cst_29 : f32 to vector<2x16xf32>
    %44 = arith.addf %42, %43 : vector<2x16xf32>
    %45 = math.rsqrt %44 : vector<2x16xf32>
    %46 = arith.mulf %40, %45 : vector<2x16xf32>
    %c0_30 = arith.constant 0 : index
    %c0_31 = arith.constant 0 : index
    %47 = vector.load %arg10[%c0_30, %c0_31] : memref<1x16xf32, #tpu.memory_space<vmem>>, vector<1x16xf32>
    %48 = vector.broadcast %47 : vector<1x16xf32> to vector<2x16xf32>
    %49 = arith.mulf %46, %48 : vector<2x16xf32>
    %c0_32 = arith.constant 0 : index
    %c0_33 = arith.constant 0 : index
    %50 = vector.load %arg11[%c0_32, %c0_33] : memref<1x16xf32, #tpu.memory_space<vmem>>, vector<1x16xf32>
    %51 = vector.broadcast %50 : vector<1x16xf32> to vector<2x16xf32>
    %52 = arith.addf %49, %51 : vector<2x16xf32>
    %cst_34 = arith.constant 0.000000e+00 : f32
    %53 = vector.broadcast %cst_34 : f32 to vector<2x16xf32>
    %54 = arith.cmpf oge, %52, %53 : vector<2x16xf32>
    %cst_35 = arith.constant 2.000000e-02 : f32
    %55 = vector.broadcast %cst_35 : f32 to vector<2x16xf32>
    %56 = arith.mulf %55, %52 : vector<2x16xf32>
    %57 = arith.select %54, %52, %56 : vector<2x16xi1>, vector<2x16xf32>
    %c0_36 = arith.constant 0 : index
    %c0_37 = arith.constant 0 : index
    %58 = vector.load %arg12[%c0_36, %c0_37] : memref<24x2xf32, #tpu.memory_space<vmem>>, vector<24x2xf32>
    %cst_38 = arith.constant dense<0.000000e+00> : vector<24x16xf32>
    %59 = tpu.matmul %58, %57, %cst_38 {dimension_numbers = #tpu.dot_dimension_numbers<[1], [0], [0], [1], [0, 0, 1, 1], [], []>} : vector<24x2xf32>, vector<2x16xf32>, vector<24x16xf32> -> vector<24x16xf32>
    %c0_39 = arith.constant 0 : index
    %c0_40 = arith.constant 0 : index
    %60 = vector.load %arg13[%c0_39, %c0_40] : memref<16x32xf32, #tpu.memory_space<vmem>>, vector<16x32xf32>
    %cst_41 = arith.constant dense<0.000000e+00> : vector<24x32xf32>
    %61 = tpu.matmul %30, %60, %cst_41 {dimension_numbers = #tpu.dot_dimension_numbers<[1], [0], [0], [1], [0, 0, 1, 1], [], []>} : vector<24x16xf32>, vector<16x32xf32>, vector<24x32xf32> -> vector<24x32xf32>
    %c0_42 = arith.constant 0 : index
    %c0_43 = arith.constant 0 : index
    %62 = vector.load %arg14[%c0_42, %c0_43] : memref<16x32xf32, #tpu.memory_space<vmem>>, vector<16x32xf32>
    %cst_44 = arith.constant dense<0.000000e+00> : vector<24x32xf32>
    %63 = tpu.matmul %59, %62, %cst_44 {dimension_numbers = #tpu.dot_dimension_numbers<[1], [0], [0], [1], [0, 0, 1, 1], [], []>} : vector<24x16xf32>, vector<16x32xf32>, vector<24x32xf32> -> vector<24x32xf32>
    %64 = arith.addf %61, %63 : vector<24x32xf32>
    %c0_45 = arith.constant 0 : index
    %c0_46 = arith.constant 0 : index
    %65 = vector.load %arg15[%c0_45, %c0_46] : memref<24x32xf32, #tpu.memory_space<vmem>>, vector<24x32xf32>
    %66 = arith.addf %64, %65 : vector<24x32xf32>
    %c0_47 = arith.constant 0 : index
    %c0_48 = arith.constant 0 : index
    %67 = vector.load %arg27[%c0_47, %c0_48] : memref<24x24xf32, #tpu.memory_space<vmem>>, vector<24x24xf32>
    %c0_49 = arith.constant 0 : index
    %c0_50 = arith.constant 0 : index
    %68 = vector.load %arg16[%c0_49, %c0_50] : memref<1x32xf32, #tpu.memory_space<vmem>>, vector<1x32xf32>
    %c0_51 = arith.constant 0 : index
    %c0_52 = arith.constant 0 : index
    %69 = vector.load %arg17[%c0_51, %c0_52] : memref<1x32xf32, #tpu.memory_space<vmem>>, vector<1x32xf32>
    %cst_53 = arith.constant dense<0.000000e+00> : vector<24xf32>
    %70 = vector.multi_reduction <add>, %66, %cst_53 [1] : vector<24x32xf32> to vector<24xf32>
    %71 = vector.shape_cast %70 : vector<24xf32> to vector<24x1xf32>
    %cst_54 = arith.constant 3.200000e+01 : f32
    %72 = vector.broadcast %cst_54 : f32 to vector<24x1xf32>
    %73 = arith.divf %71, %72 : vector<24x1xf32>
    %74 = vector.broadcast %73 : vector<24x1xf32> to vector<24x32xf32>
    %75 = arith.subf %66, %74 : vector<24x32xf32>
    %76 = arith.mulf %75, %75 : vector<24x32xf32>
    %cst_55 = arith.constant dense<0.000000e+00> : vector<24xf32>
    %77 = vector.multi_reduction <add>, %76, %cst_55 [1] : vector<24x32xf32> to vector<24xf32>
    %78 = vector.shape_cast %77 : vector<24xf32> to vector<24x1xf32>
    %cst_56 = arith.constant 3.200000e+01 : f32
    %79 = vector.broadcast %cst_56 : f32 to vector<24x1xf32>
    %80 = arith.divf %78, %79 : vector<24x1xf32>
    %cst_57 = arith.constant 9.99999974E-6 : f32
    %81 = vector.broadcast %cst_57 : f32 to vector<24x1xf32>
    %82 = arith.addf %80, %81 : vector<24x1xf32>
    %83 = math.rsqrt %82 : vector<24x1xf32>
    %84 = vector.broadcast %83 : vector<24x1xf32> to vector<24x32xf32>
    %85 = arith.mulf %75, %84 : vector<24x32xf32>
    %86 = vector.broadcast %68 : vector<1x32xf32> to vector<24x32xf32>
    %87 = arith.mulf %85, %86 : vector<24x32xf32>
    %88 = vector.broadcast %69 : vector<1x32xf32> to vector<24x32xf32>
    %89 = arith.addf %87, %88 : vector<24x32xf32>
    %c0_58 = arith.constant 0 : index
    %c0_59 = arith.constant 0 : index
    %90 = vector.load %arg18[%c0_58, %c0_59] : memref<32x96xf32, #tpu.memory_space<vmem>>, vector<32x96xf32>
    %cst_60 = arith.constant dense<0.000000e+00> : vector<24x96xf32>
    %91 = tpu.matmul %89, %90, %cst_60 {dimension_numbers = #tpu.dot_dimension_numbers<[1], [0], [0], [1], [0, 0, 1, 1], [], []>} : vector<24x32xf32>, vector<32x96xf32>, vector<24x96xf32> -> vector<24x96xf32>
    %c0_61 = arith.constant 0 : index
    %c0_62 = arith.constant 0 : index
    %92 = vector.load %arg19[%c0_61, %c0_62] : memref<32x32xf32, #tpu.memory_space<vmem>>, vector<32x32xf32>
    %c0_63 = arith.constant 0 : index
    %c0_64 = arith.constant 0 : index
    %93 = vector.load %arg20[%c0_63, %c0_64] : memref<1x32xf32, #tpu.memory_space<vmem>>, vector<1x32xf32>
    %94 = vector.extract_strided_slice %91 {offsets = [0, 0], sizes = [24, 16], strides = [1, 1]} : vector<24x96xf32> to vector<24x16xf32>
    %cst_65 = arith.constant 2.500000e-01 : f32
    %95 = vector.broadcast %cst_65 : f32 to vector<24x16xf32>
    %96 = arith.mulf %94, %95 : vector<24x16xf32>
    %97 = vector.extract_strided_slice %91 {offsets = [0, 32], sizes = [24, 16], strides = [1, 1]} : vector<24x96xf32> to vector<24x16xf32>
    %98 = vector.extract_strided_slice %91 {offsets = [0, 64], sizes = [24, 16], strides = [1, 1]} : vector<24x96xf32> to vector<24x16xf32>
    %cst_66 = arith.constant dense<0.000000e+00> : vector<24x24xf32>
    %99 = tpu.matmul %96, %97, %cst_66 {dimension_numbers = #tpu.dot_dimension_numbers<[1], [1], [0], [0], [0, 0, 1, 0], [], []>} : vector<24x16xf32>, vector<24x16xf32>, vector<24x24xf32> -> vector<24x24xf32>
    %100 = arith.addf %99, %67 : vector<24x24xf32>
    %cst_67 = arith.constant dense<0xFF800000> : vector<24xf32>
    %101 = vector.multi_reduction <maximumf>, %100, %cst_67 [1] : vector<24x24xf32> to vector<24xf32>
    %102 = vector.shape_cast %101 : vector<24xf32> to vector<24x1xf32>
    %103 = vector.broadcast %102 : vector<24x1xf32> to vector<24x24xf32>
    %104 = arith.subf %100, %103 : vector<24x24xf32>
    %105 = math.exp %104 : vector<24x24xf32>
    %cst_68 = arith.constant dense<0.000000e+00> : vector<24xf32>
    %106 = vector.multi_reduction <add>, %105, %cst_68 [1] : vector<24x24xf32> to vector<24xf32>
    %107 = vector.shape_cast %106 : vector<24xf32> to vector<24x1xf32>
    %108 = vector.broadcast %107 : vector<24x1xf32> to vector<24x24xf32>
    %109 = arith.divf %105, %108 : vector<24x24xf32>
    %cst_69 = arith.constant dense<0.000000e+00> : vector<24x16xf32>
    %110 = tpu.matmul %109, %98, %cst_69 {dimension_numbers = #tpu.dot_dimension_numbers<[1], [0], [0], [1], [0, 0, 1, 1], [], []>} : vector<24x24xf32>, vector<24x16xf32>, vector<24x16xf32> -> vector<24x16xf32>
    %111 = vector.extract_strided_slice %92 {offsets = [0, 0], sizes = [16, 32], strides = [1, 1]} : vector<32x32xf32> to vector<16x32xf32>
    %cst_70 = arith.constant dense<0.000000e+00> : vector<24x32xf32>
    %112 = tpu.matmul %110, %111, %cst_70 {dimension_numbers = #tpu.dot_dimension_numbers<[1], [0], [0], [1], [0, 0, 1, 1], [], []>} : vector<24x16xf32>, vector<16x32xf32>, vector<24x32xf32> -> vector<24x32xf32>
    %113 = vector.broadcast %93 : vector<1x32xf32> to vector<24x32xf32>
    %114 = arith.addf %113, %112 : vector<24x32xf32>
    %115 = vector.extract_strided_slice %91 {offsets = [0, 16], sizes = [24, 16], strides = [1, 1]} : vector<24x96xf32> to vector<24x16xf32>
    %cst_71 = arith.constant 2.500000e-01 : f32
    %116 = vector.broadcast %cst_71 : f32 to vector<24x16xf32>
    %117 = arith.mulf %115, %116 : vector<24x16xf32>
    %118 = vector.extract_strided_slice %91 {offsets = [0, 48], sizes = [24, 16], strides = [1, 1]} : vector<24x96xf32> to vector<24x16xf32>
    %119 = vector.extract_strided_slice %91 {offsets = [0, 80], sizes = [24, 16], strides = [1, 1]} : vector<24x96xf32> to vector<24x16xf32>
    %cst_72 = arith.constant dense<0.000000e+00> : vector<24x24xf32>
    %120 = tpu.matmul %117, %118, %cst_72 {dimension_numbers = #tpu.dot_dimension_numbers<[1], [1], [0], [0], [0, 0, 1, 0], [], []>} : vector<24x16xf32>, vector<24x16xf32>, vector<24x24xf32> -> vector<24x24xf32>
    %121 = arith.addf %120, %67 : vector<24x24xf32>
    %cst_73 = arith.constant dense<0xFF800000> : vector<24xf32>
    %122 = vector.multi_reduction <maximumf>, %121, %cst_73 [1] : vector<24x24xf32> to vector<24xf32>
    %123 = vector.shape_cast %122 : vector<24xf32> to vector<24x1xf32>
    %124 = vector.broadcast %123 : vector<24x1xf32> to vector<24x24xf32>
    %125 = arith.subf %121, %124 : vector<24x24xf32>
    %126 = math.exp %125 : vector<24x24xf32>
    %cst_74 = arith.constant dense<0.000000e+00> : vector<24xf32>
    %127 = vector.multi_reduction <add>, %126, %cst_74 [1] : vector<24x24xf32> to vector<24xf32>
    %128 = vector.shape_cast %127 : vector<24xf32> to vector<24x1xf32>
    %129 = vector.broadcast %128 : vector<24x1xf32> to vector<24x24xf32>
    %130 = arith.divf %126, %129 : vector<24x24xf32>
    %cst_75 = arith.constant dense<0.000000e+00> : vector<24x16xf32>
    %131 = tpu.matmul %130, %119, %cst_75 {dimension_numbers = #tpu.dot_dimension_numbers<[1], [0], [0], [1], [0, 0, 1, 1], [], []>} : vector<24x24xf32>, vector<24x16xf32>, vector<24x16xf32> -> vector<24x16xf32>
    %132 = vector.extract_strided_slice %92 {offsets = [16, 0], sizes = [16, 32], strides = [1, 1]} : vector<32x32xf32> to vector<16x32xf32>
    %cst_76 = arith.constant dense<0.000000e+00> : vector<24x32xf32>
    %133 = tpu.matmul %131, %132, %cst_76 {dimension_numbers = #tpu.dot_dimension_numbers<[1], [0], [0], [1], [0, 0, 1, 1], [], []>} : vector<24x16xf32>, vector<16x32xf32>, vector<24x32xf32> -> vector<24x32xf32>
    %134 = arith.addf %114, %133 : vector<24x32xf32>
    %135 = arith.addf %66, %134 : vector<24x32xf32>
    %c0_77 = arith.constant 0 : index
    %c0_78 = arith.constant 0 : index
    %136 = vector.load %arg21[%c0_77, %c0_78] : memref<1x32xf32, #tpu.memory_space<vmem>>, vector<1x32xf32>
    %c0_79 = arith.constant 0 : index
    %c0_80 = arith.constant 0 : index
    %137 = vector.load %arg22[%c0_79, %c0_80] : memref<1x32xf32, #tpu.memory_space<vmem>>, vector<1x32xf32>
    %cst_81 = arith.constant dense<0.000000e+00> : vector<24xf32>
    %138 = vector.multi_reduction <add>, %135, %cst_81 [1] : vector<24x32xf32> to vector<24xf32>
    %139 = vector.shape_cast %138 : vector<24xf32> to vector<24x1xf32>
    %cst_82 = arith.constant 3.200000e+01 : f32
    %140 = vector.broadcast %cst_82 : f32 to vector<24x1xf32>
    %141 = arith.divf %139, %140 : vector<24x1xf32>
    %142 = vector.broadcast %141 : vector<24x1xf32> to vector<24x32xf32>
    %143 = arith.subf %135, %142 : vector<24x32xf32>
    %144 = arith.mulf %143, %143 : vector<24x32xf32>
    %cst_83 = arith.constant dense<0.000000e+00> : vector<24xf32>
    %145 = vector.multi_reduction <add>, %144, %cst_83 [1] : vector<24x32xf32> to vector<24xf32>
    %146 = vector.shape_cast %145 : vector<24xf32> to vector<24x1xf32>
    %cst_84 = arith.constant 3.200000e+01 : f32
    %147 = vector.broadcast %cst_84 : f32 to vector<24x1xf32>
    %148 = arith.divf %146, %147 : vector<24x1xf32>
    %cst_85 = arith.constant 9.99999974E-6 : f32
    %149 = vector.broadcast %cst_85 : f32 to vector<24x1xf32>
    %150 = arith.addf %148, %149 : vector<24x1xf32>
    %151 = math.rsqrt %150 : vector<24x1xf32>
    %152 = vector.broadcast %151 : vector<24x1xf32> to vector<24x32xf32>
    %153 = arith.mulf %143, %152 : vector<24x32xf32>
    %154 = vector.broadcast %136 : vector<1x32xf32> to vector<24x32xf32>
    %155 = arith.mulf %153, %154 : vector<24x32xf32>
    %156 = vector.broadcast %137 : vector<1x32xf32> to vector<24x32xf32>
    %157 = arith.addf %155, %156 : vector<24x32xf32>
    %c0_86 = arith.constant 0 : index
    %c0_87 = arith.constant 0 : index
    %158 = vector.load %arg23[%c0_86, %c0_87] : memref<32x128xf32, #tpu.memory_space<vmem>>, vector<32x128xf32>
    %cst_88 = arith.constant dense<0.000000e+00> : vector<24x128xf32>
    %159 = tpu.matmul %157, %158, %cst_88 {dimension_numbers = #tpu.dot_dimension_numbers<[1], [0], [0], [1], [0, 0, 1, 1], [], []>} : vector<24x32xf32>, vector<32x128xf32>, vector<24x128xf32> -> vector<24x128xf32>
    %c0_89 = arith.constant 0 : index
    %c0_90 = arith.constant 0 : index
    %160 = vector.load %arg24[%c0_89, %c0_90] : memref<1x128xf32, #tpu.memory_space<vmem>>, vector<1x128xf32>
    %161 = vector.broadcast %160 : vector<1x128xf32> to vector<24x128xf32>
    %162 = arith.addf %159, %161 : vector<24x128xf32>
    %cst_91 = arith.constant 5.000000e-01 : f32
    %163 = vector.broadcast %cst_91 : f32 to vector<24x128xf32>
    %164 = arith.mulf %163, %162 : vector<24x128xf32>
    %cst_92 = arith.constant 0.707106769 : f32
    %165 = vector.broadcast %cst_92 : f32 to vector<24x128xf32>
    %166 = arith.mulf %162, %165 : vector<24x128xf32>
    %167 = math.absf %166 : vector<24x128xf32>
    %cst_93 = arith.constant 0.327591091 : f32
    %168 = vector.broadcast %cst_93 : f32 to vector<24x128xf32>
    %169 = arith.mulf %168, %167 : vector<24x128xf32>
    %cst_94 = arith.constant 1.000000e+00 : f32
    %170 = vector.broadcast %cst_94 : f32 to vector<24x128xf32>
    %171 = arith.addf %170, %169 : vector<24x128xf32>
    %cst_95 = arith.constant 1.000000e+00 : f32
    %172 = vector.broadcast %cst_95 : f32 to vector<24x128xf32>
    %173 = arith.divf %172, %171 : vector<24x128xf32>
    %cst_96 = arith.constant 1.06140542 : f32
    %174 = vector.broadcast %cst_96 : f32 to vector<24x128xf32>
    %175 = arith.mulf %173, %174 : vector<24x128xf32>
    %cst_97 = arith.constant -1.45315206 : f32
    %176 = vector.broadcast %cst_97 : f32 to vector<24x128xf32>
    %177 = arith.addf %176, %175 : vector<24x128xf32>
    %178 = arith.mulf %173, %177 : vector<24x128xf32>
    %cst_98 = arith.constant 1.42141378 : f32
    %179 = vector.broadcast %cst_98 : f32 to vector<24x128xf32>
    %180 = arith.addf %179, %178 : vector<24x128xf32>
    %181 = arith.mulf %173, %180 : vector<24x128xf32>
    %cst_99 = arith.constant -0.284496725 : f32
    %182 = vector.broadcast %cst_99 : f32 to vector<24x128xf32>
    %183 = arith.addf %182, %181 : vector<24x128xf32>
    %184 = arith.mulf %173, %183 : vector<24x128xf32>
    %cst_100 = arith.constant 0.254829586 : f32
    %185 = vector.broadcast %cst_100 : f32 to vector<24x128xf32>
    %186 = arith.addf %185, %184 : vector<24x128xf32>
    %187 = arith.mulf %173, %186 : vector<24x128xf32>
    %cst_101 = arith.constant 0.000000e+00 : f32
    %188 = vector.broadcast %cst_101 : f32 to vector<24x128xf32>
    %189 = arith.subf %188, %167 : vector<24x128xf32>
    %190 = arith.mulf %189, %167 : vector<24x128xf32>
    %191 = math.exp %190 : vector<24x128xf32>
    %192 = arith.mulf %187, %191 : vector<24x128xf32>
    %cst_102 = arith.constant 1.000000e+00 : f32
    %193 = vector.broadcast %cst_102 : f32 to vector<24x128xf32>
    %194 = arith.subf %193, %192 : vector<24x128xf32>
    %cst_103 = arith.constant 0.000000e+00 : f32
    %195 = vector.broadcast %cst_103 : f32 to vector<24x128xf32>
    %196 = arith.cmpf oge, %166, %195 : vector<24x128xf32>
    %cst_104 = arith.constant 0.000000e+00 : f32
    %197 = vector.broadcast %cst_104 : f32 to vector<24x128xf32>
    %198 = arith.subf %197, %194 : vector<24x128xf32>
    %199 = arith.select %196, %194, %198 : vector<24x128xi1>, vector<24x128xf32>
    %cst_105 = arith.constant 1.000000e+00 : f32
    %200 = vector.broadcast %cst_105 : f32 to vector<24x128xf32>
    %201 = arith.addf %200, %199 : vector<24x128xf32>
    %202 = arith.mulf %164, %201 : vector<24x128xf32>
    %c0_106 = arith.constant 0 : index
    %c0_107 = arith.constant 0 : index
    %203 = vector.load %arg25[%c0_106, %c0_107] : memref<128x32xf32, #tpu.memory_space<vmem>>, vector<128x32xf32>
    %cst_108 = arith.constant dense<0.000000e+00> : vector<24x32xf32>
    %204 = tpu.matmul %202, %203, %cst_108 {dimension_numbers = #tpu.dot_dimension_numbers<[1], [0], [0], [1], [0, 0, 1, 1], [], []>} : vector<24x128xf32>, vector<128x32xf32>, vector<24x32xf32> -> vector<24x32xf32>
    %205 = arith.addf %135, %204 : vector<24x32xf32>
    %c0_109 = arith.constant 0 : index
    %c0_110 = arith.constant 0 : index
    %206 = vector.load %arg26[%c0_109, %c0_110] : memref<1x32xf32, #tpu.memory_space<vmem>>, vector<1x32xf32>
    %207 = vector.broadcast %206 : vector<1x32xf32> to vector<24x32xf32>
    %208 = arith.addf %205, %207 : vector<24x32xf32>
    %c0_111 = arith.constant 0 : index
    %c0_112 = arith.constant 0 : index
    %209 = vector.load %arg39[%c0_111, %c0_112] : memref<24x24xf32, #tpu.memory_space<vmem>>, vector<24x24xf32>
    %c0_113 = arith.constant 0 : index
    %c0_114 = arith.constant 0 : index
    %210 = vector.load %arg28[%c0_113, %c0_114] : memref<1x32xf32, #tpu.memory_space<vmem>>, vector<1x32xf32>
    %c0_115 = arith.constant 0 : index
    %c0_116 = arith.constant 0 : index
    %211 = vector.load %arg29[%c0_115, %c0_116] : memref<1x32xf32, #tpu.memory_space<vmem>>, vector<1x32xf32>
    %cst_117 = arith.constant dense<0.000000e+00> : vector<24xf32>
    %212 = vector.multi_reduction <add>, %208, %cst_117 [1] : vector<24x32xf32> to vector<24xf32>
    %213 = vector.shape_cast %212 : vector<24xf32> to vector<24x1xf32>
    %cst_118 = arith.constant 3.200000e+01 : f32
    %214 = vector.broadcast %cst_118 : f32 to vector<24x1xf32>
    %215 = arith.divf %213, %214 : vector<24x1xf32>
    %216 = vector.broadcast %215 : vector<24x1xf32> to vector<24x32xf32>
    %217 = arith.subf %208, %216 : vector<24x32xf32>
    %218 = arith.mulf %217, %217 : vector<24x32xf32>
    %cst_119 = arith.constant dense<0.000000e+00> : vector<24xf32>
    %219 = vector.multi_reduction <add>, %218, %cst_119 [1] : vector<24x32xf32> to vector<24xf32>
    %220 = vector.shape_cast %219 : vector<24xf32> to vector<24x1xf32>
    %cst_120 = arith.constant 3.200000e+01 : f32
    %221 = vector.broadcast %cst_120 : f32 to vector<24x1xf32>
    %222 = arith.divf %220, %221 : vector<24x1xf32>
    %cst_121 = arith.constant 9.99999974E-6 : f32
    %223 = vector.broadcast %cst_121 : f32 to vector<24x1xf32>
    %224 = arith.addf %222, %223 : vector<24x1xf32>
    %225 = math.rsqrt %224 : vector<24x1xf32>
    %226 = vector.broadcast %225 : vector<24x1xf32> to vector<24x32xf32>
    %227 = arith.mulf %217, %226 : vector<24x32xf32>
    %228 = vector.broadcast %210 : vector<1x32xf32> to vector<24x32xf32>
    %229 = arith.mulf %227, %228 : vector<24x32xf32>
    %230 = vector.broadcast %211 : vector<1x32xf32> to vector<24x32xf32>
    %231 = arith.addf %229, %230 : vector<24x32xf32>
    %c0_122 = arith.constant 0 : index
    %c0_123 = arith.constant 0 : index
    %232 = vector.load %arg30[%c0_122, %c0_123] : memref<32x96xf32, #tpu.memory_space<vmem>>, vector<32x96xf32>
    %cst_124 = arith.constant dense<0.000000e+00> : vector<24x96xf32>
    %233 = tpu.matmul %231, %232, %cst_124 {dimension_numbers = #tpu.dot_dimension_numbers<[1], [0], [0], [1], [0, 0, 1, 1], [], []>} : vector<24x32xf32>, vector<32x96xf32>, vector<24x96xf32> -> vector<24x96xf32>
    %c0_125 = arith.constant 0 : index
    %c0_126 = arith.constant 0 : index
    %234 = vector.load %arg31[%c0_125, %c0_126] : memref<32x32xf32, #tpu.memory_space<vmem>>, vector<32x32xf32>
    %c0_127 = arith.constant 0 : index
    %c0_128 = arith.constant 0 : index
    %235 = vector.load %arg32[%c0_127, %c0_128] : memref<1x32xf32, #tpu.memory_space<vmem>>, vector<1x32xf32>
    %236 = vector.extract_strided_slice %233 {offsets = [0, 0], sizes = [24, 16], strides = [1, 1]} : vector<24x96xf32> to vector<24x16xf32>
    %cst_129 = arith.constant 2.500000e-01 : f32
    %237 = vector.broadcast %cst_129 : f32 to vector<24x16xf32>
    %238 = arith.mulf %236, %237 : vector<24x16xf32>
    %239 = vector.extract_strided_slice %233 {offsets = [0, 32], sizes = [24, 16], strides = [1, 1]} : vector<24x96xf32> to vector<24x16xf32>
    %240 = vector.extract_strided_slice %233 {offsets = [0, 64], sizes = [24, 16], strides = [1, 1]} : vector<24x96xf32> to vector<24x16xf32>
    %cst_130 = arith.constant dense<0.000000e+00> : vector<24x24xf32>
    %241 = tpu.matmul %238, %239, %cst_130 {dimension_numbers = #tpu.dot_dimension_numbers<[1], [1], [0], [0], [0, 0, 1, 0], [], []>} : vector<24x16xf32>, vector<24x16xf32>, vector<24x24xf32> -> vector<24x24xf32>
    %242 = arith.addf %241, %209 : vector<24x24xf32>
    %cst_131 = arith.constant dense<0xFF800000> : vector<24xf32>
    %243 = vector.multi_reduction <maximumf>, %242, %cst_131 [1] : vector<24x24xf32> to vector<24xf32>
    %244 = vector.shape_cast %243 : vector<24xf32> to vector<24x1xf32>
    %245 = vector.broadcast %244 : vector<24x1xf32> to vector<24x24xf32>
    %246 = arith.subf %242, %245 : vector<24x24xf32>
    %247 = math.exp %246 : vector<24x24xf32>
    %cst_132 = arith.constant dense<0.000000e+00> : vector<24xf32>
    %248 = vector.multi_reduction <add>, %247, %cst_132 [1] : vector<24x24xf32> to vector<24xf32>
    %249 = vector.shape_cast %248 : vector<24xf32> to vector<24x1xf32>
    %250 = vector.broadcast %249 : vector<24x1xf32> to vector<24x24xf32>
    %251 = arith.divf %247, %250 : vector<24x24xf32>
    %cst_133 = arith.constant dense<0.000000e+00> : vector<24x16xf32>
    %252 = tpu.matmul %251, %240, %cst_133 {dimension_numbers = #tpu.dot_dimension_numbers<[1], [0], [0], [1], [0, 0, 1, 1], [], []>} : vector<24x24xf32>, vector<24x16xf32>, vector<24x16xf32> -> vector<24x16xf32>
    %253 = vector.extract_strided_slice %234 {offsets = [0, 0], sizes = [16, 32], strides = [1, 1]} : vector<32x32xf32> to vector<16x32xf32>
    %cst_134 = arith.constant dense<0.000000e+00> : vector<24x32xf32>
    %254 = tpu.matmul %252, %253, %cst_134 {dimension_numbers = #tpu.dot_dimension_numbers<[1], [0], [0], [1], [0, 0, 1, 1], [], []>} : vector<24x16xf32>, vector<16x32xf32>, vector<24x32xf32> -> vector<24x32xf32>
    %255 = vector.broadcast %235 : vector<1x32xf32> to vector<24x32xf32>
    %256 = arith.addf %255, %254 : vector<24x32xf32>
    %257 = vector.extract_strided_slice %233 {offsets = [0, 16], sizes = [24, 16], strides = [1, 1]} : vector<24x96xf32> to vector<24x16xf32>
    %cst_135 = arith.constant 2.500000e-01 : f32
    %258 = vector.broadcast %cst_135 : f32 to vector<24x16xf32>
    %259 = arith.mulf %257, %258 : vector<24x16xf32>
    %260 = vector.extract_strided_slice %233 {offsets = [0, 48], sizes = [24, 16], strides = [1, 1]} : vector<24x96xf32> to vector<24x16xf32>
    %261 = vector.extract_strided_slice %233 {offsets = [0, 80], sizes = [24, 16], strides = [1, 1]} : vector<24x96xf32> to vector<24x16xf32>
    %cst_136 = arith.constant dense<0.000000e+00> : vector<24x24xf32>
    %262 = tpu.matmul %259, %260, %cst_136 {dimension_numbers = #tpu.dot_dimension_numbers<[1], [1], [0], [0], [0, 0, 1, 0], [], []>} : vector<24x16xf32>, vector<24x16xf32>, vector<24x24xf32> -> vector<24x24xf32>
    %263 = arith.addf %262, %209 : vector<24x24xf32>
    %cst_137 = arith.constant dense<0xFF800000> : vector<24xf32>
    %264 = vector.multi_reduction <maximumf>, %263, %cst_137 [1] : vector<24x24xf32> to vector<24xf32>
    %265 = vector.shape_cast %264 : vector<24xf32> to vector<24x1xf32>
    %266 = vector.broadcast %265 : vector<24x1xf32> to vector<24x24xf32>
    %267 = arith.subf %263, %266 : vector<24x24xf32>
    %268 = math.exp %267 : vector<24x24xf32>
    %cst_138 = arith.constant dense<0.000000e+00> : vector<24xf32>
    %269 = vector.multi_reduction <add>, %268, %cst_138 [1] : vector<24x24xf32> to vector<24xf32>
    %270 = vector.shape_cast %269 : vector<24xf32> to vector<24x1xf32>
    %271 = vector.broadcast %270 : vector<24x1xf32> to vector<24x24xf32>
    %272 = arith.divf %268, %271 : vector<24x24xf32>
    %cst_139 = arith.constant dense<0.000000e+00> : vector<24x16xf32>
    %273 = tpu.matmul %272, %261, %cst_139 {dimension_numbers = #tpu.dot_dimension_numbers<[1], [0], [0], [1], [0, 0, 1, 1], [], []>} : vector<24x24xf32>, vector<24x16xf32>, vector<24x16xf32> -> vector<24x16xf32>
    %274 = vector.extract_strided_slice %234 {offsets = [16, 0], sizes = [16, 32], strides = [1, 1]} : vector<32x32xf32> to vector<16x32xf32>
    %cst_140 = arith.constant dense<0.000000e+00> : vector<24x32xf32>
    %275 = tpu.matmul %273, %274, %cst_140 {dimension_numbers = #tpu.dot_dimension_numbers<[1], [0], [0], [1], [0, 0, 1, 1], [], []>} : vector<24x16xf32>, vector<16x32xf32>, vector<24x32xf32> -> vector<24x32xf32>
    %276 = arith.addf %256, %275 : vector<24x32xf32>
    %277 = arith.addf %208, %276 : vector<24x32xf32>
    %c0_141 = arith.constant 0 : index
    %c0_142 = arith.constant 0 : index
    %278 = vector.load %arg33[%c0_141, %c0_142] : memref<1x32xf32, #tpu.memory_space<vmem>>, vector<1x32xf32>
    %c0_143 = arith.constant 0 : index
    %c0_144 = arith.constant 0 : index
    %279 = vector.load %arg34[%c0_143, %c0_144] : memref<1x32xf32, #tpu.memory_space<vmem>>, vector<1x32xf32>
    %cst_145 = arith.constant dense<0.000000e+00> : vector<24xf32>
    %280 = vector.multi_reduction <add>, %277, %cst_145 [1] : vector<24x32xf32> to vector<24xf32>
    %281 = vector.shape_cast %280 : vector<24xf32> to vector<24x1xf32>
    %cst_146 = arith.constant 3.200000e+01 : f32
    %282 = vector.broadcast %cst_146 : f32 to vector<24x1xf32>
    %283 = arith.divf %281, %282 : vector<24x1xf32>
    %284 = vector.broadcast %283 : vector<24x1xf32> to vector<24x32xf32>
    %285 = arith.subf %277, %284 : vector<24x32xf32>
    %286 = arith.mulf %285, %285 : vector<24x32xf32>
    %cst_147 = arith.constant dense<0.000000e+00> : vector<24xf32>
    %287 = vector.multi_reduction <add>, %286, %cst_147 [1] : vector<24x32xf32> to vector<24xf32>
    %288 = vector.shape_cast %287 : vector<24xf32> to vector<24x1xf32>
    %cst_148 = arith.constant 3.200000e+01 : f32
    %289 = vector.broadcast %cst_148 : f32 to vector<24x1xf32>
    %290 = arith.divf %288, %289 : vector<24x1xf32>
    %cst_149 = arith.constant 9.99999974E-6 : f32
    %291 = vector.broadcast %cst_149 : f32 to vector<24x1xf32>
    %292 = arith.addf %290, %291 : vector<24x1xf32>
    %293 = math.rsqrt %292 : vector<24x1xf32>
    %294 = vector.broadcast %293 : vector<24x1xf32> to vector<24x32xf32>
    %295 = arith.mulf %285, %294 : vector<24x32xf32>
    %296 = vector.broadcast %278 : vector<1x32xf32> to vector<24x32xf32>
    %297 = arith.mulf %295, %296 : vector<24x32xf32>
    %298 = vector.broadcast %279 : vector<1x32xf32> to vector<24x32xf32>
    %299 = arith.addf %297, %298 : vector<24x32xf32>
    %c0_150 = arith.constant 0 : index
    %c0_151 = arith.constant 0 : index
    %300 = vector.load %arg35[%c0_150, %c0_151] : memref<32x128xf32, #tpu.memory_space<vmem>>, vector<32x128xf32>
    %cst_152 = arith.constant dense<0.000000e+00> : vector<24x128xf32>
    %301 = tpu.matmul %299, %300, %cst_152 {dimension_numbers = #tpu.dot_dimension_numbers<[1], [0], [0], [1], [0, 0, 1, 1], [], []>} : vector<24x32xf32>, vector<32x128xf32>, vector<24x128xf32> -> vector<24x128xf32>
    %c0_153 = arith.constant 0 : index
    %c0_154 = arith.constant 0 : index
    %302 = vector.load %arg36[%c0_153, %c0_154] : memref<1x128xf32, #tpu.memory_space<vmem>>, vector<1x128xf32>
    %303 = vector.broadcast %302 : vector<1x128xf32> to vector<24x128xf32>
    %304 = arith.addf %301, %303 : vector<24x128xf32>
    %cst_155 = arith.constant 5.000000e-01 : f32
    %305 = vector.broadcast %cst_155 : f32 to vector<24x128xf32>
    %306 = arith.mulf %305, %304 : vector<24x128xf32>
    %cst_156 = arith.constant 0.707106769 : f32
    %307 = vector.broadcast %cst_156 : f32 to vector<24x128xf32>
    %308 = arith.mulf %304, %307 : vector<24x128xf32>
    %309 = math.absf %308 : vector<24x128xf32>
    %cst_157 = arith.constant 0.327591091 : f32
    %310 = vector.broadcast %cst_157 : f32 to vector<24x128xf32>
    %311 = arith.mulf %310, %309 : vector<24x128xf32>
    %cst_158 = arith.constant 1.000000e+00 : f32
    %312 = vector.broadcast %cst_158 : f32 to vector<24x128xf32>
    %313 = arith.addf %312, %311 : vector<24x128xf32>
    %cst_159 = arith.constant 1.000000e+00 : f32
    %314 = vector.broadcast %cst_159 : f32 to vector<24x128xf32>
    %315 = arith.divf %314, %313 : vector<24x128xf32>
    %cst_160 = arith.constant 1.06140542 : f32
    %316 = vector.broadcast %cst_160 : f32 to vector<24x128xf32>
    %317 = arith.mulf %315, %316 : vector<24x128xf32>
    %cst_161 = arith.constant -1.45315206 : f32
    %318 = vector.broadcast %cst_161 : f32 to vector<24x128xf32>
    %319 = arith.addf %318, %317 : vector<24x128xf32>
    %320 = arith.mulf %315, %319 : vector<24x128xf32>
    %cst_162 = arith.constant 1.42141378 : f32
    %321 = vector.broadcast %cst_162 : f32 to vector<24x128xf32>
    %322 = arith.addf %321, %320 : vector<24x128xf32>
    %323 = arith.mulf %315, %322 : vector<24x128xf32>
    %cst_163 = arith.constant -0.284496725 : f32
    %324 = vector.broadcast %cst_163 : f32 to vector<24x128xf32>
    %325 = arith.addf %324, %323 : vector<24x128xf32>
    %326 = arith.mulf %315, %325 : vector<24x128xf32>
    %cst_164 = arith.constant 0.254829586 : f32
    %327 = vector.broadcast %cst_164 : f32 to vector<24x128xf32>
    %328 = arith.addf %327, %326 : vector<24x128xf32>
    %329 = arith.mulf %315, %328 : vector<24x128xf32>
    %cst_165 = arith.constant 0.000000e+00 : f32
    %330 = vector.broadcast %cst_165 : f32 to vector<24x128xf32>
    %331 = arith.subf %330, %309 : vector<24x128xf32>
    %332 = arith.mulf %331, %309 : vector<24x128xf32>
    %333 = math.exp %332 : vector<24x128xf32>
    %334 = arith.mulf %329, %333 : vector<24x128xf32>
    %cst_166 = arith.constant 1.000000e+00 : f32
    %335 = vector.broadcast %cst_166 : f32 to vector<24x128xf32>
    %336 = arith.subf %335, %334 : vector<24x128xf32>
    %cst_167 = arith.constant 0.000000e+00 : f32
    %337 = vector.broadcast %cst_167 : f32 to vector<24x128xf32>
    %338 = arith.cmpf oge, %308, %337 : vector<24x128xf32>
    %cst_168 = arith.constant 0.000000e+00 : f32
    %339 = vector.broadcast %cst_168 : f32 to vector<24x128xf32>
    %340 = arith.subf %339, %336 : vector<24x128xf32>
    %341 = arith.select %338, %336, %340 : vector<24x128xi1>, vector<24x128xf32>
    %cst_169 = arith.constant 1.000000e+00 : f32
    %342 = vector.broadcast %cst_169 : f32 to vector<24x128xf32>
    %343 = arith.addf %342, %341 : vector<24x128xf32>
    %344 = arith.mulf %306, %343 : vector<24x128xf32>
    %c0_170 = arith.constant 0 : index
    %c0_171 = arith.constant 0 : index
    %345 = vector.load %arg37[%c0_170, %c0_171] : memref<128x32xf32, #tpu.memory_space<vmem>>, vector<128x32xf32>
    %cst_172 = arith.constant dense<0.000000e+00> : vector<24x32xf32>
    %346 = tpu.matmul %344, %345, %cst_172 {dimension_numbers = #tpu.dot_dimension_numbers<[1], [0], [0], [1], [0, 0, 1, 1], [], []>} : vector<24x128xf32>, vector<128x32xf32>, vector<24x32xf32> -> vector<24x32xf32>
    %347 = arith.addf %277, %346 : vector<24x32xf32>
    %c0_173 = arith.constant 0 : index
    %c0_174 = arith.constant 0 : index
    %348 = vector.load %arg38[%c0_173, %c0_174] : memref<1x32xf32, #tpu.memory_space<vmem>>, vector<1x32xf32>
    %349 = vector.broadcast %348 : vector<1x32xf32> to vector<24x32xf32>
    %350 = arith.addf %347, %349 : vector<24x32xf32>
    %c0_175 = arith.constant 0 : index
    %c0_176 = arith.constant 0 : index
    %351 = vector.load %arg40[%c0_175, %c0_176] : memref<32x32xf32, #tpu.memory_space<vmem>>, vector<32x32xf32>
    %cst_177 = arith.constant dense<0.000000e+00> : vector<24x32xf32>
    %352 = tpu.matmul %350, %351, %cst_177 {dimension_numbers = #tpu.dot_dimension_numbers<[1], [0], [0], [1], [0, 0, 1, 1], [], []>} : vector<24x32xf32>, vector<32x32xf32>, vector<24x32xf32> -> vector<24x32xf32>
    %c0_178 = arith.constant 0 : index
    %c0_179 = arith.constant 0 : index
    %353 = vector.load %arg41[%c0_178, %c0_179] : memref<1x32xf32, #tpu.memory_space<vmem>>, vector<1x32xf32>
    %354 = vector.broadcast %353 : vector<1x32xf32> to vector<24x32xf32>
    %355 = arith.addf %352, %354 : vector<24x32xf32>
    %c0_180 = arith.constant 0 : index
    %c0_181 = arith.constant 0 : index
    %356 = vector.load %arg43[%c0_180, %c0_181] : memref<128x512xf32, #tpu.memory_space<vmem>>, vector<128x512xf32>
    %c0_182 = arith.constant 0 : index
    %c0_183 = arith.constant 0 : index
    %357 = vector.load %arg44[%c0_182, %c0_183] : memref<1x512xf32, #tpu.memory_space<vmem>>, vector<1x512xf32>
    %c0_184 = arith.constant 0 : index
    %c0_185 = arith.constant 0 : index
    %c0_186 = arith.constant 0 : index
    %358 = vector.load %arg42[%c0_184, %c0_185, %c0_186] : memref<4x6x24xf32, #tpu.memory_space<vmem>>, vector<1x6x24xf32>
    %359 = vector.shape_cast %358 : vector<1x6x24xf32> to vector<6x24xf32>
    %cst_187 = arith.constant dense<0.000000e+00> : vector<6x32xf32>
    %360 = tpu.matmul %359, %355, %cst_187 {dimension_numbers = #tpu.dot_dimension_numbers<[1], [0], [0], [1], [0, 0, 1, 1], [], []>} : vector<6x24xf32>, vector<24x32xf32>, vector<6x32xf32> -> vector<6x32xf32>
    %c0_188 = arith.constant 0 : index
    %c0_189 = arith.constant 0 : index
    %361 = vector.load %arg52[%c0_188, %c0_189] : memref<6x128xf32, #tpu.memory_space<vmem>>, vector<6x32xf32>
    tpu.vector_store %arg52[%c0_188, %c0_189], %360 {strides = array<i32>} : memref<6x128xf32, #tpu.memory_space<vmem>>, vector<6x32xf32>,
    %362 = vector.extract_strided_slice %356 {offsets = [0, 0], sizes = [32, 512], strides = [1, 1]} : vector<128x512xf32> to vector<32x512xf32>
    %cst_190 = arith.constant dense<0.000000e+00> : vector<6x512xf32>
    %363 = tpu.matmul %360, %362, %cst_190 {dimension_numbers = #tpu.dot_dimension_numbers<[1], [0], [0], [1], [0, 0, 1, 1], [], []>} : vector<6x32xf32>, vector<32x512xf32>, vector<6x512xf32> -> vector<6x512xf32>
    %364 = vector.broadcast %357 : vector<1x512xf32> to vector<6x512xf32>
    %365 = arith.addf %364, %363 : vector<6x512xf32>
    %c1 = arith.constant 1 : index
    %c0_191 = arith.constant 0 : index
    %c0_192 = arith.constant 0 : index
    %366 = vector.load %arg42[%c1, %c0_191, %c0_192] : memref<4x6x24xf32, #tpu.memory_space<vmem>>, vector<1x6x24xf32>
    %367 = vector.shape_cast %366 : vector<1x6x24xf32> to vector<6x24xf32>
    %cst_193 = arith.constant dense<0.000000e+00> : vector<6x32xf32>
    %368 = tpu.matmul %367, %355, %cst_193 {dimension_numbers = #tpu.dot_dimension_numbers<[1], [0], [0], [1], [0, 0, 1, 1], [], []>} : vector<6x24xf32>, vector<24x32xf32>, vector<6x32xf32> -> vector<6x32xf32>
    %c0_194 = arith.constant 0 : index
    %c32 = arith.constant 32 : index
    %369 = vector.load %arg52[%c0_194, %c32] : memref<6x128xf32, #tpu.memory_space<vmem>>, vector<6x32xf32>
    tpu.vector_store %arg52[%c0_194, %c32], %368 {strides = array<i32>} : memref<6x128xf32, #tpu.memory_space<vmem>>, vector<6x32xf32>,
    %370 = vector.extract_strided_slice %356 {offsets = [32, 0], sizes = [32, 512], strides = [1, 1]} : vector<128x512xf32> to vector<32x512xf32>
    %cst_195 = arith.constant dense<0.000000e+00> : vector<6x512xf32>
    %371 = tpu.matmul %368, %370, %cst_195 {dimension_numbers = #tpu.dot_dimension_numbers<[1], [0], [0], [1], [0, 0, 1, 1], [], []>} : vector<6x32xf32>, vector<32x512xf32>, vector<6x512xf32> -> vector<6x512xf32>
    %372 = arith.addf %365, %371 : vector<6x512xf32>
    %c2 = arith.constant 2 : index
    %c0_196 = arith.constant 0 : index
    %c0_197 = arith.constant 0 : index
    %373 = vector.load %arg42[%c2, %c0_196, %c0_197] : memref<4x6x24xf32, #tpu.memory_space<vmem>>, vector<1x6x24xf32>
    %374 = vector.shape_cast %373 : vector<1x6x24xf32> to vector<6x24xf32>
    %cst_198 = arith.constant dense<0.000000e+00> : vector<6x32xf32>
    %375 = tpu.matmul %374, %355, %cst_198 {dimension_numbers = #tpu.dot_dimension_numbers<[1], [0], [0], [1], [0, 0, 1, 1], [], []>} : vector<6x24xf32>, vector<24x32xf32>, vector<6x32xf32> -> vector<6x32xf32>
    %c0_199 = arith.constant 0 : index
    %c64 = arith.constant 64 : index
    %376 = vector.load %arg52[%c0_199, %c64] : memref<6x128xf32, #tpu.memory_space<vmem>>, vector<6x32xf32>
    tpu.vector_store %arg52[%c0_199, %c64], %375 {strides = array<i32>} : memref<6x128xf32, #tpu.memory_space<vmem>>, vector<6x32xf32>,
    %377 = vector.extract_strided_slice %356 {offsets = [64, 0], sizes = [32, 512], strides = [1, 1]} : vector<128x512xf32> to vector<32x512xf32>
    %cst_200 = arith.constant dense<0.000000e+00> : vector<6x512xf32>
    %378 = tpu.matmul %375, %377, %cst_200 {dimension_numbers = #tpu.dot_dimension_numbers<[1], [0], [0], [1], [0, 0, 1, 1], [], []>} : vector<6x32xf32>, vector<32x512xf32>, vector<6x512xf32> -> vector<6x512xf32>
    %379 = arith.addf %372, %378 : vector<6x512xf32>
    %c3 = arith.constant 3 : index
    %c0_201 = arith.constant 0 : index
    %c0_202 = arith.constant 0 : index
    %380 = vector.load %arg42[%c3, %c0_201, %c0_202] : memref<4x6x24xf32, #tpu.memory_space<vmem>>, vector<1x6x24xf32>
    %381 = vector.shape_cast %380 : vector<1x6x24xf32> to vector<6x24xf32>
    %cst_203 = arith.constant dense<0.000000e+00> : vector<6x32xf32>
    %382 = tpu.matmul %381, %355, %cst_203 {dimension_numbers = #tpu.dot_dimension_numbers<[1], [0], [0], [1], [0, 0, 1, 1], [], []>} : vector<6x24xf32>, vector<24x32xf32>, vector<6x32xf32> -> vector<6x32xf32>
    %c0_204 = arith.constant 0 : index
    %c96 = arith.constant 96 : index
    %383 = vector.load %arg52[%c0_204, %c96] : memref<6x128xf32, #tpu.memory_space<vmem>>, vector<6x32xf32>
    tpu.vector_store %arg52[%c0_204, %c96], %382 {strides = array<i32>} : memref<6x128xf32, #tpu.memory_space<vmem>>, vector<6x32xf32>,
    %384 = vector.extract_strided_slice %356 {offsets = [96, 0], sizes = [32, 512], strides = [1, 1]} : vector<128x512xf32> to vector<32x512xf32>
    %cst_205 = arith.constant dense<0.000000e+00> : vector<6x512xf32>
    %385 = tpu.matmul %382, %384, %cst_205 {dimension_numbers = #tpu.dot_dimension_numbers<[1], [0], [0], [1], [0, 0, 1, 1], [], []>} : vector<6x32xf32>, vector<32x512xf32>, vector<6x512xf32> -> vector<6x512xf32>
    %386 = arith.addf %379, %385 : vector<6x512xf32>
    %cst_206 = arith.constant 0.000000e+00 : f32
    %387 = vector.broadcast %cst_206 : f32 to vector<6x512xf32>
    %388 = arith.maximumf %386, %387 : vector<6x512xf32>
    %389 = vector.extract_strided_slice %388 {offsets = [0, 0], sizes = [6, 256], strides = [1, 1]} : vector<6x512xf32> to vector<6x256xf32>
    %390 = vector.extract_strided_slice %388 {offsets = [0, 256], sizes = [6, 256], strides = [1, 1]} : vector<6x512xf32> to vector<6x256xf32>
    %c0_207 = arith.constant 0 : index
    %c0_208 = arith.constant 0 : index
    %391 = vector.load %arg45[%c0_207, %c0_208] : memref<256x256xf32, #tpu.memory_space<vmem>>, vector<256x256xf32>
    %cst_209 = arith.constant dense<0.000000e+00> : vector<6x256xf32>
    %392 = tpu.matmul %389, %391, %cst_209 {dimension_numbers = #tpu.dot_dimension_numbers<[1], [0], [0], [1], [0, 0, 1, 1], [], []>} : vector<6x256xf32>, vector<256x256xf32>, vector<6x256xf32> -> vector<6x256xf32>
    %c0_210 = arith.constant 0 : index
    %c0_211 = arith.constant 0 : index
    %393 = vector.load %arg46[%c0_210, %c0_211] : memref<1x256xf32, #tpu.memory_space<vmem>>, vector<1x256xf32>
    %394 = vector.broadcast %393 : vector<1x256xf32> to vector<6x256xf32>
    %395 = arith.addf %392, %394 : vector<6x256xf32>
    %cst_212 = arith.constant 0.000000e+00 : f32
    %396 = vector.broadcast %cst_212 : f32 to vector<6x256xf32>
    %397 = arith.maximumf %395, %396 : vector<6x256xf32>
    %c0_213 = arith.constant 0 : index
    %c0_214 = arith.constant 0 : index
    %398 = vector.load %arg47[%c0_213, %c0_214] : memref<256x4xf32, #tpu.memory_space<vmem>>, vector<256x4xf32>
    %cst_215 = arith.constant dense<0.000000e+00> : vector<6x4xf32>
    %399 = tpu.matmul %397, %398, %cst_215 {dimension_numbers = #tpu.dot_dimension_numbers<[1], [0], [0], [1], [0, 0, 1, 1], [], []>} : vector<6x256xf32>, vector<256x4xf32>, vector<6x4xf32> -> vector<6x4xf32>
    %c0_216 = arith.constant 0 : index
    %c0_217 = arith.constant 0 : index
    %400 = vector.load %arg48[%c0_216, %c0_217] : memref<1x4xf32, #tpu.memory_space<vmem>>, vector<1x4xf32>
    %401 = vector.broadcast %400 : vector<1x4xf32> to vector<6x4xf32>
    %402 = arith.addf %399, %401 : vector<6x4xf32>
    %c0_218 = arith.constant 0 : index
    %c0_219 = arith.constant 0 : index
    %403 = vector.load %arg51[%c0_218, %c0_219] : memref<4x36xf32, #tpu.memory_space<vmem>>, vector<4x36xf32>
    %cst_220 = arith.constant dense<0.000000e+00> : vector<6x36xf32>
    %404 = tpu.matmul %402, %403, %cst_220 {dimension_numbers = #tpu.dot_dimension_numbers<[1], [0], [0], [1], [0, 0, 1, 1], [], []>} : vector<6x4xf32>, vector<4x36xf32>, vector<6x36xf32> -> vector<6x36xf32>
    %c0_221 = arith.constant 0 : index
    %c0_222 = arith.constant 0 : index
    %405 = vector.load %arg49[%c0_221, %c0_222] : memref<64x576xf32, #tpu.memory_space<vmem>>, vector<64x576xf32>
    %c0_223 = arith.constant 0 : index
    %c0_224 = arith.constant 0 : index
    %406 = vector.load %arg50[%c0_223, %c0_224] : memref<1x576xf32, #tpu.memory_space<vmem>>, vector<1x576xf32>
    %407 = vector.extract_strided_slice %390 {offsets = [0, 0], sizes = [6, 64], strides = [1, 1]} : vector<6x256xf32> to vector<6x64xf32>
    %cst_225 = arith.constant dense<0.000000e+00> : vector<6x576xf32>
    %408 = tpu.matmul %407, %405, %cst_225 {dimension_numbers = #tpu.dot_dimension_numbers<[1], [0], [0], [1], [0, 0, 1, 1], [], []>} : vector<6x64xf32>, vector<64x576xf32>, vector<6x576xf32> -> vector<6x576xf32>
    %409 = vector.broadcast %406 : vector<1x576xf32> to vector<6x576xf32>
    %410 = arith.addf %408, %409 : vector<6x576xf32>
    %cst_226 = arith.constant 1.000000e-01 : f32
    %411 = vector.broadcast %cst_226 : f32 to vector<6x576xf32>
    %412 = arith.mulf %410, %411 : vector<6x576xf32>
    %413 = vector.extract_strided_slice %412 {offsets = [0, 0], sizes = [6, 64], strides = [1, 1]} : vector<6x576xf32> to vector<6x64xf32>
    %414 = vector.extract_strided_slice %412 {offsets = [0, 64], sizes = [6, 64], strides = [1, 1]} : vector<6x576xf32> to vector<6x64xf32>
    %415 = vector.extract_strided_slice %412 {offsets = [0, 128], sizes = [6, 64], strides = [1, 1]} : vector<6x576xf32> to vector<6x64xf32>
    %416 = vector.extract_strided_slice %412 {offsets = [0, 192], sizes = [6, 64], strides = [1, 1]} : vector<6x576xf32> to vector<6x64xf32>
    %417 = vector.extract_strided_slice %412 {offsets = [0, 256], sizes = [6, 64], strides = [1, 1]} : vector<6x576xf32> to vector<6x64xf32>
    %418 = vector.extract_strided_slice %412 {offsets = [0, 320], sizes = [6, 64], strides = [1, 1]} : vector<6x576xf32> to vector<6x64xf32>
    %419 = vector.extract_strided_slice %412 {offsets = [0, 384], sizes = [6, 64], strides = [1, 1]} : vector<6x576xf32> to vector<6x64xf32>
    %420 = vector.extract_strided_slice %412 {offsets = [0, 448], sizes = [6, 64], strides = [1, 1]} : vector<6x576xf32> to vector<6x64xf32>
    %421 = vector.extract_strided_slice %412 {offsets = [0, 512], sizes = [6, 64], strides = [1, 1]} : vector<6x576xf32> to vector<6x64xf32>
    %422 = arith.maximumf %413, %414 : vector<6x64xf32>
    %423 = arith.maximumf %422, %415 : vector<6x64xf32>
    %424 = arith.maximumf %423, %416 : vector<6x64xf32>
    %425 = arith.maximumf %424, %417 : vector<6x64xf32>
    %426 = arith.maximumf %425, %418 : vector<6x64xf32>
    %427 = arith.maximumf %426, %419 : vector<6x64xf32>
    %428 = arith.maximumf %427, %420 : vector<6x64xf32>
    %429 = arith.maximumf %428, %421 : vector<6x64xf32>
    %cst_227 = arith.constant 0.000000e+00 : f32
    %430 = vector.broadcast %cst_227 : f32 to vector<6x64xf32>
    %cst_228 = arith.constant 0.000000e+00 : f32
    %431 = vector.broadcast %cst_228 : f32 to vector<6x64xf32>
    %432 = arith.subf %413, %429 : vector<6x64xf32>
    %433 = math.exp %432 : vector<6x64xf32>
    %434 = arith.addf %430, %433 : vector<6x64xf32>
    %435 = vector.extract_strided_slice %404 {offsets = [0, 0], sizes = [6, 1], strides = [1, 1]} : vector<6x36xf32> to vector<6x1xf32>
    %436 = vector.broadcast %435 : vector<6x1xf32> to vector<6x64xf32>
    %437 = arith.mulf %433, %436 : vector<6x64xf32>
    %438 = arith.addf %431, %437 : vector<6x64xf32>
    %439 = arith.subf %414, %429 : vector<6x64xf32>
    %440 = math.exp %439 : vector<6x64xf32>
    %441 = arith.addf %434, %440 : vector<6x64xf32>
    %442 = vector.extract_strided_slice %404 {offsets = [0, 1], sizes = [6, 1], strides = [1, 1]} : vector<6x36xf32> to vector<6x1xf32>
    %443 = vector.broadcast %442 : vector<6x1xf32> to vector<6x64xf32>
    %444 = arith.mulf %440, %443 : vector<6x64xf32>
    %445 = arith.addf %438, %444 : vector<6x64xf32>
    %446 = arith.subf %415, %429 : vector<6x64xf32>
    %447 = math.exp %446 : vector<6x64xf32>
    %448 = arith.addf %441, %447 : vector<6x64xf32>
    %449 = vector.extract_strided_slice %404 {offsets = [0, 2], sizes = [6, 1], strides = [1, 1]} : vector<6x36xf32> to vector<6x1xf32>
    %450 = vector.broadcast %449 : vector<6x1xf32> to vector<6x64xf32>
    %451 = arith.mulf %447, %450 : vector<6x64xf32>
    %452 = arith.addf %445, %451 : vector<6x64xf32>
    %453 = arith.subf %416, %429 : vector<6x64xf32>
    %454 = math.exp %453 : vector<6x64xf32>
    %455 = arith.addf %448, %454 : vector<6x64xf32>
    %456 = vector.extract_strided_slice %404 {offsets = [0, 3], sizes = [6, 1], strides = [1, 1]} : vector<6x36xf32> to vector<6x1xf32>
    %457 = vector.broadcast %456 : vector<6x1xf32> to vector<6x64xf32>
    %458 = arith.mulf %454, %457 : vector<6x64xf32>
    %459 = arith.addf %452, %458 : vector<6x64xf32>
    %460 = arith.subf %417, %429 : vector<6x64xf32>
    %461 = math.exp %460 : vector<6x64xf32>
    %462 = arith.addf %455, %461 : vector<6x64xf32>
    %463 = vector.extract_strided_slice %404 {offsets = [0, 4], sizes = [6, 1], strides = [1, 1]} : vector<6x36xf32> to vector<6x1xf32>
    %464 = vector.broadcast %463 : vector<6x1xf32> to vector<6x64xf32>
    %465 = arith.mulf %461, %464 : vector<6x64xf32>
    %466 = arith.addf %459, %465 : vector<6x64xf32>
    %467 = arith.subf %418, %429 : vector<6x64xf32>
    %468 = math.exp %467 : vector<6x64xf32>
    %469 = arith.addf %462, %468 : vector<6x64xf32>
    %470 = vector.extract_strided_slice %404 {offsets = [0, 5], sizes = [6, 1], strides = [1, 1]} : vector<6x36xf32> to vector<6x1xf32>
    %471 = vector.broadcast %470 : vector<6x1xf32> to vector<6x64xf32>
    %472 = arith.mulf %468, %471 : vector<6x64xf32>
    %473 = arith.addf %466, %472 : vector<6x64xf32>
    %474 = arith.subf %419, %429 : vector<6x64xf32>
    %475 = math.exp %474 : vector<6x64xf32>
    %476 = arith.addf %469, %475 : vector<6x64xf32>
    %477 = vector.extract_strided_slice %404 {offsets = [0, 6], sizes = [6, 1], strides = [1, 1]} : vector<6x36xf32> to vector<6x1xf32>
    %478 = vector.broadcast %477 : vector<6x1xf32> to vector<6x64xf32>
    %479 = arith.mulf %475, %478 : vector<6x64xf32>
    %480 = arith.addf %473, %479 : vector<6x64xf32>
    %481 = arith.subf %420, %429 : vector<6x64xf32>
    %482 = math.exp %481 : vector<6x64xf32>
    %483 = arith.addf %476, %482 : vector<6x64xf32>
    %484 = vector.extract_strided_slice %404 {offsets = [0, 7], sizes = [6, 1], strides = [1, 1]} : vector<6x36xf32> to vector<6x1xf32>
    %485 = vector.broadcast %484 : vector<6x1xf32> to vector<6x64xf32>
    %486 = arith.mulf %482, %485 : vector<6x64xf32>
    %487 = arith.addf %480, %486 : vector<6x64xf32>
    %488 = arith.subf %421, %429 : vector<6x64xf32>
    %489 = math.exp %488 : vector<6x64xf32>
    %490 = arith.addf %483, %489 : vector<6x64xf32>
    %491 = vector.extract_strided_slice %404 {offsets = [0, 8], sizes = [6, 1], strides = [1, 1]} : vector<6x36xf32> to vector<6x1xf32>
    %492 = vector.broadcast %491 : vector<6x1xf32> to vector<6x64xf32>
    %493 = arith.mulf %489, %492 : vector<6x64xf32>
    %494 = arith.addf %487, %493 : vector<6x64xf32>
    %495 = arith.divf %494, %490 : vector<6x64xf32>
    %c0_229 = arith.constant 0 : index
    %c0_230 = arith.constant 0 : index
    %496 = vector.load %arg53[%c0_229, %c0_230] : memref<6x256xf32, #tpu.memory_space<vmem>>, vector<6x64xf32>
    tpu.vector_store %arg53[%c0_229, %c0_230], %495 {strides = array<i32>} : memref<6x256xf32, #tpu.memory_space<vmem>>, vector<6x64xf32>,
    %497 = vector.extract_strided_slice %390 {offsets = [0, 64], sizes = [6, 64], strides = [1, 1]} : vector<6x256xf32> to vector<6x64xf32>
    %cst_231 = arith.constant dense<0.000000e+00> : vector<6x576xf32>
    %498 = tpu.matmul %497, %405, %cst_231 {dimension_numbers = #tpu.dot_dimension_numbers<[1], [0], [0], [1], [0, 0, 1, 1], [], []>} : vector<6x64xf32>, vector<64x576xf32>, vector<6x576xf32> -> vector<6x576xf32>
    %499 = vector.broadcast %406 : vector<1x576xf32> to vector<6x576xf32>
    %500 = arith.addf %498, %499 : vector<6x576xf32>
    %cst_232 = arith.constant 1.000000e-01 : f32
    %501 = vector.broadcast %cst_232 : f32 to vector<6x576xf32>
    %502 = arith.mulf %500, %501 : vector<6x576xf32>
    %503 = vector.extract_strided_slice %502 {offsets = [0, 0], sizes = [6, 64], strides = [1, 1]} : vector<6x576xf32> to vector<6x64xf32>
    %504 = vector.extract_strided_slice %502 {offsets = [0, 64], sizes = [6, 64], strides = [1, 1]} : vector<6x576xf32> to vector<6x64xf32>
    %505 = vector.extract_strided_slice %502 {offsets = [0, 128], sizes = [6, 64], strides = [1, 1]} : vector<6x576xf32> to vector<6x64xf32>
    %506 = vector.extract_strided_slice %502 {offsets = [0, 192], sizes = [6, 64], strides = [1, 1]} : vector<6x576xf32> to vector<6x64xf32>
    %507 = vector.extract_strided_slice %502 {offsets = [0, 256], sizes = [6, 64], strides = [1, 1]} : vector<6x576xf32> to vector<6x64xf32>
    %508 = vector.extract_strided_slice %502 {offsets = [0, 320], sizes = [6, 64], strides = [1, 1]} : vector<6x576xf32> to vector<6x64xf32>
    %509 = vector.extract_strided_slice %502 {offsets = [0, 384], sizes = [6, 64], strides = [1, 1]} : vector<6x576xf32> to vector<6x64xf32>
    %510 = vector.extract_strided_slice %502 {offsets = [0, 448], sizes = [6, 64], strides = [1, 1]} : vector<6x576xf32> to vector<6x64xf32>
    %511 = vector.extract_strided_slice %502 {offsets = [0, 512], sizes = [6, 64], strides = [1, 1]} : vector<6x576xf32> to vector<6x64xf32>
    %512 = arith.maximumf %503, %504 : vector<6x64xf32>
    %513 = arith.maximumf %512, %505 : vector<6x64xf32>
    %514 = arith.maximumf %513, %506 : vector<6x64xf32>
    %515 = arith.maximumf %514, %507 : vector<6x64xf32>
    %516 = arith.maximumf %515, %508 : vector<6x64xf32>
    %517 = arith.maximumf %516, %509 : vector<6x64xf32>
    %518 = arith.maximumf %517, %510 : vector<6x64xf32>
    %519 = arith.maximumf %518, %511 : vector<6x64xf32>
    %cst_233 = arith.constant 0.000000e+00 : f32
    %520 = vector.broadcast %cst_233 : f32 to vector<6x64xf32>
    %cst_234 = arith.constant 0.000000e+00 : f32
    %521 = vector.broadcast %cst_234 : f32 to vector<6x64xf32>
    %522 = arith.subf %503, %519 : vector<6x64xf32>
    %523 = math.exp %522 : vector<6x64xf32>
    %524 = arith.addf %520, %523 : vector<6x64xf32>
    %525 = vector.extract_strided_slice %404 {offsets = [0, 9], sizes = [6, 1], strides = [1, 1]} : vector<6x36xf32> to vector<6x1xf32>
    %526 = vector.broadcast %525 : vector<6x1xf32> to vector<6x64xf32>
    %527 = arith.mulf %523, %526 : vector<6x64xf32>
    %528 = arith.addf %521, %527 : vector<6x64xf32>
    %529 = arith.subf %504, %519 : vector<6x64xf32>
    %530 = math.exp %529 : vector<6x64xf32>
    %531 = arith.addf %524, %530 : vector<6x64xf32>
    %532 = vector.extract_strided_slice %404 {offsets = [0, 10], sizes = [6, 1], strides = [1, 1]} : vector<6x36xf32> to vector<6x1xf32>
    %533 = vector.broadcast %532 : vector<6x1xf32> to vector<6x64xf32>
    %534 = arith.mulf %530, %533 : vector<6x64xf32>
    %535 = arith.addf %528, %534 : vector<6x64xf32>
    %536 = arith.subf %505, %519 : vector<6x64xf32>
    %537 = math.exp %536 : vector<6x64xf32>
    %538 = arith.addf %531, %537 : vector<6x64xf32>
    %539 = vector.extract_strided_slice %404 {offsets = [0, 11], sizes = [6, 1], strides = [1, 1]} : vector<6x36xf32> to vector<6x1xf32>
    %540 = vector.broadcast %539 : vector<6x1xf32> to vector<6x64xf32>
    %541 = arith.mulf %537, %540 : vector<6x64xf32>
    %542 = arith.addf %535, %541 : vector<6x64xf32>
    %543 = arith.subf %506, %519 : vector<6x64xf32>
    %544 = math.exp %543 : vector<6x64xf32>
    %545 = arith.addf %538, %544 : vector<6x64xf32>
    %546 = vector.extract_strided_slice %404 {offsets = [0, 12], sizes = [6, 1], strides = [1, 1]} : vector<6x36xf32> to vector<6x1xf32>
    %547 = vector.broadcast %546 : vector<6x1xf32> to vector<6x64xf32>
    %548 = arith.mulf %544, %547 : vector<6x64xf32>
    %549 = arith.addf %542, %548 : vector<6x64xf32>
    %550 = arith.subf %507, %519 : vector<6x64xf32>
    %551 = math.exp %550 : vector<6x64xf32>
    %552 = arith.addf %545, %551 : vector<6x64xf32>
    %553 = vector.extract_strided_slice %404 {offsets = [0, 13], sizes = [6, 1], strides = [1, 1]} : vector<6x36xf32> to vector<6x1xf32>
    %554 = vector.broadcast %553 : vector<6x1xf32> to vector<6x64xf32>
    %555 = arith.mulf %551, %554 : vector<6x64xf32>
    %556 = arith.addf %549, %555 : vector<6x64xf32>
    %557 = arith.subf %508, %519 : vector<6x64xf32>
    %558 = math.exp %557 : vector<6x64xf32>
    %559 = arith.addf %552, %558 : vector<6x64xf32>
    %560 = vector.extract_strided_slice %404 {offsets = [0, 14], sizes = [6, 1], strides = [1, 1]} : vector<6x36xf32> to vector<6x1xf32>
    %561 = vector.broadcast %560 : vector<6x1xf32> to vector<6x64xf32>
    %562 = arith.mulf %558, %561 : vector<6x64xf32>
    %563 = arith.addf %556, %562 : vector<6x64xf32>
    %564 = arith.subf %509, %519 : vector<6x64xf32>
    %565 = math.exp %564 : vector<6x64xf32>
    %566 = arith.addf %559, %565 : vector<6x64xf32>
    %567 = vector.extract_strided_slice %404 {offsets = [0, 15], sizes = [6, 1], strides = [1, 1]} : vector<6x36xf32> to vector<6x1xf32>
    %568 = vector.broadcast %567 : vector<6x1xf32> to vector<6x64xf32>
    %569 = arith.mulf %565, %568 : vector<6x64xf32>
    %570 = arith.addf %563, %569 : vector<6x64xf32>
    %571 = arith.subf %510, %519 : vector<6x64xf32>
    %572 = math.exp %571 : vector<6x64xf32>
    %573 = arith.addf %566, %572 : vector<6x64xf32>
    %574 = vector.extract_strided_slice %404 {offsets = [0, 16], sizes = [6, 1], strides = [1, 1]} : vector<6x36xf32> to vector<6x1xf32>
    %575 = vector.broadcast %574 : vector<6x1xf32> to vector<6x64xf32>
    %576 = arith.mulf %572, %575 : vector<6x64xf32>
    %577 = arith.addf %570, %576 : vector<6x64xf32>
    %578 = arith.subf %511, %519 : vector<6x64xf32>
    %579 = math.exp %578 : vector<6x64xf32>
    %580 = arith.addf %573, %579 : vector<6x64xf32>
    %581 = vector.extract_strided_slice %404 {offsets = [0, 17], sizes = [6, 1], strides = [1, 1]} : vector<6x36xf32> to vector<6x1xf32>
    %582 = vector.broadcast %581 : vector<6x1xf32> to vector<6x64xf32>
    %583 = arith.mulf %579, %582 : vector<6x64xf32>
    %584 = arith.addf %577, %583 : vector<6x64xf32>
    %585 = arith.divf %584, %580 : vector<6x64xf32>
    %c0_235 = arith.constant 0 : index
    %c64_236 = arith.constant 64 : index
    %586 = vector.load %arg53[%c0_235, %c64_236] : memref<6x256xf32, #tpu.memory_space<vmem>>, vector<6x64xf32>
    tpu.vector_store %arg53[%c0_235, %c64_236], %585 {strides = array<i32>} : memref<6x256xf32, #tpu.memory_space<vmem>>, vector<6x64xf32>,
    %587 = vector.extract_strided_slice %390 {offsets = [0, 128], sizes = [6, 64], strides = [1, 1]} : vector<6x256xf32> to vector<6x64xf32>
    %cst_237 = arith.constant dense<0.000000e+00> : vector<6x576xf32>
    %588 = tpu.matmul %587, %405, %cst_237 {dimension_numbers = #tpu.dot_dimension_numbers<[1], [0], [0], [1], [0, 0, 1, 1], [], []>} : vector<6x64xf32>, vector<64x576xf32>, vector<6x576xf32> -> vector<6x576xf32>
    %589 = vector.broadcast %406 : vector<1x576xf32> to vector<6x576xf32>
    %590 = arith.addf %588, %589 : vector<6x576xf32>
    %cst_238 = arith.constant 1.000000e-01 : f32
    %591 = vector.broadcast %cst_238 : f32 to vector<6x576xf32>
    %592 = arith.mulf %590, %591 : vector<6x576xf32>
    %593 = vector.extract_strided_slice %592 {offsets = [0, 0], sizes = [6, 64], strides = [1, 1]} : vector<6x576xf32> to vector<6x64xf32>
    %594 = vector.extract_strided_slice %592 {offsets = [0, 64], sizes = [6, 64], strides = [1, 1]} : vector<6x576xf32> to vector<6x64xf32>
    %595 = vector.extract_strided_slice %592 {offsets = [0, 128], sizes = [6, 64], strides = [1, 1]} : vector<6x576xf32> to vector<6x64xf32>
    %596 = vector.extract_strided_slice %592 {offsets = [0, 192], sizes = [6, 64], strides = [1, 1]} : vector<6x576xf32> to vector<6x64xf32>
    %597 = vector.extract_strided_slice %592 {offsets = [0, 256], sizes = [6, 64], strides = [1, 1]} : vector<6x576xf32> to vector<6x64xf32>
    %598 = vector.extract_strided_slice %592 {offsets = [0, 320], sizes = [6, 64], strides = [1, 1]} : vector<6x576xf32> to vector<6x64xf32>
    %599 = vector.extract_strided_slice %592 {offsets = [0, 384], sizes = [6, 64], strides = [1, 1]} : vector<6x576xf32> to vector<6x64xf32>
    %600 = vector.extract_strided_slice %592 {offsets = [0, 448], sizes = [6, 64], strides = [1, 1]} : vector<6x576xf32> to vector<6x64xf32>
    %601 = vector.extract_strided_slice %592 {offsets = [0, 512], sizes = [6, 64], strides = [1, 1]} : vector<6x576xf32> to vector<6x64xf32>
    %602 = arith.maximumf %593, %594 : vector<6x64xf32>
    %603 = arith.maximumf %602, %595 : vector<6x64xf32>
    %604 = arith.maximumf %603, %596 : vector<6x64xf32>
    %605 = arith.maximumf %604, %597 : vector<6x64xf32>
    %606 = arith.maximumf %605, %598 : vector<6x64xf32>
    %607 = arith.maximumf %606, %599 : vector<6x64xf32>
    %608 = arith.maximumf %607, %600 : vector<6x64xf32>
    %609 = arith.maximumf %608, %601 : vector<6x64xf32>
    %cst_239 = arith.constant 0.000000e+00 : f32
    %610 = vector.broadcast %cst_239 : f32 to vector<6x64xf32>
    %cst_240 = arith.constant 0.000000e+00 : f32
    %611 = vector.broadcast %cst_240 : f32 to vector<6x64xf32>
    %612 = arith.subf %593, %609 : vector<6x64xf32>
    %613 = math.exp %612 : vector<6x64xf32>
    %614 = arith.addf %610, %613 : vector<6x64xf32>
    %615 = vector.extract_strided_slice %404 {offsets = [0, 18], sizes = [6, 1], strides = [1, 1]} : vector<6x36xf32> to vector<6x1xf32>
    %616 = vector.broadcast %615 : vector<6x1xf32> to vector<6x64xf32>
    %617 = arith.mulf %613, %616 : vector<6x64xf32>
    %618 = arith.addf %611, %617 : vector<6x64xf32>
    %619 = arith.subf %594, %609 : vector<6x64xf32>
    %620 = math.exp %619 : vector<6x64xf32>
    %621 = arith.addf %614, %620 : vector<6x64xf32>
    %622 = vector.extract_strided_slice %404 {offsets = [0, 19], sizes = [6, 1], strides = [1, 1]} : vector<6x36xf32> to vector<6x1xf32>
    %623 = vector.broadcast %622 : vector<6x1xf32> to vector<6x64xf32>
    %624 = arith.mulf %620, %623 : vector<6x64xf32>
    %625 = arith.addf %618, %624 : vector<6x64xf32>
    %626 = arith.subf %595, %609 : vector<6x64xf32>
    %627 = math.exp %626 : vector<6x64xf32>
    %628 = arith.addf %621, %627 : vector<6x64xf32>
    %629 = vector.extract_strided_slice %404 {offsets = [0, 20], sizes = [6, 1], strides = [1, 1]} : vector<6x36xf32> to vector<6x1xf32>
    %630 = vector.broadcast %629 : vector<6x1xf32> to vector<6x64xf32>
    %631 = arith.mulf %627, %630 : vector<6x64xf32>
    %632 = arith.addf %625, %631 : vector<6x64xf32>
    %633 = arith.subf %596, %609 : vector<6x64xf32>
    %634 = math.exp %633 : vector<6x64xf32>
    %635 = arith.addf %628, %634 : vector<6x64xf32>
    %636 = vector.extract_strided_slice %404 {offsets = [0, 21], sizes = [6, 1], strides = [1, 1]} : vector<6x36xf32> to vector<6x1xf32>
    %637 = vector.broadcast %636 : vector<6x1xf32> to vector<6x64xf32>
    %638 = arith.mulf %634, %637 : vector<6x64xf32>
    %639 = arith.addf %632, %638 : vector<6x64xf32>
    %640 = arith.subf %597, %609 : vector<6x64xf32>
    %641 = math.exp %640 : vector<6x64xf32>
    %642 = arith.addf %635, %641 : vector<6x64xf32>
    %643 = vector.extract_strided_slice %404 {offsets = [0, 22], sizes = [6, 1], strides = [1, 1]} : vector<6x36xf32> to vector<6x1xf32>
    %644 = vector.broadcast %643 : vector<6x1xf32> to vector<6x64xf32>
    %645 = arith.mulf %641, %644 : vector<6x64xf32>
    %646 = arith.addf %639, %645 : vector<6x64xf32>
    %647 = arith.subf %598, %609 : vector<6x64xf32>
    %648 = math.exp %647 : vector<6x64xf32>
    %649 = arith.addf %642, %648 : vector<6x64xf32>
    %650 = vector.extract_strided_slice %404 {offsets = [0, 23], sizes = [6, 1], strides = [1, 1]} : vector<6x36xf32> to vector<6x1xf32>
    %651 = vector.broadcast %650 : vector<6x1xf32> to vector<6x64xf32>
    %652 = arith.mulf %648, %651 : vector<6x64xf32>
    %653 = arith.addf %646, %652 : vector<6x64xf32>
    %654 = arith.subf %599, %609 : vector<6x64xf32>
    %655 = math.exp %654 : vector<6x64xf32>
    %656 = arith.addf %649, %655 : vector<6x64xf32>
    %657 = vector.extract_strided_slice %404 {offsets = [0, 24], sizes = [6, 1], strides = [1, 1]} : vector<6x36xf32> to vector<6x1xf32>
    %658 = vector.broadcast %657 : vector<6x1xf32> to vector<6x64xf32>
    %659 = arith.mulf %655, %658 : vector<6x64xf32>
    %660 = arith.addf %653, %659 : vector<6x64xf32>
    %661 = arith.subf %600, %609 : vector<6x64xf32>
    %662 = math.exp %661 : vector<6x64xf32>
    %663 = arith.addf %656, %662 : vector<6x64xf32>
    %664 = vector.extract_strided_slice %404 {offsets = [0, 25], sizes = [6, 1], strides = [1, 1]} : vector<6x36xf32> to vector<6x1xf32>
    %665 = vector.broadcast %664 : vector<6x1xf32> to vector<6x64xf32>
    %666 = arith.mulf %662, %665 : vector<6x64xf32>
    %667 = arith.addf %660, %666 : vector<6x64xf32>
    %668 = arith.subf %601, %609 : vector<6x64xf32>
    %669 = math.exp %668 : vector<6x64xf32>
    %670 = arith.addf %663, %669 : vector<6x64xf32>
    %671 = vector.extract_strided_slice %404 {offsets = [0, 26], sizes = [6, 1], strides = [1, 1]} : vector<6x36xf32> to vector<6x1xf32>
    %672 = vector.broadcast %671 : vector<6x1xf32> to vector<6x64xf32>
    %673 = arith.mulf %669, %672 : vector<6x64xf32>
    %674 = arith.addf %667, %673 : vector<6x64xf32>
    %675 = arith.divf %674, %670 : vector<6x64xf32>
    %c0_241 = arith.constant 0 : index
    %c128 = arith.constant 128 : index
    %676 = vector.load %arg53[%c0_241, %c128] : memref<6x256xf32, #tpu.memory_space<vmem>>, vector<6x64xf32>
    tpu.vector_store %arg53[%c0_241, %c128], %675 {strides = array<i32>} : memref<6x256xf32, #tpu.memory_space<vmem>>, vector<6x64xf32>,
    %677 = vector.extract_strided_slice %390 {offsets = [0, 192], sizes = [6, 64], strides = [1, 1]} : vector<6x256xf32> to vector<6x64xf32>
    %cst_242 = arith.constant dense<0.000000e+00> : vector<6x576xf32>
    %678 = tpu.matmul %677, %405, %cst_242 {dimension_numbers = #tpu.dot_dimension_numbers<[1], [0], [0], [1], [0, 0, 1, 1], [], []>} : vector<6x64xf32>, vector<64x576xf32>, vector<6x576xf32> -> vector<6x576xf32>
    %679 = vector.broadcast %406 : vector<1x576xf32> to vector<6x576xf32>
    %680 = arith.addf %678, %679 : vector<6x576xf32>
    %cst_243 = arith.constant 1.000000e-01 : f32
    %681 = vector.broadcast %cst_243 : f32 to vector<6x576xf32>
    %682 = arith.mulf %680, %681 : vector<6x576xf32>
    %683 = vector.extract_strided_slice %682 {offsets = [0, 0], sizes = [6, 64], strides = [1, 1]} : vector<6x576xf32> to vector<6x64xf32>
    %684 = vector.extract_strided_slice %682 {offsets = [0, 64], sizes = [6, 64], strides = [1, 1]} : vector<6x576xf32> to vector<6x64xf32>
    %685 = vector.extract_strided_slice %682 {offsets = [0, 128], sizes = [6, 64], strides = [1, 1]} : vector<6x576xf32> to vector<6x64xf32>
    %686 = vector.extract_strided_slice %682 {offsets = [0, 192], sizes = [6, 64], strides = [1, 1]} : vector<6x576xf32> to vector<6x64xf32>
    %687 = vector.extract_strided_slice %682 {offsets = [0, 256], sizes = [6, 64], strides = [1, 1]} : vector<6x576xf32> to vector<6x64xf32>
    %688 = vector.extract_strided_slice %682 {offsets = [0, 320], sizes = [6, 64], strides = [1, 1]} : vector<6x576xf32> to vector<6x64xf32>
    %689 = vector.extract_strided_slice %682 {offsets = [0, 384], sizes = [6, 64], strides = [1, 1]} : vector<6x576xf32> to vector<6x64xf32>
    %690 = vector.extract_strided_slice %682 {offsets = [0, 448], sizes = [6, 64], strides = [1, 1]} : vector<6x576xf32> to vector<6x64xf32>
    %691 = vector.extract_strided_slice %682 {offsets = [0, 512], sizes = [6, 64], strides = [1, 1]} : vector<6x576xf32> to vector<6x64xf32>
    %692 = arith.maximumf %683, %684 : vector<6x64xf32>
    %693 = arith.maximumf %692, %685 : vector<6x64xf32>
    %694 = arith.maximumf %693, %686 : vector<6x64xf32>
    %695 = arith.maximumf %694, %687 : vector<6x64xf32>
    %696 = arith.maximumf %695, %688 : vector<6x64xf32>
    %697 = arith.maximumf %696, %689 : vector<6x64xf32>
    %698 = arith.maximumf %697, %690 : vector<6x64xf32>
    %699 = arith.maximumf %698, %691 : vector<6x64xf32>
    %cst_244 = arith.constant 0.000000e+00 : f32
    %700 = vector.broadcast %cst_244 : f32 to vector<6x64xf32>
    %cst_245 = arith.constant 0.000000e+00 : f32
    %701 = vector.broadcast %cst_245 : f32 to vector<6x64xf32>
    %702 = arith.subf %683, %699 : vector<6x64xf32>
    %703 = math.exp %702 : vector<6x64xf32>
    %704 = arith.addf %700, %703 : vector<6x64xf32>
    %705 = vector.extract_strided_slice %404 {offsets = [0, 27], sizes = [6, 1], strides = [1, 1]} : vector<6x36xf32> to vector<6x1xf32>
    %706 = vector.broadcast %705 : vector<6x1xf32> to vector<6x64xf32>
    %707 = arith.mulf %703, %706 : vector<6x64xf32>
    %708 = arith.addf %701, %707 : vector<6x64xf32>
    %709 = arith.subf %684, %699 : vector<6x64xf32>
    %710 = math.exp %709 : vector<6x64xf32>
    %711 = arith.addf %704, %710 : vector<6x64xf32>
    %712 = vector.extract_strided_slice %404 {offsets = [0, 28], sizes = [6, 1], strides = [1, 1]} : vector<6x36xf32> to vector<6x1xf32>
    %713 = vector.broadcast %712 : vector<6x1xf32> to vector<6x64xf32>
    %714 = arith.mulf %710, %713 : vector<6x64xf32>
    %715 = arith.addf %708, %714 : vector<6x64xf32>
    %716 = arith.subf %685, %699 : vector<6x64xf32>
    %717 = math.exp %716 : vector<6x64xf32>
    %718 = arith.addf %711, %717 : vector<6x64xf32>
    %719 = vector.extract_strided_slice %404 {offsets = [0, 29], sizes = [6, 1], strides = [1, 1]} : vector<6x36xf32> to vector<6x1xf32>
    %720 = vector.broadcast %719 : vector<6x1xf32> to vector<6x64xf32>
    %721 = arith.mulf %717, %720 : vector<6x64xf32>
    %722 = arith.addf %715, %721 : vector<6x64xf32>
    %723 = arith.subf %686, %699 : vector<6x64xf32>
    %724 = math.exp %723 : vector<6x64xf32>
    %725 = arith.addf %718, %724 : vector<6x64xf32>
    %726 = vector.extract_strided_slice %404 {offsets = [0, 30], sizes = [6, 1], strides = [1, 1]} : vector<6x36xf32> to vector<6x1xf32>
    %727 = vector.broadcast %726 : vector<6x1xf32> to vector<6x64xf32>
    %728 = arith.mulf %724, %727 : vector<6x64xf32>
    %729 = arith.addf %722, %728 : vector<6x64xf32>
    %730 = arith.subf %687, %699 : vector<6x64xf32>
    %731 = math.exp %730 : vector<6x64xf32>
    %732 = arith.addf %725, %731 : vector<6x64xf32>
    %733 = vector.extract_strided_slice %404 {offsets = [0, 31], sizes = [6, 1], strides = [1, 1]} : vector<6x36xf32> to vector<6x1xf32>
    %734 = vector.broadcast %733 : vector<6x1xf32> to vector<6x64xf32>
    %735 = arith.mulf %731, %734 : vector<6x64xf32>
    %736 = arith.addf %729, %735 : vector<6x64xf32>
    %737 = arith.subf %688, %699 : vector<6x64xf32>
    %738 = math.exp %737 : vector<6x64xf32>
    %739 = arith.addf %732, %738 : vector<6x64xf32>
    %740 = vector.extract_strided_slice %404 {offsets = [0, 32], sizes = [6, 1], strides = [1, 1]} : vector<6x36xf32> to vector<6x1xf32>
    %741 = vector.broadcast %740 : vector<6x1xf32> to vector<6x64xf32>
    %742 = arith.mulf %738, %741 : vector<6x64xf32>
    %743 = arith.addf %736, %742 : vector<6x64xf32>
    %744 = arith.subf %689, %699 : vector<6x64xf32>
    %745 = math.exp %744 : vector<6x64xf32>
    %746 = arith.addf %739, %745 : vector<6x64xf32>
    %747 = vector.extract_strided_slice %404 {offsets = [0, 33], sizes = [6, 1], strides = [1, 1]} : vector<6x36xf32> to vector<6x1xf32>
    %748 = vector.broadcast %747 : vector<6x1xf32> to vector<6x64xf32>
    %749 = arith.mulf %745, %748 : vector<6x64xf32>
    %750 = arith.addf %743, %749 : vector<6x64xf32>
    %751 = arith.subf %690, %699 : vector<6x64xf32>
    %752 = math.exp %751 : vector<6x64xf32>
    %753 = arith.addf %746, %752 : vector<6x64xf32>
    %754 = vector.extract_strided_slice %404 {offsets = [0, 34], sizes = [6, 1], strides = [1, 1]} : vector<6x36xf32> to vector<6x1xf32>
    %755 = vector.broadcast %754 : vector<6x1xf32> to vector<6x64xf32>
    %756 = arith.mulf %752, %755 : vector<6x64xf32>
    %757 = arith.addf %750, %756 : vector<6x64xf32>
    %758 = arith.subf %691, %699 : vector<6x64xf32>
    %759 = math.exp %758 : vector<6x64xf32>
    %760 = arith.addf %753, %759 : vector<6x64xf32>
    %761 = vector.extract_strided_slice %404 {offsets = [0, 35], sizes = [6, 1], strides = [1, 1]} : vector<6x36xf32> to vector<6x1xf32>
    %762 = vector.broadcast %761 : vector<6x1xf32> to vector<6x64xf32>
    %763 = arith.mulf %759, %762 : vector<6x64xf32>
    %764 = arith.addf %757, %763 : vector<6x64xf32>
    %765 = arith.divf %764, %760 : vector<6x64xf32>
    %c0_246 = arith.constant 0 : index
    %c192 = arith.constant 192 : index
    %766 = vector.load %arg53[%c0_246, %c192] : memref<6x256xf32, #tpu.memory_space<vmem>>, vector<6x64xf32>
    tpu.vector_store %arg53[%c0_246, %c192], %765 {strides = array<i32>} : memref<6x256xf32, #tpu.memory_space<vmem>>, vector<6x64xf32>,
    return
  }
}

</mosaic_0001>

<bundles_post_ra>
// kernel: mvt_forward.1
= control target key start
LH: loop header
LB: loop body
LE: loop exit
PB: predicated region body
PF: predicated region fallthrough
CT: control target
= control target key end

     0   :  { %s8393_s6 = smov 1   ;;  %s8394_s10 = smov 2   ;;  %s10695_s0 = inlined_call_operand.smem [shape: u32[54], index: -1, kind: input, shape index: {}] }
   0x1   :  { %s8509_s5 = sld [smem:[%s10695_s0]]   ;;  %s8395_s14 = smov 3  }
   0x2   :  { %s8514_s9 = sld [smem:[%s10695_s0 + %s8393_s6]]   ;;  %s8396_s18 = smov 4  }
   0x3   :  { %s8519_s13 = sld [smem:[%s10695_s0 + %s8394_s10]]   ;;  %s8397_s22 = smov 5  }
   0x4   :  { %s8524_s17 = sld [smem:[%s10695_s0 + %s8395_s14]]   ;;  %s8398_s26 = smov 6  }
   0x5   :  { %s8529_s21 = sld [smem:[%s10695_s0 + %s8396_s18]]   ;;  %s8399_s30 = smov 7  }
   0x6   :  { %s8534_s25 = sld [smem:[%s10695_s0 + %s8397_s22]]   ;;  %s8400_s4 = smov 8  }
   0x7   :  { %s8539_s29 = sld [smem:[%s10695_s0 + %s8398_s26]]   ;;  %s8401_s10 = smov 9  }
   0x8   :  { %10720 = sst [smem:[#allocation25_spill]] %s8514_s9  ;;  %s8402_s15 = smov 10  }
   0x9   :  { %s8544_s3 = sld [smem:[%s10695_s0 + %s8399_s30]]   ;;  %s8403_s20 = smov 11  }
   0xa   :  { %s8549_s8 = sld [smem:[%s10695_s0 + %s8400_s4]]   ;;  %s8404_s26 = smov 12  }
   0xb   :  { %10721 = sst [smem:[#allocation26_spill]] %s8529_s21  ;;  %s8405_s1 = smov 13  }
   0xc   :  { %10722 = sst [smem:[#allocation27_spill]] %s8534_s25  ;;  %s8406_s7 = smov 14  }
   0xd   :  { %10723 = sst [smem:[#allocation28_spill]] %s8539_s29  ;;  %s8408_s22 = smov 16  }
   0xe   :  { %s8554_s14 = sld [smem:[%s10695_s0 + %s8401_s10]]   ;;  %s8409_s28 = smov 17  }
   0xf   :  { %10724 = sst [smem:[#allocation29_spill]] %s8544_s3 }
  0x10   :  { %10725 = sst [smem:[#allocation30_spill]] %s8549_s8 }
  0x11   :  { %s8559_s19 = sld [smem:[%s10695_s0 + %s8402_s15]]   ;;  %s8407_s15 = smov 15  }
  0x12   :  { %s8564_s24 = sld [smem:[%s10695_s0 + %s8403_s20]]  }
  0x13   :  { %s8569_s30 = sld [smem:[%s10695_s0 + %s8404_s26]]  }
  0x14   :  { %10726 = sst [smem:[#allocation31_spill]] %s8554_s14 }
  0x15   :  { %s8574_s6 = sld [smem:[%s10695_s0 + %s8405_s1]]  }
  0x16   :  { %s8579_s12 = sld [smem:[%s10695_s0 + %s8406_s7]]   ;;  %s8410_s7 = smov 18  }
  0x17   :  { %10727 = sst [smem:[#allocation32_spill]] %s8559_s19 }
  0x18   :  { %10728 = sst [smem:[#allocation33_spill]] %s8564_s24 }
  0x19   :  { %10729 = sst [smem:[#allocation34_spill]] %s8569_s30 }
  0x1a   :  { %s8584_s20 = sld [smem:[%s10695_s0 + %s8407_s15]]   ;;  %s8411_s15 = smov 19  }
  0x1b   :  { %10730 = sst [smem:[#allocation35_spill]] %s8574_s6 }
  0x1c   :  { %10731 = sst [smem:[#allocation36_spill]] %s8579_s12 }
  0x1d   :  { %s8589_s27 = sld [smem:[%s10695_s0 + %s8408_s22]]   ;;  %s8412_s22 = smov 20  }
  0x1e   :  { %s8594_s4 = sld [smem:[%s10695_s0 + %s8409_s28]]   ;;  %s8413_s28 = smov 21  }
  0x1f   :  { %s8599_s25 = sld [smem:[%s10695_s0 + %s8410_s7]]   ;;  %s8414_s7 = smov 22  }
  0x20   :  { %10732 = sst [smem:[#allocation37_spill]] %s8584_s20 }
  0x21   :  { %s8604_s20 = sld [smem:[%s10695_s0 + %s8411_s15]]   ;;  %s8415_s15 = smov 23  }
  0x23   :  { %10733 = sst [smem:[#allocation38_spill]] %s8589_s27 }
  0x24   :  { %10734 = sst [smem:[#allocation39_spill]] %s8594_s4 }
  0x25   :  { %10735 = sst [smem:[#allocation40_spill]] %s8599_s25 }
  0x26   :  { %s8609_s27 = sld [smem:[%s10695_s0 + %s8412_s22]]   ;;  %s8416_s22 = smov 24  }
  0x27   :  { %10736 = sst [smem:[#allocation41_spill]] %s8604_s20 }
  0x28   :  { %s8614_s4 = sld [smem:[%s10695_s0 + %s8413_s28]]   ;;  %s8417_s28 = smov 25  }
  0x29   :  { %s8619_s25 = sld [smem:[%s10695_s0 + %s8414_s7]]   ;;  %s8418_s7 = smov 26  }
  0x2a   :  { %s8624_s20 = sld [smem:[%s10695_s0 + %s8415_s15]]   ;;  %s8419_s15 = smov 27  }
  0x2c   :  { %10737 = sst [smem:[#allocation42_spill]] %s8609_s27 }
  0x2d   :  { %s8629_s27 = sld [smem:[%s10695_s0 + %s8416_s22]]   ;;  %s8420_s22 = smov 28  }
  0x2e   :  { %10738 = sst [smem:[#allocation43_spill]] %s8614_s4 }
  0x2f   :  { %10739 = sst [smem:[#allocation44_spill]] %s8619_s25 }
  0x30   :  { %10740 = sst [smem:[#allocation45_spill]] %s8624_s20 }
  0x31   :  { %s8634_s4 = sld [smem:[%s10695_s0 + %s8417_s28]]   ;;  %s8421_s28 = smov 29  }
  0x32   :  { %s8639_s25 = sld [smem:[%s10695_s0 + %s8418_s7]]   ;;  %s8422_s7 = smov 30  }
  0x33   :  { %s8644_s20 = sld [smem:[%s10695_s0 + %s8419_s15]]   ;;  %s8423_s15 = smov 31  }
  0x34   :  { %s8649_s6 = sld [smem:[%s10695_s0 + %s8420_s22]]   ;;  %s8424_s22 = smov 32  }
  0x35   :  { %s8659_s30 = sld [smem:[%s10695_s0 + %s8422_s7]]   ;;  %s8426_s7 = smov 34  }
  0x36   :  { %s8669_s21 = sld [smem:[%s10695_s0 + %s8424_s22]]   ;;  %s8428_s22 = smov 36  }
  0x37   :  { %10741 = sst [smem:[#allocation46_spill]] %s8634_s4 }
  0x38   :  { %s8654_s4 = sld [smem:[%s10695_s0 + %s8421_s28]]   ;;  %s8425_s28 = smov 33  }
  0x39   :  { %10742 = sst [smem:[#allocation47_spill]] %s8644_s20 }
  0x3a   :  { %s8664_s20 = sld [smem:[%s10695_s0 + %s8423_s15]]   ;;  %s8427_s15 = smov 35  }
  0x3b   :  { %10743 = sst [smem:[#allocation48_spill]] %s8659_s30 }
  0x3c   :  { %s8674_s24 = sld [smem:[%s10695_s0 + %s8425_s28]]   ;;  %s8429_s28 = smov 37  }
  0x3d   :  { %s8679_s30 = sld [smem:[%s10695_s0 + %s8426_s7]]   ;;  %s8430_s7 = smov 38  }
  0x3e   :  { %s8689_s19 = sld [smem:[%s10695_s0 + %s8428_s22]]   ;;  %s8432_s22 = smov 40  }
  0x3f   :  { %s8694_s12 = sld [smem:[%s10695_s0 + %s8429_s28]]   ;;  %s8433_s28 = smov 41  }
  0x40   :  { %10744 = sst [smem:[#allocation49_spill]] %s8664_s20 }
  0x41   :  { %s8684_s20 = sld [smem:[%s10695_s0 + %s8427_s15]]   ;;  %s8431_s15 = smov 39  }
  0x42   :  { %s8699_s14 = sld [smem:[%s10695_s0 + %s8430_s7]]   ;;  %s8434_s7 = smov 42  }
  0x43   :  { %s8709_s9 = sld [smem:[%s10695_s0 + %s8432_s22]]   ;;  %s8436_s22 = smov 44  }
  0x44   :  { %s8719_s8 = sld [smem:[%s10695_s0 + %s8434_s7]]   ;;  %s8438_s7 = smov 46  }
  0x45   :  { %10746 = sst [smem:[#allocation51_spill]] %s8694_s12 }
  0x46   :  { %s8714_s12 = sld [smem:[%s10695_s0 + %s8433_s28]]   ;;  %s8437_s28 = smov 45  }
  0x47   :  { %10745 = sst [smem:[#allocation50_spill]] %s8684_s20 }
  0x48   :  { %s8704_s20 = sld [smem:[%s10695_s0 + %s8431_s15]]   ;;  %s8435_s15 = smov 43  }
  0x49   :  { %10748 = sst [smem:[#allocation53_spill]] %s8709_s9 }
  0x4a   :  { %10749 = sst [smem:[#allocation54_spill]] %s8719_s8 }
  0x4b   :  { %s8729_s9 = sld [smem:[%s10695_s0 + %s8436_s22]]   ;;  %s8440_s22 = smov 48  }
  0x4c   :  { %s8734_s29 = sld [smem:[%s10695_s0 + %s8437_s28]]   ;;  %s8441_s28 = smov 49  }
  0x4d   :  { %s8739_s8 = sld [smem:[%s10695_s0 + %s8438_s7]]   ;;  %s8442_s7 = smov 50  }
  0x4e   :  { %10747 = sst [smem:[#allocation52_spill]] %s8704_s20 }
  0x4f   :  { %s8724_s20 = sld [smem:[%s10695_s0 + %s8435_s15]]   ;;  %s8439_s15 = smov 47  }
  0x51   :  { %10751 = sst [smem:[#allocation56_spill]] %s8729_s9 }
  0x52   :  { %10752 = sst [smem:[#allocation57_spill]] %s8734_s29 }
  0x53   :  { %10753 = sst [smem:[#allocation58_spill]] %s8739_s8 }
  0x54   :  { %s8749_s9 = sld [smem:[%s10695_s0 + %s8440_s22]]   ;;  %s8444_s22 = smov 52  }
  0x55   :  { %10750 = sst [smem:[#allocation55_spill]] %s8724_s20 }
  0x56   :  { %s8744_s20 = sld [smem:[%s10695_s0 + %s8439_s15]]   ;;  %s8443_s15 = smov 51  }
  0x57   :  { %s8754_s29 = sld [smem:[%s10695_s0 + %s8441_s28]]   ;;  %s8445_s28 = smov 53  }
  0x58   :  { %s8759_s8 = sld [smem:[%s10695_s0 + %s8442_s7]]  }
  0x59   :  { %s8769_s3 = sld [smem:[%s10695_s0 + %s8444_s22]]  }
  0x5c   :  { %10754 = sst [smem:[#allocation59_spill]] %s8744_s20 }
  0x5d   :  { %10755 = sst [smem:[#allocation60_spill]] %s8754_s29 }
  0x5e   :  { %s8764_s20 = sld [smem:[%s10695_s0 + %s8443_s15]]  }
  0x5f   :  { %s8774_s29 = sld [smem:[%s10695_s0 + %s8445_s28]]  }
  0x60   :  { %113 = vsyncpa [#allocation3], 0 }
  0x61   :  { %114 = vsyncpa [#allocation5], 0 }
  0x62   :  { %115 = vsyncpa [#allocation8], 0 }
  0x63   :  { %116 = vsyncpa [#allocation11], 0 }
  0x64   :  { %117 = vsyncpa [#allocation14], 0 }
  0x65   :  { %118 = vsyncpa [#allocation17], 0  ;;  %s8446_s7 = smov [#allocation4]   ;;  %s8447_s11 = smov [#allocation7]  }
  0x66   :  { %s185_s10 = sshll.u32 %s8446_s7, 4  ;;  %s207_s15 = sshll.u32 %s8447_s11, 4  ;;  %s186_s10 = int_to_ptr.vmem [resolvable:$true] %s185_s10  ;;  %s208_s15 = int_to_ptr.vmem [resolvable:$true] %s207_s15 }
  0x67   :  { %s8169_s16 = scalar_lea.vmem %s186_s10, 16  ;;  %s8173_s18 = scalar_lea.vmem %s186_s10, 32 }
  0x68   :  { %p8170_p0 = scmp.ne.s32.totalorder %s186_s10, %s8169_s16  ;;  %p8174_p1 = scmp.lt.s32.totalorder %s186_s10, %s186_s10 }
  0x69   :  { %p8175_p2 = scmp.lt.s32.totalorder %s8173_s18, %s8169_s16 }
  0x6b   :  { %p8176_p3 = por %p8175_p2, %p8174_p1 }
  0x6d   :  { %p8177_p4 = pnand %p8176_p3, %p8170_p0 }
  0x6f   :  { %8180 = shalt.err (!%p8177_p4)
}
  0x70   :  { %188 = dma.hbm_to_vmem [thread:$0]  %s8639_s25, 16, %s186_s10, [#allocation5]  }
  0x71   :  { %s8189_s0 = scalar_lea.vmem %s208_s15, 16  ;;  %s8193_s22 = scalar_lea.vmem %s208_s15, 32 }
  0x72   :  { %p8190_p5 = scmp.ne.s32.totalorder %s208_s15, %s8189_s0  ;;  %p8194_p6 = scmp.lt.s32.totalorder %s208_s15, %s208_s15 }
  0x73   :  { %p8195_p7 = scmp.lt.s32.totalorder %s8193_s22, %s8189_s0 }
  0x75   :  { %p8196_p8 = por %p8195_p7, %p8194_p6 }
  0x77   :  { %p8197_p9 = pnand %p8196_p8, %p8190_p5 }
  0x79   :  { %8200 = shalt.err (!%p8197_p9)
}
  0x7a   :  { %210 = dma.hbm_to_vmem [thread:$0]  %s8654_s4, 16, %s208_s15, [#allocation8]  }
  0x7b   :  { %s8448_s23 = smov [#allocation10]   ;;  %s8449_s28 = smov [#allocation13]  }
  0x7c   :  { %s231_s26 = sshll.u32 %s8448_s23, 4  ;;  %s253_s1 = sshll.u32 %s8449_s28, 4  ;;  %s232_s26 = int_to_ptr.vmem [resolvable:$true] %s231_s26  ;;  %s254_s1 = int_to_ptr.vmem [resolvable:$true] %s253_s1 }
  0x7d   :  { %s8209_s2 = scalar_lea.vmem %s232_s26, 16  ;;  %s8213_s7 = scalar_lea.vmem %s232_s26, 32 }
  0x7e   :  { %p8210_p10 = scmp.ne.s32.totalorder %s232_s26, %s8209_s2  ;;  %p8214_p11 = scmp.lt.s32.totalorder %s232_s26, %s232_s26 }
  0x7f   :  { %p8215_p12 = scmp.lt.s32.totalorder %s8213_s7, %s8209_s2 }
  0x81   :  { %p8216_p13 = por %p8215_p12, %p8214_p11 }
  0x83   :  { %p8217_p0 = pnand %p8216_p13, %p8210_p10 }
  0x85   :  { %8220 = shalt.err (!%p8217_p0)
}
  0x86   :  { %234 = dma.hbm_to_vmem [thread:$0]  %s8674_s24, 16, %s232_s26, [#allocation11]  }
  0x87   :  { %s8229_s25 = scalar_lea.vmem %s254_s1, 16  ;;  %s8233_s10 = scalar_lea.vmem %s254_s1, 32 }
  0x88   :  { %p8230_p1 = scmp.ne.s32.totalorder %s254_s1, %s8229_s25  ;;  %p8234_p2 = scmp.lt.s32.totalorder %s254_s1, %s254_s1 }
  0x89   :  { %p8235_p3 = scmp.lt.s32.totalorder %s8233_s10, %s8229_s25 }
  0x8b   :  { %p8236_p4 = por %p8235_p3, %p8234_p2 }
  0x8d   :  { %p8237_p5 = pnand %p8236_p4, %p8230_p1 }
  0x8f   :  { %8240 = shalt.err (!%p8237_p5)
}
  0x90   :  { %256 = dma.hbm_to_vmem [thread:$0]  %s8689_s19, 16, %s254_s1, [#allocation14]  }
  0x91   :  { %s8450_s4 = smov [#allocation16]   ;;  %s8451_s15 = smov [#allocation2]  }
  0x92   :  { %s279_s11 = sshll.u32 %s8450_s4, 4  ;;  %s173_s16 = sshll.u32 %s8451_s15, 4  ;;  %s280_s11 = int_to_ptr.vmem [resolvable:$true] %s279_s11  ;;  %s174_s16 = int_to_ptr.vmem [resolvable:$true] %s173_s16 }
  0x93   :  { %s8249_s18 = scalar_lea.vmem %s280_s11, 16  ;;  %s8253_s0 = scalar_lea.vmem %s280_s11, 32 }
  0x94   :  { %p8250_p6 = scmp.ne.s32.totalorder %s280_s11, %s8249_s18  ;;  %p8254_p7 = scmp.lt.s32.totalorder %s280_s11, %s280_s11 }
  0x95   :  { %p8255_p8 = scmp.lt.s32.totalorder %s8253_s0, %s8249_s18 }
  0x97   :  { %p8256_p9 = por %p8255_p8, %p8254_p7 }
  0x99   :  { %p8257_p10 = pnand %p8256_p9, %p8250_p6 }
  0x9b   :  { %8260 = shalt.err (!%p8257_p10)
}
  0x9c   :  { %282 = dma.hbm_to_vmem [thread:$0]  %s8714_s12, 16, %s280_s11, [#allocation17]  }
  0x9d   :  { %s8269_s24 = scalar_lea.vmem %s174_s16, 16  ;;  %s8273_s22 = scalar_lea.vmem %s174_s16, 32 }
  0x9e   :  { %p8270_p11 = scmp.ne.s32.totalorder %s174_s16, %s8269_s24  ;;  %p8274_p12 = scmp.lt.s32.totalorder %s174_s16, %s174_s16 }
  0x9f   :  { %p8275_p13 = scmp.lt.s32.totalorder %s8273_s22, %s8269_s24 }
  0xa1   :  { %p8276_p0 = por %p8275_p13, %p8274_p12 }
  0xa3   :  { %p8277_p1 = pnand %p8276_p0, %p8270_p11 }
  0xa5   :  { %8280 = shalt.err (!%p8277_p1)
}
  0xa6   :  { %176 = dma.hbm_to_vmem [thread:$0]  %s8629_s27, 16, %s174_s16, [#allocation3]  }
  0xa7   :  { %s8452_s19 = smov [#allocation6]   ;;  %s8453_s26 = smov [#allocation9]  }
  0xa8   :  { %s197_s23 = sshll.u32 %s8452_s19, 4  ;;  %s221_s28 = sshll.u32 %s8453_s26, 4  ;;  %s198_s23 = int_to_ptr.vmem [resolvable:$true] %s197_s23  ;;  %s222_s28 = int_to_ptr.vmem [resolvable:$true] %s221_s28 }
  0xa9   :  { %s8289_s1 = scalar_lea.vmem %s198_s23, 16  ;;  %s8293_s2 = scalar_lea.vmem %s198_s23, 32 }
  0xaa   :  { %p8290_p2 = scmp.ne.s32.totalorder %s198_s23, %s8289_s1  ;;  %p8294_p3 = scmp.lt.s32.totalorder %s198_s23, %s198_s23 }
  0xab   :  { %p8295_p4 = scmp.lt.s32.totalorder %s8293_s2, %s8289_s1 }
  0xad   :  { %p8296_p5 = por %p8295_p4, %p8294_p3 }
  0xaf   :  { %p8297_p6 = pnand %p8296_p5, %p8290_p2 }
  0xb1   :  { %8300 = shalt.err (!%p8297_p6)
}
  0xb2   :  { %200 = dma.hbm_to_vmem [thread:$0]  %s8649_s6, 16, %s198_s23, [#allocation5]  }
  0xb3   :  { %s8309_s12 = scalar_lea.vmem %s222_s28, 16  ;;  %s8313_s7 = scalar_lea.vmem %s222_s28, 32 }
  0xb4   :  { %p8310_p7 = scmp.ne.s32.totalorder %s222_s28, %s8309_s12  ;;  %p8314_p8 = scmp.lt.s32.totalorder %s222_s28, %s222_s28 }
  0xb5   :  { %p8315_p9 = scmp.lt.s32.totalorder %s8313_s7, %s8309_s12 }
  0xb7   :  { %p8316_p10 = por %p8315_p9, %p8314_p8 }
  0xb9   :  { %p8317_p11 = pnand %p8316_p10, %p8310_p7 }
  0xbb   :  { %8320 = shalt.err (!%p8317_p11)
}
  0xbc   :  { %224 = dma.hbm_to_vmem [thread:$0]  %s8669_s21, 16, %s222_s28, [#allocation8]  }
  0xbd   :  { %s8454_s27 = smov [#allocation12]   ;;  %s8455_s10 = smov [#allocation15]  }
  0xbe   :  { %s241_s25 = sshll.u32 %s8454_s27, 4  ;;  %s265_s4 = sshll.u32 %s8455_s10, 4  ;;  %s242_s25 = int_to_ptr.vmem [resolvable:$true] %s241_s25  ;;  %s266_s4 = int_to_ptr.vmem [resolvable:$true] %s265_s4 }
  0xbf   :  { %s8329_s11 = scalar_lea.vmem %s242_s25, 16  ;;  %s8333_s15 = scalar_lea.vmem %s242_s25, 32 }
  0xc0   :  { %p8330_p12 = scmp.ne.s32.totalorder %s242_s25, %s8329_s11  ;;  %p8334_p13 = scmp.lt.s32.totalorder %s242_s25, %s242_s25 }
  0xc1   :  { %p8335_p0 = scmp.lt.s32.totalorder %s8333_s15, %s8329_s11 }
  0xc3   :  { %p8336_p1 = por %p8335_p0, %p8334_p13 }
  0xc5   :  { %p8337_p2 = pnand %p8336_p1, %p8330_p12 }
  0xc7   :  { %8340 = shalt.err (!%p8337_p2)
}
  0xc8   :  { %244 = dma.hbm_to_vmem [thread:$0]  %s8679_s30, 16, %s242_s25, [#allocation11]  }
  0xc9   :  { %s8349_s6 = scalar_lea.vmem %s266_s4, 16  ;;  %s8353_s16 = scalar_lea.vmem %s266_s4, 32 }
  0xca   :  { %p8350_p3 = scmp.ne.s32.totalorder %s266_s4, %s8349_s6  ;;  %p8354_p4 = scmp.lt.s32.totalorder %s266_s4, %s266_s4 }
  0xcb   :  { %p8355_p5 = scmp.lt.s32.totalorder %s8353_s16, %s8349_s6 }
  0xcd   :  { %p8356_p6 = por %p8355_p5, %p8354_p4 }
  0xcf   :  { %p8357_p7 = pnand %p8356_p6, %p8350_p3 }
  0xd1   :  { %8360 = shalt.err (!%p8357_p7)
}
  0xd2   :  { %268 = dma.hbm_to_vmem [thread:$0]  %s8699_s14, 16, %s266_s4, [#allocation14]  }
  0xd3   :  { %s8456_s21 = smov [#allocation18]  }
  0xd4   :  { %s301_s18 = sshll.u32 %s8456_s21, 4  ;;  %s302_s18 = int_to_ptr.vmem [resolvable:$true] %s301_s18 }
  0xd5   :  { %s8369_s0 = scalar_lea.vmem %s302_s18, 16  ;;  %s8373_s24 = scalar_lea.vmem %s302_s18, 32 }
  0xd6   :  { %p8370_p8 = scmp.ne.s32.totalorder %s302_s18, %s8369_s0  ;;  %p8374_p9 = scmp.lt.s32.totalorder %s302_s18, %s302_s18 }
  0xd7   :  { %p8375_p10 = scmp.lt.s32.totalorder %s8373_s24, %s8369_s0 }
  0xd9   :  { %p8376_p11 = por %p8375_p10, %p8374_p9 }
  0xdb   :  { %p8377_p12 = pnand %p8376_p11, %p8370_p8 }
  0xdd   :  { %8380 = shalt.err (!%p8377_p12)
}
  0xde   :  { %304 = dma.hbm_to_vmem [thread:$0]  %s8749_s9, 16, %s302_s18, [#allocation17]  }
  0xdf   :  { %8381 = dma.done.wait [#allocation3], 16  }
  0xe0   :  { %8382 = vsyncadd [#allocation3], 4294967280 }
  0xe1   :  { %8383 = dma.done.wait [#allocation5], 32  }
  0xe2   :  { %8384 = vsyncadd [#allocation5], 4294967264 }
  0xe3   :  { %8385 = dma.done.wait [#allocation8], 32  }
  0xe4   :  { %8386 = vsyncadd [#allocation8], 4294967264 }
  0xe5   :  { %8387 = dma.done.wait [#allocation11], 32  }
  0xe6   :  { %8388 = vsyncadd [#allocation11], 4294967264 }
  0xe7   :  { %8389 = dma.done.wait [#allocation14], 32  }
  0xe8   :  { %8390 = vsyncadd [#allocation14], 4294967264 }
  0xe9   :  { %8391 = dma.done.wait [#allocation17], 32  }
  0xea   :  { %8392 = vsyncadd [#allocation17], 4294967264  ;;  %v8457_v0 = vmov 0.0   ;;  %v367_v1 = vld [vmem:[%s8519_s13 + $0x78] sm:$0xff]  ;;  %v366_v2 = vld [vmem:[%s8519_s13 + $0x70] sm:$0xff]  ;;  %vm383_vm0 = vcmask 523264  }
  0xeb   :  { %393 = vmatprep.subr.mxu0 %v8457_v0  ;;  %7264 = vmatprep.subr.mxu1 %v8457_v0  ;;  %v365_v3 = vld [vmem:[%s8519_s13 + $0x68] sm:$0xff]  ;;  %v364_v4 = vld [vmem:[%s8519_s13 + $0x60] sm:$0xff]  ;;  %v363_v5 = vld [vmem:[%s8519_s13 + $0x58] sm:$0xff]  ;;  %vm8458_vm1 = vmmov 0   ;;  %s10756_s9 = sld [smem:[#allocation29_spill]]  ;;  %vm476_vm2 = vcmask 195584  }
  0xec   :  { %394 = vmatpush1.msra.mxu0 %v367_v1  ;;  %v362_v6 = vld [vmem:[%s8519_s13 + $0x50] sm:$0xff]  ;;  %v347_v7 = vld [vmem:[%s8509_s5 + $0x8] sm:$0xff]  ;;  %v360_v9 = vld [vmem:[%s8519_s13 + $0x40] sm:$0xff]  ;;  %7270 = vmatprep.mubr.msk.f32.mxu1 %vm8458_vm1, %v8457_v0  ;;  %vm566_vm3 = vcmask 130048   ;;  %vm888_vm4 = vcmask 1043456   ;;  %vm884_vm5 = vcmask 31744  }
  0xed   :  { %395 = vmatprep.subr.mxu0 %v8457_v0  ;;  %6848 = vmatprep.mubr.msk.f32.mxu0 %vm383_vm0, %v347_v7  ;;  %v361_v8 = vld [vmem:[%s8519_s13 + $0x48] sm:$0xff]  ;;  %v359_v10 = vld [vmem:[%s8519_s13 + $0x38] sm:$0xff]  ;;  %v358_v11 = vld [vmem:[%s8519_s13 + $0x30] sm:$0xff]  ;;  %s10760_s14 = sld [smem:[#allocation31_spill]]  ;;  %vm1147_vm7 = vcmask 1041408   ;;  %vm1137_vm8 = vcmask 15360  }
  0xee   :  { %396 = vmatpush1.msra.mxu0 %v366_v2  ;;  %v357_v12 = vld [vmem:[%s8519_s13 + $0x28] sm:$0xff]  ;;  %v356_v13 = vld [vmem:[%s8519_s13 + $0x20] sm:$0xff]  ;;  %v355_v14 = vld [vmem:[%s8519_s13 + $0x18] sm:$0xff]  ;;  %s10761_s30 = sld [smem:[#allocation36_spill]]  ;;  %vm1424_vm12 = vcmask 261120   ;;  %s8459_s25 = smov 96  }
  0xef   :  { %397 = vmatprep.subr.mxu0 %v8457_v0  ;;  %v354_v15 = vld [vmem:[%s8519_s13 + $0x10] sm:$0xff]  ;;  %v353_v16 = vld [vmem:[%s8519_s13 + $0x8] sm:$0xff]  ;;  %v352_v17 = vld [vmem:[%s8519_s13] sm:$0xff]  ;;  %s10762_s22 = sld [smem:[#allocation32_spill]]  ;;  %s8460_s4 = smov 64  }
  0xf0   :  { %398 = vmatpush1.msra.mxu0 %v365_v3  ;;  %v375_v18 = vld [vmem:[%s8519_s13 + $0xb8] sm:$0xff]  ;;  %v374_v19 = vld [vmem:[%s8519_s13 + $0xb0] sm:$0xff]  ;;  %v373_v20 = vld [vmem:[%s8519_s13 + $0xa8] sm:$0xff]  ;;  %s10763_s19 = sld [smem:[#allocation33_spill]]  ;;  %s8461_s11 = smov 80  }
  0xf1   :  { %399 = vmatprep.subr.mxu0 %v8457_v0  ;;  %v372_v21 = vld [vmem:[%s8519_s13 + $0xa0] sm:$0xff]  ;;  %v371_v22 = vld [vmem:[%s8519_s13 + $0x98] sm:$0xff]  ;;  %v370_v23 = vld [vmem:[%s8519_s13 + $0x90] sm:$0xff]  ;;  %s10764_s23 = sld [smem:[#allocation26_spill]]  ;;  %s8462_s6 = smov 112  }
  0xf2   :  { %400 = vmatpush1.msra.mxu0 %v364_v4  ;;  %v369_v24 = vld [vmem:[%s8519_s13 + $0x88] sm:$0xff]  ;;  %v368_v25 = vld [vmem:[%s8519_s13 + $0x80] sm:$0xff]  ;;  %v349_v27 = vld [vmem:[%s8509_s5 + $0x18] sm:$0xff]  ;;  %s10757_s13 = sld [smem:[#allocation28_spill]]  ;;  %s8463_s16 = smov 48  }
  0xf3   :  { %401 = vmatprep.subr.mxu0 %v8457_v0  ;;  %v346_v26 = vld [vmem:[%s8509_s5] sm:$0xff]  ;;  %v348_v28 = vld [vmem:[%s8509_s5 + $0x10] sm:$0xff]  ;;  %v351_v29 = vld [vmem:[%s8509_s5 + $0x28] sm:$0xff]  ;;  %s10765_s26 = sld [smem:[#allocation34_spill]] }
  0xf4   :  { %402 = vmatpush1.msra.mxu0 %v363_v5  ;;  %v350_v30 = vld [vmem:[%s8509_s5 + $0x20] sm:$0xff]  ;;  %v474_v44 = vld [vmem:[%s10756_s9 + $0x8] sm:$0xff]  ;;  %v475_v45 = vld [vmem:[%s10756_s9 + $0x10] sm:$0xff]  ;;  %s10758_s5 = sld [smem:[#allocation30_spill]] }
  0xf5   :  { %403 = vmatprep.subr.mxu0 %v8457_v0  ;;  %v6847_v35 = vld [vmem:[%s8524_s17] ss:$0 sm:$0xff]  ;;  %s10759_s17 = sld [smem:[#allocation25_spill]] }
  0xf6   :  { %404 = vmatpush1.msra.mxu0 %v362_v6  ;;  %v473_v41 = vld [vmem:[%s10756_s9] sm:$0xff]  ;;  %s10766_s28 = sld [smem:[#allocation35_spill]] }
  0xf7   :  { %405 = vmatprep.subr.mxu0 %v8457_v0  ;;  %s10767_s1 = sld [smem:[#allocation27_spill]] }
  0xf8   :  { %406 = vmatpush1.msra.mxu0 %v361_v8  ;;  %v8863_v42 = vld [vmem:[%s10757_s13 + $0x8] sm:$0xff]  ;;  %v8869_v43 = vld [vmem:[%s10757_s13] sm:$0xff]  ;;  %s10768_s2 = sld [smem:[#allocation37_spill]] }
  0xf9   :  { %407 = vmatprep.subr.mxu0 %v8457_v0  ;;  %s10769_s12 = sld [smem:[#allocation40_spill]] }
  0xfa   :  { %408 = vmatpush1.msra.mxu0 %v360_v9  ;;  %v876_v61 = vld [vmem:[%s10758_s5] sm:$0xf]  ;;  %s10770_s7 = sld [smem:[#allocation38_spill]] }
  0xfb   :  { %409 = vmatprep.subr.mxu0 %v8457_v0  ;;  %v875_v5 = vld [vmem:[%s10759_s17] sm:$0x3]  ;;  %s10771_s27 = sld [smem:[#allocation39_spill]] }
  0xfc   :  { %410 = vmatpush1.msra.mxu0 %v359_v10  ;;  %s10772_s10 = sld [smem:[#allocation47_spill]] }
  0xfd   :  { %411 = vmatprep.subr.mxu0 %v8457_v0  ;;  %s10773_s15 = sld [smem:[#allocation41_spill]] }
  0xfe   :  { %412 = vmatpush1.msra.mxu0 %v358_v11  ;;  %s10774_s21 = sld [smem:[#allocation42_spill]] }
  0xff   :  { %413 = vmatprep.subr.mxu0 %v8457_v0  ;;  %s10775_s18 = sld [smem:[#allocation45_spill]] }
 0x100   :  { %414 = vmatpush1.msra.mxu0 %v357_v12  ;;  %s10776_s0 = sld [smem:[#allocation43_spill]] }
 0x101   :  { %415 = vmatprep.subr.mxu0 %v8457_v0  ;;  %s10777_s24 = sld [smem:[#allocation44_spill]] }
 0x102   :  { %416 = vmatpush1.msra.mxu0 %v356_v13  ;;  %s10778_s9 = sld [smem:[#allocation46_spill]] }
 0x103   :  { %417 = vmatprep.subr.mxu0 %v8457_v0  ;;  %s10779_s13 = sld [smem:[#allocation48_spill]] }
 0x104   :  { %418 = vmatpush1.msra.mxu0 %v355_v14  ;;  %s10780_s5 = sld [smem:[#allocation52_spill]] }
 0x105   :  { %419 = vmatprep.subr.mxu0 %v8457_v0  ;;  %s10781_s17 = sld [smem:[#allocation49_spill]] }
 0x106   :  { %420 = vmatpush1.msra.mxu0 %v354_v15 }
 0x107   :  { %421 = vmatprep.subr.mxu0 %v8457_v0 }
 0x108   :  { %422 = vmatpush1.msra.mxu0 %v353_v16 }
 0x109   :  { %423 = vmatprep.subr.mxu0 %v8457_v0 }
 0x10a   :  { %424 = vmatpush1.msra.mxu0 %v352_v17 }
 0x10b   :  { %441 = vmatprep.subr.mxu0 %v8457_v0 }
 0x10c   :  { %442 = vmatpush2.msra.mxu0 %v375_v18 }
 0x10d   :  { %443 = vmatprep.subr.mxu0 %v8457_v0 }
 0x10e   :  { %444 = vmatpush2.msra.mxu0 %v374_v19 }
 0x10f   :  { %445 = vmatprep.subr.mxu0 %v8457_v0 }
 0x110   :  { %446 = vmatpush2.msra.mxu0 %v373_v20  ;;  %v6865_v20 = vld [vmem:[%s10760_s14] ss:$0 sm:$0xff]  ;;  %s10782_s14 = sld [smem:[#allocation50_spill]] }
 0x111   :  { %447 = vmatprep.subr.mxu0 %v8457_v0 }
 0x112   :  { %448 = vmatpush2.msra.mxu0 %v372_v21 }
 0x113   :  { %449 = vmatprep.subr.mxu0 %v8457_v0 }
 0x114   :  { %450 = vmatpush2.msra.mxu0 %v371_v22 }
 0x115   :  { %451 = vmatprep.subr.mxu0 %v8457_v0 }
 0x116   :  { %452 = vmatpush2.msra.mxu0 %v370_v23 }
 0x117   :  { %453 = vmatprep.subr.mxu0 %v8457_v0 }
 0x118   :  { %454 = vmatpush2.msra.mxu0 %v369_v24 }
 0x119   :  { %455 = vmatprep.subr.mxu0 %v8457_v0 }
 0x11a   :  { %456 = vmatpush2.msra.mxu0 %v368_v25 }
 0x11b   :  { %458 = vmatmul.mubr.f32.vlgmr.msra.gmra.mxu0 %v346_v26  ;;  %7350 = vmatprep.subr.mxu0 %v8457_v0 }
 0x11c   :  { %6849 = vmatprep.mubr.msk.f32.mxu0 %vm383_vm0, %v349_v27 }
 0x11f   :  { %463 = vmatmul.mubr.f32.gmra.mxu0 %v348_v28 }
 0x120   :  { %6850 = vmatprep.mubr.msk.f32.mxu0 %vm383_vm0, %v351_v29 }
 0x123   :  { %468 = vmatmul.mubr.f32.gmra.mxu0 %v350_v30 }
 0x124   :  { %7354 = vmatprep.mubr.msk.f32.mxu0 %vm8458_vm1, %v8457_v0 }
 0x1db   :  { %v459_v31 = vpop.f32.mrf.mxu0 }
 0x1dc   :  { %v8857_v40 = vadd.f32 %v6847_v35, %v459_v31 }
 0x1dd   :  { %v461_v32 = vpop.f32.mrf.mxu0 }
 0x1de   :  { %v656_v50 = vmul.f32 %v8857_v40, %v8857_v40 }
 0x1df   :  { %v464_v33 = vpop.f32.mrf.mxu0 }
 0x1e0   :  { %v8853_v39 = vadd.f32 %v6847_v35, %v464_v33 }
 0x1e1   :  { %v466_v34 = vpop.f32.mrf.mxu0 }
 0x1e2   :  { %v657_v48 = vmul.f32 %v8853_v39, %v8853_v39 }
 0x1e3   :  { %v469_v36 = vpop.f32.mrf.mxu0 }
 0x1e4   :  { %v8851_v37 = vadd.f32 %v6847_v35, %v469_v36  ;;  %v1234_v35 = vld [vmem:[%s10761_s30 + $0x8] sm:$0xff] }
 0x1e5   :  { %v471_v38 = vpop.f32.mrf.mxu0  ;;  %7351 = vmatpush3.msra.mxu0 %v1234_v35 }
 0x1e6   :  { %7265 = vmatpush3.msra.mxu1 %v8851_v37  ;;  %v658_v46 = vmul.f32 %v8851_v37, %v8851_v37  ;;  %7352 = vmatprep.subr.mxu0 %v8457_v0 }
 0x1e7   :  { %7266 = vmatprep.subr.mxu1 %v8457_v0 }
 0x1e8   :  { %7267 = vmatpush3.msra.mxu1 %v8853_v39 }
 0x1e9   :  { %7268 = vmatprep.subr.mxu1 %v8457_v0 }
 0x1ea   :  { %7269 = vmatpush3.msra.mxu1 %v8857_v40 }
 0x1eb   :  { %7271 = vmatmul.mubr.msk.f32.vlgmr.msra.gmra.mxu1 %vm476_vm2, %v473_v41  ;;  %7279 = vmatprep.subr.mxu1 %v8457_v0 }
 0x1ec   :  { %7273 = vmatprep.mubr.msk.f32.mxu1 %vm8458_vm1, %v8457_v0  ;;  %7280 = vmatpush3.msra.mxu1 %v8863_v42 }
 0x1ed   :  { %7281 = vmatprep.subr.mxu1 %v8457_v0 }
 0x1ee   :  { %7282 = vmatpush3.msra.mxu1 %v8869_v43 }
 0x1ef   :  { %7274 = vmatmul.mubr.msk.f32.gmra.mxu1 %vm476_vm2, %v474_v44  ;;  %7292 = vmatprep.subr.mxu1 %v8457_v0 }
 0x1f0   :  { %7276 = vmatprep.mubr.msk.f32.mxu1 %vm8458_vm1, %v8457_v0 }
 0x1f3   :  { %7277 = vmatmul.mubr.msk.f32.gmra.mxu1 %vm476_vm2, %v475_v45 }
 0x1f4   :  { %7283 = vmatprep.mubr.msk.f32.mxu1 %vm8458_vm1, %v8457_v0 }
 0x2ab   :  { %v552_v47 = vpop.f32.mrf.mxu1 }
 0x2ac   :  { %7284 = vmatmul.mubr.msk.f32.vlgmr.msra.gmra.mxu1 %vm566_vm3, %v552_v47  ;;  %v6871_v47 = vld [vmem:[%s10763_s19] ss:$0 sm:$0xff]  ;;  %s10785_s19 = sld [smem:[#allocation54_spill]] }
 0x2ad   :  { %7293 = vmatpush3.msra.mxu1 %v658_v46  ;;  %v7272_v49 = vpop.f32.mrf.mxu1  ;;  %7286 = vmatprep.mubr.msk.f32.mxu1 %vm8458_vm1, %v8457_v0 }
 0x2ae   :  { %7294 = vmatprep.subr.mxu1 %v8457_v0 }
 0x2af   :  { %7295 = vmatpush3.msra.mxu1 %v657_v48  ;;  %v557_v51 = vpop.f32.mrf.mxu1 }
 0x2b0   :  { %7296 = vmatprep.subr.mxu1 %v8457_v0  ;;  %7287 = vmatmul.mubr.msk.f32.gmra.mxu1 %vm566_vm3, %v557_v51  ;;  %v6863_v51 = vld [vmem:[%s10764_s23] ss:$0 sm:$0xff]  ;;  %s10786_s23 = sld [smem:[#allocation55_spill]] }
 0x2b1   :  { %7297 = vmatpush3.msra.mxu1 %v656_v50  ;;  %v7275_v52 = vpop.f32.mrf.mxu1  ;;  %7289 = vmatprep.mubr.msk.f32.mxu1 %vm8458_vm1, %v8457_v0 }
 0x2b2   :  { %7307 = vmatprep.subr.mxu1 %v8457_v0  ;;  %v1134_v52 = vld [vmem:[%s10765_s26] sm:$0xff] }
 0x2b3   :  { %v562_v53 = vpop.f32.mrf.mxu1 }
 0x2b4   :  { %7290 = vmatmul.mubr.msk.f32.gmra.mxu1 %vm566_vm3, %v562_v53 }
 0x2b5   :  { %v7278_v54 = vpop.f32.mrf.mxu1  ;;  %7298 = vmatprep.mubr.msk.f32.mxu1 %vm8458_vm1, %v8457_v0 }
 0x2b6   :  { %v1232_v54 = vld [vmem:[%s10766_s28 + $0x8] sm:$0xff] }
 0x2b8   :  { %7299 = vmatmul.mubr.msk.f32.vlgmr.msra.gmra.mxu1 %vm476_vm2, %v473_v41 }
 0x2b9   :  { %7301 = vmatprep.mubr.msk.f32.mxu1 %vm8458_vm1, %v8457_v0  ;;  %7308 = vmatpush3.msra.mxu1 %v8863_v42 }
 0x2ba   :  { %7309 = vmatprep.subr.mxu1 %v8457_v0 }
 0x2bb   :  { %7310 = vmatpush3.msra.mxu1 %v8869_v43 }
 0x2bc   :  { %7302 = vmatmul.mubr.msk.f32.gmra.mxu1 %vm476_vm2, %v474_v44  ;;  %7320 = vmatprep.subr.mxu1 %v8457_v0 }
 0x2bd   :  { %7304 = vmatprep.mubr.msk.f32.mxu1 %vm8458_vm1, %v8457_v0 }
 0x2c0   :  { %7305 = vmatmul.mubr.msk.f32.gmra.mxu1 %vm476_vm2, %v475_v45  ;;  %v6870_v45 = vld [vmem:[%s10762_s22] ss:$0 sm:$0xff]  ;;  %s10784_s22 = sld [smem:[#allocation53_spill]] }
 0x2c1   :  { %7311 = vmatprep.mubr.msk.f32.mxu1 %vm8458_vm1, %v8457_v0 }
 0x36c   :  { %v642_v55 = vpop.f32.mrf.mxu1 }
 0x36d   :  { %v831_v6 = vmul.f32 %v642_v55, %v642_v55  ;;  %v828_v25 = vsub.f32 %v8857_v40, %v642_v55 }
 0x36e   :  { %v7285_v56 = vpop.f32.mrf.mxu1 }
 0x36f   :  { %v1231_v56 = vld [vmem:[%s10766_s28] sm:$0xff]  ;;  %s10788_s28 = sld [smem:[#allocation57_spill]] }
 0x370   :  { %v8916_v57 = vpop.f32.mrf.mxu1 }
 0x371   :  { %v832_v10 = vmul.f32 %v8916_v57, %v8916_v57  ;;  %v829_v29 = vsub.f32 %v8853_v39, %v8916_v57  ;;  %v6864_v57 = vld [vmem:[%s10767_s1] ss:$0 sm:$0xff]  ;;  %s10789_s1 = sld [smem:[#allocation60_spill]] }
 0x372   :  { %v7288_v58 = vpop.f32.mrf.mxu1 }
 0x373   :  { %v1135_v58 = vld [vmem:[%s10765_s26 + $0x8] sm:$0xff] }
 0x374   :  { %v8918_v59 = vpop.f32.mrf.mxu1 }
 0x375   :  { %v833_v15 = vmul.f32 %v8918_v59, %v8918_v59  ;;  %v830_v32 = vsub.f32 %v8851_v37, %v8918_v59 }
 0x376   :  { %v7291_v60 = vpop.f32.mrf.mxu1 }
 0x378   :  { %v725_v62 = vpop.f32.mrf.mxu1 }
 0x379   :  { %7312 = vmatmul.mubr.msk.f32.vlgmr.msra.gmra.mxu1 %vm566_vm3, %v725_v62 }
 0x37a   :  { %v7300_v63 = vpop.f32.mrf.mxu1  ;;  %7314 = vmatprep.mubr.msk.f32.mxu1 %vm8458_vm1, %v8457_v0  ;;  %7321 = vmatpush3.msk.msra.mxu1 %vm888_vm4, %v876_v61  ;;  %v1136_v61 = vld [vmem:[%s10765_s26 + $0x10] sm:$0xff]  ;;  %s10787_s26 = sld [smem:[#allocation56_spill]] }
 0x37b   :  { %7325 = vmatprep.subr.mxu1 %v8457_v0 }
 0x37c   :  { %v730_v1 = vpop.f32.mrf.mxu1 }
 0x37d   :  { %7315 = vmatmul.mubr.msk.f32.gmra.mxu1 %vm566_vm3, %v730_v1 }
 0x37e   :  { %v7303_v2 = vpop.f32.mrf.mxu1  ;;  %7317 = vmatprep.mubr.msk.f32.mxu1 %vm8458_vm1, %v8457_v0 }
 0x380   :  { %v735_v3 = vpop.f32.mrf.mxu1 }
 0x381   :  { %7318 = vmatmul.mubr.msk.f32.gmra.mxu1 %vm566_vm3, %v735_v3 }
 0x382   :  { %v7306_v4 = vpop.f32.mrf.mxu1  ;;  %7322 = vmatprep.mubr.msk.f32.mxu1 %vm8458_vm1, %v8457_v0 }
 0x385   :  { %7323 = vmatmul.mubr.msk.f32.vlgmr.msra.gmra.mxu1 %vm884_vm5, %v875_v5 }
 0x386   :  { %7326 = vmatpush3.msra.mxu1 %v8863_v42  ;;  %7329 = vmatprep.mubr.msk.f32.mxu1 %vm8458_vm1, %v8457_v0 }
 0x387   :  { %7327 = vmatprep.subr.mxu1 %v8457_v0 }
 0x388   :  { %7328 = vmatpush3.msra.mxu1 %v8869_v43 }
 0x389   :  { %7332 = vmatprep.subr.mxu1 %v8457_v0 }
 0x439   :  { %v814_v7 = vpop.f32.mrf.mxu1 }
 0x43a   :  { %v834_v8 = vsub.f32 %v814_v7, %v831_v6 }
 0x43b   :  { %v7313_v9 = vpop.f32.mrf.mxu1 }
 0x43c   :  { %v837_v11 = vadd.f32 1e-05, %v834_v8  ;;  %v1233_v8 = vld [vmem:[%s10761_s30] sm:$0xff]  ;;  %s10783_s30 = sld [smem:[#allocation51_spill]] }
 0x43d   :  { %v819_v12 = vpop.f32.mrf.mxu1  ;;  %7353 = vmatpush3.msra.mxu0 %v1233_v8 }
 0x43e   :  { %7977 = vrsqrt.f32 %v837_v11  ;;  %v835_v13 = vsub.f32 %v819_v12, %v832_v10  ;;  %7376 = vmatprep.subr.mxu0 %v8457_v0 }
 0x43f   :  { %v7316_v14 = vpop.f32.mrf.mxu1 }
 0x440   :  { %v838_v16 = vadd.f32 1e-05, %v835_v13 }
 0x441   :  { %v824_v17 = vpop.f32.mrf.mxu1 }
 0x442   :  { %7979 = vrsqrt.f32 %v838_v16  ;;  %v836_v18 = vsub.f32 %v824_v17, %v833_v15 }
 0x443   :  { %v7319_v19 = vpop.f32.mrf.mxu1 }
 0x444   :  { %v839_v21 = vadd.f32 1e-05, %v836_v18 }
 0x445   :  { %v958_v22 = vpop.f32.mrf.mxu1 }
 0x446   :  { %7981 = vrsqrt.f32 %v839_v21  ;;  %v959_v23 = vadd.f32 %v6865_v20, %v958_v22  ;;  %v1413_v22 = vld [vmem:[%s10768_s2] sm:$0xff] }
 0x447   :  { %v7324_v24 = vpop.f32.mrf.mxu1 }
 0x448   :  { %7330 = vmatmul.mubr.msk.f32.vlgmr.msra.gmra.mxu1 %vm566_vm3, %v959_v23  ;;  %v1035_v26 = vmul.f32 %v959_v23, %v959_v23 }
 0x449   :  { %7333 = vmatpush3.msra.mxu1 %v8863_v42  ;;  %7336 = vmatprep.mubr.msk.f32.mxu1 %vm8458_vm1, %v8457_v0 }
 0x44a   :  { %7334 = vmatprep.subr.mxu1 %v8457_v0 }
 0x44b   :  { %v7978_v27 = vpop.eup %7977  ;;  %7335 = vmatpush3.msra.mxu1 %v8869_v43 }
 0x44c   :  { %v843_v28 = vmul.f32 %v7978_v27, %v828_v25  ;;  %7337 = vmatmul.mubr.msk.f32.vlgmr.msra.gmra.mxu1 %vm566_vm3, %v1035_v26  ;;  %7339 = vmatprep.subr.mxu1 %v8457_v0  ;;  %v1414_v27 = vld [vmem:[%s10768_s2 + $0x8] sm:$0xff] }
 0x44d   :  { %7341 = vmatprep.mubr.msk.f32.mxu1 %vm8458_vm1, %v8457_v0 }
 0x44e   :  { %v853_v55 = vmul.f32 %v6863_v51, %v843_v28 }
 0x44f   :  { %v7980_v30 = vpop.eup %7979 }
 0x450   :  { %v844_v31 = vmul.f32 %v7980_v30, %v829_v29  ;;  %v863_v59 = vadd.f32 %v6864_v57, %v853_v55  ;;  %v1485_v55 = vld [vmem:[%s10769_s12 + $0x10] sm:$0xff] }
 0x452   :  { %v854_v60 = vmul.f32 %v6863_v51, %v844_v31  ;;  %v869_v62 = vmul.f32 0.02, %v863_v59  ;;  %vm866_vm9 = vcmp.ge.f32.partialorder %v863_v59, 0.0 }
 0x453   :  { %v7982_v33 = vpop.eup %7981 }
 0x454   :  { %v845_v34 = vmul.f32 %v7982_v33, %v830_v32  ;;  %v864_v63 = vadd.f32 %v6864_v57, %v854_v60  ;;  %v872_v2 = vsel %vm866_vm9, %v863_v59, %v869_v62  ;;  %v1415_v33 = vld [vmem:[%s10768_s2 + $0x10] sm:$0xff]  ;;  %s10790_s2 = sld [smem:[#allocation59_spill]] }
 0x456   :  { %v855_v1 = vmul.f32 %v6863_v51, %v845_v34  ;;  %v870_v3 = vmul.f32 0.02, %v864_v63  ;;  %vm867_vm10 = vcmp.ge.f32.partialorder %v864_v63, 0.0 }
 0x458   :  { %v865_v4 = vadd.f32 %v6864_v57, %v855_v1  ;;  %v873_v5 = vsel %vm867_vm10, %v864_v63, %v870_v3  ;;  %v1483_v57 = vld [vmem:[%s10769_s12] sm:$0xff] }
 0x45a   :  { %v871_v6 = vmul.f32 0.02, %v865_v4  ;;  %vm868_vm11 = vcmp.ge.f32.partialorder %v865_v4, 0.0 }
 0x45c   :  { %v874_v7 = vsel %vm868_vm11, %v865_v4, %v871_v6 }
 0x508   :  { %v1031_v36 = vpop.f32.mrf.mxu1 }
 0x509   :  { %v1110_v40 = vmul.f32 %v1031_v36, %v1031_v36  ;;  %v1109_v37 = vsub.f32 %v959_v23, %v1031_v36 }
 0x50a   :  { %v7331_v38 = vpop.f32.mrf.mxu1 }
 0x50c   :  { %v1105_v41 = vpop.f32.mrf.mxu1 }
 0x50d   :  { %v1111_v39 = vsub.f32 %v1105_v41, %v1110_v40 }
 0x50e   :  { %v7338_v42 = vpop.f32.mrf.mxu1 }
 0x50f   :  { %v1112_v43 = vadd.f32 1e-05, %v1111_v39 }
 0x511   :  { %7983 = vrsqrt.f32 %v1112_v43 }
 0x51e   :  { %v7984_v44 = vpop.eup %7983 }
 0x51f   :  { %v1114_v46 = vmul.f32 %v7984_v44, %v1109_v37 }
 0x521   :  { %v1122_v48 = vmul.f32 %v6870_v45, %v1114_v46 }
 0x523   :  { %v1130_v49 = vadd.f32 %v6871_v47, %v1122_v48 }
 0x525   :  { %vm1131_vm6 = vcmp.ge.f32.partialorder %v1130_v49, 0.0  ;;  %v1132_v50 = vmul.f32 0.02, %v1130_v49 }
 0x527   :  { %v1133_v53 = vsel %vm1131_vm6, %v1130_v49, %v1132_v50 }
 0x528   :  { %7340 = vmatpush3.msk.msra.mxu1 %vm1147_vm7, %v1133_v53 }
 0x529   :  { %7342 = vmatmul.mubr.msk.f32.vlgmr.msra.gmra.mxu1 %vm1137_vm8, %v1134_v52  ;;  %7363 = vmatprep.subr.mxu1 %v8457_v0 }
 0x52a   :  { %7344 = vmatprep.mubr.msk.f32.mxu1 %vm8458_vm1, %v8457_v0  ;;  %7364 = vmatpush3.msra.mxu1 %v1232_v54  ;;  %v1486_v54 = vld [vmem:[%s10769_s12 + $0x18] sm:$0xff] }
 0x52b   :  { %7365 = vmatprep.subr.mxu1 %v8457_v0 }
 0x52c   :  { %7366 = vmatpush3.msra.mxu1 %v1231_v56  ;;  %v1484_v56 = vld [vmem:[%s10769_s12 + $0x8] sm:$0xff]  ;;  %s10791_s12 = sld [smem:[#allocation58_spill]] }
 0x52d   :  { %7345 = vmatmul.mubr.msk.f32.gmra.mxu1 %vm1137_vm8, %v1135_v58  ;;  %7393 = vmatprep.subr.mxu1 %v8457_v0 }
 0x52e   :  { %7347 = vmatprep.mubr.msk.f32.mxu1 %vm8458_vm1, %v8457_v0 }
 0x531   :  { %7348 = vmatmul.mubr.msk.f32.gmra.mxu1 %vm1137_vm8, %v1136_v61  ;;  %vm4010_vm8 = vcmask 259072  }
 0x532   :  { %7367 = vmatprep.mubr.msk.f32.mxu1 %vm8458_vm1, %v8457_v0 }
 0x535   :  { %7368 = vmatmul.mubr.msk.f32.vlgmr.msra.gmra.mxu1 %vm566_vm3, %v872_v2 }
 0x536   :  { %7370 = vmatprep.mubr.msk.f32.mxu1 %vm8458_vm1, %v8457_v0 }
 0x539   :  { %7371 = vmatmul.mubr.msk.f32.gmra.mxu1 %vm566_vm3, %v873_v5  ;;  %v6882_v5 = vld [vmem:[%s10770_s7] ss:$0 sm:$0xff] }
 0x53a   :  { %7373 = vmatprep.mubr.msk.f32.mxu1 %vm8458_vm1, %v8457_v0 }
 0x53d   :  { %7374 = vmatmul.mubr.msk.f32.gmra.mxu1 %vm566_vm3, %v874_v7  ;;  %v6883_v7 = vld [vmem:[%s10771_s27] ss:$0 sm:$0xff] }
 0x53e   :  { %7399 = vmatprep.mubr.msk.f32.mxu1 %vm8458_vm1, %v8457_v0 }
 0x5e9   :  { %v1217_v9 = vpop.f32.mrf.mxu1 }
 0x5ea   :  { %7355 = vmatmul.mubr.msk.f32.vlgmr.msra.gmra.mxu0 %vm566_vm3, %v1217_v9 }
 0x5eb   :  { %v7343_v10 = vpop.f32.mrf.mxu1  ;;  %7357 = vmatprep.mubr.msk.f32.mxu0 %vm8458_vm1, %v8457_v0  ;;  %7377 = vmatpush3.msra.mxu0 %v1486_v54 }
 0x5ec   :  { %7378 = vmatprep.subr.mxu0 %v8457_v0 }
 0x5ed   :  { %v1222_v11 = vpop.f32.mrf.mxu1  ;;  %7379 = vmatpush3.msra.mxu0 %v1485_v55 }
 0x5ee   :  { %7358 = vmatmul.mubr.msk.f32.gmra.mxu0 %vm566_vm3, %v1222_v11  ;;  %7380 = vmatprep.subr.mxu0 %v8457_v0 }
 0x5ef   :  { %v7346_v12 = vpop.f32.mrf.mxu1  ;;  %7360 = vmatprep.mubr.msk.f32.mxu0 %vm8458_vm1, %v8457_v0  ;;  %7381 = vmatpush3.msra.mxu0 %v1484_v56 }
 0x5f0   :  { %7382 = vmatprep.subr.mxu0 %v8457_v0 }
 0x5f1   :  { %v1227_v13 = vpop.f32.mrf.mxu1  ;;  %7383 = vmatpush3.msra.mxu0 %v1483_v57 }
 0x5f2   :  { %7361 = vmatmul.mubr.msk.f32.gmra.mxu0 %vm566_vm3, %v1227_v13  ;;  %7408 = vmatprep.subr.mxu0 %v8457_v0 }
 0x5f3   :  { %v7349_v14 = vpop.f32.mrf.mxu1  ;;  %7384 = vmatprep.mubr.msk.f32.mxu0 %vm8458_vm1, %v8457_v0 }
 0x5f5   :  { %v1399_v15 = vpop.f32.mrf.mxu1 }
 0x5f7   :  { %v7369_v16 = vpop.f32.mrf.mxu1 }
 0x5f9   :  { %v1404_v17 = vpop.f32.mrf.mxu1 }
 0x5fb   :  { %v7372_v18 = vpop.f32.mrf.mxu1 }
 0x5fd   :  { %v1409_v19 = vpop.f32.mrf.mxu1 }
 0x5ff   :  { %v7375_v20 = vpop.f32.mrf.mxu1 }
 0x6aa   :  { %v1310_v21 = vpop.f32.mrf.mxu0 }
 0x6ab   :  { %v1400_v23 = vadd.f32 %v1399_v15, %v1310_v21 }
 0x6ac   :  { %v7356_v24 = vpop.f32.mrf.mxu0 }
 0x6ad   :  { %v9004_v25 = vadd.f32 %v1413_v22, %v1400_v23 }
 0x6ae   :  { %v1315_v26 = vpop.f32.mrf.mxu0 }
 0x6af   :  { %v1405_v28 = vadd.f32 %v1404_v17, %v1315_v26  ;;  %v1425_v29 = vsel %vm1424_vm12, %v9004_v25, 0.0 }
 0x6b0   :  { %v7359_v30 = vpop.f32.mrf.mxu0  ;;  %1426 = vadd.xlane.f32.xlu0 %v1425_v29 }
 0x6b1   :  { %v9009_v31 = vadd.f32 %v1414_v27, %v1405_v28 }
 0x6b2   :  { %v1320_v32 = vpop.f32.mrf.mxu0 }
 0x6b3   :  { %v1410_v34 = vadd.f32 %v1409_v19, %v1320_v32  ;;  %v1428_v35 = vsel %vm1424_vm12, %v9009_v31, 0.0  ;;  %v9074_v32 = vld [vmem:[%s10772_s10] sm:$0xff] }
 0x6b4   :  { %v7362_v36 = vpop.f32.mrf.mxu0  ;;  %1429 = vadd.xlane.f32.xlu0 %v1428_v35 }
 0x6b5   :  { %v9014_v38 = vadd.f32 %v1415_v33, %v1410_v34  ;;  %v9078_v36 = vld [vmem:[%s10772_s10 + $0x8] sm:$0xff] }
 0x6b7   :  { %v1431_v40 = vsel %vm1424_vm12, %v9014_v38, 0.0 }
 0x6b8   :  { %1432 = vadd.xlane.f32.xlu1 %v1431_v40 }
 0x739   :  { %v1427_v41 = vpop.xlane.xlu0 %1426 }
 0x73a   :  { %v1435_v39 = vmul.f32 0.03125, %v1427_v41 }
 0x73c   :  { %v1438_v42 = vsub.f32 %v9004_v25, %v1435_v39 }
 0x73d   :  { %v1430_v43 = vpop.xlane.xlu0 %1429 }
 0x73e   :  { %v1436_v37 = vmul.f32 0.03125, %v1430_v43  ;;  %v1441_v44 = vmul.f32 %v1438_v42, %v1438_v42  ;;  %v9083_v43 = vld [vmem:[%s10772_s10 + $0x10] sm:$0xff] }
 0x740   :  { %v1439_v45 = vsub.f32 %v9009_v31, %v1436_v37  ;;  %v1444_v46 = vsel %vm1424_vm12, %v1441_v44, 0.0 }
 0x741   :  { %1445 = vadd.xlane.f32.xlu1 %v1444_v46  ;;  %v1433_v47 = vpop.xlane.xlu1 %1432 }
 0x742   :  { %v1437_v48 = vmul.f32 0.03125, %v1433_v47  ;;  %v1442_v49 = vmul.f32 %v1439_v45, %v1439_v45 }
 0x744   :  { %v1440_v50 = vsub.f32 %v9014_v38, %v1437_v48  ;;  %v1447_v51 = vsel %vm1424_vm12, %v1442_v49, 0.0 }
 0x745   :  { %1448 = vadd.xlane.f32.xlu0 %v1447_v51 }
 0x746   :  { %v1443_v52 = vmul.f32 %v1440_v50, %v1440_v50 }
 0x748   :  { %v1450_v53 = vsel %vm1424_vm12, %v1443_v52, 0.0 }
 0x749   :  { %1451 = vadd.xlane.f32.xlu1 %v1450_v53 }
 0x7ca   :  { %v1446_v58 = vpop.xlane.xlu1 %1445 }
 0x7cb   :  { %v1453_v59 = vmul.f32 0.03125, %v1446_v58 }
 0x7cd   :  { %v1456_v60 = vadd.f32 1e-05, %v1453_v59 }
 0x7ce   :  { %v1449_v61 = vpop.xlane.xlu0 %1448 }
 0x7cf   :  { %7985 = vrsqrt.f32 %v1456_v60  ;;  %v1454_v62 = vmul.f32 0.03125, %v1449_v61 }
 0x7d1   :  { %v1457_v63 = vadd.f32 1e-05, %v1454_v62 }
 0x7d2   :  { %v1452_v1 = vpop.xlane.xlu1 %1451 }
 0x7d3   :  { %7987 = vrsqrt.f32 %v1457_v63  ;;  %v1455_v2 = vmul.f32 0.03125, %v1452_v1  ;;  %v1577_v1 = vld [vmem:[%s10773_s15 + $0x8] sm:$0xff] }
 0x7d5   :  { %v1458_v3 = vadd.f32 1e-05, %v1455_v2 }
 0x7d7   :  { %7989 = vrsqrt.f32 %v1458_v3 }
 0x7dc   :  { %v7986_v4 = vpop.eup %7985 }
 0x7dd   :  { %v1462_v6 = vmul.f32 %v7986_v4, %v1438_v42 }
 0x7df   :  { %v1471_v8 = vmul.f32 %v6882_v5, %v1462_v6 }
 0x7e0   :  { %v7988_v9 = vpop.eup %7987 }
 0x7e1   :  { %v1480_v10 = vadd.f32 %v6883_v7, %v1471_v8  ;;  %v1463_v11 = vmul.f32 %v7988_v9, %v1439_v45 }
 0x7e3   :  { %7385 = vmatmul.mubr.msk.f32.vlgmr.msra.gmra.mxu0 %vm1424_vm12, %v1480_v10  ;;  %v1472_v12 = vmul.f32 %v6882_v5, %v1463_v11 }
 0x7e4   :  { %v7990_v13 = vpop.eup %7989  ;;  %7387 = vmatprep.mubr.msk.f32.mxu0 %vm8458_vm1, %v8457_v0 }
 0x7e5   :  { %v1481_v14 = vadd.f32 %v6883_v7, %v1472_v12  ;;  %v1464_v15 = vmul.f32 %v7990_v13, %v1440_v50 }
 0x7e7   :  { %7388 = vmatmul.mubr.msk.f32.gmra.mxu0 %vm1424_vm12, %v1481_v14  ;;  %v1473_v16 = vmul.f32 %v6882_v5, %v1464_v15 }
 0x7e8   :  { %7390 = vmatprep.mubr.msk.f32.mxu0 %vm8458_vm1, %v8457_v0 }
 0x7e9   :  { %v1482_v17 = vadd.f32 %v6883_v7, %v1473_v16 }
 0x7eb   :  { %7391 = vmatmul.mubr.msk.f32.gmra.mxu0 %vm1424_vm12, %v1482_v17 }
 0x7ec   :  { %7414 = vmatprep.mubr.msk.f32.mxu0 %vm8458_vm1, %v8457_v0 }
 0x8a3   :  { %v9043_v18 = vpop.f32.mrf.mxu0 }
 0x8a4   :  { %v1581_v28 = vmul.f32 0.25, %v9043_v18 }
 0x8a5   :  { %v7386_v19 = vpop.f32.mrf.mxu0 }
 0x8a7   :  { %v9045_v20 = vpop.f32.mrf.mxu0 }
 0x8a8   :  { %1589 = vrot.lane.b32.xlu1 %v9045_v20, %s8459_s25  ;;  %v1582_v29 = vmul.f32 0.25, %v9045_v20 }
 0x8a9   :  { %v7389_v21 = vpop.f32.mrf.mxu0 }
 0x8aa   :  { %v1576_v21 = vld [vmem:[%s10773_s15] sm:$0xff] }
 0x8ab   :  { %v9049_v22 = vpop.f32.mrf.mxu0 }
 0x8ac   :  { %1587 = vrot.lane.b32.xlu1 %v9043_v18, %s8459_s25  ;;  %1591 = vrot.lane.b32.xlu0 %v9049_v22, %s8459_s25  ;;  %v1583_v30 = vmul.f32 0.25, %v9049_v22 }
 0x8ad   :  { %v7392_v23 = vpop.f32.mrf.mxu0 }
 0x91a   :  { %v1590_v26 = vpop.permute.xlu1 %1589 }
 0x91e   :  { %v1592_v24 = vpop.permute.xlu0 %1591  ;;  %v1588_v27 = vpop.permute.xlu1 %1587 }
 0x91f   :  { %7394 = vmatpush3.xpose.msk.msra.mxu1 %vm566_vm3, %v1592_v24 }
 0x920   :  { %7395 = vmatprep.subr.mxu1 %v8457_v0 }
 0x923   :  { %7396 = vmatpush3.xpose.msk.msra.mxu1 %vm566_vm3, %v1590_v26 }
 0x924   :  { %7397 = vmatprep.subr.mxu1 %v8457_v0 }
 0x927   :  { %7398 = vmatpush3.xpose.msk.msra.mxu1 %vm566_vm3, %v1588_v27 }
 0x928   :  { %7423 = vmatprep.subr.mxu1 %v8457_v0 }
 0x92a   :  { %7400 = vmatmul.mubr.msk.f32.vlgmr.msra.gmra.mxu1 %vm566_vm3, %v1581_v28 }
 0x92b   :  { %7402 = vmatprep.mubr.msk.f32.mxu1 %vm8458_vm1, %v8457_v0  ;;  %7424 = vmatpush3.msra.mxu1 %v1577_v1  ;;  %v1579_v1 = vld [vmem:[%s10773_s15 + $0x18] sm:$0xff] }
 0x92c   :  { %7425 = vmatprep.subr.mxu1 %v8457_v0 }
 0x92d   :  { %7426 = vmatpush3.msra.mxu1 %v1576_v21  ;;  %v6899_v21 = vld [vmem:[%s10774_s21] ss:$0 sm:$0xff] }
 0x92e   :  { %7403 = vmatmul.mubr.msk.f32.gmra.mxu1 %vm566_vm3, %v1582_v29  ;;  %7451 = vmatprep.subr.mxu1 %v8457_v0 }
 0x92f   :  { %7405 = vmatprep.mubr.msk.f32.mxu1 %vm8458_vm1, %v8457_v0 }
 0x932   :  { %7406 = vmatmul.mubr.msk.f32.gmra.mxu1 %vm566_vm3, %v1583_v30 }
 0x933   :  { %7427 = vmatprep.mubr.msk.f32.mxu1 %vm8458_vm1, %v8457_v0 }
 0x9ea   :  { %v1674_v33 = vpop.f32.mrf.mxu1 }
 0x9eb   :  { %v1675_v34 = vadd.f32 %v1674_v33, %v9074_v32 }
 0x9ec   :  { %v7401_v35 = vpop.f32.mrf.mxu1 }
 0x9ed   :  { %v1688_v40 = vsel %vm476_vm2, %v1675_v34, -inf }
 0x9ee   :  { %1689 = vmax.xlane.f32.xlu1 %v1688_v40  ;;  %v1679_v41 = vpop.f32.mrf.mxu1 }
 0x9ef   :  { %v1680_v39 = vadd.f32 %v1679_v41, %v9078_v36 }
 0x9f0   :  { %v7404_v42 = vpop.f32.mrf.mxu1 }
 0x9f1   :  { %v1691_v37 = vsel %vm476_vm2, %v1680_v39, -inf }
 0x9f2   :  { %1692 = vmax.xlane.f32.xlu0 %v1691_v37  ;;  %v1684_v44 = vpop.f32.mrf.mxu1 }
 0x9f3   :  { %v1685_v45 = vadd.f32 %v1684_v44, %v9083_v43 }
 0x9f4   :  { %v7407_v46 = vpop.f32.mrf.mxu1 }
 0x9f5   :  { %v1694_v47 = vsel %vm476_vm2, %v1685_v45, -inf }
 0x9f6   :  { %1695 = vmax.xlane.f32.xlu0 %v1694_v47 }
 0x9ff   :  { %1725 = vrot.lane.b32.xlu1 %v9049_v22, %s8460_s4 }
 0xa03   :  { %1721 = vrot.lane.b32.xlu1 %v9043_v18, %s8460_s4 }
 0xa07   :  { %1927 = vrot.lane.b32.xlu1 %v9049_v22, %s8461_s11 }
 0xa0b   :  { %1925 = vrot.lane.b32.xlu1 %v9045_v20, %s8461_s11 }
 0xa77   :  { %v1690_v48 = vpop.xlane.xlu1 %1689 }
 0xa78   :  { %v1697_v49 = vsub.f32 %v1675_v34, %v1690_v48 }
 0xa7a   :  { %v1700_v50 = vmul.f32 1.442695, %v1697_v49 }
 0xa7b   :  { %v1726_v51 = vpop.permute.xlu1 %1725  ;;  %v1693_v52 = vpop.xlane.xlu0 %1692 }
 0xa7c   :  { %7991 = vpow2.f32 %v1700_v50  ;;  %v1698_v53 = vsub.f32 %v1680_v39, %v1693_v52  ;;  %7409 = vmatpush3.msra.mxu0 %v1726_v51 }
 0xa7d   :  { %7410 = vmatprep.subr.mxu0 %v8457_v0 }
 0xa7e   :  { %v1702_v54 = vmul.f32 1.442695, %v1698_v53 }
 0xa7f   :  { %v1696_v59 = vpop.xlane.xlu0 %1695  ;;  %v1722_v2 = vpop.permute.xlu1 %1721 }
 0xa80   :  { %7993 = vpow2.f32 %v1702_v54  ;;  %v1699_v60 = vsub.f32 %v1685_v45, %v1696_v59 }
 0xa82   :  { %v1704_v61 = vmul.f32 1.442695, %v1699_v60 }
 0xa83   :  { %v1928_v3 = vpop.permute.xlu1 %1927 }
 0xa84   :  { %7995 = vpow2.f32 %v1704_v61 }
 0xa87   :  { %v1926_v4 = vpop.permute.xlu1 %1925 }
 0xa89   :  { %v7992_v55 = vpop.eup %7991 }
 0xa8a   :  { %v1706_v56 = vsel %vm476_vm2, %v7992_v55, 0.0 }
 0xa8b   :  { %1707 = vadd.xlane.f32.xlu0 %v1706_v56 }
 0xa8d   :  { %v7994_v57 = vpop.eup %7993 }
 0xa8e   :  { %v1709_v58 = vsel %vm476_vm2, %v7994_v57, 0.0 }
 0xa8f   :  { %1710 = vadd.xlane.f32.xlu1 %v1709_v58 }
 0xa91   :  { %v7996_v62 = vpop.eup %7995 }
 0xa92   :  { %v1712_v63 = vsel %vm476_vm2, %v7996_v62, 0.0 }
 0xaa0   :  { %1917 = vrot.lane.b32.xlu1 %v1581_v28, %s8462_s6 }
 0xaa1   :  { %1723 = vrot.lane.b32.xlu0 %v9045_v20, %s8460_s4 }
 0xaa4   :  { %1921 = vrot.lane.b32.xlu1 %v1583_v30, %s8462_s6 }
 0xac0   :  { %1713 = vadd.xlane.f32.xlu0 %v1712_v63 }
 0xad6   :  { %1923 = vrot.lane.b32.xlu0 %v9043_v18, %s8461_s11 }
 0xada   :  { %1919 = vrot.lane.b32.xlu0 %v1582_v29, %s8462_s6 }
 0xb14   :  { %v1708_v5 = vpop.xlane.xlu0 %1707 }
 0xb15   :  { %7997 = vrcp.f32 %v1708_v5 }
 0xb18   :  { %v1711_v6 = vpop.xlane.xlu1 %1710  ;;  %v1724_v7 = vpop.permute.xlu0 %1723 }
 0xb19   :  { %7999 = vrcp.f32 %v1711_v6  ;;  %7411 = vmatpush3.msra.mxu0 %v1724_v7 }
 0xb1a   :  { %7412 = vmatprep.subr.mxu0 %v8457_v0 }
 0xb1b   :  { %7413 = vmatpush3.msra.mxu0 %v1722_v2 }
 0xb1c   :  { %7436 = vmatprep.subr.mxu0 %v8457_v0  ;;  %v1918_v16 = vpop.permute.xlu1 %1917 }
 0xb20   :  { %v1922_v19 = vpop.permute.xlu1 %1921 }
 0xb22   :  { %v7998_v8 = vpop.eup %7997 }
 0xb23   :  { %v1716_v9 = vmul.f32 %v7998_v8, %v7992_v55 }
 0xb25   :  { %7415 = vmatmul.mubr.msk.f32.vlgmr.msra.gmra.mxu0 %vm476_vm2, %v1716_v9 }
 0xb26   :  { %v8000_v10 = vpop.eup %7999  ;;  %7437 = vmatpush3.xpose.msk.msra.mxu0 %vm566_vm3, %v1928_v3  ;;  %7417 = vmatprep.mubr.msk.f32.mxu0 %vm8458_vm1, %v8457_v0 }
 0xb27   :  { %7438 = vmatprep.subr.mxu0 %v8457_v0  ;;  %v1718_v11 = vmul.f32 %v8000_v10, %v7994_v57 }
 0xb29   :  { %7418 = vmatmul.mubr.msk.f32.gmra.mxu0 %vm476_vm2, %v1718_v11 }
 0xb2a   :  { %7439 = vmatpush3.xpose.msk.msra.mxu0 %vm566_vm3, %v1926_v4  ;;  %7420 = vmatprep.mubr.msk.f32.mxu0 %vm8458_vm1, %v8457_v0 }
 0xb2b   :  { %7440 = vmatprep.subr.mxu0 %v8457_v0 }
 0xb49   :  { %v1714_v12 = vpop.xlane.xlu0 %1713 }
 0xb4a   :  { %8001 = vrcp.f32 %v1714_v12  ;;  %v1578_v12 = vld [vmem:[%s10773_s15 + $0x10] sm:$0xff] }
 0xb4d   :  { %v1924_v13 = vpop.permute.xlu0 %1923 }
 0xb4e   :  { %7441 = vmatpush3.xpose.msk.msra.mxu0 %vm566_vm3, %v1924_v13 }
 0xb4f   :  { %7466 = vmatprep.subr.mxu0 %v8457_v0 }
 0xb51   :  { %v1920_v17 = vpop.permute.xlu0 %1919 }
 0xb57   :  { %v8002_v14 = vpop.eup %8001 }
 0xb58   :  { %v1720_v15 = vmul.f32 %v8002_v14, %v7996_v62 }
 0xb5a   :  { %7421 = vmatmul.mubr.msk.f32.gmra.mxu0 %vm476_vm2, %v1720_v15 }
 0xb5b   :  { %7442 = vmatprep.mubr.msk.f32.mxu0 %vm8458_vm1, %v8457_v0 }
 0xb5e   :  { %7443 = vmatmul.mubr.msk.f32.vlgmr.msra.gmra.mxu0 %vm566_vm3, %v1918_v16 }
 0xb5f   :  { %7445 = vmatprep.mubr.msk.f32.mxu0 %vm8458_vm1, %v8457_v0  ;;  %7467 = vmatpush3.msra.mxu0 %v1579_v1 }
 0xb60   :  { %7468 = vmatprep.subr.mxu0 %v8457_v0 }
 0xb61   :  { %7469 = vmatpush3.msra.mxu0 %v1578_v12 }
 0xb62   :  { %7446 = vmatmul.mubr.msk.f32.gmra.mxu0 %vm566_vm3, %v1920_v17  ;;  %7496 = vmatprep.subr.mxu0 %v8457_v0 }
 0xb63   :  { %7448 = vmatprep.mubr.msk.f32.mxu0 %vm8458_vm1, %v8457_v0 }
 0xb66   :  { %7449 = vmatmul.mubr.msk.f32.gmra.mxu0 %vm566_vm3, %v1922_v19 }
 0xb67   :  { %7470 = vmatprep.mubr.msk.f32.mxu0 %vm8458_vm1, %v8457_v0 }
 0xbe5   :  { %v1805_v23 = vpop.f32.mrf.mxu0 }
 0xbe6   :  { %7428 = vmatmul.mubr.msk.f32.vlgmr.msra.gmra.mxu1 %vm566_vm3, %v1805_v23 }
 0xbe7   :  { %v7416_v24 = vpop.f32.mrf.mxu0  ;;  %7430 = vmatprep.mubr.msk.f32.mxu1 %vm8458_vm1, %v8457_v0 }
 0xbe9   :  { %v1810_v26 = vpop.f32.mrf.mxu0 }
 0xbea   :  { %7431 = vmatmul.mubr.msk.f32.gmra.mxu1 %vm566_vm3, %v1810_v26 }
 0xbeb   :  { %v7419_v27 = vpop.f32.mrf.mxu0  ;;  %7433 = vmatprep.mubr.msk.f32.mxu1 %vm8458_vm1, %v8457_v0 }
 0xc1a   :  { %v1815_v28 = vpop.f32.mrf.mxu0 }
 0xc1b   :  { %7434 = vmatmul.mubr.msk.f32.gmra.mxu1 %vm566_vm3, %v1815_v28 }
 0xc1c   :  { %v7422_v29 = vpop.f32.mrf.mxu0  ;;  %7457 = vmatprep.mubr.msk.f32.mxu1 %vm8458_vm1, %v8457_v0 }
 0xc1e   :  { %v2007_v30 = vpop.f32.mrf.mxu0 }
 0xc1f   :  { %v2008_v33 = vadd.f32 %v2007_v30, %v9074_v32 }
 0xc20   :  { %v7444_v34 = vpop.f32.mrf.mxu0 }
 0xc21   :  { %v2021_v35 = vsel %vm476_vm2, %v2008_v33, -inf }
 0xc22   :  { %2022 = vmax.xlane.f32.xlu0 %v2021_v35  ;;  %v2012_v40 = vpop.f32.mrf.mxu0 }
 0xc23   :  { %v2013_v41 = vadd.f32 %v2012_v40, %v9078_v36 }
 0xc24   :  { %v7447_v39 = vpop.f32.mrf.mxu0 }
 0xc25   :  { %v2024_v42 = vsel %vm476_vm2, %v2013_v41, -inf }
 0xc26   :  { %2025 = vmax.xlane.f32.xlu1 %v2024_v42  ;;  %v2017_v37 = vpop.f32.mrf.mxu0 }
 0xc27   :  { %v2018_v44 = vadd.f32 %v2017_v37, %v9083_v43 }
 0xc28   :  { %v7450_v45 = vpop.f32.mrf.mxu0 }
 0xc29   :  { %v2027_v46 = vsel %vm476_vm2, %v2018_v44, -inf }
 0xc2a   :  { %2028 = vmax.xlane.f32.xlu0 %v2027_v46 }
 0xc37   :  { %2056 = vrot.lane.b32.xlu1 %v9045_v20, %s8463_s16 }
 0xca6   :  { %v9154_v32 = vpop.f32.mrf.mxu1 }
 0xca7   :  { %v1914_v23 = vadd.f32 %v6899_v21, %v9154_v32 }
 0xca8   :  { %v7429_v47 = vpop.f32.mrf.mxu1 }
 0xcaa   :  { %v9156_v48 = vpop.f32.mrf.mxu1 }
 0xcab   :  { %v2023_v36 = vpop.xlane.xlu0 %2022  ;;  %v1915_v28 = vadd.f32 %v6899_v21, %v9156_v48 }
 0xcac   :  { %v2030_v49 = vsub.f32 %v2008_v33, %v2023_v36  ;;  %v7432_v50 = vpop.f32.mrf.mxu1 }
 0xcae   :  { %v2033_v51 = vmul.f32 1.442695, %v2030_v49 }
 0xcaf   :  { %v2026_v52 = vpop.xlane.xlu1 %2025 }
 0xcb0   :  { %8003 = vpow2.f32 %v2033_v51  ;;  %v2031_v43 = vsub.f32 %v2013_v41, %v2026_v52 }
 0xcb2   :  { %v2035_v53 = vmul.f32 1.442695, %v2031_v43 }
 0xcb3   :  { %v2029_v54 = vpop.xlane.xlu0 %2028  ;;  %v2057_v3 = vpop.permute.xlu1 %2056 }
 0xcb4   :  { %8005 = vpow2.f32 %v2035_v53  ;;  %v2032_v55 = vsub.f32 %v2018_v44, %v2029_v54 }
 0xcb6   :  { %v2037_v56 = vmul.f32 1.442695, %v2032_v55 }
 0xcb8   :  { %8007 = vpow2.f32 %v2037_v56  ;;  %v2309_v56 = vld [vmem:[%s10775_s18 + $0x18] sm:$0xff] }
 0xcbd   :  { %v8004_v20 = vpop.eup %8003 }
 0xcbe   :  { %v2039_v57 = vsel %vm476_vm2, %v8004_v20, 0.0 }
 0xcbf   :  { %2040 = vadd.xlane.f32.xlu0 %v2039_v57  ;;  %v2307_v57 = vld [vmem:[%s10775_s18 + $0x8] sm:$0xff] }
 0xcc1   :  { %v8006_v58 = vpop.eup %8005 }
 0xcc2   :  { %v2042_v59 = vsel %vm476_vm2, %v8006_v58, 0.0 }
 0xcc3   :  { %2043 = vadd.xlane.f32.xlu0 %v2042_v59 }
 0xcc5   :  { %v8008_v60 = vpop.eup %8007 }
 0xcc6   :  { %v2045_v61 = vsel %vm476_vm2, %v8008_v60, 0.0 }
 0xcc7   :  { %2046 = vadd.xlane.f32.xlu1 %v2045_v61 }
 0xcd8   :  { %2054 = vrot.lane.b32.xlu1 %v9043_v18, %s8463_s16 }
 0xcd9   :  { %2058 = vrot.lane.b32.xlu0 %v9049_v22, %s8463_s16 }
 0xcdb   :  { %v1904_v62 = vpop.f32.mrf.mxu1 }
 0xcdc   :  { %v1916_v40 = vadd.f32 %v6899_v21, %v1904_v62  ;;  %v2500_v21 = vld [vmem:[%s10778_s9 + $0x68] sm:$0xff] }
 0xcdd   :  { %v7435_v63 = vpop.f32.mrf.mxu1 }
 0xd48   :  { %v2041_v2 = vpop.xlane.xlu0 %2040 }
 0xd49   :  { %8009 = vrcp.f32 %v2041_v2 }
 0xd4c   :  { %v2044_v4 = vpop.xlane.xlu0 %2043 }
 0xd4d   :  { %8011 = vrcp.f32 %v2044_v4 }
 0xd50   :  { %v2047_v5 = vpop.xlane.xlu1 %2046  ;;  %v2059_v6 = vpop.permute.xlu0 %2058 }
 0xd51   :  { %8013 = vrcp.f32 %v2047_v5  ;;  %7452 = vmatpush3.msra.mxu1 %v2059_v6  ;;  %v6912_v6 = vld [vmem:[%s10776_s0] ss:$0 sm:$0xff] }
 0xd52   :  { %7453 = vmatprep.subr.mxu1 %v8457_v0 }
 0xd53   :  { %7454 = vmatpush3.msra.mxu1 %v2057_v3 }
 0xd54   :  { %v2055_v18 = vpop.permute.xlu1 %2054  ;;  %7455 = vmatprep.subr.mxu1 %v8457_v0 }
 0xd55   :  { %7456 = vmatpush3.msra.mxu1 %v2055_v18 }
 0xd56   :  { %v8010_v22 = vpop.eup %8009  ;;  %7479 = vmatprep.subr.mxu1 %v8457_v0 }
 0xd57   :  { %v2049_v7 = vmul.f32 %v8010_v22, %v8004_v20  ;;  %v2308_v20 = vld [vmem:[%s10775_s18 + $0x10] sm:$0xff]  ;;  %v6913_v22 = vld [vmem:[%s10777_s24] ss:$0 sm:$0xff] }
 0xd59   :  { %7458 = vmatmul.mubr.msk.f32.vlgmr.msra.gmra.mxu1 %vm476_vm2, %v2049_v7 }
 0xd5a   :  { %v8012_v8 = vpop.eup %8011  ;;  %7460 = vmatprep.mubr.msk.f32.mxu1 %vm8458_vm1, %v8457_v0  ;;  %7480 = vmatpush3.msra.mxu1 %v2309_v56 }
 0xd5b   :  { %v2051_v9 = vmul.f32 %v8012_v8, %v8006_v58  ;;  %7481 = vmatprep.subr.mxu1 %v8457_v0  ;;  %v2306_v58 = vld [vmem:[%s10775_s18] sm:$0xff] }
 0xd5c   :  { %7482 = vmatpush3.msra.mxu1 %v2308_v20 }
 0xd5d   :  { %7461 = vmatmul.mubr.msk.f32.gmra.mxu1 %vm476_vm2, %v2051_v9  ;;  %7483 = vmatprep.subr.mxu1 %v8457_v0 }
 0xd5e   :  { %v8014_v10 = vpop.eup %8013  ;;  %7463 = vmatprep.mubr.msk.f32.mxu1 %vm8458_vm1, %v8457_v0  ;;  %7484 = vmatpush3.msra.mxu1 %v2307_v57 }
 0xd5f   :  { %v2053_v11 = vmul.f32 %v8014_v10, %v8008_v60  ;;  %7485 = vmatprep.subr.mxu1 %v8457_v0 }
 0xd60   :  { %7486 = vmatpush3.msra.mxu1 %v2306_v58 }
 0xd61   :  { %7464 = vmatmul.mubr.msk.f32.gmra.mxu1 %vm476_vm2, %v2053_v11  ;;  %7537 = vmatprep.subr.mxu1 %v8457_v0 }
 0xd62   :  { %7487 = vmatprep.mubr.msk.f32.mxu1 %vm8458_vm1, %v8457_v0 }
 0xe19   :  { %v2138_v13 = vpop.f32.mrf.mxu1 }
 0xe1a   :  { %7471 = vmatmul.mubr.msk.f32.vlgmr.msra.gmra.mxu0 %vm566_vm3, %v2138_v13 }
 0xe1b   :  { %v7459_v14 = vpop.f32.mrf.mxu1  ;;  %7473 = vmatprep.mubr.msk.f32.mxu0 %vm8458_vm1, %v8457_v0 }
 0xe1d   :  { %v2143_v15 = vpop.f32.mrf.mxu1 }
 0xe1e   :  { %7474 = vmatmul.mubr.msk.f32.gmra.mxu0 %vm566_vm3, %v2143_v15 }
 0xe1f   :  { %v7462_v16 = vpop.f32.mrf.mxu1  ;;  %7476 = vmatprep.mubr.msk.f32.mxu0 %vm8458_vm1, %v8457_v0 }
 0xe21   :  { %v2148_v17 = vpop.f32.mrf.mxu1 }
 0xe22   :  { %7477 = vmatmul.mubr.msk.f32.gmra.mxu0 %vm566_vm3, %v2148_v17  ;;  %v2502_v17 = vld [vmem:[%s10778_s9 + $0x78] sm:$0xff] }
 0xe23   :  { %v7465_v19 = vpop.f32.mrf.mxu1  ;;  %7528 = vmatprep.mubr.msk.f32.mxu0 %vm8458_vm1, %v8457_v0  ;;  %7497 = vmatpush3.msra.mxu0 %v2502_v17 }
 0xe24   :  { %7498 = vmatprep.subr.mxu0 %v8457_v0  ;;  %v2501_v19 = vld [vmem:[%s10778_s9 + $0x70] sm:$0xff] }
 0xe25   :  { %7499 = vmatpush3.msra.mxu0 %v2501_v19 }
 0xe26   :  { %7500 = vmatprep.subr.mxu0 %v8457_v0 }
 0xe27   :  { %7501 = vmatpush3.msra.mxu0 %v2500_v21 }
 0xe28   :  { %7502 = vmatprep.subr.mxu0 %v8457_v0 }
 0xeda   :  { %v2227_v24 = vpop.f32.mrf.mxu0 }
 0xedb   :  { %v2241_v26 = vadd.f32 %v2227_v24, %v1914_v23  ;;  %v2499_v23 = vld [vmem:[%s10778_s9 + $0x60] sm:$0xff]  ;;  %v2498_v24 = vld [vmem:[%s10778_s9 + $0x58] sm:$0xff] }
 0xedc   :  { %v7472_v27 = vpop.f32.mrf.mxu0  ;;  %7503 = vmatpush3.msra.mxu0 %v2499_v23 }
 0xedd   :  { %v9194_v29 = vadd.f32 %v2241_v26, %v9004_v25  ;;  %7504 = vmatprep.subr.mxu0 %v8457_v0  ;;  %v2497_v26 = vld [vmem:[%s10778_s9 + $0x50] sm:$0xff]  ;;  %v2496_v27 = vld [vmem:[%s10778_s9 + $0x48] sm:$0xff] }
 0xede   :  { %v2232_v30 = vpop.f32.mrf.mxu0  ;;  %7505 = vmatpush3.msra.mxu0 %v2498_v24 }
 0xedf   :  { %v2242_v33 = vadd.f32 %v2232_v30, %v1915_v28  ;;  %v2249_v34 = vsel %vm1424_vm12, %v9194_v29, 0.0  ;;  %7506 = vmatprep.subr.mxu0 %v8457_v0  ;;  %v2495_v28 = vld [vmem:[%s10778_s9 + $0x40] sm:$0xff]  ;;  %v2494_v30 = vld [vmem:[%s10778_s9 + $0x38] sm:$0xff] }
 0xee0   :  { %2250 = vadd.xlane.f32.xlu1 %v2249_v34  ;;  %v7475_v35 = vpop.f32.mrf.mxu0  ;;  %7507 = vmatpush3.msra.mxu0 %v2497_v26  ;;  %v2492_v34 = vld [vmem:[%s10778_s9 + $0x28] sm:$0xff] }
 0xee1   :  { %v9199_v41 = vadd.f32 %v2242_v33, %v9009_v31  ;;  %7508 = vmatprep.subr.mxu0 %v8457_v0  ;;  %v2493_v33 = vld [vmem:[%s10778_s9 + $0x30] sm:$0xff]  ;;  %v2491_v35 = vld [vmem:[%s10778_s9 + $0x20] sm:$0xff] }
 0xee2   :  { %v2237_v39 = vpop.f32.mrf.mxu0  ;;  %7509 = vmatpush3.msra.mxu0 %v2496_v27 }
 0xee3   :  { %v2243_v42 = vadd.f32 %v2237_v39, %v1916_v40  ;;  %v2252_v37 = vsel %vm1424_vm12, %v9199_v41, 0.0  ;;  %7510 = vmatprep.subr.mxu0 %v8457_v0  ;;  %v2490_v40 = vld [vmem:[%s10778_s9 + $0x18] sm:$0xff]  ;;  %v2489_v39 = vld [vmem:[%s10778_s9 + $0x10] sm:$0xff] }
 0xee4   :  { %2253 = vadd.xlane.f32.xlu0 %v2252_v37  ;;  %v7478_v44 = vpop.f32.mrf.mxu0  ;;  %7511 = vmatpush3.msra.mxu0 %v2495_v28  ;;  %v2487_v37 = vld [vmem:[%s10778_s9] sm:$0xff] }
 0xee5   :  { %v9204_v25 = vadd.f32 %v2243_v42, %v9014_v38  ;;  %7512 = vmatprep.subr.mxu0 %v8457_v0  ;;  %v2488_v42 = vld [vmem:[%s10778_s9 + $0x8] sm:$0xff]  ;;  %v6914_v44 = vld [vmem:[#allocation2] ss:$0 sm:$0xff] }
 0xee6   :  { %7513 = vmatpush3.msra.mxu0 %v2494_v30 }
 0xee7   :  { %v2255_v45 = vsel %vm1424_vm12, %v9204_v25, 0.0  ;;  %7514 = vmatprep.subr.mxu0 %v8457_v0 }
 0xee8   :  { %2256 = vadd.xlane.f32.xlu0 %v2255_v45  ;;  %7515 = vmatpush3.msra.mxu0 %v2493_v33 }
 0xee9   :  { %7516 = vmatprep.subr.mxu0 %v8457_v0 }
 0xeea   :  { %7517 = vmatpush3.msra.mxu0 %v2492_v34 }
 0xeeb   :  { %7518 = vmatprep.subr.mxu0 %v8457_v0 }
 0xeec   :  { %7519 = vmatpush3.msra.mxu0 %v2491_v35 }
 0xeed   :  { %7520 = vmatprep.subr.mxu0 %v8457_v0 }
 0xeee   :  { %7521 = vmatpush3.msra.mxu0 %v2490_v40 }
 0xeef   :  { %7522 = vmatprep.subr.mxu0 %v8457_v0 }
 0xef0   :  { %7523 = vmatpush3.msra.mxu0 %v2489_v39 }
 0xef1   :  { %7524 = vmatprep.subr.mxu0 %v8457_v0 }
 0xef2   :  { %7525 = vmatpush3.msra.mxu0 %v2488_v42 }
 0xef3   :  { %7526 = vmatprep.subr.mxu0 %v8457_v0 }
 0xef4   :  { %7527 = vmatpush3.msra.mxu0 %v2487_v37 }
 0xef5   :  { %7569 = vmatprep.subr.mxu0 %v8457_v0 }
 0xf69   :  { %v2251_v46 = vpop.xlane.xlu1 %2250 }
 0xf6a   :  { %v2258_v32 = vmul.f32 0.03125, %v2251_v46 }
 0xf6c   :  { %v2261_v47 = vsub.f32 %v9194_v29, %v2258_v32 }
 0xf6d   :  { %v2254_v31 = vpop.xlane.xlu0 %2253 }
 0xf6e   :  { %v2259_v48 = vmul.f32 0.03125, %v2254_v31  ;;  %v2264_v36 = vmul.f32 %v2261_v47, %v2261_v47 }
 0xf70   :  { %v2262_v49 = vsub.f32 %v9199_v41, %v2259_v48  ;;  %v2267_v50 = vsel %vm1424_vm12, %v2264_v36, 0.0 }
 0xf71   :  { %2268 = vadd.xlane.f32.xlu0 %v2267_v50  ;;  %v2257_v38 = vpop.xlane.xlu0 %2256 }
 0xf72   :  { %v2260_v51 = vmul.f32 0.03125, %v2257_v38  ;;  %v2265_v52 = vmul.f32 %v2262_v49, %v2262_v49 }
 0xf74   :  { %v2263_v43 = vsub.f32 %v9204_v25, %v2260_v51  ;;  %v2270_v53 = vsel %vm1424_vm12, %v2265_v52, 0.0 }
 0xf75   :  { %2271 = vadd.xlane.f32.xlu1 %v2270_v53 }
 0xf76   :  { %v2266_v54 = vmul.f32 %v2263_v43, %v2263_v43 }
 0xf78   :  { %v2273_v55 = vsel %vm1424_vm12, %v2266_v54, 0.0 }
 0xf79   :  { %2274 = vadd.xlane.f32.xlu0 %v2273_v55 }
 0xffa   :  { %v2269_v59 = vpop.xlane.xlu0 %2268 }
 0xffb   :  { %v2276_v60 = vmul.f32 0.03125, %v2269_v59 }
 0xffd   :  { %v2279_v61 = vadd.f32 1e-05, %v2276_v60 }
 0xffe   :  { %v2272_v62 = vpop.xlane.xlu1 %2271 }
 0xfff   :  { %8015 = vrsqrt.f32 %v2279_v61  ;;  %v2277_v63 = vmul.f32 0.03125, %v2272_v62 }
0x1001   :  { %v2280_v1 = vadd.f32 1e-05, %v2277_v63 }
0x1002   :  { %v2275_v2 = vpop.xlane.xlu0 %2274 }
0x1003   :  { %8017 = vrsqrt.f32 %v2280_v1  ;;  %v2278_v3 = vmul.f32 0.03125, %v2275_v2 }
0x1005   :  { %v2281_v4 = vadd.f32 1e-05, %v2278_v3 }
0x1007   :  { %8019 = vrsqrt.f32 %v2281_v4 }
0x100c   :  { %v8016_v5 = vpop.eup %8015 }
0x100d   :  { %v2285_v18 = vmul.f32 %v8016_v5, %v2261_v47 }
0x100f   :  { %v2294_v7 = vmul.f32 %v6912_v6, %v2285_v18 }
0x1010   :  { %v8018_v8 = vpop.eup %8017 }
0x1011   :  { %v2303_v9 = vadd.f32 %v6913_v22, %v2294_v7  ;;  %v2286_v10 = vmul.f32 %v8018_v8, %v2262_v49 }
0x1013   :  { %7488 = vmatmul.mubr.msk.f32.vlgmr.msra.gmra.mxu1 %vm1424_vm12, %v2303_v9  ;;  %v2295_v11 = vmul.f32 %v6912_v6, %v2286_v10 }
0x1014   :  { %v8020_v12 = vpop.eup %8019  ;;  %7490 = vmatprep.mubr.msk.f32.mxu1 %vm8458_vm1, %v8457_v0 }
0x1015   :  { %v2304_v13 = vadd.f32 %v6913_v22, %v2295_v11  ;;  %v2287_v14 = vmul.f32 %v8020_v12, %v2263_v43 }
0x1017   :  { %7491 = vmatmul.mubr.msk.f32.gmra.mxu1 %vm1424_vm12, %v2304_v13  ;;  %v2296_v15 = vmul.f32 %v6912_v6, %v2287_v14 }
0x1018   :  { %7493 = vmatprep.mubr.msk.f32.mxu1 %vm8458_vm1, %v8457_v0 }
0x1019   :  { %v2305_v16 = vadd.f32 %v6913_v22, %v2296_v15 }
0x101b   :  { %7494 = vmatmul.mubr.msk.f32.gmra.mxu1 %vm1424_vm12, %v2305_v16 }
0x101c   :  { %7545 = vmatprep.mubr.msk.f32.mxu1 %vm8458_vm1, %v8457_v0 }
0x10d3   :  { %v2392_v45 = vpop.f32.mrf.mxu1 }
0x10d4   :  { %v9265_v46 = vadd.f32 %v6914_v44, %v2392_v45 }
0x10d5   :  { %v7489_v32 = vpop.f32.mrf.mxu1 }
0x10d6   :  { %v9268_v47 = vmul.f32 0.70710677, %v9265_v46 }
0x10d7   :  { %v2397_v31 = vpop.f32.mrf.mxu1 }
0x10d8   :  { %v2412_v48 = vand.u32 2147483647, %v9268_v47  ;;  %v9271_v36 = vadd.f32 %v6914_v44, %v2397_v31  ;;  %vm2472_vm13 = vcmp.ge.f32.partialorder %v9268_v47, 0.0 }
0x10d9   :  { %v7492_v49 = vpop.f32.mrf.mxu1 }
0x10da   :  { %v2415_v50 = vmul.f32 0.3275911, %v2412_v48  ;;  %v9274_v38 = vmul.f32 0.70710677, %v9271_v36  ;;  %v2454_v59 = vsub.f32 0.0, %v2412_v48 }
0x10db   :  { %v2402_v51 = vpop.f32.mrf.mxu1 }
0x10dc   :  { %v2418_v52 = vadd.f32 1.0, %v2415_v50  ;;  %v2413_v43 = vand.u32 2147483647, %v9274_v38  ;;  %v9277_v53 = vadd.f32 %v6914_v44, %v2402_v51  ;;  %v2457_v61 = vmul.f32 %v2454_v59, %v2412_v48 }
0x10dd   :  { %v7495_v54 = vpop.f32.mrf.mxu1  ;;  %vm2473_vm14 = vcmp.ge.f32.partialorder %v9274_v38, 0.0 }
0x10de   :  { %8021 = vrcp.f32 %v2418_v52  ;;  %v2416_v55 = vmul.f32 0.3275911, %v2413_v43  ;;  %v9280_v56 = vmul.f32 0.70710677, %v9277_v53  ;;  %v2455_v62 = vsub.f32 0.0, %v2413_v43 }
0x10df   :  { %v2460_v2 = vmul.f32 1.442695, %v2457_v61  ;;  %v2406_v52 = vmul.f32 0.5, %v9265_v46 }
0x10e0   :  { %v2419_v20 = vadd.f32 1.0, %v2416_v55  ;;  %v2414_v57 = vand.u32 2147483647, %v9280_v56  ;;  %v2458_v3 = vmul.f32 %v2455_v62, %v2413_v43  ;;  %vm2474_vm15 = vcmp.ge.f32.partialorder %v9280_v56, 0.0 }
0x10e2   :  { %8023 = vrcp.f32 %v2419_v20  ;;  %v2417_v58 = vmul.f32 0.3275911, %v2414_v57  ;;  %v2456_v4 = vsub.f32 0.0, %v2414_v57  ;;  %v2462_v22 = vmul.f32 1.442695, %v2458_v3 }
0x10e3   :  { %v6918_v3 = vld [vmem:[#allocation4] ss:$0 sm:$0xff] }
0x10e4   :  { %v2420_v60 = vadd.f32 1.0, %v2417_v58  ;;  %v2459_v8 = vmul.f32 %v2456_v4, %v2414_v57 }
0x10e6   :  { %8025 = vrcp.f32 %v2420_v60  ;;  %v2464_v14 = vmul.f32 1.442695, %v2459_v8  ;;  %v2407_v60 = vmul.f32 0.5, %v9271_v36 }
0x10e7   :  { %8027 = vpow2.f32 %v2460_v2 }
0x10e8   :  { %8029 = vpow2.f32 %v2462_v22 }
0x10e9   :  { %8031 = vpow2.f32 %v2464_v14 }
0x10eb   :  { %v8022_v63 = vpop.eup %8021 }
0x10ec   :  { %v2427_v1 = vmul.f32 1.0614054, %v8022_v63 }
0x10ee   :  { %v2430_v5 = vadd.f32 -1.4531521, %v2427_v1  ;;  %v2408_v1 = vmul.f32 0.5, %v9277_v53 }
0x10ef   :  { %v8024_v6 = vpop.eup %8023 }
0x10f0   :  { %v2433_v18 = vmul.f32 %v8022_v63, %v2430_v5  ;;  %v2428_v7 = vmul.f32 1.0614054, %v8024_v6 }
0x10f2   :  { %v2436_v9 = vadd.f32 1.4214138, %v2433_v18  ;;  %v2431_v10 = vadd.f32 -1.4531521, %v2428_v7 }
0x10f3   :  { %v8026_v11 = vpop.eup %8025 }
0x10f4   :  { %v2439_v12 = vmul.f32 %v8022_v63, %v2436_v9  ;;  %v2434_v13 = vmul.f32 %v8024_v6, %v2431_v10  ;;  %v2429_v15 = vmul.f32 1.0614054, %v8026_v11  ;;  %v8028_v34 = vpop.eup %8027 }
0x10f5   :  { %v8030_v45 = vpop.eup %8029 }
0x10f6   :  { %v2442_v16 = vadd.f32 -0.28449672, %v2439_v12  ;;  %v2437_v17 = vadd.f32 1.4214138, %v2434_v13  ;;  %v2432_v19 = vadd.f32 -1.4531521, %v2429_v15  ;;  %v8032_v55 = vpop.eup %8031 }
0x10f8   :  { %v2445_v21 = vmul.f32 %v8022_v63, %v2442_v16  ;;  %v2440_v23 = vmul.f32 %v8024_v6, %v2437_v17  ;;  %v2435_v24 = vmul.f32 %v8026_v11, %v2432_v19 }
0x10fa   :  { %v2448_v26 = vadd.f32 0.2548296, %v2445_v21  ;;  %v2443_v27 = vadd.f32 -0.28449672, %v2440_v23  ;;  %v2438_v28 = vadd.f32 1.4214138, %v2435_v24 }
0x10fc   :  { %v2451_v30 = vmul.f32 %v8022_v63, %v2448_v26  ;;  %v2446_v33 = vmul.f32 %v8024_v6, %v2443_v27  ;;  %v2441_v35 = vmul.f32 %v8026_v11, %v2438_v28 }
0x10fe   :  { %v2466_v40 = vmul.f32 %v8028_v34, %v2451_v30  ;;  %v2449_v39 = vadd.f32 0.2548296, %v2446_v33  ;;  %v2444_v42 = vadd.f32 -0.28449672, %v2441_v35  ;;  %v2661_v33 = vld [vmem:[%s10779_s13 + $0x18] sm:$0xff]  ;;  %v2660_v34 = vld [vmem:[%s10779_s13 + $0x10] sm:$0xff] }
0x10ff   :  { %7538 = vmatpush3.msra.mxu1 %v2661_v33  ;;  %v2659_v35 = vld [vmem:[%s10779_s13 + $0x8] sm:$0xff] }
0x1100   :  { %v2469_v37 = vsub.f32 1.0, %v2466_v40  ;;  %v2452_v44 = vmul.f32 %v8024_v6, %v2449_v39  ;;  %v2447_v32 = vmul.f32 %v8026_v11, %v2444_v42  ;;  %7539 = vmatprep.subr.mxu1 %v8457_v0  ;;  %v2658_v40 = vld [vmem:[%s10779_s13] sm:$0xff] }
0x1101   :  { %7540 = vmatpush3.msra.mxu1 %v2660_v34 }
0x1102   :  { %v2475_v31 = vsub.f32 0.0, %v2469_v37  ;;  %v2467_v48 = vmul.f32 %v8030_v45, %v2452_v44  ;;  %v2450_v49 = vadd.f32 0.2548296, %v2447_v32  ;;  %7541 = vmatprep.subr.mxu1 %v8457_v0 }
0x1103   :  { %7542 = vmatpush3.msra.mxu1 %v2659_v35 }
0x1104   :  { %v2478_v50 = vsel %vm2472_vm13, %v2469_v37, %v2475_v31  ;;  %v2470_v51 = vsub.f32 1.0, %v2467_v48  ;;  %v2453_v54 = vmul.f32 %v8026_v11, %v2450_v49  ;;  %7543 = vmatprep.subr.mxu1 %v8457_v0 }
0x1105   :  { %v2481_v43 = vadd.f32 1.0, %v2478_v50  ;;  %7544 = vmatpush3.msra.mxu1 %v2658_v40 }
0x1106   :  { %v2476_v20 = vsub.f32 0.0, %v2470_v51  ;;  %v2468_v58 = vmul.f32 %v8032_v55, %v2453_v54  ;;  %7554 = vmatprep.subr.mxu1 %v8457_v0 }
0x1107   :  { %v2484_v57 = vmul.f32 %v2481_v43, %v2406_v52  ;;  %v6920_v43 = vld [vmem:[#allocation7] ss:$0 sm:$0xff] }
0x1108   :  { %v2479_v59 = vsel %vm2473_vm14, %v2470_v51, %v2476_v20  ;;  %v2471_v62 = vsub.f32 1.0, %v2468_v58  ;;  %v6919_v51 = vld [vmem:[#allocation6] ss:$0 sm:$0xff] }
0x1109   :  { %7529 = vmatmul.mubr.f32.vlgmr.msra.gmra.mxu0 %v2484_v57  ;;  %v2482_v61 = vadd.f32 1.0, %v2479_v59 }
0x110a   :  { %7531 = vmatprep.mubr.msk.f32.mxu0 %vm8458_vm1, %v8457_v0  ;;  %v2477_v63 = vsub.f32 0.0, %v2471_v62 }
0x110b   :  { %v2485_v47 = vmul.f32 %v2482_v61, %v2407_v60 }
0x110c   :  { %v2480_v46 = vsel %vm2474_vm15, %v2471_v62, %v2477_v63 }
0x110d   :  { %7532 = vmatmul.mubr.f32.gmra.mxu0 %v2485_v47  ;;  %v2483_v38 = vadd.f32 1.0, %v2480_v46 }
0x110e   :  { %7534 = vmatprep.mubr.msk.f32.mxu0 %vm8458_vm1, %v8457_v0 }
0x110f   :  { %v2486_v2 = vmul.f32 %v2483_v38, %v2408_v1 }
0x1111   :  { %7535 = vmatmul.mubr.f32.gmra.mxu0 %v2486_v2 }
0x1112   :  { %7575 = vmatprep.mubr.msk.f32.mxu0 %vm8458_vm1, %v8457_v0 }
0x11c9   :  { %v2569_v36 = vpop.f32.mrf.mxu0 }
0x11ca   :  { %v2583_v4 = vadd.f32 %v2569_v36, %v9194_v29 }
0x11cb   :  { %v7530_v5 = vpop.f32.mrf.mxu0 }
0x11cc   :  { %v9296_v6 = vadd.f32 %v6918_v3, %v2583_v4 }
0x11cd   :  { %v2574_v56 = vpop.f32.mrf.mxu0 }
0x11ce   :  { %v2584_v18 = vadd.f32 %v2574_v56, %v9199_v41  ;;  %v2601_v53 = vsel %vm1424_vm12, %v9296_v6, 0.0 }
0x11cf   :  { %2602 = vadd.xlane.f32.xlu1 %v2601_v53  ;;  %v7533_v22 = vpop.f32.mrf.mxu0 }
0x11d0   :  { %v9301_v7 = vadd.f32 %v6918_v3, %v2584_v18  ;;  %v9364_v22 = vld [vmem:[%s10780_s5] sm:$0xff] }
0x11d1   :  { %v2579_v8 = vpop.f32.mrf.mxu0 }
0x11d2   :  { %v2604_v9 = vsel %vm1424_vm12, %v9301_v7, 0.0  ;;  %v2585_v10 = vadd.f32 %v2579_v8, %v9204_v25 }
0x11d3   :  { %2605 = vadd.xlane.f32.xlu0 %v2604_v9  ;;  %v7536_v29 = vpop.f32.mrf.mxu0 }
0x11d4   :  { %v9306_v11 = vadd.f32 %v6918_v3, %v2585_v10  ;;  %v9368_v29 = vld [vmem:[%s10780_s5 + $0x8] sm:$0xff] }
0x11d6   :  { %v2607_v41 = vsel %vm1424_vm12, %v9306_v11, 0.0 }
0x11d7   :  { %2608 = vadd.xlane.f32.xlu1 %v2607_v41 }
0x1258   :  { %v2603_v12 = vpop.xlane.xlu1 %2602 }
0x1259   :  { %v2610_v13 = vmul.f32 0.03125, %v2603_v12 }
0x125b   :  { %v2613_v14 = vsub.f32 %v9296_v6, %v2610_v13 }
0x125c   :  { %v2606_v15 = vpop.xlane.xlu0 %2605 }
0x125d   :  { %v2611_v16 = vmul.f32 0.03125, %v2606_v15  ;;  %v2616_v17 = vmul.f32 %v2613_v14, %v2613_v14  ;;  %v9373_v15 = vld [vmem:[%s10780_s5 + $0x10] sm:$0xff] }
0x125f   :  { %v2614_v19 = vsub.f32 %v9301_v7, %v2611_v16  ;;  %v2619_v25 = vsel %vm1424_vm12, %v2616_v17, 0.0 }
0x1260   :  { %2620 = vadd.xlane.f32.xlu0 %v2619_v25  ;;  %v2609_v21 = vpop.xlane.xlu1 %2608 }
0x1261   :  { %v2617_v23 = vmul.f32 %v2614_v19, %v2614_v19  ;;  %v2612_v24 = vmul.f32 0.03125, %v2609_v21 }
0x1263   :  { %v2622_v26 = vsel %vm1424_vm12, %v2617_v23, 0.0  ;;  %v2615_v27 = vsub.f32 %v9306_v11, %v2612_v24 }
0x1264   :  { %2623 = vadd.xlane.f32.xlu1 %v2622_v26 }
0x1265   :  { %v2618_v28 = vmul.f32 %v2615_v27, %v2615_v27 }
0x1267   :  { %v2625_v30 = vsel %vm1424_vm12, %v2618_v28, 0.0 }
0x1268   :  { %2626 = vadd.xlane.f32.xlu0 %v2625_v30 }
0x12e9   :  { %v2621_v39 = vpop.xlane.xlu0 %2620 }
0x12ea   :  { %v2628_v42 = vmul.f32 0.03125, %v2621_v39 }
0x12ec   :  { %v2631_v37 = vadd.f32 1e-05, %v2628_v42 }
0x12ed   :  { %v2624_v44 = vpop.xlane.xlu1 %2623 }
0x12ee   :  { %8033 = vrsqrt.f32 %v2631_v37  ;;  %v2629_v45 = vmul.f32 0.03125, %v2624_v44 }
0x12f0   :  { %v2632_v32 = vadd.f32 1e-05, %v2629_v45 }
0x12f1   :  { %v2627_v31 = vpop.xlane.xlu0 %2626 }
0x12f2   :  { %8035 = vrsqrt.f32 %v2632_v32  ;;  %v2630_v48 = vmul.f32 0.03125, %v2627_v31 }
0x12f4   :  { %v2633_v49 = vadd.f32 1e-05, %v2630_v48 }
0x12f6   :  { %8037 = vrsqrt.f32 %v2633_v49  ;;  %v2752_v49 = vld [vmem:[%s10781_s17 + $0x8] sm:$0xff] }
0x12fb   :  { %v8034_v50 = vpop.eup %8033 }
0x12fc   :  { %v2637_v52 = vmul.f32 %v8034_v50, %v2613_v14 }
0x12fe   :  { %v2646_v54 = vmul.f32 %v6919_v51, %v2637_v52 }
0x12ff   :  { %v8036_v55 = vpop.eup %8035 }
0x1300   :  { %v2655_v20 = vadd.f32 %v6920_v43, %v2646_v54  ;;  %v2638_v57 = vmul.f32 %v8036_v55, %v2614_v19 }
0x1302   :  { %7546 = vmatmul.mubr.msk.f32.vlgmr.msra.gmra.mxu1 %vm1424_vm12, %v2655_v20  ;;  %v2647_v58 = vmul.f32 %v6919_v51, %v2638_v57 }
0x1303   :  { %7548 = vmatprep.mubr.msk.f32.mxu1 %vm8458_vm1, %v8457_v0  ;;  %v8038_v59 = vpop.eup %8037 }
0x1304   :  { %v2656_v60 = vadd.f32 %v6920_v43, %v2647_v58  ;;  %v2639_v61 = vmul.f32 %v8038_v59, %v2615_v27 }
0x1306   :  { %7549 = vmatmul.mubr.msk.f32.gmra.mxu1 %vm1424_vm12, %v2656_v60  ;;  %v2648_v62 = vmul.f32 %v6919_v51, %v2639_v61 }
0x1307   :  { %7551 = vmatprep.mubr.msk.f32.mxu1 %vm8458_vm1, %v8457_v0 }
0x1308   :  { %v2657_v47 = vadd.f32 %v6920_v43, %v2648_v62 }
0x130a   :  { %7552 = vmatmul.mubr.msk.f32.gmra.mxu1 %vm1424_vm12, %v2657_v47 }
0x130b   :  { %7560 = vmatprep.mubr.msk.f32.mxu1 %vm8458_vm1, %v8457_v0 }
0x13c2   :  { %v9333_v63 = vpop.f32.mrf.mxu1 }
0x13c3   :  { %v2756_v56 = vmul.f32 0.25, %v9333_v63 }
0x13c4   :  { %v7547_v46 = vpop.f32.mrf.mxu1 }
0x13c6   :  { %v9335_v1 = vpop.f32.mrf.mxu1 }
0x13c7   :  { %2764 = vrot.lane.b32.xlu0 %v9335_v1, %s8459_s25  ;;  %v2757_v18 = vmul.f32 0.25, %v9335_v1 }
0x13c8   :  { %v7550_v38 = vpop.f32.mrf.mxu1 }
0x13c9   :  { %v2751_v38 = vld [vmem:[%s10781_s17] sm:$0xff] }
0x13ca   :  { %v9339_v2 = vpop.f32.mrf.mxu1 }
0x13cb   :  { %2766 = vrot.lane.b32.xlu1 %v9339_v2, %s8459_s25  ;;  %v2758_v53 = vmul.f32 0.25, %v9339_v2 }
0x13cc   :  { %v7553_v36 = vpop.f32.mrf.mxu1 }
0x13cf   :  { %2762 = vrot.lane.b32.xlu1 %v9333_v63, %s8459_s25 }
0x1439   :  { %v2765_v4 = vpop.permute.xlu0 %2764 }
0x143d   :  { %v2767_v3 = vpop.permute.xlu1 %2766 }
0x143e   :  { %7555 = vmatpush3.xpose.msk.msra.mxu1 %vm566_vm3, %v2767_v3 }
0x143f   :  { %7556 = vmatprep.subr.mxu1 %v8457_v0 }
0x1441   :  { %v2763_v5 = vpop.permute.xlu1 %2762 }
0x1442   :  { %7557 = vmatpush3.xpose.msk.msra.mxu1 %vm566_vm3, %v2765_v4 }
0x1443   :  { %7558 = vmatprep.subr.mxu1 %v8457_v0 }
0x1446   :  { %7559 = vmatpush3.xpose.msk.msra.mxu1 %vm566_vm3, %v2763_v5 }
0x1447   :  { %7584 = vmatprep.subr.mxu1 %v8457_v0 }
0x1449   :  { %7561 = vmatmul.mubr.msk.f32.vlgmr.msra.gmra.mxu1 %vm566_vm3, %v2756_v56 }
0x144a   :  { %7563 = vmatprep.mubr.msk.f32.mxu1 %vm8458_vm1, %v8457_v0  ;;  %7585 = vmatpush3.msra.mxu1 %v2752_v49 }
0x144b   :  { %7586 = vmatprep.subr.mxu1 %v8457_v0 }
0x144c   :  { %7587 = vmatpush3.msra.mxu1 %v2751_v38  ;;  %v6936_v38 = vld [vmem:[#allocation9] ss:$0 sm:$0xff] }
0x144d   :  { %7564 = vmatmul.mubr.msk.f32.gmra.mxu1 %vm566_vm3, %v2757_v18  ;;  %7612 = vmatprep.subr.mxu1 %v8457_v0 }
0x144e   :  { %7566 = vmatprep.mubr.msk.f32.mxu1 %vm8458_vm1, %v8457_v0 }
0x1451   :  { %7567 = vmatmul.mubr.msk.f32.gmra.mxu1 %vm566_vm3, %v2758_v53 }
0x1452   :  { %7588 = vmatprep.mubr.msk.f32.mxu1 %vm8458_vm1, %v8457_v0 }
0x1509   :  { %v2849_v8 = vpop.f32.mrf.mxu1 }
0x150a   :  { %v2850_v9 = vadd.f32 %v2849_v8, %v9364_v22 }
0x150b   :  { %v7562_v10 = vpop.f32.mrf.mxu1 }
0x150c   :  { %v2863_v41 = vsel %vm476_vm2, %v2850_v9, -inf }
0x150d   :  { %2864 = vmax.xlane.f32.xlu1 %v2863_v41  ;;  %v2854_v12 = vpop.f32.mrf.mxu1 }
0x150e   :  { %v2855_v13 = vadd.f32 %v2854_v12, %v9368_v29 }
0x150f   :  { %v7565_v14 = vpop.f32.mrf.mxu1 }
0x1510   :  { %v2866_v16 = vsel %vm476_vm2, %v2855_v13, -inf }
0x1511   :  { %2867 = vmax.xlane.f32.xlu0 %v2866_v16  ;;  %v2859_v17 = vpop.f32.mrf.mxu1 }
0x1512   :  { %v2860_v19 = vadd.f32 %v2859_v17, %v9373_v15 }
0x1513   :  { %v7568_v25 = vpop.f32.mrf.mxu1 }
0x1514   :  { %v2869_v21 = vsel %vm476_vm2, %v2860_v19, -inf }
0x1515   :  { %2870 = vmax.xlane.f32.xlu0 %v2869_v21 }
0x151e   :  { %2898 = vrot.lane.b32.xlu1 %v9335_v1, %s8460_s4 }
0x1522   :  { %2896 = vrot.lane.b32.xlu1 %v9333_v63, %s8460_s4 }
0x1526   :  { %3102 = vrot.lane.b32.xlu1 %v9339_v2, %s8461_s11 }
0x152b   :  { %2900 = vrot.lane.b32.xlu0 %v9339_v2, %s8460_s4 }
0x1596   :  { %v2865_v23 = vpop.xlane.xlu1 %2864 }
0x1597   :  { %v2872_v24 = vsub.f32 %v2850_v9, %v2865_v23 }
0x1599   :  { %v2875_v26 = vmul.f32 1.442695, %v2872_v24 }
0x159a   :  { %v2868_v27 = vpop.xlane.xlu0 %2867  ;;  %v2899_v34 = vpop.permute.xlu1 %2898 }
0x159b   :  { %8039 = vpow2.f32 %v2875_v26  ;;  %v2873_v28 = vsub.f32 %v2855_v13, %v2868_v27 }
0x159d   :  { %v2877_v30 = vmul.f32 1.442695, %v2873_v28 }
0x159e   :  { %v2871_v33 = vpop.xlane.xlu0 %2870  ;;  %v2897_v40 = vpop.permute.xlu1 %2896 }
0x159f   :  { %8041 = vpow2.f32 %v2877_v30  ;;  %v2874_v45 = vsub.f32 %v2860_v19, %v2871_v33 }
0x15a1   :  { %v2879_v32 = vmul.f32 1.442695, %v2874_v45 }
0x15a2   :  { %v2901_v35 = vpop.permute.xlu0 %2900  ;;  %v3103_v50 = vpop.permute.xlu1 %3102 }
0x15a3   :  { %7570 = vmatpush3.msra.mxu0 %v2901_v35  ;;  %8043 = vpow2.f32 %v2879_v32 }
0x15a4   :  { %7571 = vmatprep.subr.mxu0 %v8457_v0 }
0x15a5   :  { %7572 = vmatpush3.msra.mxu0 %v2899_v34 }
0x15a6   :  { %7573 = vmatprep.subr.mxu0 %v8457_v0 }
0x15a7   :  { %7574 = vmatpush3.msra.mxu0 %v2897_v40 }
0x15a8   :  { %v8040_v39 = vpop.eup %8039  ;;  %7597 = vmatprep.subr.mxu0 %v8457_v0 }
0x15a9   :  { %v2881_v42 = vsel %vm476_vm2, %v8040_v39, 0.0 }
0x15aa   :  { %2882 = vadd.xlane.f32.xlu1 %v2881_v42 }
0x15ac   :  { %v8042_v37 = vpop.eup %8041 }
0x15ad   :  { %v2884_v44 = vsel %vm476_vm2, %v8042_v37, 0.0 }
0x15ae   :  { %2885 = vadd.xlane.f32.xlu0 %v2884_v44 }
0x15b0   :  { %v8044_v31 = vpop.eup %8043 }
0x15b1   :  { %v2887_v48 = vsel %vm476_vm2, %v8044_v31, 0.0 }
0x15bb   :  { %3098 = vrot.lane.b32.xlu1 %v9333_v63, %s8461_s11 }
0x15c4   :  { %3100 = vrot.lane.b32.xlu0 %v9335_v1, %s8461_s11 }
0x15c8   :  { %3092 = vrot.lane.b32.xlu0 %v2756_v56, %s8462_s6 }
0x15cc   :  { %3096 = vrot.lane.b32.xlu0 %v2758_v53, %s8462_s6 }
0x15df   :  { %2888 = vadd.xlane.f32.xlu1 %v2887_v48  ;;  %v2754_v48 = vld [vmem:[%s10781_s17 + $0x18] sm:$0xff] }
0x15f0   :  { %3094 = vrot.lane.b32.xlu1 %v2757_v18, %s8462_s6 }
0x1633   :  { %v2883_v51 = vpop.xlane.xlu1 %2882 }
0x1634   :  { %8045 = vrcp.f32 %v2883_v51 }
0x1637   :  { %v2886_v52 = vpop.xlane.xlu0 %2885  ;;  %v3099_v58 = vpop.permute.xlu1 %3098 }
0x1638   :  { %8047 = vrcp.f32 %v2886_v52 }
0x163b   :  { %v3101_v57 = vpop.permute.xlu0 %3100 }
0x163f   :  { %v3093_v62 = vpop.permute.xlu0 %3092 }
0x1641   :  { %v8046_v43 = vpop.eup %8045 }
0x1642   :  { %v2891_v54 = vmul.f32 %v8046_v43, %v8040_v39 }
0x1643   :  { %v3097_v46 = vpop.permute.xlu0 %3096 }
0x1644   :  { %7576 = vmatmul.mubr.msk.f32.vlgmr.msra.gmra.mxu0 %vm476_vm2, %v2891_v54 }
0x1645   :  { %v8048_v55 = vpop.eup %8047  ;;  %7598 = vmatpush3.xpose.msk.msra.mxu0 %vm566_vm3, %v3103_v50  ;;  %7578 = vmatprep.mubr.msk.f32.mxu0 %vm8458_vm1, %v8457_v0 }
0x1646   :  { %7599 = vmatprep.subr.mxu0 %v8457_v0  ;;  %v2893_v20 = vmul.f32 %v8048_v55, %v8042_v37 }
0x1648   :  { %7579 = vmatmul.mubr.msk.f32.gmra.mxu0 %vm476_vm2, %v2893_v20 }
0x1649   :  { %7600 = vmatpush3.xpose.msk.msra.mxu0 %vm566_vm3, %v3101_v57  ;;  %7581 = vmatprep.mubr.msk.f32.mxu0 %vm8458_vm1, %v8457_v0 }
0x164a   :  { %7601 = vmatprep.subr.mxu0 %v8457_v0 }
0x164d   :  { %7602 = vmatpush3.xpose.msk.msra.mxu0 %vm566_vm3, %v3099_v58  ;;  %v2753_v58 = vld [vmem:[%s10781_s17 + $0x10] sm:$0xff] }
0x164e   :  { %7627 = vmatprep.subr.mxu0 %v8457_v0 }
0x1668   :  { %v2889_v59 = vpop.xlane.xlu1 %2888 }
0x1669   :  { %8049 = vrcp.f32 %v2889_v59 }
0x166c   :  { %v3095_v47 = vpop.permute.xlu1 %3094 }
0x1676   :  { %v8050_v60 = vpop.eup %8049 }
0x1677   :  { %v2895_v61 = vmul.f32 %v8050_v60, %v8044_v31 }
0x1679   :  { %7582 = vmatmul.mubr.msk.f32.gmra.mxu0 %vm476_vm2, %v2895_v61 }
0x167a   :  { %7603 = vmatprep.mubr.msk.f32.mxu0 %vm8458_vm1, %v8457_v0 }
0x167d   :  { %7604 = vmatmul.mubr.msk.f32.vlgmr.msra.gmra.mxu0 %vm566_vm3, %v3093_v62 }
0x167e   :  { %7606 = vmatprep.mubr.msk.f32.mxu0 %vm8458_vm1, %v8457_v0  ;;  %7628 = vmatpush3.msra.mxu0 %v2754_v48 }
0x167f   :  { %7629 = vmatprep.subr.mxu0 %v8457_v0 }
0x1680   :  { %7630 = vmatpush3.msra.mxu0 %v2753_v58 }
0x1681   :  { %7607 = vmatmul.mubr.msk.f32.gmra.mxu0 %vm566_vm3, %v3095_v47  ;;  %7657 = vmatprep.subr.mxu0 %v8457_v0 }
0x1682   :  { %7609 = vmatprep.mubr.msk.f32.mxu0 %vm8458_vm1, %v8457_v0 }
0x1685   :  { %7610 = vmatmul.mubr.msk.f32.gmra.mxu0 %vm566_vm3, %v3097_v46 }
0x1686   :  { %7631 = vmatprep.mubr.msk.f32.mxu0 %vm8458_vm1, %v8457_v0 }
0x1704   :  { %v2980_v36 = vpop.f32.mrf.mxu0 }
0x1705   :  { %7589 = vmatmul.mubr.msk.f32.vlgmr.msra.gmra.mxu1 %vm566_vm3, %v2980_v36 }
0x1706   :  { %v7577_v3 = vpop.f32.mrf.mxu0  ;;  %7591 = vmatprep.mubr.msk.f32.mxu1 %vm8458_vm1, %v8457_v0 }
0x1708   :  { %v2985_v4 = vpop.f32.mrf.mxu0 }
0x1709   :  { %7592 = vmatmul.mubr.msk.f32.gmra.mxu1 %vm566_vm3, %v2985_v4 }
0x170a   :  { %v7580_v5 = vpop.f32.mrf.mxu0  ;;  %7594 = vmatprep.mubr.msk.f32.mxu1 %vm8458_vm1, %v8457_v0 }
0x1739   :  { %v2990_v56 = vpop.f32.mrf.mxu0 }
0x173a   :  { %7595 = vmatmul.mubr.msk.f32.gmra.mxu1 %vm566_vm3, %v2990_v56 }
0x173b   :  { %v7583_v18 = vpop.f32.mrf.mxu0  ;;  %7618 = vmatprep.mubr.msk.f32.mxu1 %vm8458_vm1, %v8457_v0 }
0x173d   :  { %v3182_v53 = vpop.f32.mrf.mxu0 }
0x173e   :  { %v3183_v8 = vadd.f32 %v3182_v53, %v9364_v22 }
0x173f   :  { %v7605_v9 = vpop.f32.mrf.mxu0 }
0x1740   :  { %v3196_v10 = vsel %vm476_vm2, %v3183_v8, -inf }
0x1741   :  { %3197 = vmax.xlane.f32.xlu1 %v3196_v10  ;;  %v3187_v41 = vpop.f32.mrf.mxu0 }
0x1742   :  { %v3188_v12 = vadd.f32 %v3187_v41, %v9368_v29 }
0x1743   :  { %v7608_v13 = vpop.f32.mrf.mxu0 }
0x1744   :  { %v3199_v14 = vsel %vm476_vm2, %v3188_v12, -inf }
0x1745   :  { %3200 = vmax.xlane.f32.xlu0 %v3199_v14  ;;  %v3192_v16 = vpop.f32.mrf.mxu0 }
0x1746   :  { %v3193_v17 = vadd.f32 %v3192_v16, %v9373_v15 }
0x1747   :  { %v7611_v19 = vpop.f32.mrf.mxu0 }
0x1748   :  { %v3202_v25 = vsel %vm476_vm2, %v3193_v17, -inf }
0x1749   :  { %3203 = vmax.xlane.f32.xlu0 %v3202_v25 }
0x1752   :  { %3233 = vrot.lane.b32.xlu1 %v9339_v2, %s8463_s16 }
0x17c5   :  { %v9444_v22 = vpop.f32.mrf.mxu1 }
0x17c6   :  { %v3089_v36 = vadd.f32 %v6936_v38, %v9444_v22 }
0x17c7   :  { %v7590_v21 = vpop.f32.mrf.mxu1 }
0x17c9   :  { %v9446_v23 = vpop.f32.mrf.mxu1 }
0x17ca   :  { %v3198_v29 = vpop.xlane.xlu1 %3197  ;;  %v3090_v56 = vadd.f32 %v6936_v38, %v9446_v23 }
0x17cb   :  { %v3205_v24 = vsub.f32 %v3183_v8, %v3198_v29  ;;  %v7593_v26 = vpop.f32.mrf.mxu1 }
0x17cd   :  { %v3208_v27 = vmul.f32 1.442695, %v3205_v24 }
0x17ce   :  { %v3234_v28 = vpop.permute.xlu1 %3233  ;;  %v3201_v30 = vpop.xlane.xlu0 %3200 }
0x17cf   :  { %8051 = vpow2.f32 %v3208_v27  ;;  %v3206_v15 = vsub.f32 %v3188_v12, %v3201_v30  ;;  %7613 = vmatpush3.msra.mxu1 %v3234_v28 }
0x17d0   :  { %7614 = vmatprep.subr.mxu1 %v8457_v0 }
0x17d1   :  { %v3210_v33 = vmul.f32 1.442695, %v3206_v15 }
0x17d2   :  { %v3204_v34 = vpop.xlane.xlu0 %3203 }
0x17d3   :  { %8053 = vpow2.f32 %v3210_v33  ;;  %v3207_v2 = vsub.f32 %v3193_v17, %v3204_v34 }
0x17d5   :  { %v3212_v35 = vmul.f32 1.442695, %v3207_v2  ;;  %v3484_v2 = vld [vmem:[%s10782_s14 + $0x18] sm:$0xff] }
0x17d7   :  { %8055 = vpow2.f32 %v3212_v35  ;;  %v3483_v35 = vld [vmem:[%s10782_s14 + $0x10] sm:$0xff] }
0x17dc   :  { %v8052_v40 = vpop.eup %8051 }
0x17dd   :  { %v3214_v39 = vsel %vm476_vm2, %v8052_v40, 0.0 }
0x17de   :  { %3215 = vadd.xlane.f32.xlu0 %v3214_v39  ;;  %v3481_v39 = vld [vmem:[%s10782_s14] sm:$0xff] }
0x17e0   :  { %v8054_v42 = vpop.eup %8053 }
0x17e1   :  { %v3217_v37 = vsel %vm476_vm2, %v8054_v42, 0.0 }
0x17e2   :  { %3218 = vadd.xlane.f32.xlu1 %v3217_v37 }
0x17e4   :  { %v8056_v44 = vpop.eup %8055 }
0x17e5   :  { %v3220_v45 = vsel %vm476_vm2, %v8056_v44, 0.0 }
0x17e6   :  { %3221 = vadd.xlane.f32.xlu0 %v3220_v45 }
0x17f3   :  { %3229 = vrot.lane.b32.xlu1 %v9333_v63, %s8463_s16 }
0x17fa   :  { %v3079_v32 = vpop.f32.mrf.mxu1 }
0x17fb   :  { %v3091_v41 = vadd.f32 %v6936_v38, %v3079_v32  ;;  %v3675_v38 = vld [vmem:[%s10783_s30 + $0x68] sm:$0xff] }
0x17fc   :  { %3231 = vrot.lane.b32.xlu0 %v9335_v1, %s8463_s16  ;;  %v7596_v31 = vpop.f32.mrf.mxu1 }
0x1867   :  { %v3216_v49 = vpop.xlane.xlu0 %3215 }
0x1868   :  { %8057 = vrcp.f32 %v3216_v49 }
0x186b   :  { %v3219_v50 = vpop.xlane.xlu1 %3218 }
0x186c   :  { %8059 = vrcp.f32 %v3219_v50 }
0x186f   :  { %v3222_v51 = vpop.xlane.xlu0 %3221  ;;  %v3230_v63 = vpop.permute.xlu1 %3229 }
0x1870   :  { %8061 = vrcp.f32 %v3222_v51 }
0x1873   :  { %v3232_v52 = vpop.permute.xlu0 %3231 }
0x1874   :  { %7615 = vmatpush3.msra.mxu1 %v3232_v52  ;;  %v6949_v52 = vld [vmem:[#allocation10] ss:$0 sm:$0xff] }
0x1875   :  { %v8058_v43 = vpop.eup %8057  ;;  %7616 = vmatprep.subr.mxu1 %v8457_v0 }
0x1876   :  { %v3224_v54 = vmul.f32 %v8058_v43, %v8052_v40  ;;  %7617 = vmatpush3.msra.mxu1 %v3230_v63  ;;  %v3482_v40 = vld [vmem:[%s10782_s14 + $0x8] sm:$0xff] }
0x1877   :  { %7640 = vmatprep.subr.mxu1 %v8457_v0  ;;  %v6950_v63 = vld [vmem:[#allocation12] ss:$0 sm:$0xff] }
0x1878   :  { %7619 = vmatmul.mubr.msk.f32.vlgmr.msra.gmra.mxu1 %vm476_vm2, %v3224_v54 }
0x1879   :  { %v8060_v1 = vpop.eup %8059  ;;  %7621 = vmatprep.mubr.msk.f32.mxu1 %vm8458_vm1, %v8457_v0  ;;  %7641 = vmatpush3.msra.mxu1 %v3484_v2 }
0x187a   :  { %v3226_v55 = vmul.f32 %v8060_v1, %v8054_v42  ;;  %7642 = vmatprep.subr.mxu1 %v8457_v0 }
0x187b   :  { %7643 = vmatpush3.msra.mxu1 %v3483_v35 }
0x187c   :  { %7622 = vmatmul.mubr.msk.f32.gmra.mxu1 %vm476_vm2, %v3226_v55  ;;  %7644 = vmatprep.subr.mxu1 %v8457_v0 }
0x187d   :  { %v8062_v20 = vpop.eup %8061  ;;  %7624 = vmatprep.mubr.msk.f32.mxu1 %vm8458_vm1, %v8457_v0  ;;  %7645 = vmatpush3.msra.mxu1 %v3482_v40 }
0x187e   :  { %v3228_v57 = vmul.f32 %v8062_v20, %v8056_v44  ;;  %7646 = vmatprep.subr.mxu1 %v8457_v0 }
0x187f   :  { %7647 = vmatpush3.msra.mxu1 %v3481_v39 }
0x1880   :  { %7625 = vmatmul.mubr.msk.f32.gmra.mxu1 %vm476_vm2, %v3228_v57  ;;  %7698 = vmatprep.subr.mxu1 %v8457_v0 }
0x1881   :  { %7648 = vmatprep.mubr.msk.f32.mxu1 %vm8458_vm1, %v8457_v0 }
0x1938   :  { %v3313_v59 = vpop.f32.mrf.mxu1 }
0x1939   :  { %7632 = vmatmul.mubr.msk.f32.vlgmr.msra.gmra.mxu0 %vm566_vm3, %v3313_v59 }
0x193a   :  { %v7620_v60 = vpop.f32.mrf.mxu1  ;;  %7634 = vmatprep.mubr.msk.f32.mxu0 %vm8458_vm1, %v8457_v0 }
0x193c   :  { %v3318_v61 = vpop.f32.mrf.mxu1 }
0x193d   :  { %7635 = vmatmul.mubr.msk.f32.gmra.mxu0 %vm566_vm3, %v3318_v61 }
0x193e   :  { %v7623_v62 = vpop.f32.mrf.mxu1  ;;  %7637 = vmatprep.mubr.msk.f32.mxu0 %vm8458_vm1, %v8457_v0 }
0x1940   :  { %v3323_v47 = vpop.f32.mrf.mxu1 }
0x1941   :  { %7638 = vmatmul.mubr.msk.f32.gmra.mxu0 %vm566_vm3, %v3323_v47  ;;  %v3677_v47 = vld [vmem:[%s10783_s30 + $0x78] sm:$0xff] }
0x1942   :  { %v7626_v46 = vpop.f32.mrf.mxu1  ;;  %7689 = vmatprep.mubr.msk.f32.mxu0 %vm8458_vm1, %v8457_v0  ;;  %7658 = vmatpush3.msra.mxu0 %v3677_v47 }
0x1943   :  { %7659 = vmatprep.subr.mxu0 %v8457_v0  ;;  %v3676_v46 = vld [vmem:[%s10783_s30 + $0x70] sm:$0xff] }
0x1944   :  { %7660 = vmatpush3.msra.mxu0 %v3676_v46 }
0x1945   :  { %7661 = vmatprep.subr.mxu0 %v8457_v0 }
0x1946   :  { %7662 = vmatpush3.msra.mxu0 %v3675_v38 }
0x1947   :  { %7663 = vmatprep.subr.mxu0 %v8457_v0 }
0x19f9   :  { %v3402_v3 = vpop.f32.mrf.mxu0 }
0x19fa   :  { %v3416_v4 = vadd.f32 %v3402_v3, %v3089_v36  ;;  %v3674_v36 = vld [vmem:[%s10783_s30 + $0x60] sm:$0xff]  ;;  %v3673_v3 = vld [vmem:[%s10783_s30 + $0x58] sm:$0xff] }
0x19fb   :  { %v7633_v5 = vpop.f32.mrf.mxu0  ;;  %7664 = vmatpush3.msra.mxu0 %v3674_v36 }
0x19fc   :  { %v9483_v18 = vadd.f32 %v3416_v4, %v9296_v6  ;;  %7665 = vmatprep.subr.mxu0 %v8457_v0  ;;  %v3672_v4 = vld [vmem:[%s10783_s30 + $0x50] sm:$0xff]  ;;  %v3671_v5 = vld [vmem:[%s10783_s30 + $0x48] sm:$0xff] }
0x19fd   :  { %v3407_v53 = vpop.f32.mrf.mxu0  ;;  %7666 = vmatpush3.msra.mxu0 %v3673_v3 }
0x19fe   :  { %v3417_v8 = vadd.f32 %v3407_v53, %v3090_v56  ;;  %v3424_v9 = vsel %vm1424_vm12, %v9483_v18, 0.0  ;;  %7667 = vmatprep.subr.mxu0 %v8457_v0  ;;  %v3670_v56 = vld [vmem:[%s10783_s30 + $0x40] sm:$0xff]  ;;  %v3669_v53 = vld [vmem:[%s10783_s30 + $0x38] sm:$0xff] }
0x19ff   :  { %3425 = vadd.xlane.f32.xlu1 %v3424_v9  ;;  %v7636_v10 = vpop.f32.mrf.mxu0  ;;  %7668 = vmatpush3.msra.mxu0 %v3672_v4  ;;  %v3667_v9 = vld [vmem:[%s10783_s30 + $0x28] sm:$0xff] }
0x1a00   :  { %v9488_v12 = vadd.f32 %v3417_v8, %v9301_v7  ;;  %7669 = vmatprep.subr.mxu0 %v8457_v0  ;;  %v3668_v8 = vld [vmem:[%s10783_s30 + $0x30] sm:$0xff]  ;;  %v3666_v10 = vld [vmem:[%s10783_s30 + $0x20] sm:$0xff] }
0x1a01   :  { %v3412_v13 = vpop.f32.mrf.mxu0  ;;  %7670 = vmatpush3.msra.mxu0 %v3671_v5 }
0x1a02   :  { %v3418_v14 = vadd.f32 %v3412_v13, %v3091_v41  ;;  %v3427_v16 = vsel %vm1424_vm12, %v9488_v12, 0.0  ;;  %7671 = vmatprep.subr.mxu0 %v8457_v0  ;;  %v3665_v41 = vld [vmem:[%s10783_s30 + $0x18] sm:$0xff]  ;;  %v3664_v13 = vld [vmem:[%s10783_s30 + $0x10] sm:$0xff] }
0x1a03   :  { %3428 = vadd.xlane.f32.xlu0 %v3427_v16  ;;  %v7639_v17 = vpop.f32.mrf.mxu0  ;;  %7672 = vmatpush3.msra.mxu0 %v3670_v56  ;;  %v3662_v16 = vld [vmem:[%s10783_s30] sm:$0xff] }
0x1a04   :  { %v9493_v6 = vadd.f32 %v3418_v14, %v9306_v11  ;;  %7673 = vmatprep.subr.mxu0 %v8457_v0  ;;  %v3663_v14 = vld [vmem:[%s10783_s30 + $0x8] sm:$0xff]  ;;  %v3774_v17 = vld [vmem:[%s10784_s22 + $0x18] sm:$0xff] }
0x1a05   :  { %7674 = vmatpush3.msra.mxu0 %v3669_v53 }
0x1a06   :  { %v3430_v19 = vsel %vm1424_vm12, %v9493_v6, 0.0  ;;  %7675 = vmatprep.subr.mxu0 %v8457_v0 }
0x1a07   :  { %3431 = vadd.xlane.f32.xlu0 %v3430_v19  ;;  %7676 = vmatpush3.msra.mxu0 %v3668_v8  ;;  %v6951_v19 = vld [vmem:[#allocation13] ss:$0 sm:$0xff] }
0x1a08   :  { %7677 = vmatprep.subr.mxu0 %v8457_v0 }
0x1a09   :  { %7678 = vmatpush3.msra.mxu0 %v3667_v9 }
0x1a0a   :  { %7679 = vmatprep.subr.mxu0 %v8457_v0 }
0x1a0b   :  { %7680 = vmatpush3.msra.mxu0 %v3666_v10 }
0x1a0c   :  { %7681 = vmatprep.subr.mxu0 %v8457_v0 }
0x1a0d   :  { %7682 = vmatpush3.msra.mxu0 %v3665_v41 }
0x1a0e   :  { %7683 = vmatprep.subr.mxu0 %v8457_v0 }
0x1a0f   :  { %7684 = vmatpush3.msra.mxu0 %v3664_v13 }
0x1a10   :  { %7685 = vmatprep.subr.mxu0 %v8457_v0 }
0x1a11   :  { %7686 = vmatpush3.msra.mxu0 %v3663_v14 }
0x1a12   :  { %7687 = vmatprep.subr.mxu0 %v8457_v0 }
0x1a13   :  { %7688 = vmatpush3.msra.mxu0 %v3662_v16 }
0x1a14   :  { %7724 = vmatprep.subr.mxu0 %v8457_v0 }
0x1a88   :  { %v3426_v25 = vpop.xlane.xlu1 %3425 }
0x1a89   :  { %v3433_v22 = vmul.f32 0.03125, %v3426_v25 }
0x1a8b   :  { %v3436_v21 = vsub.f32 %v9483_v18, %v3433_v22 }
0x1a8c   :  { %v3429_v7 = vpop.xlane.xlu0 %3428 }
0x1a8d   :  { %v3434_v23 = vmul.f32 0.03125, %v3429_v7  ;;  %v3439_v29 = vmul.f32 %v3436_v21, %v3436_v21 }
0x1a8f   :  { %v3437_v24 = vsub.f32 %v9488_v12, %v3434_v23  ;;  %v3442_v26 = vsel %vm1424_vm12, %v3439_v29, 0.0 }
0x1a90   :  { %3443 = vadd.xlane.f32.xlu1 %v3442_v26  ;;  %v3432_v11 = vpop.xlane.xlu0 %3431 }
0x1a91   :  { %v3435_v27 = vmul.f32 0.03125, %v3432_v11  ;;  %v3440_v28 = vmul.f32 %v3437_v24, %v3437_v24 }
0x1a93   :  { %v3438_v30 = vsub.f32 %v9493_v6, %v3435_v27  ;;  %v3445_v15 = vsel %vm1424_vm12, %v3440_v28, 0.0 }
0x1a94   :  { %3446 = vadd.xlane.f32.xlu0 %v3445_v15 }
0x1a95   :  { %v3441_v33 = vmul.f32 %v3438_v30, %v3438_v30 }
0x1a97   :  { %v3448_v34 = vsel %vm1424_vm12, %v3441_v33, 0.0 }
0x1a98   :  { %3449 = vadd.xlane.f32.xlu1 %v3448_v34 }
0x1b19   :  { %v3444_v42 = vpop.xlane.xlu1 %3443 }
0x1b1a   :  { %v3451_v37 = vmul.f32 0.03125, %v3444_v42 }
0x1b1c   :  { %v3454_v44 = vadd.f32 1e-05, %v3451_v37 }
0x1b1d   :  { %v3447_v45 = vpop.xlane.xlu0 %3446 }
0x1b1e   :  { %8063 = vrsqrt.f32 %v3454_v44  ;;  %v3452_v32 = vmul.f32 0.03125, %v3447_v45 }
0x1b20   :  { %v3455_v31 = vadd.f32 1e-05, %v3452_v32 }
0x1b21   :  { %v3450_v48 = vpop.xlane.xlu1 %3449 }
0x1b22   :  { %8065 = vrsqrt.f32 %v3455_v31  ;;  %v3453_v49 = vmul.f32 0.03125, %v3450_v48 }
0x1b24   :  { %v3456_v50 = vadd.f32 1e-05, %v3453_v49 }
0x1b26   :  { %8067 = vrsqrt.f32 %v3456_v50 }
0x1b2b   :  { %v8064_v51 = vpop.eup %8063 }
0x1b2c   :  { %v3460_v43 = vmul.f32 %v8064_v51, %v3436_v21 }
0x1b2e   :  { %v3469_v54 = vmul.f32 %v6949_v52, %v3460_v43 }
0x1b2f   :  { %v8066_v1 = vpop.eup %8065 }
0x1b30   :  { %v3478_v55 = vadd.f32 %v6950_v63, %v3469_v54  ;;  %v3461_v20 = vmul.f32 %v8066_v1, %v3437_v24 }
0x1b32   :  { %7649 = vmatmul.mubr.msk.f32.vlgmr.msra.gmra.mxu1 %vm1424_vm12, %v3478_v55  ;;  %v3470_v57 = vmul.f32 %v6949_v52, %v3461_v20 }
0x1b33   :  { %v8068_v58 = vpop.eup %8067  ;;  %7651 = vmatprep.mubr.msk.f32.mxu1 %vm8458_vm1, %v8457_v0  ;;  %7699 = vmatpush3.msra.mxu1 %v3774_v17 }
0x1b34   :  { %v3479_v59 = vadd.f32 %v6950_v63, %v3470_v57  ;;  %v3462_v60 = vmul.f32 %v8068_v58, %v3438_v30  ;;  %7700 = vmatprep.subr.mxu1 %v8457_v0 }
0x1b36   :  { %7652 = vmatmul.mubr.msk.f32.gmra.mxu1 %vm1424_vm12, %v3479_v59  ;;  %v3471_v61 = vmul.f32 %v6949_v52, %v3462_v60 }
0x1b37   :  { %7654 = vmatprep.mubr.msk.f32.mxu1 %vm8458_vm1, %v8457_v0 }
0x1b38   :  { %v3480_v62 = vadd.f32 %v6950_v63, %v3471_v61 }
0x1b3a   :  { %7655 = vmatmul.mubr.msk.f32.gmra.mxu1 %vm1424_vm12, %v3480_v62 }
0x1b3b   :  { %7706 = vmatprep.mubr.msk.f32.mxu1 %vm8458_vm1, %v8457_v0 }
0x1bf2   :  { %v3567_v25 = vpop.f32.mrf.mxu1 }
0x1bf3   :  { %v9554_v22 = vadd.f32 %v6951_v19, %v3567_v25 }
0x1bf4   :  { %v7650_v21 = vpop.f32.mrf.mxu1 }
0x1bf5   :  { %v9557_v7 = vmul.f32 0.70710677, %v9554_v22 }
0x1bf6   :  { %v3572_v23 = vpop.f32.mrf.mxu1 }
0x1bf7   :  { %v3587_v29 = vand.u32 2147483647, %v9557_v7  ;;  %v9560_v24 = vadd.f32 %v6951_v19, %v3572_v23  ;;  %vm3647_vm3 = vcmp.ge.f32.partialorder %v9557_v7, 0.0 }
0x1bf8   :  { %v7653_v26 = vpop.f32.mrf.mxu1 }
0x1bf9   :  { %v3590_v11 = vmul.f32 0.3275911, %v3587_v29  ;;  %v9563_v27 = vmul.f32 0.70710677, %v9560_v24  ;;  %v3629_v37 = vsub.f32 0.0, %v3587_v29 }
0x1bfa   :  { %v3577_v28 = vpop.f32.mrf.mxu1 }
0x1bfb   :  { %v3593_v30 = vadd.f32 1.0, %v3590_v11  ;;  %v3588_v15 = vand.u32 2147483647, %v9563_v27  ;;  %v9566_v33 = vadd.f32 %v6951_v19, %v3577_v28  ;;  %v3632_v45 = vmul.f32 %v3629_v37, %v3587_v29 }
0x1bfc   :  { %v7656_v34 = vpop.f32.mrf.mxu1  ;;  %vm3648_vm6 = vcmp.ge.f32.partialorder %v9563_v27, 0.0 }
0x1bfd   :  { %8069 = vrcp.f32 %v3593_v30  ;;  %v3591_v2 = vmul.f32 0.3275911, %v3588_v15  ;;  %v9569_v35 = vmul.f32 0.70710677, %v9566_v33  ;;  %v3630_v32 = vsub.f32 0.0, %v3588_v15 }
0x1bfe   :  { %v3635_v49 = vmul.f32 1.442695, %v3632_v45  ;;  %v3581_v30 = vmul.f32 0.5, %v9554_v22  ;;  %v3583_v27 = vmul.f32 0.5, %v9566_v33 }
0x1bff   :  { %v3594_v40 = vadd.f32 1.0, %v3591_v2  ;;  %v3589_v39 = vand.u32 2147483647, %v9569_v35  ;;  %v3633_v50 = vmul.f32 %v3630_v32, %v3588_v15  ;;  %vm3649_vm7 = vcmp.ge.f32.partialorder %v9569_v35, 0.0  ;;  %v3771_v35 = vld [vmem:[%s10784_s22] sm:$0xff] }
0x1c01   :  { %8071 = vrcp.f32 %v3594_v40  ;;  %v3592_v42 = vmul.f32 0.3275911, %v3589_v39  ;;  %v3631_v51 = vsub.f32 0.0, %v3589_v39  ;;  %v3637_v54 = vmul.f32 1.442695, %v3633_v50  ;;  %v3772_v50 = vld [vmem:[%s10784_s22 + $0x8] sm:$0xff] }
0x1c03   :  { %v3595_v44 = vadd.f32 1.0, %v3592_v42  ;;  %v3634_v55 = vmul.f32 %v3631_v51, %v3589_v39  ;;  %v6955_v51 = vld [vmem:[#allocation15] ss:$0 sm:$0xff] }
0x1c05   :  { %8073 = vrcp.f32 %v3595_v44  ;;  %v3639_v61 = vmul.f32 1.442695, %v3634_v55  ;;  %v3582_v44 = vmul.f32 0.5, %v9560_v24 }
0x1c06   :  { %8075 = vpow2.f32 %v3635_v49  ;;  %v3773_v49 = vld [vmem:[%s10784_s22 + $0x10] sm:$0xff] }
0x1c07   :  { %8077 = vpow2.f32 %v3637_v54  ;;  %7701 = vmatpush3.msra.mxu1 %v3773_v49  ;;  %v3887_v49 = vld [vmem:[%s10786_s23 + $0x80] sm:$0xff] }
0x1c08   :  { %8079 = vpow2.f32 %v3639_v61  ;;  %7702 = vmatprep.subr.mxu1 %v8457_v0 }
0x1c09   :  { %7703 = vmatpush3.msra.mxu1 %v3772_v50  ;;  %v6967_v50 = vld [vmem:[%s10785_s19 + $0x10] sm:$0x3f] }
0x1c0a   :  { %v8070_v31 = vpop.eup %8069  ;;  %7704 = vmatprep.subr.mxu1 %v8457_v0 }
0x1c0b   :  { %v3602_v48 = vmul.f32 1.0614054, %v8070_v31  ;;  %7705 = vmatpush3.msra.mxu1 %v3771_v35  ;;  %v3916_v35 = vld [vmem:[%s10786_s23 + $0x168] sm:$0xff] }
0x1c0c   :  { %7715 = vmatprep.subr.mxu1 %v8457_v0 }
0x1c0d   :  { %v3605_v52 = vadd.f32 -1.4531521, %v3602_v48 }
0x1c0e   :  { %v8072_v43 = vpop.eup %8071 }
0x1c0f   :  { %v3608_v63 = vmul.f32 %v8070_v31, %v3605_v52  ;;  %v3603_v1 = vmul.f32 1.0614054, %v8072_v43 }
0x1c11   :  { %v3611_v20 = vadd.f32 1.4214138, %v3608_v63  ;;  %v3606_v57 = vadd.f32 -1.4531521, %v3603_v1 }
0x1c12   :  { %v8074_v58 = vpop.eup %8073 }
0x1c13   :  { %v3614_v59 = vmul.f32 %v8070_v31, %v3611_v20  ;;  %v3609_v60 = vmul.f32 %v8072_v43, %v3606_v57  ;;  %v3604_v62 = vmul.f32 1.0614054, %v8074_v58  ;;  %v8076_v10 = vpop.eup %8075 }
0x1c14   :  { %v8078_v25 = vpop.eup %8077 }
0x1c15   :  { %v3617_v47 = vadd.f32 -0.28449672, %v3614_v59  ;;  %v3612_v46 = vadd.f32 1.4214138, %v3609_v60  ;;  %v3607_v38 = vadd.f32 -1.4531521, %v3604_v62  ;;  %v8080_v2 = vpop.eup %8079 }
0x1c17   :  { %v3620_v36 = vmul.f32 %v8070_v31, %v3617_v47  ;;  %v3615_v3 = vmul.f32 %v8072_v43, %v3612_v46  ;;  %v3610_v4 = vmul.f32 %v8074_v58, %v3607_v38  ;;  %v6956_v47 = vld [vmem:[#allocation16] ss:$0 sm:$0xff] }
0x1c19   :  { %v3623_v5 = vadd.f32 0.2548296, %v3620_v36  ;;  %v3618_v56 = vadd.f32 -0.28449672, %v3615_v3  ;;  %v3613_v53 = vadd.f32 1.4214138, %v3610_v4 }
0x1c1a   :  { %v3936_v4 = vld [vmem:[%s10785_s19] sm:$0x3f] }
0x1c1b   :  { %v3626_v8 = vmul.f32 %v8070_v31, %v3623_v5  ;;  %v3621_v9 = vmul.f32 %v8072_v43, %v3618_v56  ;;  %v3616_v41 = vmul.f32 %v8074_v58, %v3613_v53  ;;  %v6963_v5 = vld [vmem:[%s10785_s19 + $0x8] sm:$0x3f]  ;;  %v3883_v53 = vld [vmem:[%s10786_s23 + $0x60] sm:$0xff] }
0x1c1c   :  { %v3884_v56 = vld [vmem:[%s10786_s23 + $0x68] sm:$0xff] }
0x1c1d   :  { %v3641_v13 = vmul.f32 %v8076_v10, %v3626_v8  ;;  %v3624_v14 = vadd.f32 0.2548296, %v3621_v9  ;;  %v3619_v16 = vadd.f32 -0.28449672, %v3616_v41  ;;  %v3880_v8 = vld [vmem:[%s10786_s23 + $0x48] sm:$0xff]  ;;  %v3879_v9 = vld [vmem:[%s10786_s23 + $0x40] sm:$0xff] }
0x1c1e   :  { %v3876_v10 = vld [vmem:[%s10786_s23 + $0x28] sm:$0xff]  ;;  %v3875_v41 = vld [vmem:[%s10786_s23 + $0x20] sm:$0xff] }
0x1c1f   :  { %v3644_v17 = vsub.f32 1.0, %v3641_v13  ;;  %v3627_v19 = vmul.f32 %v8072_v43, %v3624_v14  ;;  %v3622_v21 = vmul.f32 %v8074_v58, %v3619_v16  ;;  %v3872_v13 = vld [vmem:[%s10786_s23 + $0x8] sm:$0xff]  ;;  %v3871_v14 = vld [vmem:[%s10786_s23] sm:$0xff]  ;;  %v3886_v16 = vld [vmem:[%s10786_s23 + $0x78] sm:$0xff] }
0x1c21   :  { %v3650_v23 = vsub.f32 0.0, %v3644_v17  ;;  %v3642_v29 = vmul.f32 %v8078_v25, %v3627_v19  ;;  %v3625_v26 = vadd.f32 0.2548296, %v3622_v21  ;;  %v3901_v19 = vld [vmem:[%s10786_s23 + $0xf0] sm:$0xff]  ;;  %v3898_v25 = vld [vmem:[%s10786_s23 + $0xd8] sm:$0xff] }
0x1c22   :  { %v3897_v21 = vld [vmem:[%s10786_s23 + $0xd0] sm:$0xff] }
0x1c23   :  { %v3653_v11 = vsel %vm3647_vm3, %v3644_v17, %v3650_v23  ;;  %v3645_v28 = vsub.f32 1.0, %v3642_v29  ;;  %v3628_v34 = vmul.f32 %v8074_v58, %v3625_v26  ;;  %v3902_v17 = vld [vmem:[%s10786_s23 + $0xf8] sm:$0xff]  ;;  %v3893_v29 = vld [vmem:[%s10786_s23 + $0xb0] sm:$0xff] }
0x1c24   :  { %v3656_v15 = vadd.f32 1.0, %v3653_v11  ;;  %v3894_v23 = vld [vmem:[%s10786_s23 + $0xb8] sm:$0xff]  ;;  %v3889_v11 = vld [vmem:[%s10786_s23 + $0x90] sm:$0xff] }
0x1c25   :  { %v3651_v40 = vsub.f32 0.0, %v3645_v28  ;;  %v3643_v42 = vmul.f32 %v8080_v2, %v3628_v34  ;;  %v3890_v26 = vld [vmem:[%s10786_s23 + $0x98] sm:$0xff]  ;;  %v3881_v2 = vld [vmem:[%s10786_s23 + $0x50] sm:$0xff] }
0x1c26   :  { %v3659_v39 = vmul.f32 %v3656_v15, %v3581_v30  ;;  %v3882_v15 = vld [vmem:[%s10786_s23 + $0x58] sm:$0xff] }
0x1c27   :  { %v3654_v37 = vsel %vm3648_vm6, %v3645_v28, %v3651_v40  ;;  %v3646_v7 = vsub.f32 1.0, %v3643_v42  ;;  %v3885_v28 = vld [vmem:[%s10786_s23 + $0x70] sm:$0xff]  ;;  %v3878_v40 = vld [vmem:[%s10786_s23 + $0x38] sm:$0xff] }
0x1c28   :  { %7690 = vmatmul.mubr.f32.vlgmr.msra.gmra.mxu0 %v3659_v39  ;;  %v3657_v45 = vadd.f32 1.0, %v3654_v37  ;;  %v3877_v37 = vld [vmem:[%s10786_s23 + $0x30] sm:$0xff] }
0x1c29   :  { %7692 = vmatprep.mubr.msk.f32.mxu0 %vm8458_vm1, %v8457_v0  ;;  %v3652_v32 = vsub.f32 0.0, %v3646_v7 }
0x1c2a   :  { %v3660_v22 = vmul.f32 %v3657_v45, %v3582_v44  ;;  %v3874_v44 = vld [vmem:[%s10786_s23 + $0x18] sm:$0xff]  ;;  %v3873_v45 = vld [vmem:[%s10786_s23 + $0x10] sm:$0xff] }
0x1c2b   :  { %v3655_v31 = vsel %vm3649_vm7, %v3646_v7, %v3652_v32  ;;  %v3900_v7 = vld [vmem:[%s10786_s23 + $0xe8] sm:$0xff] }
0x1c2c   :  { %7693 = vmatmul.mubr.f32.gmra.mxu0 %v3660_v22  ;;  %v3658_v24 = vadd.f32 1.0, %v3655_v31  ;;  %v3899_v22 = vld [vmem:[%s10786_s23 + $0xe0] sm:$0xff]  ;;  %v3896_v32 = vld [vmem:[%s10786_s23 + $0xc8] sm:$0xff] }
0x1c2d   :  { %7695 = vmatprep.mubr.msk.f32.mxu0 %vm8458_vm1, %v8457_v0  ;;  %v3895_v31 = vld [vmem:[%s10786_s23 + $0xc0] sm:$0xff] }
0x1c2e   :  { %v3661_v48 = vmul.f32 %v3658_v24, %v3583_v27  ;;  %v3892_v27 = vld [vmem:[%s10786_s23 + $0xa8] sm:$0xff]  ;;  %v3891_v24 = vld [vmem:[%s10786_s23 + $0xa0] sm:$0xff] }
0x1c30   :  { %7696 = vmatmul.mubr.f32.gmra.mxu0 %v3661_v48  ;;  %v3888_v48 = vld [vmem:[%s10786_s23 + $0x88] sm:$0xff] }
0x1c31   :  { %7730 = vmatprep.mubr.msk.f32.mxu0 %vm8458_vm1, %v8457_v0 }
0x1ce8   :  { %v3744_v33 = vpop.f32.mrf.mxu0 }
0x1ce9   :  { %v3758_v52 = vadd.f32 %v3744_v33, %v9483_v18  ;;  %v3915_v33 = vld [vmem:[%s10786_s23 + $0x160] sm:$0xff] }
0x1cea   :  { %v7691_v43 = vpop.f32.mrf.mxu0 }
0x1ceb   :  { %v3768_v63 = vadd.f32 %v6955_v51, %v3758_v52  ;;  %v3912_v52 = vld [vmem:[%s10786_s23 + $0x148] sm:$0xff]  ;;  %v3917_v43 = vld [vmem:[%s10786_s23 + $0x170] sm:$0xff] }
0x1cec   :  { %v3749_v54 = vpop.f32.mrf.mxu0 }
0x1ced   :  { %v3759_v1 = vadd.f32 %v3749_v54, %v9488_v12  ;;  %7707 = vmatmul.mubr.msk.f32.vlgmr.msra.gmra.mxu1 %vm1424_vm12, %v3768_v63  ;;  %v3911_v63 = vld [vmem:[%s10786_s23 + $0x140] sm:$0xff]  ;;  %v3914_v54 = vld [vmem:[%s10786_s23 + $0x158] sm:$0xff] }
0x1cee   :  { %v7694_v55 = vpop.f32.mrf.mxu0  ;;  %7709 = vmatprep.mubr.msk.f32.mxu1 %vm8458_vm1, %v8457_v0 }
0x1cef   :  { %v3769_v20 = vadd.f32 %v6955_v51, %v3759_v1  ;;  %v3908_v1 = vld [vmem:[%s10786_s23 + $0x128] sm:$0xff]  ;;  %v3913_v55 = vld [vmem:[%s10786_s23 + $0x150] sm:$0xff] }
0x1cf0   :  { %v3754_v57 = vpop.f32.mrf.mxu0 }
0x1cf1   :  { %7710 = vmatmul.mubr.msk.f32.gmra.mxu1 %vm1424_vm12, %v3769_v20  ;;  %v3760_v58 = vadd.f32 %v3754_v57, %v9493_v6  ;;  %v3907_v20 = vld [vmem:[%s10786_s23 + $0x120] sm:$0xff]  ;;  %v3910_v57 = vld [vmem:[%s10786_s23 + $0x138] sm:$0xff] }
0x1cf2   :  { %7712 = vmatprep.mubr.msk.f32.mxu1 %vm8458_vm1, %v8457_v0  ;;  %v7697_v18 = vpop.f32.mrf.mxu0 }
0x1cf3   :  { %v3770_v59 = vadd.f32 %v6955_v51, %v3760_v58  ;;  %v3918_v51 = vld [vmem:[%s10786_s23 + $0x178] sm:$0xff]  ;;  %v3904_v58 = vld [vmem:[%s10786_s23 + $0x108] sm:$0xff]  ;;  %v3909_v18 = vld [vmem:[%s10786_s23 + $0x130] sm:$0xff] }
0x1cf5   :  { %7713 = vmatmul.mubr.msk.f32.gmra.mxu1 %vm1424_vm12, %v3770_v59  ;;  %v3903_v59 = vld [vmem:[%s10786_s23 + $0x100] sm:$0xff] }
0x1cf6   :  { %7721 = vmatprep.mubr.msk.f32.mxu1 %vm8458_vm1, %v8457_v0 }
0x1dad   :  { %v3857_v12 = vpop.f32.mrf.mxu1 }
0x1dae   :  { %v9610_v3 = vadd.f32 %v6956_v47, %v3857_v12  ;;  %v3906_v12 = vld [vmem:[%s10786_s23 + $0x118] sm:$0xff] }
0x1daf   :  { %v7708_v60 = vpop.f32.mrf.mxu1 }
0x1db0   :  { %v3905_v60 = vld [vmem:[%s10786_s23 + $0x110] sm:$0xff] }
0x1db1   :  { %v3862_v61 = vpop.f32.mrf.mxu1 }
0x1db2   :  { %v9604_v36 = vadd.f32 %v6956_v47, %v3862_v61  ;;  %v3932_v61 = vld [vmem:[%s10786_s23 + $0x1e8] sm:$0xff] }
0x1db3   :  { %v7711_v62 = vpop.f32.mrf.mxu1 }
0x1db4   :  { %v4158_v62 = vlaneseq }
0x1db5   :  { %v3867_v46 = vpop.f32.mrf.mxu1 }
0x1db6   :  { %v9602_v6 = vadd.f32 %v6956_v47, %v3867_v46  ;;  %v9697_v47 = vshrl.u32 %v4158_v62, 7  ;;  %v4889_v62 = vld [vmem:[%s10788_s28 + $0x80] sm:$0xff] }
0x1db7   :  { %v7714_v38 = vpop.f32.mrf.mxu1 }
0x1db8   :  { %7716 = vmatpush3.msra.mxu1 %v9602_v6  ;;  %7725 = vmatpush3.msra.mxu0 %v9602_v6  ;;  %v10719_v46 = vsub.s32 2, %v9697_v47 }
0x1db9   :  { %7717 = vmatprep.subr.mxu1 %v8457_v0  ;;  %7726 = vmatprep.subr.mxu0 %v8457_v0 }
0x1dba   :  { %7718 = vmatpush3.msra.mxu1 %v9604_v36  ;;  %7727 = vmatpush3.msra.mxu0 %v9604_v36 }
0x1dbb   :  { %7719 = vmatprep.subr.mxu1 %v8457_v0  ;;  %7728 = vmatprep.subr.mxu0 %v8457_v0 }
0x1dbc   :  { %7720 = vmatpush3.msra.mxu1 %v9610_v3  ;;  %7729 = vmatpush3.msra.mxu0 %v9610_v3 }
0x1dbd   :  { %7722 = vmatmul.mubr.msk.f32.vlgmr.msra.gmra.mxu1 %vm476_vm2, %v3936_v4  ;;  %7731 = vmatmul.mubr.msk.f32.vlgmr.msra.gmra.mxu0 %vm476_vm2, %v6963_v5  ;;  %v9701_v4 = vld [vmem:[%s10787_s26] sm:$0xf] }
0x1dbe   :  { %4039 = vmatprep.subr.mxu1 %v3884_v56  ;;  %4079 = vmatprep.mubr.f32.mxu1 %v8457_v0  ;;  %v4169_v5 = vrot.slane %v9701_v4, %v10719_v46 }
0x1dbf   :  { %4040 = vmatpush1.msra.mxu1 %v3883_v53  ;;  %4400 = vmatprep.mubr.f32.mxu0 %v8457_v0  ;;  %v9707_v53 = vsub.s32 0, %v9697_v47 }
0x1dc0   :  { %4041 = vmatprep.subr.mxu1 %v3880_v8  ;;  %4360 = vmatprep.subr.mxu0 %v3902_v17 }
0x1dc1   :  { %4042 = vmatpush1.msra.mxu1 %v3879_v9  ;;  %4361 = vmatpush1.msra.mxu0 %v3901_v19 }
0x1dc2   :  { %4043 = vmatprep.subr.mxu1 %v3876_v10  ;;  %4362 = vmatprep.subr.mxu0 %v3898_v25  ;;  %v9710_v10 = vsub.s32 1, %v9697_v47 }
0x1dc3   :  { %4044 = vmatpush1.msra.mxu1 %v3875_v41  ;;  %4363 = vmatpush1.msra.mxu0 %v3897_v21 }
0x1dc4   :  { %4045 = vmatprep.subr.mxu1 %v3872_v13  ;;  %4364 = vmatprep.subr.mxu0 %v3894_v23  ;;  %v4161_v13 = vrot.slane %v9701_v4, %v9707_v53 }
0x1dc5   :  { %4046 = vmatpush1.msra.mxu1 %v3871_v14  ;;  %4365 = vmatpush1.msra.mxu0 %v3893_v29 }
0x1dc6   :  { %4110 = vmatprep.subr.mxu1 %v3886_v16  ;;  %4366 = vmatprep.subr.mxu0 %v3890_v26  ;;  %v4165_v16 = vrot.slane %v9701_v4, %v9710_v10 }
0x1dc7   :  { %4367 = vmatpush1.msra.mxu0 %v3889_v11 }
0x1dc8   :  { %4518 = vmatprep.subr.mxu0 %v3916_v35 }
0x1e7d   :  { %v4006_v30 = vpop.f32.mrf.mxu1  ;;  %v9643_v34 = vpop.f32.mrf.mxu0 }
0x1e7e   :  { %4011 = vst.msk [vmem:[%s8769_s3] sm:$0x3f] %vm4010_vm8, %v4006_v30  ;;  %6961 = vmatmul.mubr.msk.f32.vlgmr.msra.gmra.mxu1 %vm1424_vm12, %v4006_v30  ;;  %6966 = vmatmul.mubr.msk.f32.vlgmr.msra.gmra.mxu0 %vm1424_vm12, %v9643_v34 }
0x1e7f   :  { %4111 = vmatpush1.msra.mxu1 %v3885_v28  ;;  %v7723_v39 = vpop.f32.mrf.mxu1  ;;  %4150 = vmatprep.mubr.f32.mxu1 %v8457_v0  ;;  %v7732_v42 = vpop.f32.mrf.mxu0  ;;  %v3931_v28 = vld [vmem:[%s10786_s23 + $0x1e0] sm:$0xff] }
0x1e80   :  { %4112 = vmatprep.subr.mxu1 %v3882_v15  ;;  %4558 = vmatprep.mubr.f32.mxu0 %v8457_v0  ;;  %v6971_v15 = vld [vmem:[%s10785_s19 + $0x18] sm:$0x3f]  ;;  %v3927_v39 = vld [vmem:[%s10786_s23 + $0x1c0] sm:$0xff]  ;;  %v3929_v42 = vld [vmem:[%s10786_s23 + $0x1d0] sm:$0xff] }
0x1e81   :  { %4113 = vmatpush1.msra.mxu1 %v3881_v2  ;;  %4519 = vmatpush1.msra.mxu0 %v3915_v33  ;;  %v3934_v2 = vld [vmem:[%s10786_s23 + $0x1f8] sm:$0xff]  ;;  %v4903_v33 = vld [vmem:[%s10788_s28 + $0xf0] sm:$0xff] }
0x1e82   :  { %4114 = vmatprep.subr.mxu1 %v3878_v40  ;;  %4520 = vmatprep.subr.mxu0 %v3912_v52  ;;  %v3930_v40 = vld [vmem:[%s10786_s23 + $0x1d8] sm:$0xff]  ;;  %v4902_v52 = vld [vmem:[%s10788_s28 + $0xe8] sm:$0xff] }
0x1e83   :  { %4115 = vmatpush1.msra.mxu1 %v3877_v37  ;;  %4521 = vmatpush1.msra.mxu0 %v3911_v63  ;;  %v3926_v37 = vld [vmem:[%s10786_s23 + $0x1b8] sm:$0xff] }
0x1e84   :  { %4116 = vmatprep.subr.mxu1 %v3874_v44  ;;  %4522 = vmatprep.subr.mxu0 %v3908_v1  ;;  %v3923_v44 = vld [vmem:[%s10786_s23 + $0x1a0] sm:$0xff]  ;;  %v4899_v1 = vld [vmem:[%s10788_s28 + $0xd0] sm:$0xff] }
0x1e85   :  { %4117 = vmatpush1.msra.mxu1 %v3873_v45  ;;  %4523 = vmatpush1.msra.mxu0 %v3907_v20  ;;  %v3925_v45 = vld [vmem:[%s10786_s23 + $0x1b0] sm:$0xff]  ;;  %v4897_v20 = vld [vmem:[%s10788_s28 + $0xc0] sm:$0xff] }
0x1e86   :  { %6962 = vmatmul.mubr.msk.f32.vlgmr.msra.gmra.mxu1 %vm1424_vm12, %v4006_v30  ;;  %4289 = vmatprep.subr.mxu1 %v3900_v7  ;;  %v3920_v7 = vld [vmem:[%s10786_s23 + $0x188] sm:$0xff] }
0x1e87   :  { %4290 = vmatpush1.msra.mxu1 %v3899_v22  ;;  %4329 = vmatprep.mubr.f32.mxu1 %v8457_v0  ;;  %v3922_v22 = vld [vmem:[%s10786_s23 + $0x198] sm:$0xff] }
0x1e88   :  { %4291 = vmatprep.subr.mxu1 %v3896_v32  ;;  %4524 = vmatprep.subr.mxu0 %v3904_v58  ;;  %v3919_v32 = vld [vmem:[%s10786_s23 + $0x180] sm:$0xff]  ;;  %v4895_v58 = vld [vmem:[%s10788_s28 + $0xb0] sm:$0xff] }
0x1e89   :  { %4292 = vmatpush1.msra.mxu1 %v3895_v31  ;;  %4525 = vmatpush1.msra.mxu0 %v3903_v59  ;;  %v3921_v31 = vld [vmem:[%s10786_s23 + $0x190] sm:$0xff]  ;;  %v4893_v59 = vld [vmem:[%s10788_s28 + $0xa0] sm:$0xff] }
0x1e8a   :  { %4293 = vmatprep.subr.mxu1 %v3892_v27  ;;  %7742 = vmatprep.subr.mxu0 %v8457_v0  ;;  %v4904_v27 = vld [vmem:[%s10788_s28 + $0xf8] sm:$0xff] }
0x1e8b   :  { %4294 = vmatpush1.msra.mxu1 %v3891_v24 }
0x1e8c   :  { %4295 = vmatprep.subr.mxu1 %v3888_v48 }
0x1e8d   :  { %4296 = vmatpush1.msra.mxu1 %v3887_v49 }
0x1e8e   :  { %6965 = vmatmul.mubr.msk.f32.vlgmr.msra.gmra.mxu1 %vm1424_vm12, %v9643_v34  ;;  %7733 = vmatprep.subr.mxu1 %v8457_v0 }
0x1e8f   :  { %7734 = vmatpush3.msra.mxu1 %v9602_v6  ;;  %7739 = vmatprep.mubr.msk.f32.mxu1 %vm8458_vm1, %v8457_v0 }
0x1e90   :  { %7735 = vmatprep.subr.mxu1 %v8457_v0 }
0x1e91   :  { %7736 = vmatpush3.msra.mxu1 %v9604_v36 }
0x1e92   :  { %7737 = vmatprep.subr.mxu1 %v8457_v0 }
0x1e93   :  { %7738 = vmatpush3.msra.mxu1 %v9610_v3 }
0x1e94   :  { %7740 = vmatmul.mubr.msk.f32.vlgmr.msra.gmra.mxu1 %vm476_vm2, %v6967_v50  ;;  %4589 = vmatprep.subr.mxu1 %v3918_v51 }
0x1e95   :  { %4629 = vmatprep.mubr.f32.mxu1 %v8457_v0  ;;  %4590 = vmatpush1.msra.mxu1 %v3917_v43  ;;  %v4901_v43 = vld [vmem:[%s10788_s28 + $0xe0] sm:$0xff] }
0x1e96   :  { %4591 = vmatprep.subr.mxu1 %v3914_v54  ;;  %v4900_v54 = vld [vmem:[%s10788_s28 + $0xd8] sm:$0xff] }
0x1e97   :  { %4592 = vmatpush1.msra.mxu1 %v3913_v55  ;;  %v4898_v55 = vld [vmem:[%s10788_s28 + $0xc8] sm:$0xff] }
0x1e98   :  { %4593 = vmatprep.subr.mxu1 %v3910_v57  ;;  %v4896_v57 = vld [vmem:[%s10788_s28 + $0xb8] sm:$0xff] }
0x1e99   :  { %4594 = vmatpush1.msra.mxu1 %v3909_v18  ;;  %v4894_v18 = vld [vmem:[%s10788_s28 + $0xa8] sm:$0xff] }
0x1e9a   :  { %4595 = vmatprep.subr.mxu1 %v3906_v12  ;;  %v4892_v12 = vld [vmem:[%s10788_s28 + $0x98] sm:$0xff] }
0x1e9b   :  { %4596 = vmatpush1.msra.mxu1 %v3905_v60  ;;  %v4891_v60 = vld [vmem:[%s10788_s28 + $0x90] sm:$0xff] }
0x1e9c   :  { %4747 = vmatprep.subr.mxu1 %v3932_v61  ;;  %v4890_v61 = vld [vmem:[%s10788_s28 + $0x88] sm:$0xff] }
0x1f3e   :  { %v4081_v38 = vpop.f32.mrf.mxu1  ;;  %v4402_v9 = vpop.f32.mrf.mxu0 }
0x1f3f   :  { %v4178_v19 = vadd.f32 %v4161_v13, %v4081_v38  ;;  %v4888_v38 = vld [vmem:[%s10788_s28 + $0x78] sm:$0xff]  ;;  %v4882_v13 = vld [vmem:[%s10788_s28 + $0x48] sm:$0xff] }
0x1f40   :  { %v4083_v56 = vpop.f32.mrf.mxu1  ;;  %v9753_v24 = vpop.f32.mrf.mxu0 }
0x1f41   :  { %v4179_v21 = vadd.f32 %v4165_v16, %v4083_v56  ;;  %v4886_v56 = vld [vmem:[%s10788_s28 + $0x68] sm:$0xff]  ;;  %v4881_v16 = vld [vmem:[%s10788_s28 + $0x40] sm:$0xff] }
0x1f46   :  { %v4152_v8 = vpop.f32.mrf.mxu1 }
0x1f47   :  { %v4180_v41 = vadd.f32 %v4169_v5, %v4152_v8  ;;  %v4887_v5 = vld [vmem:[%s10788_s28 + $0x70] sm:$0xff]  ;;  %v4885_v8 = vld [vmem:[%s10788_s28 + $0x60] sm:$0xff] }
0x1f48   :  { %v9718_v17 = vpop.f32.mrf.mxu1 }
0x1f49   :  { %v9714_v14 = vadd.f32 %v4402_v9, %v4180_v41  ;;  %v4884_v9 = vld [vmem:[%s10788_s28 + $0x58] sm:$0xff]  ;;  %v4883_v41 = vld [vmem:[%s10788_s28 + $0x50] sm:$0xff] }
0x1f4e   :  { %v4331_v25 = vpop.f32.mrf.mxu1 }
0x1f4f   :  { %v4407_v23 = vadd.f32 %v4331_v25, %v4178_v19  ;;  %v4880_v19 = vld [vmem:[%s10788_s28 + $0x38] sm:$0xff]  ;;  %v4879_v25 = vld [vmem:[%s10788_s28 + $0x30] sm:$0xff] }
0x1f50   :  { %v4333_v29 = vpop.f32.mrf.mxu1 }
0x1f51   :  { %v4408_v26 = vadd.f32 %v4333_v29, %v4179_v21  ;;  %v4878_v21 = vld [vmem:[%s10788_s28 + $0x28] sm:$0xff]  ;;  %v4876_v29 = vld [vmem:[%s10788_s28 + $0x18] sm:$0xff] }
0x1f54   :  { %v9720_v11 = vpop.f32.mrf.mxu1 }
0x1f55   :  { %6969 = vmatmul.mubr.msk.f32.vlgmr.msra.gmra.mxu0 %vm1424_vm12, %v9720_v11  ;;  %6970 = vmatmul.mubr.msk.f32.vlgmr.msra.gmra.mxu1 %vm1424_vm12, %v9720_v11 }
0x1f56   :  { %7743 = vmatpush3.msra.mxu0 %v9602_v6  ;;  %7748 = vmatprep.mubr.msk.f32.mxu0 %vm8458_vm1, %v8457_v0  ;;  %v7741_v30 = vpop.f32.mrf.mxu1  ;;  %v3933_v6 = vld [vmem:[%s10786_s23 + $0x1f0] sm:$0xff] }
0x1f57   :  { %7744 = vmatprep.subr.mxu0 %v8457_v0  ;;  %4748 = vmatpush1.msra.mxu1 %v3931_v28  ;;  %v4874_v28 = vld [vmem:[%s10788_s28 + $0x8] sm:$0xff]  ;;  %v4873_v30 = vld [vmem:[%s10788_s28] sm:$0xff] }
0x1f58   :  { %7745 = vmatpush3.msra.mxu0 %v9604_v36  ;;  %4787 = vmatprep.mubr.f32.mxu1 %v8457_v0  ;;  %v3928_v36 = vld [vmem:[%s10786_s23 + $0x1c8] sm:$0xff] }
0x1f59   :  { %7746 = vmatprep.subr.mxu0 %v8457_v0  ;;  %4749 = vmatprep.subr.mxu1 %v3928_v36  ;;  %v4933_v36 = vld [vmem:[%s10788_s28 + $0x1e0] sm:$0xff] }
0x1f5a   :  { %7747 = vmatpush3.msra.mxu0 %v9610_v3  ;;  %4750 = vmatpush1.msra.mxu1 %v3927_v39  ;;  %v3924_v3 = vld [vmem:[%s10786_s23 + $0x1a8] sm:$0xff]  ;;  %v4931_v39 = vld [vmem:[%s10788_s28 + $0x1d0] sm:$0xff] }
0x1f5b   :  { %7749 = vmatmul.mubr.msk.f32.vlgmr.msra.gmra.mxu0 %vm476_vm2, %v6971_v15  ;;  %4818 = vmatprep.subr.mxu0 %v3934_v2  ;;  %v4936_v15 = vld [vmem:[%s10788_s28 + $0x1f8] sm:$0xff]  ;;  %v4935_v2 = vld [vmem:[%s10788_s28 + $0x1f0] sm:$0xff]  ;;  %vm4719_vm2 = vcmask 1046272  }
0x1f5c   :  { %4819 = vmatpush1.msra.mxu0 %v3933_v6  ;;  %4858 = vmatprep.mubr.f32.mxu0 %v8457_v0  ;;  %v4934_v6 = vld [vmem:[%s10788_s28 + $0x1e8] sm:$0xff] }
0x1f5d   :  { %4820 = vmatprep.subr.mxu0 %v3930_v40  ;;  %4751 = vmatprep.subr.mxu1 %v3924_v3  ;;  %v4932_v40 = vld [vmem:[%s10788_s28 + $0x1d8] sm:$0xff]  ;;  %v4929_v3 = vld [vmem:[%s10788_s28 + $0x1c0] sm:$0xff] }
0x1f5e   :  { %4821 = vmatpush1.msra.mxu0 %v3929_v42  ;;  %4752 = vmatpush1.msra.mxu1 %v3923_v44  ;;  %v4930_v42 = vld [vmem:[%s10788_s28 + $0x1c8] sm:$0xff]  ;;  %v4927_v44 = vld [vmem:[%s10788_s28 + $0x1b0] sm:$0xff] }
0x1f5f   :  { %4822 = vmatprep.subr.mxu0 %v3926_v37  ;;  %4753 = vmatprep.subr.mxu1 %v3920_v7  ;;  %v4928_v37 = vld [vmem:[%s10788_s28 + $0x1b8] sm:$0xff]  ;;  %v4925_v7 = vld [vmem:[%s10788_s28 + $0x1a0] sm:$0xff] }
0x1f60   :  { %4823 = vmatpush1.msra.mxu0 %v3925_v45  ;;  %4754 = vmatpush1.msra.mxu1 %v3919_v32  ;;  %v4926_v45 = vld [vmem:[%s10788_s28 + $0x1a8] sm:$0xff]  ;;  %v4923_v32 = vld [vmem:[%s10788_s28 + $0x190] sm:$0xff] }
0x1f61   :  { %4824 = vmatprep.subr.mxu0 %v3922_v22  ;;  %4949 = vmatprep.subr.mxu1 %v4904_v27  ;;  %v4924_v22 = vld [vmem:[%s10788_s28 + $0x198] sm:$0xff]  ;;  %v4921_v27 = vld [vmem:[%s10788_s28 + $0x180] sm:$0xff] }
0x1f62   :  { %4825 = vmatpush1.msra.mxu0 %v3921_v31  ;;  %v4922_v31 = vld [vmem:[%s10788_s28 + $0x188] sm:$0xff] }
0x2015   :  { %v4560_v48 = vpop.f32.mrf.mxu0 }
0x2016   :  { %v9755_v49 = vadd.f32 %v4560_v48, %v4407_v23  ;;  %v4877_v23 = vld [vmem:[%s10788_s28 + $0x20] sm:$0xff]  ;;  %v4920_v48 = vld [vmem:[%s10788_s28 + $0x178] sm:$0xff] }
0x2017   :  { %v4562_v50 = vpop.f32.mrf.mxu0 }
0x2018   :  { %v9757_v35 = vadd.f32 %v4562_v50, %v4408_v26  ;;  %v4875_v26 = vld [vmem:[%s10788_s28 + $0x10] sm:$0xff] }
0x2019   :  { %v4919_v50 = vld [vmem:[%s10788_s28 + $0x170] sm:$0xff] }
0x201b   :  { %v9760_v51 = vpop.f32.mrf.mxu0 }
0x201c   :  { %6973 = vmatmul.mubr.msk.f32.vlgmr.msra.gmra.mxu1 %vm1424_vm12, %v9760_v51  ;;  %6974 = vmatmul.mubr.msk.f32.vlgmr.msra.gmra.mxu0 %vm1424_vm12, %v9760_v51 }
0x201d   :  { %v7750_v63 = vpop.f32.mrf.mxu0  ;;  %4950 = vmatpush1.msra.mxu1 %v4903_v33  ;;  %v4918_v33 = vld [vmem:[%s10788_s28 + $0x168] sm:$0xff] }
0x201e   :  { %4951 = vmatprep.subr.mxu1 %v4902_v52  ;;  %v4917_v52 = vld [vmem:[%s10788_s28 + $0x160] sm:$0xff]  ;;  %v4915_v63 = vld [vmem:[%s10788_s28 + $0x150] sm:$0xff] }
0x201f   :  { %4952 = vmatpush1.msra.mxu1 %v4901_v43  ;;  %v4916_v43 = vld [vmem:[%s10788_s28 + $0x158] sm:$0xff] }
0x2020   :  { %4953 = vmatprep.subr.mxu1 %v4900_v54  ;;  %v4914_v54 = vld [vmem:[%s10788_s28 + $0x148] sm:$0xff] }
0x2021   :  { %4954 = vmatpush1.msra.mxu1 %v4899_v1  ;;  %v4913_v1 = vld [vmem:[%s10788_s28 + $0x140] sm:$0xff] }
0x2022   :  { %4955 = vmatprep.subr.mxu1 %v4898_v55  ;;  %v4912_v55 = vld [vmem:[%s10788_s28 + $0x138] sm:$0xff] }
0x2023   :  { %4956 = vmatpush1.msra.mxu1 %v4897_v20  ;;  %v4911_v20 = vld [vmem:[%s10788_s28 + $0x130] sm:$0xff] }
0x2024   :  { %4957 = vmatprep.subr.mxu1 %v4896_v57  ;;  %v4910_v57 = vld [vmem:[%s10788_s28 + $0x128] sm:$0xff] }
0x2025   :  { %4958 = vmatpush1.msra.mxu1 %v4895_v58  ;;  %v4909_v58 = vld [vmem:[%s10788_s28 + $0x120] sm:$0xff] }
0x2026   :  { %4959 = vmatprep.subr.mxu1 %v4894_v18  ;;  %v4908_v18 = vld [vmem:[%s10788_s28 + $0x118] sm:$0xff] }
0x2027   :  { %4960 = vmatpush1.msra.mxu1 %v4893_v59  ;;  %v4907_v59 = vld [vmem:[%s10788_s28 + $0x110] sm:$0xff] }
0x2028   :  { %4961 = vmatprep.subr.mxu1 %v4892_v12  ;;  %v4906_v12 = vld [vmem:[%s10788_s28 + $0x108] sm:$0xff] }
0x2029   :  { %4962 = vmatpush1.msra.mxu1 %v4891_v60  ;;  %v4905_v60 = vld [vmem:[%s10788_s28 + $0x100] sm:$0xff] }
0x202a   :  { %4963 = vmatprep.subr.mxu1 %v4890_v61  ;;  %v10718_v61 = vsub.s32 3, %v9697_v47 }
0x202b   :  { %4964 = vmatpush1.msra.mxu1 %v4889_v62 }
0x202c   :  { %4965 = vmatprep.subr.mxu1 %v4888_v38  ;;  %v4173_v62 = vrot.slane %v9701_v4, %v10718_v61  ;;  %v4631_v38 = vpop.f32.mrf.mxu1  ;;  %v5131_v61 = vld [vmem:[%s8764_s20] sm:$0xf] }
0x202d   :  { %4966 = vmatpush1.msra.mxu1 %v4887_v5 }
0x202e   :  { %4967 = vmatprep.subr.mxu1 %v4886_v56  ;;  %v4181_v5 = vadd.f32 %v4173_v62, %v9718_v17  ;;  %v4633_v56 = vpop.f32.mrf.mxu1  ;;  %v5032_v62 = vld [vmem:[%s10790_s2 + $0x50] sm:$0xff] }
0x202f   :  { %4968 = vmatpush1.msra.mxu1 %v4885_v8 }
0x2030   :  { %4969 = vmatprep.subr.mxu1 %v4884_v9  ;;  %v4410_v8 = vadd.f32 %v9753_v24, %v4181_v5  ;;  %v4638_v9 = vadd.f32 %v4631_v38, %v9714_v14  ;;  %v5047_v38 = vld [vmem:[%s10790_s2 + $0xc8] sm:$0xff] }
0x2031   :  { %4970 = vmatpush1.msra.mxu1 %v4883_v41  ;;  %v5031_v5 = vld [vmem:[%s10790_s2 + $0x48] sm:$0xff] }
0x2032   :  { %4971 = vmatprep.subr.mxu1 %v4882_v13 }
0x2033   :  { %4972 = vmatpush1.msra.mxu1 %v4881_v16  ;;  %v4639_v16 = vadd.f32 %v4633_v56, %v4410_v8  ;;  %v5046_v56 = vld [vmem:[%s10790_s2 + $0xc0] sm:$0xff] }
0x2034   :  { %4973 = vmatprep.subr.mxu1 %v4880_v19  ;;  %v5030_v8 = vld [vmem:[%s10790_s2 + $0x40] sm:$0xff] }
0x2035   :  { %4974 = vmatpush1.msra.mxu1 %v4879_v25 }
0x2036   :  { %4975 = vmatprep.subr.mxu1 %v4878_v21 }
0x2037   :  { %4976 = vmatpush1.msra.mxu1 %v4877_v23 }
0x2038   :  { %4977 = vmatprep.subr.mxu1 %v4876_v29 }
0x2039   :  { %4978 = vmatpush1.msra.mxu1 %v4875_v26 }
0x203a   :  { %4979 = vmatprep.subr.mxu1 %v4874_v28  ;;  %v9845_v28 = vld [vmem:[%s10789_s1 + $0x138] sm:$0xff] }
0x203b   :  { %4980 = vmatpush1.msra.mxu1 %v4873_v30  ;;  %v9862_v30 = vld [vmem:[%s10789_s1 + $0xc0] sm:$0xff] }
0x203c   :  { %4981 = vmatprep.subr.mxu1 %v4936_v15  ;;  %v9867_v15 = vld [vmem:[%s10789_s1 + $0x98] sm:$0xff] }
0x203d   :  { %4982 = vmatpush2.msra.mxu1 %v4935_v2  ;;  %v9872_v2 = vld [vmem:[%s10789_s1 + $0x70] sm:$0xff] }
0x203e   :  { %4983 = vmatprep.subr.mxu1 %v4934_v6  ;;  %v9877_v6 = vld [vmem:[%s10789_s1 + $0x48] sm:$0xff] }
0x203f   :  { %4984 = vmatpush2.msra.mxu1 %v4933_v36  ;;  %v9882_v36 = vld [vmem:[%s10789_s1 + $0x20] sm:$0xff] }
0x2040   :  { %4985 = vmatprep.subr.mxu1 %v4932_v40  ;;  %v9886_v40 = vld [vmem:[%s10789_s1 + $0x130] sm:$0xff] }
0x2041   :  { %4986 = vmatpush2.msra.mxu1 %v4931_v39  ;;  %v9890_v39 = vld [vmem:[%s10789_s1 + $0x128] sm:$0xff] }
0x2042   :  { %4987 = vmatprep.subr.mxu1 %v4930_v42  ;;  %v9894_v42 = vld [vmem:[%s10789_s1 + $0x108] sm:$0xff] }
0x2043   :  { %4988 = vmatpush2.msra.mxu1 %v4929_v3  ;;  %v9900_v3 = vld [vmem:[%s10789_s1 + $0x100] sm:$0xff] }
0x2044   :  { %4989 = vmatprep.subr.mxu1 %v4928_v37  ;;  %v9904_v37 = vld [vmem:[%s10789_s1 + $0xe0] sm:$0xff] }
0x2045   :  { %4990 = vmatpush2.msra.mxu1 %v4927_v44  ;;  %v9909_v44 = vld [vmem:[%s10789_s1 + $0xd8] sm:$0xff] }
0x2046   :  { %4991 = vmatprep.subr.mxu1 %v4926_v45  ;;  %v9913_v45 = vld [vmem:[%s10789_s1 + $0xb8] sm:$0xff] }
0x2047   :  { %4992 = vmatpush2.msra.mxu1 %v4925_v7  ;;  %v9917_v7 = vld [vmem:[%s10789_s1 + $0xb0] sm:$0xff] }
0x2048   :  { %4993 = vmatprep.subr.mxu1 %v4924_v22  ;;  %v9921_v22 = vld [vmem:[%s10789_s1 + $0x90] sm:$0xff] }
0x2049   :  { %4994 = vmatpush2.msra.mxu1 %v4923_v32  ;;  %v9925_v32 = vld [vmem:[%s10789_s1 + $0x88] sm:$0xff] }
0x204a   :  { %4995 = vmatprep.subr.mxu1 %v4922_v31  ;;  %v9929_v31 = vld [vmem:[%s10789_s1 + $0x68] sm:$0xff] }
0x204b   :  { %4996 = vmatpush2.msra.mxu1 %v4921_v27  ;;  %v9933_v27 = vld [vmem:[%s10789_s1 + $0x60] sm:$0xff] }
0x204c   :  { %4997 = vmatprep.subr.mxu1 %v4920_v48  ;;  %v9937_v48 = vld [vmem:[%s10789_s1 + $0x40] sm:$0xff] }
0x204d   :  { %4998 = vmatpush2.msra.mxu1 %v4919_v50  ;;  %v9941_v50 = vld [vmem:[%s10789_s1 + $0x38] sm:$0xff] }
0x204e   :  { %4999 = vmatprep.subr.mxu1 %v4918_v33  ;;  %v9945_v33 = vld [vmem:[%s10789_s1 + $0x18] sm:$0xff] }
0x204f   :  { %5000 = vmatpush2.msra.mxu1 %v4917_v52  ;;  %v9949_v52 = vld [vmem:[%s10789_s1 + $0x10] sm:$0xff] }
0x2050   :  { %5001 = vmatprep.subr.mxu1 %v4916_v43  ;;  %v9953_v43 = vld [vmem:[%s10789_s1 + $0x120] sm:$0xff] }
0x2051   :  { %5002 = vmatpush2.msra.mxu1 %v4915_v63  ;;  %v5053_v63 = vld [vmem:[%s10790_s2 + $0xf8] sm:$0xff] }
0x2052   :  { %5003 = vmatprep.subr.mxu1 %v4914_v54  ;;  %v5037_v54 = vld [vmem:[%s10790_s2 + $0x78] sm:$0xff]  ;;  %7191 = vmatprep.subr.mxu0 %v5053_v63  ;;  %v5039_v63 = vld [vmem:[%s10790_s2 + $0x88] sm:$0xff] }
0x2053   :  { %5004 = vmatpush2.msra.mxu1 %v4913_v1  ;;  %v5052_v1 = vld [vmem:[%s10790_s2 + $0xf0] sm:$0xff]  ;;  %7192 = vmatpush3.msra.mxu0 %v5037_v54  ;;  %v5023_v54 = vld [vmem:[%s10790_s2 + $0x8] sm:$0xff] }
0x2054   :  { %5005 = vmatprep.subr.mxu1 %v4912_v55  ;;  %v5036_v55 = vld [vmem:[%s10790_s2 + $0x70] sm:$0xff]  ;;  %7193 = vmatprep.subr.mxu0 %v5052_v1  ;;  %v5038_v1 = vld [vmem:[%s10790_s2 + $0x80] sm:$0xff] }
0x2055   :  { %5006 = vmatpush2.msra.mxu1 %v4911_v20  ;;  %v5051_v20 = vld [vmem:[%s10790_s2 + $0xe8] sm:$0xff]  ;;  %7194 = vmatpush3.msra.mxu0 %v5036_v55  ;;  %v5022_v55 = vld [vmem:[%s10790_s2] sm:$0xff] }
0x2056   :  { %5007 = vmatprep.subr.mxu1 %v4910_v57  ;;  %v5035_v57 = vld [vmem:[%s10790_s2 + $0x68] sm:$0xff]  ;;  %7195 = vmatprep.subr.mxu0 %v5051_v20  ;;  %v9992_v20 = vld [vmem:[%s10789_s1 + $0x118] sm:$0xff] }
0x2057   :  { %5008 = vmatpush2.msra.mxu1 %v4909_v58  ;;  %v5050_v58 = vld [vmem:[%s10790_s2 + $0xe0] sm:$0xff]  ;;  %7196 = vmatpush3.msra.mxu0 %v5035_v57 }
0x2058   :  { %5009 = vmatprep.subr.mxu1 %v4908_v18  ;;  %v5034_v18 = vld [vmem:[%s10790_s2 + $0x60] sm:$0xff]  ;;  %7197 = vmatprep.subr.mxu0 %v5050_v58  ;;  %v9997_v58 = vld [vmem:[%s10789_s1 + $0xf8] sm:$0xff] }
0x2059   :  { %5010 = vmatpush2.msra.mxu1 %v4907_v59  ;;  %v5049_v59 = vld [vmem:[%s10790_s2 + $0xd8] sm:$0xff]  ;;  %7198 = vmatpush3.msra.mxu0 %v5034_v18  ;;  %v10002_v18 = vld [vmem:[%s10789_s1 + $0xf0] sm:$0xff] }
0x205a   :  { %5011 = vmatprep.subr.mxu1 %v4906_v12  ;;  %v5033_v12 = vld [vmem:[%s10790_s2 + $0x58] sm:$0xff]  ;;  %7199 = vmatprep.subr.mxu0 %v5049_v59  ;;  %v10006_v59 = vld [vmem:[%s10789_s1 + $0xd0] sm:$0xff] }
0x205b   :  { %5012 = vmatpush2.msra.mxu1 %v4905_v60  ;;  %v5048_v60 = vld [vmem:[%s10790_s2 + $0xd0] sm:$0xff]  ;;  %7200 = vmatpush3.msra.mxu0 %v5033_v12  ;;  %v10011_v12 = vld [vmem:[%s10789_s1 + $0xc8] sm:$0xff] }
0x205c   :  { %7756 = vmatprep.subr.mxu1 %v8457_v0  ;;  %7201 = vmatprep.subr.mxu0 %v5048_v60  ;;  %v10015_v60 = vld [vmem:[%s10789_s1 + $0xa8] sm:$0xff] }
0x205d   :  { %7202 = vmatpush3.msra.mxu0 %v5032_v62  ;;  %v10019_v62 = vld [vmem:[%s10789_s1 + $0xa0] sm:$0xff] }
0x205e   :  { %7203 = vmatprep.subr.mxu0 %v5047_v38  ;;  %v10023_v38 = vld [vmem:[%s10789_s1 + $0x80] sm:$0xff] }
0x205f   :  { %7204 = vmatpush3.msra.mxu0 %v5031_v5  ;;  %v10027_v5 = vld [vmem:[%s10789_s1 + $0x78] sm:$0xff] }
0x2060   :  { %7205 = vmatprep.subr.mxu0 %v5046_v56  ;;  %v10031_v56 = vld [vmem:[%s10789_s1 + $0x58] sm:$0xff] }
0x2061   :  { %7206 = vmatpush3.msra.mxu0 %v5030_v8  ;;  %v10035_v8 = vld [vmem:[%s10789_s1 + $0x50] sm:$0xff] }
0x20dc   :  { %v4789_v41 = vpop.f32.mrf.mxu1  ;;  %v4860_v13 = vpop.f32.mrf.mxu0 }
0x20dd   :  { %v4867_v19 = vadd.f32 %v4860_v13, %v4638_v9  ;;  %v4865_v25 = vadd.f32 %v4789_v41, %v9755_v49  ;;  %v9850_v49 = vld [vmem:[%s10789_s1 + $0x110] sm:$0xff]  ;;  %v5045_v9 = vld [vmem:[%s10790_s2 + $0xb8] sm:$0xff] }
0x20de   :  { %v4791_v21 = vpop.f32.mrf.mxu1  ;;  %v4862_v23 = vpop.f32.mrf.mxu0  ;;  %v5029_v41 = vld [vmem:[%s10790_s2 + $0x38] sm:$0xff]  ;;  %v5044_v13 = vld [vmem:[%s10790_s2 + $0xb0] sm:$0xff]  ;;  %7207 = vmatprep.subr.mxu0 %v5045_v9 }
0x20df   :  { %v9837_v4 = vmax.f32 %v4867_v19, 0.0  ;;  %v4866_v17 = vadd.f32 %v4791_v21, %v9757_v35  ;;  %v4868_v29 = vadd.f32 %v4862_v23, %v4639_v16  ;;  %v4869_v14 = vmax.f32 %v4865_v25, 0.0  ;;  %v9857_v35 = vld [vmem:[%s10789_s1 + $0xe8] sm:$0xff]  ;;  %v5028_v16 = vld [vmem:[%s10790_s2 + $0x30] sm:$0xff]  ;;  %7208 = vmatpush3.msra.mxu0 %v5029_v41  ;;  %v5042_v21 = vld [vmem:[%s10790_s2 + $0xa0] sm:$0xff] }
0x20e0   :  { %v5043_v19 = vld [vmem:[%s10790_s2 + $0xa8] sm:$0xff]  ;;  %7209 = vmatprep.subr.mxu0 %v5044_v13  ;;  %v5026_v23 = vld [vmem:[%s10790_s2 + $0x20] sm:$0xff]  ;;  %v10039_v9 = vld [vmem:[%s10789_s1 + $0x30] sm:$0xff] }
0x20e1   :  { %v4870_v24 = vmax.f32 %v4866_v17, 0.0  ;;  %v9840_v26 = vmax.f32 %v4868_v29, 0.0  ;;  %5650 = vrot.lane.b32.xlu0 %v9837_v4, %s8460_s4  ;;  %v5027_v25 = vld [vmem:[%s10790_s2 + $0x28] sm:$0xff]  ;;  %7210 = vmatpush3.msra.mxu0 %v5028_v16  ;;  %v5041_v17 = vld [vmem:[%s10790_s2 + $0x98] sm:$0xff]  ;;  %v10051_v16 = vld [vmem:[%s10789_s1] sm:$0xff] }
0x20e2   :  { %7211 = vmatprep.subr.mxu0 %v5043_v19  ;;  %v5025_v29 = vld [vmem:[%s10790_s2 + $0x18] sm:$0xff]  ;;  %v10043_v41 = vld [vmem:[%s10789_s1 + $0x28] sm:$0xff] }
0x20e3   :  { %5013 = vmatprep.mubr.f32.mxu1 %v4870_v24  ;;  %6402 = vrot.lane.b32.xlu1 %v9840_v26, %s8460_s4  ;;  %v5040_v24 = vld [vmem:[%s10790_s2 + $0x90] sm:$0xff]  ;;  %v10047_v13 = vld [vmem:[%s10789_s1 + $0x8] sm:$0xff] }
0x20e4   :  { %5014 = vmatmul.mubr.f32.vlgmr.msra.gmra.mxu1 %v4869_v14  ;;  %7212 = vmatpush3.msra.mxu0 %v5027_v25  ;;  %v5024_v14 = vld [vmem:[%s10790_s2 + $0x10] sm:$0xff]  ;;  %v4937_v25 = vld [vmem:[%s10791_s12] sm:$0x3] }
0x20e5   :  { %7757 = vmatpush3.msra.mxu1 %v9845_v28  ;;  %7772 = vmatprep.mubr.msk.f32.mxu1 %vm8458_vm1, %v8457_v0 }
0x20e6   :  { %7758 = vmatprep.subr.mxu1 %v8457_v0  ;;  %7213 = vmatprep.subr.mxu0 %v5042_v21  ;;  %v4942_v21 = vrot.slane %v4937_v25, %v9707_v53 }
0x20e7   :  { %7759 = vmatpush3.msra.mxu1 %v9850_v49  ;;  %7214 = vmatpush3.msra.mxu0 %v5026_v23  ;;  %v4946_v23 = vrot.slane %v4937_v25, %v9710_v10 }
0x20e8   :  { %7760 = vmatprep.subr.mxu1 %v8457_v0  ;;  %7215 = vmatprep.subr.mxu0 %v5041_v17 }
0x20e9   :  { %7761 = vmatpush3.msra.mxu1 %v9857_v35  ;;  %7216 = vmatpush3.msra.mxu0 %v5025_v29 }
0x20ea   :  { %7762 = vmatprep.subr.mxu1 %v8457_v0  ;;  %7217 = vmatprep.subr.mxu0 %v5040_v24 }
0x20eb   :  { %7763 = vmatpush3.msra.mxu1 %v9862_v30  ;;  %7218 = vmatpush3.msra.mxu0 %v5024_v14 }
0x20ec   :  { %7764 = vmatprep.subr.mxu1 %v8457_v0  ;;  %7219 = vmatprep.subr.mxu0 %v5039_v63 }
0x20ed   :  { %7765 = vmatpush3.msra.mxu1 %v9867_v15  ;;  %7220 = vmatpush3.msra.mxu0 %v5023_v54 }
0x20ee   :  { %7766 = vmatprep.subr.mxu1 %v8457_v0  ;;  %7221 = vmatprep.subr.mxu0 %v5038_v1 }
0x20ef   :  { %7767 = vmatpush3.msra.mxu1 %v9872_v2  ;;  %7222 = vmatpush3.msra.mxu0 %v5022_v55 }
0x20f0   :  { %7768 = vmatprep.subr.mxu1 %v8457_v0  ;;  %7751 = vmatprep.subr.mxu0 %v8457_v0 }
0x20f1   :  { %7769 = vmatpush3.msra.mxu1 %v9877_v6 }
0x20f2   :  { %7770 = vmatprep.subr.mxu1 %v8457_v0 }
0x20f3   :  { %7771 = vmatpush3.msra.mxu1 %v9882_v36 }
0x20f4   :  { %7773 = vmatmul.mubr.msk.f32.vlgmr.msra.gmra.mxu1 %vm383_vm0, %v9837_v4  ;;  %5741 = vmatprep.subr.mxu1 %v9886_v40 }
0x20f5   :  { %5742 = vmatpush1.msra.mxu1 %v9890_v39  ;;  %5789 = vmatprep.mubr.f32.mxu1 %v8457_v0 }
0x20f6   :  { %5743 = vmatprep.subr.mxu1 %v9894_v42 }
0x20f7   :  { %5744 = vmatpush1.msra.mxu1 %v9900_v3 }
0x20f8   :  { %5745 = vmatprep.subr.mxu1 %v9904_v37 }
0x20f9   :  { %5746 = vmatpush1.msra.mxu1 %v9909_v44 }
0x20fa   :  { %5747 = vmatprep.subr.mxu1 %v9913_v45 }
0x20fb   :  { %5748 = vmatpush1.msra.mxu1 %v9917_v7 }
0x20fc   :  { %5749 = vmatprep.subr.mxu1 %v9921_v22 }
0x20fd   :  { %5750 = vmatpush1.msra.mxu1 %v9925_v32 }
0x20fe   :  { %5751 = vmatprep.subr.mxu1 %v9929_v31 }
0x20ff   :  { %5752 = vmatpush1.msra.mxu1 %v9933_v27 }
0x2100   :  { %5753 = vmatprep.subr.mxu1 %v9937_v48 }
0x2101   :  { %5754 = vmatpush1.msra.mxu1 %v9941_v50 }
0x2102   :  { %5755 = vmatprep.subr.mxu1 %v9945_v33 }
0x2103   :  { %5756 = vmatpush1.msra.mxu1 %v9949_v52 }
0x2104   :  { %6048 = vmatprep.subr.mxu1 %v9953_v43 }
0x2153   :  { %v9994_v57 = vpop.permute.xlu0 %5650 }
0x2154   :  { %6982 = vmatmul.mubr.msk.f32.vlgmr.msra.gmra.mxu1 %vm383_vm0, %v9994_v57 }
0x2155   :  { %6049 = vmatpush1.msra.mxu1 %v9992_v20  ;;  %6096 = vmatprep.mubr.f32.mxu1 %v8457_v0  ;;  %v10094_v19 = vpop.permute.xlu1 %6402 }
0x2156   :  { %6050 = vmatprep.subr.mxu1 %v9997_v58 }
0x2157   :  { %6051 = vmatpush1.msra.mxu1 %v10002_v18 }
0x2158   :  { %6052 = vmatprep.subr.mxu1 %v10006_v59 }
0x2159   :  { %6053 = vmatpush1.msra.mxu1 %v10011_v12 }
0x215a   :  { %6054 = vmatprep.subr.mxu1 %v10015_v60 }
0x215b   :  { %6055 = vmatpush1.msra.mxu1 %v10019_v62 }
0x215c   :  { %6056 = vmatprep.subr.mxu1 %v10023_v38 }
0x215d   :  { %6057 = vmatpush1.msra.mxu1 %v10027_v5 }
0x215e   :  { %6058 = vmatprep.subr.mxu1 %v10031_v56 }
0x215f   :  { %6059 = vmatpush1.msra.mxu1 %v10035_v8 }
0x2160   :  { %6060 = vmatprep.subr.mxu1 %v10039_v9 }
0x2161   :  { %6061 = vmatpush1.msra.mxu1 %v10043_v41 }
0x2162   :  { %6062 = vmatprep.subr.mxu1 %v10047_v13 }
0x2163   :  { %6063 = vmatpush1.msra.mxu1 %v10051_v16 }
0x2164   :  { %6984 = vmatmul.mubr.msk.f32.vlgmr.msra.gmra.mxu1 %vm383_vm0, %v9840_v26  ;;  %7794 = vmatprep.subr.mxu1 %v8457_v0 }
0x2165   :  { %7795 = vmatpush3.msra.mxu1 %v9845_v28  ;;  %7810 = vmatprep.mubr.msk.f32.mxu1 %vm8458_vm1, %v8457_v0 }
0x2166   :  { %7796 = vmatprep.subr.mxu1 %v8457_v0 }
0x2167   :  { %7797 = vmatpush3.msra.mxu1 %v9850_v49 }
0x2168   :  { %7798 = vmatprep.subr.mxu1 %v8457_v0 }
0x2169   :  { %7799 = vmatpush3.msra.mxu1 %v9857_v35 }
0x216a   :  { %7800 = vmatprep.subr.mxu1 %v8457_v0 }
0x216b   :  { %7801 = vmatpush3.msra.mxu1 %v9862_v30 }
0x216c   :  { %7802 = vmatprep.subr.mxu1 %v8457_v0 }
0x216d   :  { %7803 = vmatpush3.msra.mxu1 %v9867_v15 }
0x216e   :  { %7804 = vmatprep.subr.mxu1 %v8457_v0 }
0x216f   :  { %7805 = vmatpush3.msra.mxu1 %v9872_v2 }
0x2170   :  { %7806 = vmatprep.subr.mxu1 %v8457_v0 }
0x2171   :  { %7807 = vmatpush3.msra.mxu1 %v9877_v6 }
0x2172   :  { %7808 = vmatprep.subr.mxu1 %v8457_v0 }
0x2173   :  { %7809 = vmatpush3.msra.mxu1 %v9882_v36 }
0x2174   :  { %7811 = vmatmul.mubr.msk.f32.vlgmr.msra.gmra.mxu1 %vm383_vm0, %v9840_v26  ;;  %6493 = vmatprep.subr.mxu1 %v9886_v40 }
0x2175   :  { %6494 = vmatpush1.msra.mxu1 %v9890_v39  ;;  %6541 = vmatprep.mubr.f32.mxu1 %v8457_v0 }
0x2176   :  { %6495 = vmatprep.subr.mxu1 %v9894_v42 }
0x2177   :  { %6496 = vmatpush1.msra.mxu1 %v9900_v3 }
0x2178   :  { %6497 = vmatprep.subr.mxu1 %v9904_v37 }
0x2179   :  { %6498 = vmatpush1.msra.mxu1 %v9909_v44 }
0x217a   :  { %6499 = vmatprep.subr.mxu1 %v9913_v45 }
0x217b   :  { %6500 = vmatpush1.msra.mxu1 %v9917_v7 }
0x217c   :  { %6501 = vmatprep.subr.mxu1 %v9921_v22 }
0x217d   :  { %6502 = vmatpush1.msra.mxu1 %v9925_v32 }
0x217e   :  { %6503 = vmatprep.subr.mxu1 %v9929_v31 }
0x217f   :  { %6504 = vmatpush1.msra.mxu1 %v9933_v27 }
0x2180   :  { %6505 = vmatprep.subr.mxu1 %v9937_v48 }
0x2181   :  { %6506 = vmatpush1.msra.mxu1 %v9941_v50 }
0x2182   :  { %6507 = vmatprep.subr.mxu1 %v9945_v33 }
0x2183   :  { %6508 = vmatpush1.msra.mxu1 %v9949_v52 }
0x2184   :  { %6988 = vmatmul.mubr.msk.f32.vlgmr.msra.gmra.mxu1 %vm383_vm0, %v10094_v19 }
0x21a4   :  { %v5015_v17 = vpop.f32.mrf.mxu1 }
0x21a5   :  { %v5016_v29 = vadd.f32 %v5015_v17, %v4942_v21 }
0x21a6   :  { %v5017_v24 = vpop.f32.mrf.mxu1 }
0x21a7   :  { %v5018_v14 = vadd.f32 %v5017_v24, %v4946_v23  ;;  %v5020_v54 = vmax.f32 %v5016_v29, 0.0 }
0x21a9   :  { %v5021_v63 = vmax.f32 %v5018_v14, 0.0 }
0x21ab   :  { %5125 = vmatprep.mubr.f32.mxu0 %v5021_v63  ;;  %v6975_v63 = vld [vmem:[#allocation18] ss:$0 sm:$0xff] }
0x21ac   :  { %5126 = vmatmul.mubr.f32.vlgmr.msra.gmra.mxu0 %v5020_v54 }
0x21ad   :  { %7753 = vmatprep.mubr.msk.f32.mxu0 %vm8458_vm1, %v8457_v0  ;;  %7752 = vmatpush3.msk.msra.mxu0 %vm888_vm4, %v5131_v61  ;;  %vm5648_vm4 = vcmask 521216  }
0x21ae   :  { %5294 = vmatprep.subr.mxu0 %v9953_v43 }
0x21b4   :  { %v10104_v1 = vpop.f32.mrf.mxu1 }
0x21b6   :  { %v7774_v55 = vpop.f32.mrf.mxu1 }
0x2214   :  { %v10109_v25 = vpop.f32.mrf.mxu1 }
0x2216   :  { %v10111_v21 = vpop.f32.mrf.mxu1 }
0x2224   :  { %v10113_v23 = vpop.f32.mrf.mxu1 }
0x2226   :  { %v10115_v17 = vpop.f32.mrf.mxu1 }
0x2234   :  { %v10117_v29 = vpop.f32.mrf.mxu1 }
0x2236   :  { %v7812_v24 = vpop.f32.mrf.mxu1 }
0x226c   :  { %v7223_v14 = vpop.f32.mrf.mxu0 }
0x226e   :  { %v7224_v54 = vpop.f32.mrf.mxu0 }
0x226f   :  { %v7225_v55 = vadd.f32 %v7224_v54, %v7223_v14 }
0x2271   :  { %v5128_v46 = vadd.f32 %v7225_v55, %v6975_v63  ;;  %v8468_v55 = vmov 30  }
0x2273   :  { %7754 = vmatmul.mubr.msk.f32.vlgmr.msra.gmra.mxu0 %vm884_vm5, %v5128_v46  ;;  %v8464_v46 = vmov 1   ;;  %vm6027_vm5 = vcmask 1046016  }
0x2274   :  { %5295 = vmatpush1.msra.mxu0 %v9992_v20  ;;  %5342 = vmatprep.mubr.f32.mxu0 %v8457_v0 }
0x2275   :  { %5296 = vmatprep.subr.mxu0 %v9997_v58  ;;  %7941 = vset.pattern.permute.xlu0 %v8464_v46 }
0x2276   :  { %5297 = vmatpush1.msra.mxu0 %v10002_v18 }
0x2277   :  { %5298 = vmatprep.subr.mxu0 %v10006_v59 }
0x2278   :  { %5299 = vmatpush1.msra.mxu0 %v10011_v12 }
0x2279   :  { %5300 = vmatprep.subr.mxu0 %v10015_v60 }
0x227a   :  { %5301 = vmatpush1.msra.mxu0 %v10019_v62 }
0x227b   :  { %5302 = vmatprep.subr.mxu0 %v10023_v38 }
0x227c   :  { %5303 = vmatpush1.msra.mxu0 %v10027_v5 }
0x227d   :  { %5304 = vmatprep.subr.mxu0 %v10031_v56 }
0x227e   :  { %5305 = vmatpush1.msra.mxu0 %v10035_v8 }
0x227f   :  { %5306 = vmatprep.subr.mxu0 %v10039_v9 }
0x2280   :  { %5307 = vmatpush1.msra.mxu0 %v10043_v41 }
0x2281   :  { %5308 = vmatprep.subr.mxu0 %v10047_v13 }
0x2282   :  { %5309 = vmatpush1.msra.mxu0 %v10051_v16 }
0x2283   :  { %6978 = vmatmul.mubr.msk.f32.vlgmr.msra.gmra.mxu0 %vm383_vm0, %v9837_v4  ;;  %5365 = vmatprep.subr.mxu0 %v9886_v40 }
0x2284   :  { %5366 = vmatpush1.msra.mxu0 %v9890_v39  ;;  %5413 = vmatprep.mubr.f32.mxu0 %v8457_v0 }
0x2285   :  { %5367 = vmatprep.subr.mxu0 %v9894_v42 }
0x2286   :  { %5368 = vmatpush1.msra.mxu0 %v9900_v3 }
0x2287   :  { %5369 = vmatprep.subr.mxu0 %v9904_v37 }
0x2288   :  { %5370 = vmatpush1.msra.mxu0 %v9909_v44 }
0x2289   :  { %5371 = vmatprep.subr.mxu0 %v9913_v45 }
0x228a   :  { %5372 = vmatpush1.msra.mxu0 %v9917_v7 }
0x228b   :  { %5373 = vmatprep.subr.mxu0 %v9921_v22 }
0x228c   :  { %5374 = vmatpush1.msra.mxu0 %v9925_v32 }
0x228d   :  { %5375 = vmatprep.subr.mxu0 %v9929_v31 }
0x228e   :  { %5376 = vmatpush1.msra.mxu0 %v9933_v27 }
0x228f   :  { %5377 = vmatprep.subr.mxu0 %v9937_v48 }
0x2290   :  { %5378 = vmatpush1.msra.mxu0 %v9941_v50 }
0x2291   :  { %5379 = vmatprep.subr.mxu0 %v9945_v33 }
0x2292   :  { %5380 = vmatpush1.msra.mxu0 %v9949_v52 }
0x2293   :  { %6979 = vmatmul.mubr.msk.f32.vlgmr.msra.gmra.mxu0 %vm383_vm0, %v9837_v4  ;;  %5670 = vmatprep.subr.mxu0 %v9953_v43 }
0x2294   :  { %5671 = vmatpush1.msra.mxu0 %v9992_v20  ;;  %5718 = vmatprep.mubr.f32.mxu0 %v8457_v0 }
0x2295   :  { %5672 = vmatprep.subr.mxu0 %v9997_v58 }
0x2296   :  { %5673 = vmatpush1.msra.mxu0 %v10002_v18 }
0x2297   :  { %5674 = vmatprep.subr.mxu0 %v10006_v59 }
0x2298   :  { %5675 = vmatpush1.msra.mxu0 %v10011_v12 }
0x2299   :  { %5676 = vmatprep.subr.mxu0 %v10015_v60 }
0x229a   :  { %5677 = vmatpush1.msra.mxu0 %v10019_v62 }
0x229b   :  { %5678 = vmatprep.subr.mxu0 %v10023_v38 }
0x229c   :  { %5679 = vmatpush1.msra.mxu0 %v10027_v5 }
0x229d   :  { %5680 = vmatprep.subr.mxu0 %v10031_v56 }
0x229e   :  { %5681 = vmatpush1.msra.mxu0 %v10035_v8 }
0x229f   :  { %5682 = vmatprep.subr.mxu0 %v10039_v9 }
0x22a0   :  { %5683 = vmatpush1.msra.mxu0 %v10043_v41 }
0x22a1   :  { %5684 = vmatprep.subr.mxu0 %v10047_v13 }
0x22a2   :  { %5685 = vmatpush1.msra.mxu0 %v10051_v16 }
0x22a3   :  { %6981 = vmatmul.mubr.msk.f32.vlgmr.msra.gmra.mxu0 %vm383_vm0, %v9994_v57  ;;  %7775 = vmatprep.subr.mxu0 %v8457_v0 }
0x22a4   :  { %7776 = vmatpush3.msra.mxu0 %v9845_v28  ;;  %7791 = vmatprep.mubr.msk.f32.mxu0 %vm8458_vm1, %v8457_v0 }
0x22a5   :  { %7777 = vmatprep.subr.mxu0 %v8457_v0 }
0x22a6   :  { %7778 = vmatpush3.msra.mxu0 %v9850_v49 }
0x22a7   :  { %7779 = vmatprep.subr.mxu0 %v8457_v0 }
0x22a8   :  { %7780 = vmatpush3.msra.mxu0 %v9857_v35 }
0x22a9   :  { %7781 = vmatprep.subr.mxu0 %v8457_v0 }
0x22aa   :  { %7782 = vmatpush3.msra.mxu0 %v9862_v30 }
0x22ab   :  { %7783 = vmatprep.subr.mxu0 %v8457_v0 }
0x22ac   :  { %7784 = vmatpush3.msra.mxu0 %v9867_v15 }
0x22ad   :  { %7785 = vmatprep.subr.mxu0 %v8457_v0 }
0x22ae   :  { %7786 = vmatpush3.msra.mxu0 %v9872_v2 }
0x22af   :  { %7787 = vmatprep.subr.mxu0 %v8457_v0 }
0x22b0   :  { %7788 = vmatpush3.msra.mxu0 %v9877_v6 }
0x22b1   :  { %7789 = vmatprep.subr.mxu0 %v8457_v0 }
0x22b2   :  { %7790 = vmatpush3.msra.mxu0 %v9882_v36 }
0x22b3   :  { %7792 = vmatmul.mubr.msk.f32.vlgmr.msra.gmra.mxu0 %vm383_vm0, %v9994_v57  ;;  %6119 = vmatprep.subr.mxu0 %v9886_v40 }
0x22b4   :  { %6120 = vmatpush1.msra.mxu0 %v9890_v39  ;;  %6167 = vmatprep.mubr.f32.mxu0 %v8457_v0 }
0x22b5   :  { %6121 = vmatprep.subr.mxu0 %v9894_v42 }
0x22b6   :  { %6122 = vmatpush1.msra.mxu0 %v9900_v3 }
0x22b7   :  { %6123 = vmatprep.subr.mxu0 %v9904_v37 }
0x22b8   :  { %6124 = vmatpush1.msra.mxu0 %v9909_v44  ;;  %v10793_v44 = vsub.s32 3, %v9697_v47 }
0x22b9   :  { %6125 = vmatprep.subr.mxu0 %v9913_v45 }
0x22ba   :  { %6126 = vmatpush1.msra.mxu0 %v9917_v7 }
0x22bb   :  { %6127 = vmatprep.subr.mxu0 %v9921_v22 }
0x22bc   :  { %6128 = vmatpush1.msra.mxu0 %v9925_v32 }
0x22bd   :  { %6129 = vmatprep.subr.mxu0 %v9929_v31 }
0x22be   :  { %6130 = vmatpush1.msra.mxu0 %v9933_v27 }
0x22bf   :  { %6131 = vmatprep.subr.mxu0 %v9937_v48 }
0x22c0   :  { %6132 = vmatpush1.msra.mxu0 %v9941_v50 }
0x22c1   :  { %6133 = vmatprep.subr.mxu0 %v9945_v33 }
0x22c2   :  { %6134 = vmatpush1.msra.mxu0 %v9949_v52 }
0x22c3   :  { %6985 = vmatmul.mubr.msk.f32.vlgmr.msra.gmra.mxu0 %vm383_vm0, %v9840_v26  ;;  %6422 = vmatprep.subr.mxu0 %v9953_v43  ;;  %v8465_v26 = vmov 0  }
0x22c4   :  { %6423 = vmatpush1.msra.mxu0 %v9992_v20  ;;  %6470 = vmatprep.mubr.f32.mxu0 %v8457_v0 }
0x22c5   :  { %6424 = vmatprep.subr.mxu0 %v9997_v58  ;;  %7940 = vset.pattern.permute.xlu1 %v8465_v26  ;;  %v8470_v26 = vmov 28  }
0x22c6   :  { %6425 = vmatpush1.msra.mxu0 %v10002_v18 }
0x22c7   :  { %6426 = vmatprep.subr.mxu0 %v10006_v59 }
0x22c8   :  { %6427 = vmatpush1.msra.mxu0 %v10011_v12 }
0x22c9   :  { %6428 = vmatprep.subr.mxu0 %v10015_v60 }
0x22ca   :  { %6429 = vmatpush1.msra.mxu0 %v10019_v62 }
0x22cb   :  { %6430 = vmatprep.subr.mxu0 %v10023_v38 }
0x22cc   :  { %6431 = vmatpush1.msra.mxu0 %v10027_v5 }
0x22cd   :  { %6432 = vmatprep.subr.mxu0 %v10031_v56  ;;  %v6543_v56 = vpop.f32.mrf.mxu1 }
0x22ce   :  { %6433 = vmatpush1.msra.mxu0 %v10035_v8  ;;  %v8467_v8 = vmov 10  }
0x22cf   :  { %6434 = vmatprep.subr.mxu0 %v10039_v9 }
0x22d0   :  { %6435 = vmatpush1.msra.mxu0 %v10043_v41 }
0x22d1   :  { %6436 = vmatprep.subr.mxu0 %v10047_v13 }
0x22d2   :  { %6437 = vmatpush1.msra.mxu0 %v10051_v16 }
0x22d3   :  { %6987 = vmatmul.mubr.msk.f32.vlgmr.msra.gmra.mxu0 %vm383_vm0, %v10094_v19  ;;  %7813 = vmatprep.subr.mxu0 %v8457_v0 }
0x22d4   :  { %7814 = vmatpush3.msra.mxu0 %v9845_v28  ;;  %7829 = vmatprep.mubr.msk.f32.mxu0 %vm8458_vm1, %v8457_v0  ;;  %v10257_v28 = vld [vmem:[%s8759_s8] sm:$0x1f]  ;;  %s8466_s8 = smov 32   ;;  %vm4490_vm1 = vcmask 783872  }
0x22d5   :  { %7815 = vmatprep.subr.mxu0 %v8457_v0  ;;  %v5257_v39 = vrot.slane %v10257_v28, %v9710_v10  ;;  %v5265_v45 = vrot.slane %v10257_v28, %v10793_v44 }
0x22d6   :  { %7816 = vmatpush3.msra.mxu0 %v9850_v49  ;;  %v5253_v49 = vrot.slane %v10257_v28, %v9707_v53 }
0x22d7   :  { %7817 = vmatprep.subr.mxu0 %v8457_v0  ;;  %v5794_v32 = vadd.f32 %v10111_v21, %v5265_v45  ;;  %v6101_v52 = vadd.f32 %v10115_v17, %v5257_v39 }
0x22d8   :  { %7818 = vmatpush3.msra.mxu0 %v9857_v35  ;;  %v6099_v48 = vadd.f32 %v10113_v23, %v5253_v49 }
0x22d9   :  { %7819 = vmatprep.subr.mxu0 %v8457_v0  ;;  %v10287_v31 = vmul.f32 0.1, %v5794_v32  ;;  %v10300_v43 = vmul.f32 0.1, %v6101_v52 }
0x22da   :  { %7820 = vmatpush3.msra.mxu0 %v9862_v30  ;;  %v10295_v33 = vmul.f32 0.1, %v6099_v48 }
0x22db   :  { %7821 = vmatprep.subr.mxu0 %v8457_v0 }
0x22dc   :  { %7822 = vmatpush3.msra.mxu0 %v9867_v15 }
0x22dd   :  { %7823 = vmatprep.subr.mxu0 %v8457_v0 }
0x22de   :  { %7824 = vmatpush3.msra.mxu0 %v9872_v2 }
0x22df   :  { %7825 = vmatprep.subr.mxu0 %v8457_v0 }
0x22e0   :  { %7826 = vmatpush3.msra.mxu0 %v9877_v6 }
0x22e1   :  { %7827 = vmatprep.subr.mxu0 %v8457_v0 }
0x22e2   :  { %7828 = vmatpush3.msra.mxu0 %v9882_v36  ;;  %v10792_v36 = vsub.s32 2, %v9697_v47 }
0x22e3   :  { %7830 = vmatmul.mubr.msk.f32.vlgmr.msra.gmra.mxu0 %vm383_vm0, %v10094_v19  ;;  %vm4261_vm0 = vcmask 521472  }
0x22e4   :  { %v5261_v40 = vrot.slane %v10257_v28, %v10792_v36 }
0x22e6   :  { %v5792_v7 = vadd.f32 %v10109_v25, %v5261_v40  ;;  %v6544_v9 = vadd.f32 %v6543_v56, %v5261_v40  ;;  %v8475_v56 = vmov 3  }
0x22e8   :  { %v10282_v10 = vmul.f32 0.1, %v5792_v7  ;;  %v10324_v13 = vmul.f32 0.1, %v6544_v9 }
0x2333   :  { %v10254_v61 = vpop.f32.mrf.mxu0 }
0x2335   :  { %v7755_v4 = vpop.f32.mrf.mxu0 }
0x2336   :  { %v8469_v4 = vmov 2  }
0x2343   :  { %v5344_v35 = vpop.f32.mrf.mxu0 }
0x2344   :  { %v5345_v30 = vadd.f32 %v5344_v35, %v5253_v49  ;;  %v8472_v35 = vmov 14  }
0x2345   :  { %v5346_v0 = vpop.f32.mrf.mxu0 }
0x2346   :  { %v10334_v23 = vmul.f32 0.1, %v5345_v30  ;;  %v5347_v17 = vadd.f32 %v5346_v0, %v5257_v39 }
0x2348   :  { %v10338_v24 = vmul.f32 0.1, %v5347_v17 }
0x2353   :  { %v10261_v15 = vpop.f32.mrf.mxu0 }
0x2354   :  { %v5416_v14 = vadd.f32 %v10261_v15, %v5261_v40  ;;  %v5268_v15 = vsub.s32 4, %v9697_v47 }
0x2355   :  { %v10263_v2 = vpop.f32.mrf.mxu0 }
0x2356   :  { %v10343_v63 = vmul.f32 0.1, %v5416_v14  ;;  %v5418_v54 = vadd.f32 %v10263_v2, %v5265_v45  ;;  %v8476_v14 = vmov 4  }
0x2358   :  { %v10348_v46 = vmul.f32 0.1, %v5418_v54 }
0x2363   :  { %v5720_v6 = vpop.f32.mrf.mxu0 }
0x2364   :  { %v5721_v42 = vadd.f32 %v5720_v6, %v5253_v49 }
0x2365   :  { %v5722_v3 = vpop.f32.mrf.mxu0 }
0x2366   :  { %v10270_v37 = vmul.f32 0.1, %v5721_v42  ;;  %v5723_v53 = vadd.f32 %v5722_v3, %v5257_v39 }
0x2368   :  { %v10276_v22 = vmul.f32 0.1, %v5723_v53  ;;  %5872 = vrot.lane.b32.xlu1 %v10270_v37, %s8460_s4 }
0x236a   :  { %5878 = vrot.lane.b32.xlu0 %v10276_v22, %s8460_s4 }
0x236e   :  { %5884 = vrot.lane.b32.xlu0 %v10282_v10, %s8460_s4 }
0x2372   :  { %5890 = vrot.lane.b32.xlu0 %v10287_v31, %s8460_s4 }
0x2373   :  { %v10291_v27 = vpop.f32.mrf.mxu0 }
0x2375   :  { %v7793_v50 = vpop.f32.mrf.mxu0 }
0x2376   :  { %4258 = vrot.lane.b32.xlu0 %v9643_v34, %s8466_s8 }
0x237a   :  { %6250 = vrot.lane.b32.xlu0 %v10295_v33, %s8460_s4 }
0x237e   :  { %6256 = vrot.lane.b32.xlu0 %v10300_v43, %s8460_s4 }
0x2383   :  { %v6169_v20 = vpop.f32.mrf.mxu0 }
0x2384   :  { %v6170_v57 = vadd.f32 %v6169_v20, %v5261_v40  ;;  %v10362_v40 = vrot.slane %v10257_v28, %v5268_v15  ;;  %v8473_v20 = vmov 32  }
0x2385   :  { %v6171_v58 = vpop.f32.mrf.mxu0 }
0x2386   :  { %v10304_v18 = vmul.f32 0.1, %v6170_v57  ;;  %v6172_v59 = vadd.f32 %v6171_v58, %v5265_v45  ;;  %v5863_v42 = vadd.f32 %v10291_v27, %v10362_v40  ;;  %v8474_v58 = vmov 34  }
0x2388   :  { %6262 = vrot.lane.b32.xlu0 %v10304_v18, %s8460_s4  ;;  %v10308_v34 = vmul.f32 0.1, %v6172_v59 }
0x238c   :  { %6268 = vrot.lane.b32.xlu0 %v10308_v34, %s8460_s4 }
0x2390   :  { %4716 = vrot.lane.b32.xlu0 %v9760_v51, %s8459_s25  ;;  %v6545_v51 = vpop.f32.mrf.mxu1 }
0x2391   :  { %v6546_v16 = vadd.f32 %v6545_v51, %v5265_v45  ;;  %v10368_v45 = vmul.f32 0.1, %v5863_v42 }
0x2393   :  { %v6472_v12 = vpop.f32.mrf.mxu0  ;;  %v10328_v19 = vmul.f32 0.1, %v6546_v16 }
0x2394   :  { %v6473_v60 = vadd.f32 %v6472_v12, %v5253_v49  ;;  %5543 = vperm.xlu0 %7941, %v10254_v61   ;;  %v8471_v49 = vmov 12  }
0x2395   :  { %v6474_v62 = vpop.f32.mrf.mxu0 }
0x2396   :  { %v10315_v38 = vmul.f32 0.1, %v6473_v60  ;;  %v6475_v5 = vadd.f32 %v6474_v62, %v5257_v39  ;;  %v6241_v60 = vadd.f32 %v10117_v29, %v10362_v40 }
0x2398   :  { %6624 = vrot.lane.b32.xlu1 %v10315_v38, %s8460_s4  ;;  %7943 = vset.pattern.permute.xlu0 %v8467_v8  ;;  %v10320_v41 = vmul.f32 0.1, %v6475_v5  ;;  %v10387_v9 = vmul.f32 0.1, %v6241_v60 }
0x2399   :  { %5918 = vperm.xlu0 %7943, %v10254_v61  }
0x239c   :  { %6630 = vrot.lane.b32.xlu1 %v10320_v41, %s8460_s4 }
0x239d   :  { %7946 = vset.pattern.permute.xlu0 %v8468_v55 }
0x23a0   :  { %6636 = vrot.lane.b32.xlu1 %v10324_v13, %s8460_s4 }
0x23a3   :  { %v10330_v25 = vpop.f32.mrf.mxu0 }
0x23a4   :  { %6642 = vrot.lane.b32.xlu1 %v10328_v19, %s8460_s4 }
0x23a5   :  { %v7831_v21 = vpop.f32.mrf.mxu0 }
0x23a8   :  { %5496 = vrot.lane.b32.xlu1 %v10334_v23, %s8460_s4 }
0x23ac   :  { %5502 = vrot.lane.b32.xlu1 %v10338_v24, %s8460_s4 }
0x23b0   :  { %5508 = vrot.lane.b32.xlu1 %v10343_v63, %s8460_s4 }
0x23b4   :  { %5514 = vrot.lane.b32.xlu1 %v10348_v46, %s8460_s4 }
0x23b8   :  { %4487 = vrot.lane.b32.xlu1 %v9720_v11, %s8460_s4 }
0x23bc   :  { %5525 = vperm.xlu1 %7940, %v10254_v61  }
0x23c0   :  { %7942 = vset.pattern.permute.xlu1 %v8469_v4 }
0x23c1   :  { %5557 = vperm.xlu1 %7942, %v10254_v61  }
0x23c5   :  { %7944 = vset.pattern.permute.xlu1 %v8470_v26  ;;  %v8477_v26 = vmov 5  }
0x23c6   :  { %6670 = vperm.xlu1 %7944, %v10254_v61  }
0x23ca   :  { %7945 = vset.pattern.permute.xlu1 %v8471_v49 }
0x23cb   :  { %5946 = vperm.xlu1 %7945, %v10254_v61  }
0x23cf   :  { %7947 = vset.pattern.permute.xlu1 %v8472_v35 }
0x23da   :  { %v5873_v30 = vpop.permute.xlu1 %5872 }
0x23db   :  { %v5875_v0 = vmax.f32 %v10270_v37, %v5873_v30  ;;  %v6615_v30 = vadd.f32 %v10330_v25, %v10362_v40 }
0x23dc   :  { %v5879_v11 = vpop.permute.xlu0 %5878 }
0x23dd   :  { %v5876_v2 = vmax.f32 %v5875_v0, %v10276_v22 }
0x23df   :  { %v5881_v6 = vmax.f32 %v5876_v2, %v5879_v11  ;;  %v8478_v11 = vmov 9  }
0x23e0   :  { %v5885_v36 = vpop.permute.xlu0 %5884 }
0x23e1   :  { %v5882_v39 = vmax.f32 %v5881_v6, %v10282_v10  ;;  %v10406_v6 = vmul.f32 0.1, %v6615_v30  ;;  %v8487_v30 = vmov 19  }
0x23e3   :  { %v5887_v3 = vmax.f32 %v5882_v39, %v5885_v36 }
0x23e4   :  { %v5891_v53 = vpop.permute.xlu0 %5890 }
0x23e5   :  { %v5888_v44 = vmax.f32 %v5887_v3, %v10287_v31  ;;  %v8479_v3 = vmov 27  }
0x23e7   :  { %v5893_v47 = vmax.f32 %v5888_v44, %v5891_v53 }
0x23e8   :  { %v4259_v7 = vpop.permute.xlu0 %4258 }
0x23e9   :  { %v10371_v32 = vmax.f32 %v5893_v47, %v10368_v45  ;;  %4262 = vst.msk [vmem:[%s8769_s3] sm:$0x3f] %vm4261_vm0, %v4259_v7 }
0x23eb   :  { %5906 = vrot.lane.b32.xlu1 %v10371_v32, %s8460_s4  ;;  %v6011_v27 = vsub.f32 %v10368_v45, %v10371_v32 }
0x23ec   :  { %v6251_v28 = vpop.permute.xlu0 %6250 }
0x23ed   :  { %v6253_v48 = vmax.f32 %v10295_v33, %v6251_v28  ;;  %v8480_v28 = vmov 29  }
0x23ef   :  { %5974 = vperm.xlu1 %7947, %v10254_v61   ;;  %v6254_v50 = vmax.f32 %v6253_v48, %v10300_v43 }
0x23f0   :  { %v6257_v52 = vpop.permute.xlu0 %6256 }
0x23f1   :  { %v6259_v57 = vmax.f32 %v6254_v50, %v6257_v52  ;;  %v5487_v52 = vadd.f32 %v10104_v1, %v10362_v40 }
0x23f3   :  { %7948 = vset.pattern.permute.xlu1 %v8473_v20  ;;  %v6260_v59 = vmax.f32 %v6259_v57, %v10304_v18  ;;  %v8481_v57 = vmov 21  }
0x23f4   :  { %6726 = vperm.xlu1 %7948, %v10254_v61  }
0x23f8   :  { %7950 = vset.pattern.permute.xlu1 %v8474_v58 }
0x23f9   :  { %6754 = vperm.xlu1 %7950, %v10254_v61  }
0x23fa   :  { %v6263_v12 = vpop.permute.xlu0 %6262 }
0x23fb   :  { %v6265_v62 = vmax.f32 %v6260_v59, %v6263_v12  ;;  %v10422_v12 = vmul.f32 0.1, %v5487_v52 }
0x23fd   :  { %v6266_v5 = vmax.f32 %v6265_v62, %v10308_v34  ;;  %7951 = vset.pattern.permute.xlu1 %v8475_v56 }
0x23fe   :  { %v6269_v8 = vpop.permute.xlu0 %6268 }
0x23ff   :  { %v6271_v51 = vmax.f32 %v6266_v5, %v6269_v8  ;;  %v8482_v5 = vmov 31  }
0x2401   :  { %v10390_v16 = vmax.f32 %v6271_v51, %v10387_v9 }
0x2402   :  { %v4717_v40 = vpop.permute.xlu0 %4716 }
0x2403   :  { %6284 = vrot.lane.b32.xlu1 %v10390_v16, %s8460_s4 }
0x2407   :  { %5571 = vperm.xlu1 %7951, %v10254_v61  }
0x240a   :  { %v6625_v29 = vpop.permute.xlu1 %6624 }
0x240b   :  { %v6627_v17 = vmax.f32 %v10315_v38, %v6625_v29  ;;  %7952 = vset.pattern.permute.xlu1 %v8476_v14  ;;  %v8483_v14 = vmov 15  }
0x240c   :  { %5585 = vperm.xlu1 %7952, %v10254_v61  }
0x240d   :  { %v6628_v54 = vmax.f32 %v6627_v17, %v10320_v41 }
0x240e   :  { %v6631_v55 = vpop.permute.xlu1 %6630 }
0x240f   :  { %v6633_v4 = vmax.f32 %v6628_v54, %v6631_v55  ;;  %v8484_v54 = vmov 7  }
0x2410   :  { %7953 = vset.pattern.permute.xlu1 %v8477_v26  ;;  %v8486_v26 = vmov 17  }
0x2411   :  { %5599 = vperm.xlu1 %7953, %v10254_v61   ;;  %v6634_v49 = vmax.f32 %v6633_v4, %v10324_v13  ;;  %v8485_v4 = vmov 16  }
0x2412   :  { %v6637_v35 = vpop.permute.xlu1 %6636 }
0x2413   :  { %v6639_v0 = vmax.f32 %v6634_v49, %v6637_v35 }
0x2415   :  { %7955 = vset.pattern.permute.xlu1 %v8478_v11  ;;  %v6640_v15 = vmax.f32 %v6639_v0, %v10328_v19 }
0x2416   :  { %v6643_v2 = vpop.permute.xlu1 %6642  ;;  %5900 = vperm.xlu1 %7955, %v10254_v61  }
0x2417   :  { %v6645_v36 = vmax.f32 %v6640_v15, %v6643_v2  ;;  %v8488_v2 = vmov 11  }
0x2419   :  { %v10409_v39 = vmax.f32 %v6645_v36, %v10406_v6  ;;  %v8489_v36 = vmov 13  }
0x241a   :  { %v5497_v42 = vpop.permute.xlu1 %5496  ;;  %7956 = vset.pattern.permute.xlu1 %v8479_v3  ;;  %v8491_v3 = vmov 33  }
0x241b   :  { %v5499_v53 = vmax.f32 %v10334_v23, %v5497_v42  ;;  %6652 = vperm.xlu1 %7956, %v10254_v61   ;;  %v6763_v25 = vsub.f32 %v10406_v6, %v10409_v39  ;;  %v8490_v42 = vmov 23  }
0x241d   :  { %v5500_v44 = vmax.f32 %v5499_v53, %v10338_v24  ;;  %v8492_v53 = vmov 25  }
0x241e   :  { %v5503_v47 = vpop.permute.xlu1 %5502 }
0x241f   :  { %v5505_v7 = vmax.f32 %v5500_v44, %v5503_v47  ;;  %7958 = vset.pattern.permute.xlu1 %v8480_v28 }
0x2420   :  { %6684 = vperm.xlu1 %7958, %v10254_v61  }
0x2421   :  { %v5506_v48 = vmax.f32 %v5505_v7, %v10343_v63 }
0x2422   :  { %v5509_v50 = vpop.permute.xlu1 %5508 }
0x2423   :  { %v5511_v20 = vmax.f32 %v5506_v48, %v5509_v50 }
0x2424   :  { %7959 = vset.pattern.permute.xlu1 %v8481_v57  ;;  %v5895_v57 = vsub.f32 %v10270_v37, %v10371_v32 }
0x2425   :  { %6324 = vperm.xlu1 %7959, %v10254_v61   ;;  %v5512_v58 = vmax.f32 %v5511_v20, %v10348_v46 }
0x2426   :  { %v5515_v59 = vpop.permute.xlu1 %5514 }
0x2427   :  { %v5517_v60 = vmax.f32 %v5512_v58, %v5515_v59  ;;  %v5896_v59 = vmul.f32 1.442695, %v5895_v57 }
0x2429   :  { %v10425_v62 = vmax.f32 %v5517_v60, %v10422_v12  ;;  %7961 = vset.pattern.permute.xlu1 %v8482_v5  ;;  %v6647_v60 = vsub.f32 %v10315_v38, %v10409_v39 }
0x242a   :  { %v4488_v1 = vpop.permute.xlu1 %4487  ;;  %6712 = vperm.xlu1 %7961, %v10254_v61  }
0x242b   :  { %4491 = vst.msk [vmem:[%s8769_s3] sm:$0x3f] %vm4490_vm1, %v4488_v1  ;;  %5531 = vrot.lane.b32.xlu0 %v10425_v62, %s8460_s4  ;;  %v5519_v56 = vsub.f32 %v10334_v23, %v10425_v62  ;;  %v5552_v8 = vsub.f32 %v10338_v24, %v10425_v62  ;;  %v5580_v50 = vsub.f32 %v10343_v63, %v10425_v62  ;;  %v6648_v1 = vmul.f32 1.442695, %v6647_v60 }
0x242c   :  { %4720 = vst.msk [vmem:[%s8769_s3] sm:$0x3f] %vm4719_vm2, %v4717_v40  ;;  %v6679_v40 = vsub.f32 %v10320_v41, %v10409_v39 }
0x242d   :  { %v5520_v29 = vmul.f32 1.442695, %v5519_v56  ;;  %v5553_v17 = vmul.f32 1.442695, %v5552_v8  ;;  %v5581_v52 = vmul.f32 1.442695, %v5580_v50 }
0x242e   :  { %7963 = vset.pattern.permute.xlu1 %v8483_v14 }
0x242f   :  { %6658 = vrot.lane.b32.xlu0 %v10409_v39, %s8460_s4  ;;  %5988 = vperm.xlu1 %7963, %v10254_v61   ;;  %8081 = vpow2.f32 %v5520_v29 }
0x2430   :  { %8083 = vpow2.f32 %v5553_v17  ;;  %v6680_v17 = vmul.f32 1.442695, %v6679_v40 }
0x2431   :  { %8085 = vpow2.f32 %v5581_v52 }
0x2432   :  { %8087 = vpow2.f32 %v5896_v59 }
0x2433   :  { %6698 = vperm.xlu0 %7946, %v10254_v61   ;;  %7965 = vset.pattern.permute.xlu1 %v8484_v54  ;;  %8089 = vpow2.f32 %v6648_v1  ;;  %v6707_v54 = vsub.f32 %v10324_v13, %v10409_v39 }
0x2434   :  { %5627 = vperm.xlu1 %7965, %v10254_v61   ;;  %8091 = vpow2.f32 %v6680_v17 }
0x2437   :  { %v5526_v55 = vpop.permute.xlu1 %5525  ;;  %7949 = vset.pattern.permute.xlu0 %v8485_v4 }
0x2438   :  { %6002 = vperm.xlu0 %7949, %v10254_v61   ;;  %7967 = vset.pattern.permute.xlu1 %v8486_v26 }
0x243c   :  { %v10444_v49 = vpop.eup %8081  ;;  %v5558_v35 = vpop.permute.xlu1 %5557  ;;  %7954 = vset.pattern.permute.xlu0 %v8487_v30  ;;  %v6708_v30 = vmul.f32 1.442695, %v6707_v54 }
0x243d   :  { %v10446_v0 = vpop.eup %8083  ;;  %v10449_v11 = vmul.f32 %v10444_v49, %v5526_v55  ;;  %6296 = vperm.xlu0 %7954, %v10254_v61  }
0x243e   :  { %v10453_v15 = vmul.f32 %v10446_v0, %v5558_v35  ;;  %v10483_v56 = vpop.eup %8085  ;;  %v5544_v35 = vpop.permute.xlu0 %5543  ;;  %8093 = vpow2.f32 %v6708_v30 }
0x243f   :  { %v10492_v55 = vpop.eup %8087 }
0x2441   :  { %7957 = vset.pattern.permute.xlu0 %v8488_v2  ;;  %v10459_v44 = vpop.permute.xlu1 %6670  ;;  %v5983_v2 = vsub.f32 %v10287_v31, %v10371_v32 }
0x2442   :  { %5932 = vperm.xlu0 %7957, %v10254_v61  }
0x2443   :  { %v5984_v50 = vmul.f32 1.442695, %v5983_v2 }
0x2445   :  { %8095 = vpow2.f32 %v5984_v50 }
0x2446   :  { %7960 = vset.pattern.permute.xlu0 %v8489_v36  ;;  %v10461_v47 = vpop.permute.xlu1 %5946  ;;  %v10499_v36 = vpop.eup %8089 }
0x2447   :  { %5960 = vperm.xlu0 %7960, %v10254_v61   ;;  %v10506_v52 = vpop.eup %8091 }
0x244b   :  { %7962 = vset.pattern.permute.xlu0 %v8490_v42 }
0x244c   :  { %6352 = vperm.xlu0 %7962, %v10254_v61  }
0x2450   :  { %7964 = vset.pattern.permute.xlu0 %v8491_v3 }
0x2451   :  { %6740 = vperm.xlu0 %7964, %v10254_v61  }
0x2455   :  { %7966 = vset.pattern.permute.xlu0 %v8492_v53  ;;  %v10504_v53 = vpop.permute.xlu0 %5918 }
0x245d   :  { %v10463_v7 = vpop.permute.xlu1 %5906 }
0x245e   :  { %v5909_v30 = vsub.f32 %v10270_v37, %v10463_v7  ;;  %v5965_v37 = vsub.f32 %v10282_v10, %v10463_v7 }
0x246a   :  { %v10465_v28 = vpop.permute.xlu1 %5974 }
0x246f   :  { %v10467_v48 = vpop.permute.xlu1 %6726 }
0x2474   :  { %v10471_v20 = vpop.permute.xlu1 %6754 }
0x2478   :  { %v10475_v58 = vpop.permute.xlu1 %6284 }
0x2482   :  { %v10479_v5 = vpop.permute.xlu1 %5571 }
0x2487   :  { %v5586_v8 = vpop.permute.xlu1 %5585 }
0x2488   :  { %v10486_v29 = vmul.f32 %v10483_v56, %v5586_v8 }
0x248c   :  { %v10488_v14 = vpop.permute.xlu1 %5599 }
0x2491   :  { %v5901_v4 = vpop.permute.xlu1 %5900 }
0x2492   :  { %v10495_v26 = vmul.f32 %v10492_v55, %v5901_v4 }
0x2496   :  { %v6653_v42 = vpop.permute.xlu1 %6652 }
0x2497   :  { %v10502_v3 = vmul.f32 %v10499_v36, %v6653_v42  ;;  %v10523_v42 = vpop.eup %8093 }
0x249b   :  { %v6685_v57 = vpop.permute.xlu1 %6684 }
0x249c   :  { %v10509_v59 = vmul.f32 %v10506_v52, %v6685_v57 }
0x249d   :  { %v10511_v60 = vpop.permute.xlu0 %5531 }
0x249e   :  { %v5534_v1 = vsub.f32 %v10334_v23, %v10511_v60  ;;  %v5562_v40 = vsub.f32 %v10338_v24, %v10511_v60  ;;  %v5590_v8 = vsub.f32 %v10343_v63, %v10511_v60  ;;  %v5937_v23 = vsub.f32 %v10276_v22, %v10463_v7 }
0x249f   :  { %v5910_v24 = vmul.f32 1.442695, %v5909_v30  ;;  %v5927_v63 = vsub.f32 %v10276_v22, %v10371_v32 }
0x24a0   :  { %v5535_v17 = vmul.f32 1.442695, %v5534_v1  ;;  %v5563_v54 = vmul.f32 1.442695, %v5562_v40  ;;  %v10519_v4 = vpop.permute.xlu1 %6324  ;;  %v5591_v2 = vmul.f32 1.442695, %v5590_v8  ;;  %v10532_v40 = vpop.eup %8095 }
0x24a1   :  { %v5938_v1 = vmul.f32 1.442695, %v5937_v23  ;;  %v6659_v8 = vpop.permute.xlu0 %6658  ;;  %v5928_v30 = vmul.f32 1.442695, %v5927_v63  ;;  %v5993_v63 = vsub.f32 %v10287_v31, %v10463_v7 }
0x24a2   :  { %8097 = vpow2.f32 %v5535_v17  ;;  %v6717_v7 = vsub.f32 %v10324_v13, %v6659_v8 }
0x24a3   :  { %8099 = vpow2.f32 %v5563_v54 }
0x24a4   :  { %8101 = vpow2.f32 %v5591_v2  ;;  %v5955_v2 = vsub.f32 %v10282_v10, %v10371_v32  ;;  %v6735_v32 = vsub.f32 %v10328_v19, %v10409_v39 }
0x24a5   :  { %v6713_v50 = vpop.permute.xlu1 %6712  ;;  %8103 = vpow2.f32 %v5910_v24 }
0x24a6   :  { %v10528_v57 = vmul.f32 %v10523_v42, %v6713_v50  ;;  %8105 = vpow2.f32 %v5938_v1  ;;  %v5966_v50 = vmul.f32 1.442695, %v5965_v37  ;;  %v5956_v24 = vmul.f32 1.442695, %v5955_v2 }
0x24a7   :  { %8107 = vpow2.f32 %v5928_v30  ;;  %v6689_v30 = vsub.f32 %v10320_v41, %v6659_v8 }
0x24a8   :  { %8109 = vpow2.f32 %v5966_v50  ;;  %v5994_v50 = vmul.f32 1.442695, %v5993_v63  ;;  %v6745_v63 = vsub.f32 %v10328_v19, %v6659_v8  ;;  %v6764_v19 = vmul.f32 1.442695, %v6763_v25 }
0x24a9   :  { %8111 = vpow2.f32 %v5956_v24  ;;  %v8493_v24 = vmov 20  }
0x24aa   :  { %v5989_v17 = vpop.permute.xlu1 %5988 }
0x24ab   :  { %v10537_v54 = vmul.f32 %v10532_v40, %v5989_v17  ;;  %v6661_v17 = vsub.f32 %v10315_v38, %v6659_v8  ;;  %v6287_v8 = vsub.f32 %v10295_v33, %v10475_v58 }
0x24ad   :  { %v6662_v37 = vmul.f32 1.442695, %v6661_v17  ;;  %v6718_v17 = vmul.f32 1.442695, %v6717_v7  ;;  %v5618_v7 = vsub.f32 %v10348_v46, %v10511_v60 }
0x24ae   :  { %v10541_v21 = vpop.permute.xlu0 %6698 }
0x24af   :  { %v8098_v22 = vpop.eup %8097  ;;  %8113 = vpow2.f32 %v6662_v37 }
0x24b0   :  { %v8100_v23 = vpop.eup %8099  ;;  %5538 = vrot.lane.b32.xlu1 %v8098_v22, %s8460_s4  ;;  %v5546_v51 = vmul.f32 %v8098_v22, %v5544_v35  ;;  %8115 = vpow2.f32 %v5994_v50 }
0x24b1   :  { %5566 = vrot.lane.b32.xlu0 %v8100_v23, %s8460_s4  ;;  %v10548_v10 = vpop.eup %8101  ;;  %v5574_v38 = vmul.f32 %v8100_v23, %v10479_v5 }
0x24b2   :  { %v8104_v2 = vpop.eup %8103 }
0x24b3   :  { %v6003_v1 = vpop.permute.xlu0 %6002  ;;  %v8106_v31 = vpop.eup %8105  ;;  %v5921_v22 = vmul.f32 %v8104_v2, %v10504_v53 }
0x24b4   :  { %5548 = vrot.lane.b32.xlu1 %v5546_v51, %s8460_s4  ;;  %v6690_v51 = vmul.f32 1.442695, %v6689_v30  ;;  %v10562_v41 = vpop.eup %8107  ;;  %v5949_v23 = vmul.f32 %v8106_v31, %v10461_v47  ;;  %v6746_v47 = vmul.f32 1.442695, %v6745_v63 }
0x24b5   :  { %5594 = vrot.lane.b32.xlu0 %v10548_v10, %s8460_s4  ;;  %v8110_v53 = vpop.eup %8109 }
0x24b6   :  { %8117 = vpow2.f32 %v6690_v51  ;;  %v10572_v37 = vpop.eup %8111  ;;  %v5977_v30 = vmul.f32 %v8110_v53, %v10465_v28  ;;  %v6288_v51 = vmul.f32 1.442695, %v6287_v8 }
0x24b7   :  { %8119 = vpow2.f32 %v6718_v17 }
0x24b8   :  { %6016 = vperm.xlu1 %7967, %v10254_v61   ;;  %v10556_v35 = vpop.permute.xlu0 %6296  ;;  %8121 = vpow2.f32 %v6746_v47  ;;  %v8495_v47 = vmov 18  }
0x24b9   :  { %5576 = vrot.lane.b32.xlu0 %v5574_v38, %s8460_s4  ;;  %8123 = vpow2.f32 %v6288_v51 }
0x24bc   :  { %5923 = vrot.lane.b32.xlu1 %v5921_v22, %s8460_s4  ;;  %v8114_v38 = vpop.eup %8113 }
0x24bd   :  { %5913 = vrot.lane.b32.xlu0 %v8104_v2, %s8460_s4  ;;  %v5933_v5 = vpop.permute.xlu0 %5932  ;;  %7970 = vset.pattern.permute.xlu1 %v8493_v24  ;;  %v6315_v24 = vsub.f32 %v10300_v43, %v10475_v58 }
0x24be   :  { %v10568_v13 = vmul.f32 %v10562_v41, %v5933_v5  ;;  %v5619_v5 = vmul.f32 1.442695, %v5618_v7  ;;  %v8497_v7 = vmov 24  }
0x24bf   :  { %v6316_v60 = vmul.f32 1.442695, %v6315_v24 }
0x24c0   :  { %5951 = vrot.lane.b32.xlu1 %v5949_v23, %s8460_s4  ;;  %v8494_v23 = vmov 35   ;;  %8125 = vpow2.f32 %v5619_v5  ;;  %v8498_v5 = vmov 26  }
0x24c1   :  { %5941 = vrot.lane.b32.xlu0 %v8106_v31, %s8460_s4  ;;  %v8116_v31 = vpop.eup %8115  ;;  %8127 = vpow2.f32 %v6316_v60 }
0x24c2   :  { %v5961_v2 = vpop.permute.xlu0 %5960  ;;  %v6005_v63 = vmul.f32 %v8116_v31, %v6003_v1  ;;  %v6371_v1 = vsub.f32 %v10308_v34, %v10475_v58 }
0x24c3   :  { %v10576_v50 = vmul.f32 %v10572_v37, %v5961_v2  ;;  %v8118_v28 = vpop.eup %8117 }
0x24c4   :  { %5979 = vrot.lane.b32.xlu1 %v5977_v30, %s8460_s4  ;;  %v8120_v22 = vpop.eup %8119  ;;  %v6673_v30 = vmul.f32 %v8114_v38, %v10459_v44  ;;  %v6701_v51 = vmul.f32 %v8118_v28, %v10541_v21 }
0x24c5   :  { %5969 = vrot.lane.b32.xlu0 %v8110_v53, %s8460_s4  ;;  %v8122_v17 = vpop.eup %8121  ;;  %v6343_v53 = vsub.f32 %v10304_v18, %v10475_v58  ;;  %v6729_v44 = vmul.f32 %v8120_v22, %v10467_v48 }
0x24c6   :  { %v8124_v2 = vpop.eup %8123  ;;  %v6757_v21 = vmul.f32 %v8122_v17, %v10471_v20 }
0x24c7   :  { %v6344_v8 = vmul.f32 1.442695, %v6343_v53  ;;  %v8500_v53 = vmov 8  }
0x24c8   :  { %6665 = vrot.lane.b32.xlu1 %v8114_v38, %s8460_s4 }
0x24c9   :  { %5997 = vrot.lane.b32.xlu0 %v8116_v31, %s8460_s4  ;;  %8129 = vpow2.f32 %v6344_v8  ;;  %v6372_v31 = vmul.f32 1.442695, %v6371_v1 }
0x24cb   :  { %8131 = vpow2.f32 %v6372_v31 }
0x24cc   :  { %6693 = vrot.lane.b32.xlu1 %v8118_v28, %s8460_s4  ;;  %v8496_v28 = vmov 22  }
0x24cd   :  { %6380 = vperm.xlu0 %7966, %v10254_v61   ;;  %v8126_v38 = vpop.eup %8125 }
0x24ce   :  { %v8128_v58 = vpop.eup %8127 }
0x24cf   :  { %v6327_v60 = vmul.f32 %v8128_v58, %v10519_v4 }
0x24d0   :  { %6721 = vrot.lane.b32.xlu1 %v8120_v22, %s8460_s4  ;;  %v5628_v22 = vpop.permute.xlu1 %5627 }
0x24d1   :  { %7968 = vset.pattern.permute.xlu0 %v8494_v23  ;;  %v5630_v20 = vmul.f32 %v8126_v38, %v5628_v22 }
0x24d2   :  { %6768 = vperm.xlu0 %7968, %v10254_v61  }
0x24d4   :  { %6749 = vrot.lane.b32.xlu1 %v8122_v17, %s8460_s4  ;;  %v8499_v17 = vmov 6  }
0x24d6   :  { %6007 = vrot.lane.b32.xlu0 %v6005_v63, %s8460_s4  ;;  %v8130_v48 = vpop.eup %8129  ;;  %v6299_v63 = vmul.f32 %v8124_v2, %v10556_v35  ;;  %v5608_v35 = vsub.f32 %v10348_v46, %v10425_v62 }
0x24d7   :  { %7969 = vset.pattern.permute.xlu0 %v8495_v47  ;;  %v6353_v47 = vpop.permute.xlu0 %6352 }
0x24d8   :  { %6675 = vrot.lane.b32.xlu1 %v6673_v30, %s8460_s4  ;;  %v10615_v24 = vpop.eup %8131  ;;  %v5602_v30 = vmul.f32 %v10548_v10, %v10488_v14 }
0x24da   :  { %6291 = vrot.lane.b32.xlu0 %v8124_v2, %s8460_s4  ;;  %v5609_v2 = vmul.f32 1.442695, %v5608_v35 }
0x24db   :  { %v10632_v4 = vpop.permute.xlu0 %6740 }
0x24dc   :  { %6703 = vrot.lane.b32.xlu1 %v6701_v51, %s8460_s4  ;;  %8133 = vpow2.f32 %v5609_v2 }
0x24de   :  { %6278 = vperm.xlu0 %7969, %v10254_v61  }
0x24e0   :  { %6731 = vrot.lane.b32.xlu1 %v6729_v44, %s8460_s4 }
0x24e2   :  { %5622 = vrot.lane.b32.xlu0 %v8126_v38, %s8460_s4 }
0x24e3   :  { %7971 = vset.pattern.permute.xlu0 %v8496_v28 }
0x24e4   :  { %6759 = vrot.lane.b32.xlu1 %v6757_v21, %s8460_s4 }
0x24e6   :  { %6338 = vperm.xlu0 %7971, %v10254_v61  }
0x24e8   :  { %6319 = vrot.lane.b32.xlu1 %v8128_v58, %s8460_s4 }
0x24e9   :  { %v10639_v58 = vpop.eup %8133 }
0x24ea   :  { %7973 = vset.pattern.permute.xlu0 %v8497_v7 }
0x24eb   :  { %6366 = vperm.xlu0 %7973, %v10254_v61  }
0x24ec   :  { %6347 = vrot.lane.b32.xlu1 %v8130_v48, %s8460_s4 }
0x24ef   :  { %7975 = vset.pattern.permute.xlu0 %v8498_v5 }
0x24f0   :  { %6394 = vperm.xlu0 %7975, %v10254_v61   ;;  %6310 = vperm.xlu1 %7970, %v10254_v61  }
0x24f4   :  { %5632 = vrot.lane.b32.xlu0 %v5630_v20, %s8460_s4  ;;  %6375 = vrot.lane.b32.xlu1 %v10615_v24, %s8460_s4 }
0x24f5   :  { %7972 = vset.pattern.permute.xlu1 %v8499_v17  ;;  %7976 = vset.pattern.permute.xlu0 %v8494_v23  ;;  %v6355_v23 = vmul.f32 %v8130_v48, %v6353_v47 }
0x24f8   :  { %6301 = vrot.lane.b32.xlu1 %v6299_v63, %s8460_s4 }
0x24fc   :  { %5613 = vperm.xlu1 %7972, %v10254_v61  }
0x2500   :  { %6329 = vrot.lane.b32.xlu1 %v6327_v60, %s8460_s4 }
0x2501   :  { %7974 = vset.pattern.permute.xlu1 %v8500_v53 }
0x2504   :  { %5641 = vperm.xlu1 %7974, %v10254_v61  }
0x2508   :  { %5604 = vrot.lane.b32.xlu1 %v5602_v30, %s8460_s4 }
0x250c   :  { %6357 = vrot.lane.b32.xlu1 %v6355_v23, %s8460_s4 }
0x2522   :  { %v5539_v8 = vpop.permute.xlu1 %5538 }
0x2523   :  { %v5541_v51 = vadd.f32 %v10444_v49, %v5539_v8  ;;  %v5567_v61 = vpop.permute.xlu0 %5566  ;;  %v6012_v49 = vmul.f32 1.442695, %v6011_v27 }
0x2525   :  { %v5555_v1 = vadd.f32 %v10446_v0, %v5541_v51  ;;  %8135 = vpow2.f32 %v6012_v49 }
0x2526   :  { %v5549_v14 = vpop.permute.xlu1 %5548 }
0x2527   :  { %v5569_v10 = vadd.f32 %v5567_v61, %v5555_v1  ;;  %v5551_v44 = vadd.f32 %v5549_v14, %v10449_v11  ;;  %v5595_v38 = vpop.permute.xlu0 %5594 }
0x2529   :  { %v5583_v31 = vadd.f32 %v10483_v56, %v5569_v10  ;;  %v5561_v21 = vadd.f32 %v10453_v15, %v5551_v44 }
0x252b   :  { %v5597_v46 = vadd.f32 %v5595_v38, %v5583_v31  ;;  %v5577_v28 = vpop.permute.xlu0 %5576 }
0x252c   :  { %v5579_v7 = vadd.f32 %v5577_v28, %v5561_v21  ;;  %v10794_v21 = vsub.f32 %v10422_v12, %v10425_v62 }
0x252d   :  { %v10645_v0 = vadd.f32 %v10639_v58, %v5597_v46 }
0x252e   :  { %v10648_v48 = vadd.f32 %v10486_v29, %v5579_v7  ;;  %v5637_v46 = vmul.f32 1.442695, %v10794_v21 }
0x252f   :  { %v5914_v11 = vpop.permute.xlu0 %5913 }
0x2530   :  { %v5916_v56 = vadd.f32 %v10492_v55, %v5914_v11 }
0x2532   :  { %v5930_v15 = vadd.f32 %v10562_v41, %v5916_v56  ;;  %v6736_v41 = vmul.f32 1.442695, %v6735_v32  ;;  %v8136_v35 = vpop.eup %8135 }
0x2533   :  { %v5942_v22 = vpop.permute.xlu0 %5941  ;;  %v6017_v5 = vpop.permute.xlu1 %6016 }
0x2534   :  { %v5944_v20 = vadd.f32 %v5942_v22, %v5930_v15  ;;  %8137 = vpow2.f32 %v6736_v41  ;;  %v6019_v11 = vmul.f32 %v8136_v35, %v6017_v5  ;;  %v6361_v22 = vsub.f32 %v10308_v34, %v10390_v16 }
0x2535   :  { %8139 = vpow2.f32 %v6764_v19 }
0x2536   :  { %v5958_v17 = vadd.f32 %v10572_v37, %v5944_v20 }
0x2537   :  { %v5970_v63 = vpop.permute.xlu0 %5969  ;;  %v5924_v45 = vpop.permute.xlu1 %5923 }
0x2538   :  { %v5972_v27 = vadd.f32 %v5970_v63, %v5958_v17  ;;  %v5926_v29 = vadd.f32 %v5924_v45, %v10495_v26 }
0x253a   :  { %v5986_v60 = vadd.f32 %v10532_v40, %v5972_v27  ;;  %v5936_v55 = vadd.f32 %v10568_v13, %v5926_v29  ;;  %v6362_v27 = vmul.f32 1.442695, %v6361_v22 }
0x253b   :  { %v5998_v53 = vpop.permute.xlu0 %5997  ;;  %v5952_v30 = vpop.permute.xlu1 %5951 }
0x253c   :  { %v6000_v47 = vadd.f32 %v5998_v53, %v5986_v60  ;;  %v5954_v23 = vadd.f32 %v5952_v30, %v5936_v55 }
0x253e   :  { %v6014_v2 = vadd.f32 %v8136_v35, %v6000_v47  ;;  %v5964_v37 = vadd.f32 %v10576_v50, %v5954_v23  ;;  %v6273_v50 = vsub.f32 %v10295_v33, %v10390_v16 }
0x253f   :  { %v5980_v8 = vpop.permute.xlu1 %5979 }
0x2540   :  { %v5982_v51 = vadd.f32 %v5980_v8, %v5964_v37  ;;  %8141 = vrcp.f32 %v6014_v2 }
0x2542   :  { %v5992_v26 = vadd.f32 %v10537_v54, %v5982_v51  ;;  %v6274_v54 = vmul.f32 1.442695, %v6273_v50  ;;  %v10795_v51 = vsub.f32 %v10387_v9, %v10390_v16 }
0x2543   :  { %v6666_v40 = vpop.permute.xlu1 %6665 }
0x2544   :  { %v6668_v13 = vadd.f32 %v10499_v36, %v6666_v40  ;;  %v6305_v36 = vsub.f32 %v10300_v43, %v10390_v16  ;;  %8143 = vpow2.f32 %v6274_v54 }
0x2545   :  { %8145 = vpow2.f32 %v5637_v46 }
0x2546   :  { %v6682_v61 = vadd.f32 %v10506_v52, %v6668_v13  ;;  %v8138_v52 = vpop.eup %8137 }
0x2547   :  { %v6694_v1 = vpop.permute.xlu1 %6693  ;;  %v8140_v7 = vpop.eup %8139 }
0x2548   :  { %v6696_v14 = vadd.f32 %v6694_v1, %v6682_v61  ;;  %v6381_v10 = vpop.permute.xlu0 %6380 }
0x2549   :  { %v6383_v44 = vmul.f32 %v10615_v24, %v6381_v10  ;;  %v6306_v24 = vmul.f32 1.442695, %v6305_v36 }
0x254a   :  { %v6710_v6 = vadd.f32 %v10523_v42, %v6696_v14  ;;  %v6333_v42 = vsub.f32 %v10304_v18, %v10390_v16 }
0x254b   :  { %6385 = vrot.lane.b32.xlu1 %v6383_v44, %s8460_s4  ;;  %v6722_v39 = vpop.permute.xlu1 %6721  ;;  %8147 = vpow2.f32 %v6306_v24 }
0x254c   :  { %v6724_v25 = vadd.f32 %v6722_v39, %v6710_v6  ;;  %v6334_v62 = vmul.f32 1.442695, %v6333_v42 }
0x254d   :  { %v6769_v38 = vpop.permute.xlu0 %6768  ;;  %v8142_v17 = vpop.eup %8141 }
0x254e   :  { %v6738_v31 = vadd.f32 %v8138_v52, %v6724_v25  ;;  %v6771_v2 = vmul.f32 %v8140_v7, %v6769_v38 }
0x254f   :  { %v6750_v33 = vpop.permute.xlu1 %6749 }
0x2550   :  { %v6752_v28 = vadd.f32 %v6750_v33, %v6738_v31 }
0x2551   :  { %v6008_v49 = vpop.permute.xlu0 %6007  ;;  %v8144_v53 = vpop.eup %8143 }
0x2552   :  { %v6766_v56 = vadd.f32 %v8140_v7, %v6752_v28  ;;  %v6010_v15 = vadd.f32 %v6008_v49, %v5992_v26  ;;  %v8146_v23 = vpop.eup %8145 }
0x2553   :  { %v6676_v43 = vpop.permute.xlu1 %6675 }
0x2554   :  { %v6020_v20 = vadd.f32 %v6019_v11, %v6010_v15  ;;  %v6678_v12 = vadd.f32 %v6676_v43, %v10502_v3  ;;  %8149 = vrcp.f32 %v6766_v56  ;;  %v6743_v3 = vmul.f32 %v8138_v52, %v10632_v4 }
0x2555   :  { %v6292_v63 = vpop.permute.xlu0 %6291  ;;  %8151 = vpow2.f32 %v6334_v62 }
0x2556   :  { %v6022_v18 = vmul.f32 %v8142_v17, %v6020_v20  ;;  %v6688_v45 = vadd.f32 %v10509_v59, %v6678_v12  ;;  %8153 = vpow2.f32 %v6362_v27  ;;  %v6294_v41 = vadd.f32 %v8144_v53, %v6292_v63 }
0x2557   :  { %v6704_v32 = vpop.permute.xlu1 %6703 }
0x2558   :  { %v6706_v5 = vadd.f32 %v6704_v32, %v6688_v45  ;;  %6024 = vrot.lane.b32.xlu0 %v6022_v18, %s8460_s4  ;;  %v8148_v19 = vpop.eup %8147 }
0x2559   :  { %v6279_v29 = vpop.permute.xlu0 %6278  ;;  %v6308_v4 = vadd.f32 %v8148_v19, %v6294_v41 }
0x255a   :  { %v6716_v34 = vadd.f32 %v10528_v57, %v6706_v5  ;;  %v6390_v57 = vmul.f32 1.442695, %v10795_v51  ;;  %v6281_v36 = vmul.f32 %v8144_v53, %v6279_v29 }
0x255b   :  { %v6732_v60 = vpop.permute.xlu1 %6731 }
0x255c   :  { %v6734_v55 = vadd.f32 %v6732_v60, %v6716_v34  ;;  %8155 = vpow2.f32 %v6390_v57 }
0x255d   :  { %v5623_v30 = vpop.permute.xlu0 %5622 }
0x255e   :  { %v5625_v47 = vadd.f32 %v5623_v30, %v10645_v0  ;;  %v6744_v59 = vadd.f32 %v6743_v3, %v6734_v55 }
0x255f   :  { %v6760_v35 = vpop.permute.xlu1 %6759 }
0x2560   :  { %v5639_v37 = vadd.f32 %v8146_v23, %v5625_v47  ;;  %v6762_v8 = vadd.f32 %v6760_v35, %v6744_v59 }
0x2561   :  { %v8150_v40 = vpop.eup %8149  ;;  %v6339_v21 = vpop.permute.xlu0 %6338 }
0x2562   :  { %v6772_v26 = vadd.f32 %v6771_v2, %v6762_v8  ;;  %v8152_v14 = vpop.eup %8151  ;;  %8157 = vrcp.f32 %v5639_v37 }
0x2563   :  { %v6320_v13 = vpop.permute.xlu1 %6319  ;;  %v8154_v44 = vpop.eup %8153  ;;  %v6341_v24 = vmul.f32 %v8152_v14, %v6339_v21 }
0x2564   :  { %v6774_v61 = vmul.f32 %v8150_v40, %v6772_v26  ;;  %v6322_v1 = vadd.f32 %v6320_v13, %v6308_v4 }
0x2566   :  { %6776 = vrot.lane.b32.xlu1 %v6774_v61, %s8460_s4  ;;  %v6336_v0 = vadd.f32 %v8152_v14, %v6322_v1  ;;  %v6367_v28 = vpop.permute.xlu0 %6366 }
0x2567   :  { %v6348_v10 = vpop.permute.xlu1 %6347  ;;  %v6369_v17 = vmul.f32 %v8154_v44, %v6367_v28 }
0x2568   :  { %v6350_v50 = vadd.f32 %v6348_v10, %v6336_v0 }
0x2569   :  { %v8156_v54 = vpop.eup %8155 }
0x256a   :  { %v6364_v6 = vadd.f32 %v8154_v44, %v6350_v50 }
0x256b   :  { %v6311_v39 = vpop.permute.xlu1 %6310  ;;  %v6395_v56 = vpop.permute.xlu0 %6394 }
0x256c   :  { %v6313_v25 = vmul.f32 %v8148_v19, %v6311_v39  ;;  %v6397_v34 = vmul.f32 %v8156_v54, %v6395_v56 }
0x256f   :  { %v6376_v9 = vpop.permute.xlu1 %6375  ;;  %v5633_v12 = vpop.permute.xlu0 %5632 }
0x2570   :  { %v6378_v16 = vadd.f32 %v6376_v9, %v6364_v6  ;;  %v8158_v27 = vpop.eup %8157 }
0x2572   :  { %v6392_v52 = vadd.f32 %v8156_v54, %v6378_v16 }
0x2573   :  { %v6302_v38 = vpop.permute.xlu1 %6301 }
0x2574   :  { %v6304_v31 = vadd.f32 %v6302_v38, %v6281_v36  ;;  %8159 = vrcp.f32 %v6392_v52 }
0x2576   :  { %v6314_v46 = vadd.f32 %v6313_v25, %v6304_v31 }
0x2577   :  { %v5614_v33 = vpop.permute.xlu1 %5613 }
0x2578   :  { %v5616_v43 = vmul.f32 %v10639_v58, %v5614_v33 }
0x257b   :  { %v6330_v42 = vpop.permute.xlu1 %6329 }
0x257c   :  { %v6332_v7 = vadd.f32 %v6330_v42, %v6314_v46 }
0x257e   :  { %v6342_v49 = vadd.f32 %v6341_v24, %v6332_v7 }
0x257f   :  { %v5642_v11 = vpop.permute.xlu1 %5641 }
0x2580   :  { %v5644_v63 = vmul.f32 %v8146_v23, %v5642_v11 }
0x2581   :  { %v8160_v3 = vpop.eup %8159 }
0x2583   :  { %v5605_v15 = vpop.permute.xlu1 %5604 }
0x2584   :  { %v5607_v22 = vadd.f32 %v5605_v15, %v10648_v48 }
0x2586   :  { %v5617_v20 = vadd.f32 %v5616_v43, %v5607_v22 }
0x2587   :  { %v6358_v62 = vpop.permute.xlu1 %6357 }
0x2588   :  { %v5635_v18 = vadd.f32 %v5633_v12, %v5617_v20  ;;  %v6360_v45 = vadd.f32 %v6358_v62, %v6342_v49 }
0x258a   :  { %v5645_v32 = vadd.f32 %v5644_v63, %v5635_v18  ;;  %v6370_v5 = vadd.f32 %v6369_v17, %v6360_v45 }
0x258c   :  { %v5647_v29 = vmul.f32 %v8158_v27, %v5645_v32 }
0x258e   :  { %5649 = vst.msk [vmem:[%s8774_s29] sm:$0x3f] %vm5648_vm4, %v5647_v29 }
0x25bd   :  { %v6386_v58 = vpop.permute.xlu1 %6385 }
0x25be   :  { %v6388_v48 = vadd.f32 %v6386_v58, %v6370_v5 }
0x25c0   :  { %v6398_v60 = vadd.f32 %v6397_v34, %v6388_v48 }
0x25c2   :  { %v6400_v55 = vmul.f32 %v8160_v3, %v6398_v60 }
0x25c4   :  { %6401 = vst.msk [vmem:[%s8774_s29 + $0x8] sm:$0x3f] %vm5648_vm4, %v6400_v55 }
0x25ca   :  { %v6025_v53 = vpop.permute.xlu0 %6024 }
0x25cb   :  { %6028 = vst.msk [vmem:[%s8774_s29] sm:$0x3f] %vm6027_vm5, %v6025_v53 }
0x25d8   :  { %v6777_v30 = vpop.permute.xlu1 %6776 }
0x25d9   :  { %6779 = vst.msk [vmem:[%s8774_s29 + $0x8] sm:$0x3f] %vm6027_vm5, %v6777_v30 }
0x25da   :  { %6788 = vsyncpa [#allocation3], 1 }
0x25db   :  { %6789 = vsyncpa [#allocation5], 1 }
0x25dc   :  { %6790 = vsyncpa [#allocation8], 1 }
0x25dd   :  { %6791 = vsyncpa [#allocation11], 1 }
0x25de   :  { %6792 = vsyncpa [#allocation14], 1 }
0x25df   :  { %6793 = vsyncpa [#allocation17], 1 }

</bundles_post_ra>
